<compile_context>
chip_gen: v6e
topology: v6e:2x2x1
jax: 0.10.0
libtpu: 0.0.40
codegen_flags: <defaults>
</compile_context>

<pallas_src>
import functools

import jax
import jax.numpy as jnp
import numpy as np
from jax import lax
from jax.experimental import pallas as pl
from jax.experimental.pallas import tpu as pltpu

LANE = 128
_VMEM_LIMIT = 48 * 1024 * 1024   # raise the 16/32 MiB scoped-VMEM default


def _round_up(n, m):
    return ((n + m - 1) // m) * m


def _pad_last(x, c):
    pad = c - x.shape[-1]
    if pad == 0:
        return x
    cfg = [(0, 0)] * (x.ndim - 1) + [(0, pad)]
    return jnp.pad(x, cfg)


def _pick_row_tile(rows, row_cost, target=512):
    """Largest divisor `t` of `rows` with t * row_cost <= target (>= 1)."""
    best = 1
    for cand in range(1, rows + 1):
        if rows % cand == 0 and cand * row_cost <= target:
            best = cand
    return best


# ----------------------------------------------------------------------------
# Kernel A: ConvTranspose2d(kernel=(2,2), stride=2) with the 2x2 scatter fused
#           into the output layout (N, H, 2, W, 2*Cp) -> free reshape outside.
# ----------------------------------------------------------------------------
def _upsample2x2_kernel(x_ref, w_ref, b_ref, o_ref):
    # x_ref: (1, TH, W, Cp_in) bf16
    # w_ref: (2, Cp_in, 2*Cp_out) bf16   [di, ci, dj*Cp_out + co]
    # b_ref: (1, 2*Cp_out) f32
    # o_ref: (1, TH, 2, W, 2*Cp_out) bf16
    th, w, cin = x_ref.shape[1], x_ref.shape[2], x_ref.shape[3]
    x = x_ref[0].reshape(th * w, cin)      # free relayout when W % 8 == 0
    for di in range(2):
        acc = jnp.dot(x, w_ref[di], preferred_element_type=jnp.float32)
        acc = acc + b_ref[...]
        o_ref[0, :, di, :, :] = acc.reshape(th, w, -1).astype(o_ref.dtype)


def trans_conv2x2_stride2(x_p, w_eff, bias2):
    """ConvTranspose2d(k=(2,2), stride=2) on channel-padded NHWC bf16 input.

    x_p:   (N, H, W, Cp_in)       bf16
    w_eff: (2, Cp_in, 2*Cp_out)   bf16
    bias2: (1, 2*Cp_out)          f32
    returns (N, 2H, 2W, Cp_out)   bf16
    """
    N, H, W, cp_in = x_p.shape
    two_cpo = w_eff.shape[-1]
    cp_out = two_cpo // 2
    th = _pick_row_tile(H, W)
    grid = (N, H // th)

    out = pl.pallas_call(
        _upsample2x2_kernel,
        out_shape=jax.ShapeDtypeStruct((N, H, 2, W, two_cpo), jnp.bfloat16),
        grid=grid,
        in_specs=[
            pl.BlockSpec((1, th, W, cp_in), lambda n, t: (n, t, 0, 0)),
            pl.BlockSpec((2, cp_in, two_cpo), lambda n, t: (0, 0, 0)),
            pl.BlockSpec((1, two_cpo), lambda n, t: (0, 0)),
        ],
        out_specs=pl.BlockSpec((1, th, 2, W, two_cpo),
                               lambda n, t: (n, t, 0, 0, 0)),
        compiler_params=pltpu.CompilerParams(
            dimension_semantics=("parallel", "parallel"),
            vmem_limit_bytes=_VMEM_LIMIT),
    )(x_p, w_eff, bias2)
    # (n, h, di, w, dj*Cp + c) row-major == (n, 2h+di, 2w+dj, c): free reshape.
    return out.reshape(N, 2 * H, 2 * W, cp_out)


# ----------------------------------------------------------------------------
# Kernel B: 3x3 conv (9 MXU dots, K = padded channels) + bias + ReLU +
#           BatchNorm(eval).  Accepts 1 or 2 input tensors; with 2 inputs the
#           channel concat (torch.cat) is fused in VMEM.  Output is row-tiled;
#           the (TH+2)-row halo is sliced from the resident padded image.
# ----------------------------------------------------------------------------
def _conv3x3_relu_bn_kernel(th, *refs):
    n_x = len(refs) - 5
    x_refs = refs[:n_x]
    w_ref, b_ref, sc_ref, sh_ref, o_ref = refs[n_x:]

    t = pl.program_id(1)
    row0 = pl.multiple_of(t * th, th)
    parts = [xr[0, pl.ds(row0, th + 2), :, :] for xr in x_refs]
    # Fused torch.cat: lane-aligned concat in VMEM (no HBM round trip).
    x = parts[0] if n_x == 1 else jnp.concatenate(parts, axis=-1)

    wp, cin = x.shape[1], x.shape[2]
    wo = wp - 2
    cout = w_ref.shape[-1]

    acc = jnp.zeros((th * wo, cout), jnp.float32)
    for dy in range(3):
        for dx in range(3):
            patch = x[dy:dy + th, dx:dx + wo, :].reshape(th * wo, cin)
            acc = acc + jnp.dot(patch, w_ref[dy, dx],
                                preferred_element_type=jnp.float32)
    acc = acc + b_ref[...]                       # conv bias
    acc = jnp.maximum(acc, 0.0)                  # ReLU
    acc = acc * sc_ref[...] + sh_ref[...]        # BatchNorm (running stats)
    o_ref[0] = acc.reshape(th, wo, cout).astype(o_ref.dtype)


def conv3x3_relu_bn(x_list, w_p, b_p, sc_p, sh_p, padding, out_dtype):
    """Conv2d(k=3,padding) -> ReLU -> BatchNorm2d(eval) -> Dropout2d(eval=id).

    x_list: 1 or 2 channel-padded NHWC bf16 arrays with identical N, H, W;
            passing two arrays fuses the channel concat into the kernel.
    """
    N, H, W, _ = x_list[0].shape
    Hp, Wp = H + 2 * padding, W + 2 * padding
    Ho, Wo = Hp - 2, Wp - 2
    cp_out = w_p.shape[-1]

    xs = [jnp.pad(x, ((0, 0), (padding, padding), (padding, padding), (0, 0)))
          for x in x_list]
    th = _pick_row_tile(Ho, Wo)
    grid = (N, Ho // th)

    # TODO(synk): for production-size images on v7x (64 MiB VMEM) the resident
    #             full-image input should become a manually DMA'd (TH+2)-row
    #             halo window (memory_space=pl.ANY + make_async_copy).
    in_specs = [pl.BlockSpec((1, Hp, Wp, x.shape[-1]),
                             lambda n, t: (n, 0, 0, 0)) for x in xs]
    in_specs += [
        pl.BlockSpec(w_p.shape, lambda n, t: (0, 0, 0, 0)),
        pl.BlockSpec((1, cp_out), lambda n, t: (0, 0)),
        pl.BlockSpec((1, cp_out), lambda n, t: (0, 0)),
        pl.BlockSpec((1, cp_out), lambda n, t: (0, 0)),
    ]
    return pl.pallas_call(
        functools.partial(_conv3x3_relu_bn_kernel, th),
        out_shape=jax.ShapeDtypeStruct((N, Ho, Wo, cp_out), out_dtype),
        grid=grid,
        in_specs=in_specs,
        out_specs=pl.BlockSpec((1, th, Wo, cp_out), lambda n, t: (n, t, 0, 0)),
        compiler_params=pltpu.CompilerParams(
            dimension_semantics=("parallel", "parallel"),
            vmem_limit_bytes=_VMEM_LIMIT),
    )(*xs, w_p, b_p, sc_p, sh_p)


# ----------------------------------------------------------------------------
# Parameter construction and full DecodeStack forward.
# ----------------------------------------------------------------------------
def make_params(key, in_channels, out_channels):
    """Deterministic parameters mimicking the PyTorch module (eval mode)."""
    ks = jax.random.split(key, 14)
    eps = 1e-5

    def bn_params(k0, k1, k2, k3, c):
        gamma = 1.0 + 0.1 * jax.random.normal(k0, (c,), jnp.float32)
        beta = 0.1 * jax.random.normal(k1, (c,), jnp.float32)
        rmean = 0.1 * jax.random.normal(k2, (c,), jnp.float32)
        rvar = 1.0 + jnp.abs(0.1 * jax.random.normal(k3, (c,), jnp.float32))
        scale = gamma / jnp.sqrt(rvar + eps)
        shift = beta - rmean * scale
        return scale, shift

    c1_scale, c1_shift = bn_params(ks[6], ks[7], ks[8], ks[9], out_channels)
    c2_scale, c2_shift = bn_params(ks[10], ks[11], ks[12], ks[13], out_channels)

    return dict(
        # ConvTranspose2d weight: (Cin, Cout, 2, 2)
        tc_w=0.1 * jax.random.normal(ks[0], (in_channels, out_channels, 2, 2),
                                     jnp.float32),
        tc_b=0.1 * jax.random.normal(ks[1], (out_channels,), jnp.float32),
        # Conv2d weights stored HWIO: (3, 3, Cin, Cout)
        c1_w=0.1 * jax.random.normal(ks[2], (3, 3, in_channels, out_channels),
                                     jnp.float32),
        c1_b=0.1 * jax.random.normal(ks[3], (out_channels,), jnp.float32),
        c1_scale=c1_scale, c1_shift=c1_shift,
        c2_w=0.1 * jax.random.normal(ks[4], (3, 3, out_channels, out_channels),
                                     jnp.float32),
        c2_b=0.1 * jax.random.normal(ks[5], (out_channels,), jnp.float32),
        c2_scale=c2_scale, c2_shift=c2_shift,
    )


def prepare_params(params, in_channels, out_channels):
    """Zero-pad channel dims to the TPU lane width and pre-cast MXU operands
    to bf16.  Padded lanes carry exact zeros end-to-end."""
    c_enc = in_channels - out_channels            # skip-connection channels
    cp_in = _round_up(in_channels, LANE)
    cp_out = _round_up(out_channels, LANE)
    cp_enc = _round_up(c_enc, LANE)

    # ConvTranspose2d: (Cin, Cout, 2, 2) -> (di, Cp_in, dj*Cp_out + co)
    twp = jnp.zeros((cp_in, cp_out, 2, 2), jnp.float32)
    twp = twp.at[:in_channels, :out_channels].set(params["tc_w"])
    tc_w = jnp.transpose(twp, (2, 0, 3, 1)).reshape(2, cp_in, 2 * cp_out)
    tc_b = _pad_last(params["tc_b"], cp_out)
    tc_b2 = jnp.tile(tc_b, 2).reshape(1, 2 * cp_out)

    # conv1 weight: input channel order is [enc (c_enc), up (out_channels)];
    # after channel padding the two groups live at lane offsets 0 and cp_enc.
    w1 = params["c1_w"]
    w1p = jnp.zeros((3, 3, cp_enc + cp_out, cp_out), jnp.float32)
    w1p = w1p.at[:, :, :c_enc, :out_channels].set(w1[:, :, :c_enc, :])
    w1p = w1p.at[:, :, cp_enc:cp_enc + out_channels, :out_channels].set(
        w1[:, :, c_enc:, :])

    w2p = jnp.zeros((3, 3, cp_out, cp_out), jnp.float32)
    w2p = w2p.at[:, :, :out_channels, :out_channels].set(params["c2_w"])

    def vec(v):
        return _pad_last(v, cp_out).reshape(1, cp_out)

    return dict(
        tc_w=tc_w.astype(jnp.bfloat16), tc_b=tc_b2,
        c1_w=w1p.astype(jnp.bfloat16), c1_b=vec(params["c1_b"]),
        c1_scale=vec(params["c1_scale"]), c1_shift=vec(params["c1_shift"]),
        c2_w=w2p.astype(jnp.bfloat16), c2_b=vec(params["c2_b"]),
        c2_scale=vec(params["c2_scale"]), c2_shift=vec(params["c2_shift"]),
    )


@functools.partial(jax.jit, static_argnames=("padding", "out_channels"))
def decode_stack_forward(pp, x_nchw, enc_nchw, padding, out_channels):
    cp_in = pp["tc_w"].shape[1]
    cp_out = pp["c1_w"].shape[-1]
    cp_enc = pp["c1_w"].shape[2] - cp_out

    # NCHW -> NHWC, zero-pad channels to lane width, bf16 for the MXU.
    x = jnp.transpose(x_nchw, (0, 2, 3, 1)).astype(jnp.float32)
    enc = jnp.transpose(enc_nchw, (0, 2, 3, 1)).astype(jnp.float32)
    x = _pad_last(x, cp_in).astype(jnp.bfloat16)
    enc = _pad_last(enc, cp_enc).astype(jnp.bfloat16)

    up = trans_conv2x2_stride2(x, pp["tc_w"], pp["tc_b"])   # (N,2H,2W,cp_out)

    # trim_tensor(encoded_features, up.size(2))
    size = up.shape[1]
    orig = enc.shape[1]
    border = (orig - size) // 2
    enc_t = enc[:, border:orig - border, border:orig - border, :]

    # torch.cat((enc_t, up), dim=1) is fused into the first conv kernel.
    h = conv3x3_relu_bn([enc_t, up], pp["c1_w"], pp["c1_b"],
                        pp["c1_scale"], pp["c1_shift"], padding, jnp.bfloat16)
    h = conv3x3_relu_bn([h], pp["c2_w"], pp["c2_b"],
                        pp["c2_scale"], pp["c2_shift"], padding, jnp.float32)

    # strip channel padding, NHWC -> NCHW (match PyTorch output convention)
    return jnp.transpose(h[..., :out_channels], (0, 3, 1, 2))


# ----------------------------------------------------------------------------
# Pure-JAX f32 reference (lax conv) for correctness check.
# ----------------------------------------------------------------------------
def _ref_conv_block(x, w_hwio, b, scale, shift, padding):
    y = lax.conv_general_dilated(
        x, w_hwio, window_strides=(1, 1),
        padding=[(padding, padding), (padding, padding)],
        dimension_numbers=("NHWC", "HWIO", "NHWC")) + b
    y = jnp.maximum(y, 0.0)
    return y * scale + shift


def ref_forward(params, x_nchw, enc_nchw, padding):
    x = jnp.transpose(x_nchw, (0, 2, 3, 1)).astype(jnp.float32)
    enc = jnp.transpose(enc_nchw, (0, 2, 3, 1)).astype(jnp.float32)
    N, H, W, _ = x.shape
    Cout = params["tc_w"].shape[1]
    up = jnp.einsum("nhwc,cokl->nhkwlo", x, params["tc_w"])
    up = up.reshape(N, 2 * H, 2 * W, Cout) + params["tc_b"]
    size, orig = up.shape[1], enc.shape[1]
    border = (orig - size) // 2
    enc_t = enc[:, border:orig - border, border:orig - border, :]
    cat = jnp.concatenate([enc_t, up], axis=-1)
    h = _ref_conv_block(cat, params["c1_w"], params["c1_b"],
                        params["c1_scale"], params["c1_shift"], padding)
    h = _ref_conv_block(h, params["c2_w"], params["c2_b"],
                        params["c2_scale"], params["c2_shift"], padding)
    return jnp.transpose(h, (0, 3, 1, 2))


if __name__ == "__main__":
    # Small UNet-style shapes: skip connection carries (in - out) channels,
    # so cat(trim(enc), up) has in_channels = (in - out) + out channels.
    batch = 2
    in_channels = 8
    out_channels = 4
    padding = 1

    key = jax.random.PRNGKey(0)
    k_p, k_x, k_e = jax.random.split(key, 3)

    params = make_params(k_p, in_channels, out_channels)
    pparams = prepare_params(params, in_channels, out_channels)

    x = jax.random.normal(k_x, (batch, in_channels, 8, 8), jnp.float32)
    encoded_features = jax.random.normal(
        k_e, (batch, in_channels - out_channels, 18, 18), jnp.float32)

    out = decode_stack_forward(pparams, x, encoded_features, padding,
                               out_channels)
    out = jax.block_until_ready(out)

    ref = jax.block_until_ready(
        ref_forward(params, x, encoded_features, padding))

    assert out.shape == (batch, out_channels, 16, 16), out.shape
    # bf16 MXU operands (f32 accumulation) -> loosened tolerance vs f32 ref.
    if not np.allclose(np.asarray(out), np.asarray(ref), rtol=5e-2, atol=5e-2):
        err = float(np.max(np.abs(np.asarray(out) - np.asarray(ref))))
        raise AssertionError(
            f"Pallas output mismatch vs JAX reference (max abs err {err})")

    print("KERNEL_OK")
</pallas_src>

<mosaic_0001>
module attributes {stable_mosaic.version = 11 : i64} {
  func.func @_upsample2x2_kernel(%arg0: i32, %arg1: i32, %arg2: memref<1x8x8x128xbf16, #tpu.memory_space<vmem>>, %arg3: memref<2x128x256xbf16, #tpu.memory_space<vmem>>, %arg4: memref<1x256xf32, #tpu.memory_space<vmem>>, %arg5: memref<1x8x2x8x256xbf16, #tpu.memory_space<vmem>>) attributes {dimension_semantics = [#tpu.dimension_semantics<parallel>, #tpu.dimension_semantics<parallel>], iteration_bounds = array<i64: 2, 1>, scalar_prefetch = 0 : i64, scratch_operands = 0 : i64, tpu.core_type = #tpu.core_type<tc>, window_params = [{transform_indices = @transform_0, window_bounds = array<i64: 1, 8, 8, 128>}, {pipeline_mode = #tpu.pipeline_mode<synchronous>, transform_indices = @transform_1, window_bounds = array<i64: 2, 128, 256>}, {pipeline_mode = #tpu.pipeline_mode<synchronous>, transform_indices = @transform_2, window_bounds = array<i64: 1, 256>}, {transform_indices = @transform_3, window_bounds = array<i64: 1, 8, 2, 8, 256>}]} {
    %c0 = arith.constant 0 : index
    %c0_0 = arith.constant 0 : index
    %c0_1 = arith.constant 0 : index
    %c0_2 = arith.constant 0 : index
    %0 = vector.load %arg2[%c0, %c0_0, %c0_1, %c0_2] : memref<1x8x8x128xbf16, #tpu.memory_space<vmem>>, vector<1x8x8x128xbf16>
    %1 = vector.shape_cast %0 : vector<1x8x8x128xbf16> to vector<8x8x128xbf16>
    %2 = vector.shape_cast %1 : vector<8x8x128xbf16> to vector<64x128xbf16>
    %c0_3 = arith.constant 0 : index
    %c0_4 = arith.constant 0 : index
    %c0_5 = arith.constant 0 : index
    %3 = vector.load %arg3[%c0_3, %c0_4, %c0_5] : memref<2x128x256xbf16, #tpu.memory_space<vmem>>, vector<1x128x256xbf16>
    %4 = vector.shape_cast %3 : vector<1x128x256xbf16> to vector<128x256xbf16>
    %cst = arith.constant dense<0.000000e+00> : vector<64x256xf32>
    %5 = tpu.matmul %2, %4, %cst {dimension_numbers = #tpu.dot_dimension_numbers<[1], [0], [0], [1], [0, 0, 1, 1], [], []>} : vector<64x128xbf16>, vector<128x256xbf16>, vector<64x256xf32> -> vector<64x256xf32>
    %c0_6 = arith.constant 0 : index
    %c0_7 = arith.constant 0 : index
    %6 = vector.load %arg4[%c0_6, %c0_7] : memref<1x256xf32, #tpu.memory_space<vmem>>, vector<1x256xf32>
    %7 = vector.broadcast %6 : vector<1x256xf32> to vector<64x256xf32>
    %8 = arith.addf %5, %7 : vector<64x256xf32>
    %9 = vector.shape_cast %8 : vector<64x256xf32> to vector<8x8x256xf32>
    %10 = arith.truncf %9 : vector<8x8x256xf32> to vector<8x8x256xbf16>
    %c0_8 = arith.constant 0 : index
    %c0_9 = arith.constant 0 : index
    %c0_10 = arith.constant 0 : index
    %c0_11 = arith.constant 0 : index
    %c0_12 = arith.constant 0 : index
    %11 = vector.load %arg5[%c0_8, %c0_9, %c0_10, %c0_11, %c0_12] : memref<1x8x2x8x256xbf16, #tpu.memory_space<vmem>>, vector<1x8x1x8x256xbf16>
    %12 = vector.shape_cast %11 : vector<1x8x1x8x256xbf16> to vector<8x8x256xbf16>
    %13 = vector.shape_cast %10 : vector<8x8x256xbf16> to vector<1x8x1x8x256xbf16>
    tpu.vector_store %arg5[%c0_8, %c0_9, %c0_10, %c0_11, %c0_12], %13 {strides = array<i32>} : memref<1x8x2x8x256xbf16, #tpu.memory_space<vmem>>, vector<1x8x1x8x256xbf16>,
    %c1 = arith.constant 1 : index
    %c0_13 = arith.constant 0 : index
    %c0_14 = arith.constant 0 : index
    %14 = vector.load %arg3[%c1, %c0_13, %c0_14] : memref<2x128x256xbf16, #tpu.memory_space<vmem>>, vector<1x128x256xbf16>
    %15 = vector.shape_cast %14 : vector<1x128x256xbf16> to vector<128x256xbf16>
    %cst_15 = arith.constant dense<0.000000e+00> : vector<64x256xf32>
    %16 = tpu.matmul %2, %15, %cst_15 {dimension_numbers = #tpu.dot_dimension_numbers<[1], [0], [0], [1], [0, 0, 1, 1], [], []>} : vector<64x128xbf16>, vector<128x256xbf16>, vector<64x256xf32> -> vector<64x256xf32>
    %c0_16 = arith.constant 0 : index
    %c0_17 = arith.constant 0 : index
    %17 = vector.load %arg4[%c0_16, %c0_17] : memref<1x256xf32, #tpu.memory_space<vmem>>, vector<1x256xf32>
    %18 = vector.broadcast %17 : vector<1x256xf32> to vector<64x256xf32>
    %19 = arith.addf %16, %18 : vector<64x256xf32>
    %20 = vector.shape_cast %19 : vector<64x256xf32> to vector<8x8x256xf32>
    %21 = arith.truncf %20 : vector<8x8x256xf32> to vector<8x8x256xbf16>
    %c0_18 = arith.constant 0 : index
    %c0_19 = arith.constant 0 : index
    %c1_20 = arith.constant 1 : index
    %c0_21 = arith.constant 0 : index
    %c0_22 = arith.constant 0 : index
    %22 = vector.load %arg5[%c0_18, %c0_19, %c1_20, %c0_21, %c0_22] : memref<1x8x2x8x256xbf16, #tpu.memory_space<vmem>>, vector<1x8x1x8x256xbf16>
    %23 = vector.shape_cast %22 : vector<1x8x1x8x256xbf16> to vector<8x8x256xbf16>
    %24 = vector.shape_cast %21 : vector<8x8x256xbf16> to vector<1x8x1x8x256xbf16>
    tpu.vector_store %arg5[%c0_18, %c0_19, %c1_20, %c0_21, %c0_22], %24 {strides = array<i32>} : memref<1x8x2x8x256xbf16, #tpu.memory_space<vmem>>, vector<1x8x1x8x256xbf16>,
    return
  }
  func.func @transform_0(%arg0: i32, %arg1: i32) -> (i32, i32, i32, i32) {
    %c0_i32 = arith.constant 0 : i32
    %c0_i32_0 = arith.constant 0 : i32
    %c0_i32_1 = arith.constant 0 : i32
    return %arg0, %arg1, %c0_i32, %c0_i32_0 : i32, i32, i32, i32
  }
  func.func @transform_1(%arg0: i32, %arg1: i32) -> (i32, i32, i32) {
    %c0_i32 = arith.constant 0 : i32
    %c0_i32_0 = arith.constant 0 : i32
    %c0_i32_1 = arith.constant 0 : i32
    %c0_i32_2 = arith.constant 0 : i32
    return %c0_i32, %c0_i32_0, %c0_i32_1 : i32, i32, i32
  }
  func.func @transform_2(%arg0: i32, %arg1: i32) -> (i32, i32) {
    %c0_i32 = arith.constant 0 : i32
    %c0_i32_0 = arith.constant 0 : i32
    %c0_i32_1 = arith.constant 0 : i32
    return %c0_i32, %c0_i32_0 : i32, i32
  }
  func.func @transform_3(%arg0: i32, %arg1: i32) -> (i32, i32, i32, i32, i32) {
    %c0_i32 = arith.constant 0 : i32
    %c0_i32_0 = arith.constant 0 : i32
    %c0_i32_1 = arith.constant 0 : i32
    %c0_i32_2 = arith.constant 0 : i32
    return %arg0, %arg1, %c0_i32, %c0_i32_0, %c0_i32_1 : i32, i32, i32, i32, i32
  }
}

module attributes {stable_mosaic.version = 11 : i64} {
  func.func @_conv3x3_relu_bn_kernel(%arg0: i32, %arg1: i32, %arg2: memref<1x18x18x128xbf16, #tpu.memory_space<vmem>>, %arg3: memref<1x18x18x128xbf16, #tpu.memory_space<vmem>>, %arg4: memref<3x3x256x128xbf16, #tpu.memory_space<vmem>>, %arg5: memref<1x128xf32, #tpu.memory_space<vmem>>, %arg6: memref<1x128xf32, #tpu.memory_space<vmem>>, %arg7: memref<1x128xf32, #tpu.memory_space<vmem>>, %arg8: memref<1x16x16x128xbf16, #tpu.memory_space<vmem>>) attributes {dimension_semantics = [#tpu.dimension_semantics<parallel>, #tpu.dimension_semantics<parallel>], iteration_bounds = array<i64: 2, 1>, scalar_prefetch = 0 : i64, scratch_operands = 0 : i64, tpu.core_type = #tpu.core_type<tc>, window_params = [{transform_indices = @transform_0, window_bounds = array<i64: 1, 18, 18, 128>}, {transform_indices = @transform_1, window_bounds = array<i64: 1, 18, 18, 128>}, {pipeline_mode = #tpu.pipeline_mode<synchronous>, transform_indices = @transform_2, window_bounds = array<i64: 3, 3, 256, 128>}, {pipeline_mode = #tpu.pipeline_mode<synchronous>, transform_indices = @transform_3, window_bounds = array<i64: 1, 128>}, {pipeline_mode = #tpu.pipeline_mode<synchronous>, transform_indices = @transform_4, window_bounds = array<i64: 1, 128>}, {pipeline_mode = #tpu.pipeline_mode<synchronous>, transform_indices = @transform_5, window_bounds = array<i64: 1, 128>}, {transform_indices = @transform_6, window_bounds = array<i64: 1, 16, 16, 128>}]} {
    %c16_i32 = arith.constant 16 : i32
    %0 = arith.muli %arg1, %c16_i32 : i32
    %1 = tpu.assume_multiple %0, 16 : i32
    %c0 = arith.constant 0 : index
    %2 = arith.index_cast %1 : i32 to index
    %c0_0 = arith.constant 0 : index
    %c0_1 = arith.constant 0 : index
    %3 = vector.load %arg2[%c0, %2, %c0_0, %c0_1] : memref<1x18x18x128xbf16, #tpu.memory_space<vmem>>, vector<1x18x18x128xbf16>
    %4 = vector.shape_cast %3 : vector<1x18x18x128xbf16> to vector<18x18x128xbf16>
    %c0_2 = arith.constant 0 : index
    %5 = arith.index_cast %1 : i32 to index
    %c0_3 = arith.constant 0 : index
    %c0_4 = arith.constant 0 : index
    %6 = vector.load %arg3[%c0_2, %5, %c0_3, %c0_4] : memref<1x18x18x128xbf16, #tpu.memory_space<vmem>>, vector<1x18x18x128xbf16>
    %7 = vector.shape_cast %6 : vector<1x18x18x128xbf16> to vector<18x18x128xbf16>
    %8 = tpu.concatenate %4, %7 in 2 : vector<18x18x128xbf16>, vector<18x18x128xbf16> -> vector<18x18x256xbf16>
    %cst = arith.constant 0.000000e+00 : f32
    %9 = vector.broadcast %cst : f32 to vector<256x128xf32>
    %10 = vector.extract_strided_slice %8 {offsets = [0, 0, 0], sizes = [16, 16, 256], strides = [1, 1, 1]} : vector<18x18x256xbf16> to vector<16x16x256xbf16>
    %11 = vector.shape_cast %10 : vector<16x16x256xbf16> to vector<256x256xbf16>
    %c0_5 = arith.constant 0 : index
    %c0_6 = arith.constant 0 : index
    %c0_7 = arith.constant 0 : index
    %c0_8 = arith.constant 0 : index
    %12 = vector.load %arg4[%c0_5, %c0_6, %c0_7, %c0_8] : memref<3x3x256x128xbf16, #tpu.memory_space<vmem>>, vector<1x1x256x128xbf16>
    %13 = vector.shape_cast %12 : vector<1x1x256x128xbf16> to vector<256x128xbf16>
    %cst_9 = arith.constant dense<0.000000e+00> : vector<256x128xf32>
    %14 = tpu.matmul %11, %13, %cst_9 {dimension_numbers = #tpu.dot_dimension_numbers<[1], [0], [0], [1], [0, 0, 1, 1], [], []>} : vector<256x256xbf16>, vector<256x128xbf16>, vector<256x128xf32> -> vector<256x128xf32>
    %15 = arith.addf %9, %14 : vector<256x128xf32>
    %16 = vector.extract_strided_slice %8 {offsets = [0, 1, 0], sizes = [16, 16, 256], strides = [1, 1, 1]} : vector<18x18x256xbf16> to vector<16x16x256xbf16>
    %17 = vector.shape_cast %16 : vector<16x16x256xbf16> to vector<256x256xbf16>
    %c0_10 = arith.constant 0 : index
    %c1 = arith.constant 1 : index
    %c0_11 = arith.constant 0 : index
    %c0_12 = arith.constant 0 : index
    %18 = vector.load %arg4[%c0_10, %c1, %c0_11, %c0_12] : memref<3x3x256x128xbf16, #tpu.memory_space<vmem>>, vector<1x1x256x128xbf16>
    %19 = vector.shape_cast %18 : vector<1x1x256x128xbf16> to vector<256x128xbf16>
    %cst_13 = arith.constant dense<0.000000e+00> : vector<256x128xf32>
    %20 = tpu.matmul %17, %19, %cst_13 {dimension_numbers = #tpu.dot_dimension_numbers<[1], [0], [0], [1], [0, 0, 1, 1], [], []>} : vector<256x256xbf16>, vector<256x128xbf16>, vector<256x128xf32> -> vector<256x128xf32>
    %21 = arith.addf %15, %20 : vector<256x128xf32>
    %22 = vector.extract_strided_slice %8 {offsets = [0, 2, 0], sizes = [16, 16, 256], strides = [1, 1, 1]} : vector<18x18x256xbf16> to vector<16x16x256xbf16>
    %23 = vector.shape_cast %22 : vector<16x16x256xbf16> to vector<256x256xbf16>
    %c0_14 = arith.constant 0 : index
    %c2 = arith.constant 2 : index
    %c0_15 = arith.constant 0 : index
    %c0_16 = arith.constant 0 : index
    %24 = vector.load %arg4[%c0_14, %c2, %c0_15, %c0_16] : memref<3x3x256x128xbf16, #tpu.memory_space<vmem>>, vector<1x1x256x128xbf16>
    %25 = vector.shape_cast %24 : vector<1x1x256x128xbf16> to vector<256x128xbf16>
    %cst_17 = arith.constant dense<0.000000e+00> : vector<256x128xf32>
    %26 = tpu.matmul %23, %25, %cst_17 {dimension_numbers = #tpu.dot_dimension_numbers<[1], [0], [0], [1], [0, 0, 1, 1], [], []>} : vector<256x256xbf16>, vector<256x128xbf16>, vector<256x128xf32> -> vector<256x128xf32>
    %27 = arith.addf %21, %26 : vector<256x128xf32>
    %28 = vector.extract_strided_slice %8 {offsets = [1, 0, 0], sizes = [16, 16, 256], strides = [1, 1, 1]} : vector<18x18x256xbf16> to vector<16x16x256xbf16>
    %29 = vector.shape_cast %28 : vector<16x16x256xbf16> to vector<256x256xbf16>
    %c1_18 = arith.constant 1 : index
    %c0_19 = arith.constant 0 : index
    %c0_20 = arith.constant 0 : index
    %c0_21 = arith.constant 0 : index
    %30 = vector.load %arg4[%c1_18, %c0_19, %c0_20, %c0_21] : memref<3x3x256x128xbf16, #tpu.memory_space<vmem>>, vector<1x1x256x128xbf16>
    %31 = vector.shape_cast %30 : vector<1x1x256x128xbf16> to vector<256x128xbf16>
    %cst_22 = arith.constant dense<0.000000e+00> : vector<256x128xf32>
    %32 = tpu.matmul %29, %31, %cst_22 {dimension_numbers = #tpu.dot_dimension_numbers<[1], [0], [0], [1], [0, 0, 1, 1], [], []>} : vector<256x256xbf16>, vector<256x128xbf16>, vector<256x128xf32> -> vector<256x128xf32>
    %33 = arith.addf %27, %32 : vector<256x128xf32>
    %34 = vector.extract_strided_slice %8 {offsets = [1, 1, 0], sizes = [16, 16, 256], strides = [1, 1, 1]} : vector<18x18x256xbf16> to vector<16x16x256xbf16>
    %35 = vector.shape_cast %34 : vector<16x16x256xbf16> to vector<256x256xbf16>
    %c1_23 = arith.constant 1 : index
    %c1_24 = arith.constant 1 : index
    %c0_25 = arith.constant 0 : index
    %c0_26 = arith.constant 0 : index
    %36 = vector.load %arg4[%c1_23, %c1_24, %c0_25, %c0_26] : memref<3x3x256x128xbf16, #tpu.memory_space<vmem>>, vector<1x1x256x128xbf16>
    %37 = vector.shape_cast %36 : vector<1x1x256x128xbf16> to vector<256x128xbf16>
    %cst_27 = arith.constant dense<0.000000e+00> : vector<256x128xf32>
    %38 = tpu.matmul %35, %37, %cst_27 {dimension_numbers = #tpu.dot_dimension_numbers<[1], [0], [0], [1], [0, 0, 1, 1], [], []>} : vector<256x256xbf16>, vector<256x128xbf16>, vector<256x128xf32> -> vector<256x128xf32>
    %39 = arith.addf %33, %38 : vector<256x128xf32>
    %40 = vector.extract_strided_slice %8 {offsets = [1, 2, 0], sizes = [16, 16, 256], strides = [1, 1, 1]} : vector<18x18x256xbf16> to vector<16x16x256xbf16>
    %41 = vector.shape_cast %40 : vector<16x16x256xbf16> to vector<256x256xbf16>
    %c1_28 = arith.constant 1 : index
    %c2_29 = arith.constant 2 : index
    %c0_30 = arith.constant 0 : index
    %c0_31 = arith.constant 0 : index
    %42 = vector.load %arg4[%c1_28, %c2_29, %c0_30, %c0_31] : memref<3x3x256x128xbf16, #tpu.memory_space<vmem>>, vector<1x1x256x128xbf16>
    %43 = vector.shape_cast %42 : vector<1x1x256x128xbf16> to vector<256x128xbf16>
    %cst_32 = arith.constant dense<0.000000e+00> : vector<256x128xf32>
    %44 = tpu.matmul %41, %43, %cst_32 {dimension_numbers = #tpu.dot_dimension_numbers<[1], [0], [0], [1], [0, 0, 1, 1], [], []>} : vector<256x256xbf16>, vector<256x128xbf16>, vector<256x128xf32> -> vector<256x128xf32>
    %45 = arith.addf %39, %44 : vector<256x128xf32>
    %46 = vector.extract_strided_slice %8 {offsets = [2, 0, 0], sizes = [16, 16, 256], strides = [1, 1, 1]} : vector<18x18x256xbf16> to vector<16x16x256xbf16>
    %47 = vector.shape_cast %46 : vector<16x16x256xbf16> to vector<256x256xbf16>
    %c2_33 = arith.constant 2 : index
    %c0_34 = arith.constant 0 : index
    %c0_35 = arith.constant 0 : index
    %c0_36 = arith.constant 0 : index
    %48 = vector.load %arg4[%c2_33, %c0_34, %c0_35, %c0_36] : memref<3x3x256x128xbf16, #tpu.memory_space<vmem>>, vector<1x1x256x128xbf16>
    %49 = vector.shape_cast %48 : vector<1x1x256x128xbf16> to vector<256x128xbf16>
    %cst_37 = arith.constant dense<0.000000e+00> : vector<256x128xf32>
    %50 = tpu.matmul %47, %49, %cst_37 {dimension_numbers = #tpu.dot_dimension_numbers<[1], [0], [0], [1], [0, 0, 1, 1], [], []>} : vector<256x256xbf16>, vector<256x128xbf16>, vector<256x128xf32> -> vector<256x128xf32>
    %51 = arith.addf %45, %50 : vector<256x128xf32>
    %52 = vector.extract_strided_slice %8 {offsets = [2, 1, 0], sizes = [16, 16, 256], strides = [1, 1, 1]} : vector<18x18x256xbf16> to vector<16x16x256xbf16>
    %53 = vector.shape_cast %52 : vector<16x16x256xbf16> to vector<256x256xbf16>
    %c2_38 = arith.constant 2 : index
    %c1_39 = arith.constant 1 : index
    %c0_40 = arith.constant 0 : index
    %c0_41 = arith.constant 0 : index
    %54 = vector.load %arg4[%c2_38, %c1_39, %c0_40, %c0_41] : memref<3x3x256x128xbf16, #tpu.memory_space<vmem>>, vector<1x1x256x128xbf16>
    %55 = vector.shape_cast %54 : vector<1x1x256x128xbf16> to vector<256x128xbf16>
    %cst_42 = arith.constant dense<0.000000e+00> : vector<256x128xf32>
    %56 = tpu.matmul %53, %55, %cst_42 {dimension_numbers = #tpu.dot_dimension_numbers<[1], [0], [0], [1], [0, 0, 1, 1], [], []>} : vector<256x256xbf16>, vector<256x128xbf16>, vector<256x128xf32> -> vector<256x128xf32>
    %57 = arith.addf %51, %56 : vector<256x128xf32>
    %58 = vector.extract_strided_slice %8 {offsets = [2, 2, 0], sizes = [16, 16, 256], strides = [1, 1, 1]} : vector<18x18x256xbf16> to vector<16x16x256xbf16>
    %59 = vector.shape_cast %58 : vector<16x16x256xbf16> to vector<256x256xbf16>
    %c2_43 = arith.constant 2 : index
    %c2_44 = arith.constant 2 : index
    %c0_45 = arith.constant 0 : index
    %c0_46 = arith.constant 0 : index
    %60 = vector.load %arg4[%c2_43, %c2_44, %c0_45, %c0_46] : memref<3x3x256x128xbf16, #tpu.memory_space<vmem>>, vector<1x1x256x128xbf16>
    %61 = vector.shape_cast %60 : vector<1x1x256x128xbf16> to vector<256x128xbf16>
    %cst_47 = arith.constant dense<0.000000e+00> : vector<256x128xf32>
    %62 = tpu.matmul %59, %61, %cst_47 {dimension_numbers = #tpu.dot_dimension_numbers<[1], [0], [0], [1], [0, 0, 1, 1], [], []>} : vector<256x256xbf16>, vector<256x128xbf16>, vector<256x128xf32> -> vector<256x128xf32>
    %63 = arith.addf %57, %62 : vector<256x128xf32>
    %c0_48 = arith.constant 0 : index
    %c0_49 = arith.constant 0 : index
    %64 = vector.load %arg5[%c0_48, %c0_49] : memref<1x128xf32, #tpu.memory_space<vmem>>, vector<1x128xf32>
    %65 = vector.broadcast %64 : vector<1x128xf32> to vector<256x128xf32>
    %66 = arith.addf %63, %65 : vector<256x128xf32>
    %cst_50 = arith.constant 0.000000e+00 : f32
    %67 = vector.broadcast %cst_50 : f32 to vector<256x128xf32>
    %68 = arith.maximumf %66, %67 : vector<256x128xf32>
    %c0_51 = arith.constant 0 : index
    %c0_52 = arith.constant 0 : index
    %69 = vector.load %arg6[%c0_51, %c0_52] : memref<1x128xf32, #tpu.memory_space<vmem>>, vector<1x128xf32>
    %70 = vector.broadcast %69 : vector<1x128xf32> to vector<256x128xf32>
    %71 = arith.mulf %68, %70 : vector<256x128xf32>
    %c0_53 = arith.constant 0 : index
    %c0_54 = arith.constant 0 : index
    %72 = vector.load %arg7[%c0_53, %c0_54] : memref<1x128xf32, #tpu.memory_space<vmem>>, vector<1x128xf32>
    %73 = vector.broadcast %72 : vector<1x128xf32> to vector<256x128xf32>
    %74 = arith.addf %71, %73 : vector<256x128xf32>
    %75 = vector.shape_cast %74 : vector<256x128xf32> to vector<16x16x128xf32>
    %76 = arith.truncf %75 : vector<16x16x128xf32> to vector<16x16x128xbf16>
    %c0_55 = arith.constant 0 : index
    %c0_56 = arith.constant 0 : index
    %c0_57 = arith.constant 0 : index
    %c0_58 = arith.constant 0 : index
    %77 = vector.load %arg8[%c0_55, %c0_56, %c0_57, %c0_58] : memref<1x16x16x128xbf16, #tpu.memory_space<vmem>>, vector<1x16x16x128xbf16>
    %78 = vector.shape_cast %77 : vector<1x16x16x128xbf16> to vector<16x16x128xbf16>
    %79 = vector.shape_cast %76 : vector<16x16x128xbf16> to vector<1x16x16x128xbf16>
    tpu.vector_store %arg8[%c0_55, %c0_56, %c0_57, %c0_58], %79 {strides = array<i32>} : memref<1x16x16x128xbf16, #tpu.memory_space<vmem>>, vector<1x16x16x128xbf16>,
    return
  }
  func.func @transform_0(%arg0: i32, %arg1: i32) -> (i32, i32, i32, i32) {
    %c0_i32 = arith.constant 0 : i32
    %c0_i32_0 = arith.constant 0 : i32
    %c0_i32_1 = arith.constant 0 : i32
    %c0_i32_2 = arith.constant 0 : i32
    return %arg0, %c0_i32, %c0_i32_0, %c0_i32_1 : i32, i32, i32, i32
  }
  func.func @transform_1(%arg0: i32, %arg1: i32) -> (i32, i32, i32, i32) {
    %c0_i32 = arith.constant 0 : i32
    %c0_i32_0 = arith.constant 0 : i32
    %c0_i32_1 = arith.constant 0 : i32
    %c0_i32_2 = arith.constant 0 : i32
    return %arg0, %c0_i32, %c0_i32_0, %c0_i32_1 : i32, i32, i32, i32
  }
  func.func @transform_2(%arg0: i32, %arg1: i32) -> (i32, i32, i32, i32) {
    %c0_i32 = arith.constant 0 : i32
    %c0_i32_0 = arith.constant 0 : i32
    %c0_i32_1 = arith.constant 0 : i32
    %c0_i32_2 = arith.constant 0 : i32
    %c0_i32_3 = arith.constant 0 : i32
    return %c0_i32, %c0_i32_0, %c0_i32_1, %c0_i32_2 : i32, i32, i32, i32
  }
  func.func @transform_3(%arg0: i32, %arg1: i32) -> (i32, i32) {
    %c0_i32 = arith.constant 0 : i32
    %c0_i32_0 = arith.constant 0 : i32
    %c0_i32_1 = arith.constant 0 : i32
    return %c0_i32, %c0_i32_0 : i32, i32
  }
  func.func @transform_4(%arg0: i32, %arg1: i32) -> (i32, i32) {
    %c0_i32 = arith.constant 0 : i32
    %c0_i32_0 = arith.constant 0 : i32
    %c0_i32_1 = arith.constant 0 : i32
    return %c0_i32, %c0_i32_0 : i32, i32
  }
  func.func @transform_5(%arg0: i32, %arg1: i32) -> (i32, i32) {
    %c0_i32 = arith.constant 0 : i32
    %c0_i32_0 = arith.constant 0 : i32
    %c0_i32_1 = arith.constant 0 : i32
    return %c0_i32, %c0_i32_0 : i32, i32
  }
  func.func @transform_6(%arg0: i32, %arg1: i32) -> (i32, i32, i32, i32) {
    %c0_i32 = arith.constant 0 : i32
    %c0_i32_0 = arith.constant 0 : i32
    %c0_i32_1 = arith.constant 0 : i32
    return %arg0, %arg1, %c0_i32, %c0_i32_0 : i32, i32, i32, i32
  }
}

module attributes {stable_mosaic.version = 11 : i64} {
  func.func @_conv3x3_relu_bn_kernel(%arg0: i32, %arg1: i32, %arg2: memref<1x18x18x128xbf16, #tpu.memory_space<vmem>>, %arg3: memref<3x3x128x128xbf16, #tpu.memory_space<vmem>>, %arg4: memref<1x128xf32, #tpu.memory_space<vmem>>, %arg5: memref<1x128xf32, #tpu.memory_space<vmem>>, %arg6: memref<1x128xf32, #tpu.memory_space<vmem>>, %arg7: memref<1x16x16x128xf32, #tpu.memory_space<vmem>>) attributes {dimension_semantics = [#tpu.dimension_semantics<parallel>, #tpu.dimension_semantics<parallel>], iteration_bounds = array<i64: 2, 1>, scalar_prefetch = 0 : i64, scratch_operands = 0 : i64, tpu.core_type = #tpu.core_type<tc>, window_params = [{transform_indices = @transform_0, window_bounds = array<i64: 1, 18, 18, 128>}, {pipeline_mode = #tpu.pipeline_mode<synchronous>, transform_indices = @transform_1, window_bounds = array<i64: 3, 3, 128, 128>}, {pipeline_mode = #tpu.pipeline_mode<synchronous>, transform_indices = @transform_2, window_bounds = array<i64: 1, 128>}, {pipeline_mode = #tpu.pipeline_mode<synchronous>, transform_indices = @transform_3, window_bounds = array<i64: 1, 128>}, {pipeline_mode = #tpu.pipeline_mode<synchronous>, transform_indices = @transform_4, window_bounds = array<i64: 1, 128>}, {transform_indices = @transform_5, window_bounds = array<i64: 1, 16, 16, 128>}]} {
    %c16_i32 = arith.constant 16 : i32
    %0 = arith.muli %arg1, %c16_i32 : i32
    %1 = tpu.assume_multiple %0, 16 : i32
    %c0 = arith.constant 0 : index
    %2 = arith.index_cast %1 : i32 to index
    %c0_0 = arith.constant 0 : index
    %c0_1 = arith.constant 0 : index
    %3 = vector.load %arg2[%c0, %2, %c0_0, %c0_1] : memref<1x18x18x128xbf16, #tpu.memory_space<vmem>>, vector<1x18x18x128xbf16>
    %4 = vector.shape_cast %3 : vector<1x18x18x128xbf16> to vector<18x18x128xbf16>
    %cst = arith.constant 0.000000e+00 : f32
    %5 = vector.broadcast %cst : f32 to vector<256x128xf32>
    %6 = vector.extract_strided_slice %4 {offsets = [0, 0, 0], sizes = [16, 16, 128], strides = [1, 1, 1]} : vector<18x18x128xbf16> to vector<16x16x128xbf16>
    %7 = vector.shape_cast %6 : vector<16x16x128xbf16> to vector<256x128xbf16>
    %c0_2 = arith.constant 0 : index
    %c0_3 = arith.constant 0 : index
    %c0_4 = arith.constant 0 : index
    %c0_5 = arith.constant 0 : index
    %8 = vector.load %arg3[%c0_2, %c0_3, %c0_4, %c0_5] : memref<3x3x128x128xbf16, #tpu.memory_space<vmem>>, vector<1x1x128x128xbf16>
    %9 = vector.shape_cast %8 : vector<1x1x128x128xbf16> to vector<128x128xbf16>
    %cst_6 = arith.constant dense<0.000000e+00> : vector<256x128xf32>
    %10 = tpu.matmul %7, %9, %cst_6 {dimension_numbers = #tpu.dot_dimension_numbers<[1], [0], [0], [1], [0, 0, 1, 1], [], []>} : vector<256x128xbf16>, vector<128x128xbf16>, vector<256x128xf32> -> vector<256x128xf32>
    %11 = arith.addf %5, %10 : vector<256x128xf32>
    %12 = vector.extract_strided_slice %4 {offsets = [0, 1, 0], sizes = [16, 16, 128], strides = [1, 1, 1]} : vector<18x18x128xbf16> to vector<16x16x128xbf16>
    %13 = vector.shape_cast %12 : vector<16x16x128xbf16> to vector<256x128xbf16>
    %c0_7 = arith.constant 0 : index
    %c1 = arith.constant 1 : index
    %c0_8 = arith.constant 0 : index
    %c0_9 = arith.constant 0 : index
    %14 = vector.load %arg3[%c0_7, %c1, %c0_8, %c0_9] : memref<3x3x128x128xbf16, #tpu.memory_space<vmem>>, vector<1x1x128x128xbf16>
    %15 = vector.shape_cast %14 : vector<1x1x128x128xbf16> to vector<128x128xbf16>
    %cst_10 = arith.constant dense<0.000000e+00> : vector<256x128xf32>
    %16 = tpu.matmul %13, %15, %cst_10 {dimension_numbers = #tpu.dot_dimension_numbers<[1], [0], [0], [1], [0, 0, 1, 1], [], []>} : vector<256x128xbf16>, vector<128x128xbf16>, vector<256x128xf32> -> vector<256x128xf32>
    %17 = arith.addf %11, %16 : vector<256x128xf32>
    %18 = vector.extract_strided_slice %4 {offsets = [0, 2, 0], sizes = [16, 16, 128], strides = [1, 1, 1]} : vector<18x18x128xbf16> to vector<16x16x128xbf16>
    %19 = vector.shape_cast %18 : vector<16x16x128xbf16> to vector<256x128xbf16>
    %c0_11 = arith.constant 0 : index
    %c2 = arith.constant 2 : index
    %c0_12 = arith.constant 0 : index
    %c0_13 = arith.constant 0 : index
    %20 = vector.load %arg3[%c0_11, %c2, %c0_12, %c0_13] : memref<3x3x128x128xbf16, #tpu.memory_space<vmem>>, vector<1x1x128x128xbf16>
    %21 = vector.shape_cast %20 : vector<1x1x128x128xbf16> to vector<128x128xbf16>
    %cst_14 = arith.constant dense<0.000000e+00> : vector<256x128xf32>
    %22 = tpu.matmul %19, %21, %cst_14 {dimension_numbers = #tpu.dot_dimension_numbers<[1], [0], [0], [1], [0, 0, 1, 1], [], []>} : vector<256x128xbf16>, vector<128x128xbf16>, vector<256x128xf32> -> vector<256x128xf32>
    %23 = arith.addf %17, %22 : vector<256x128xf32>
    %24 = vector.extract_strided_slice %4 {offsets = [1, 0, 0], sizes = [16, 16, 128], strides = [1, 1, 1]} : vector<18x18x128xbf16> to vector<16x16x128xbf16>
    %25 = vector.shape_cast %24 : vector<16x16x128xbf16> to vector<256x128xbf16>
    %c1_15 = arith.constant 1 : index
    %c0_16 = arith.constant 0 : index
    %c0_17 = arith.constant 0 : index
    %c0_18 = arith.constant 0 : index
    %26 = vector.load %arg3[%c1_15, %c0_16, %c0_17, %c0_18] : memref<3x3x128x128xbf16, #tpu.memory_space<vmem>>, vector<1x1x128x128xbf16>
    %27 = vector.shape_cast %26 : vector<1x1x128x128xbf16> to vector<128x128xbf16>
    %cst_19 = arith.constant dense<0.000000e+00> : vector<256x128xf32>
    %28 = tpu.matmul %25, %27, %cst_19 {dimension_numbers = #tpu.dot_dimension_numbers<[1], [0], [0], [1], [0, 0, 1, 1], [], []>} : vector<256x128xbf16>, vector<128x128xbf16>, vector<256x128xf32> -> vector<256x128xf32>
    %29 = arith.addf %23, %28 : vector<256x128xf32>
    %30 = vector.extract_strided_slice %4 {offsets = [1, 1, 0], sizes = [16, 16, 128], strides = [1, 1, 1]} : vector<18x18x128xbf16> to vector<16x16x128xbf16>
    %31 = vector.shape_cast %30 : vector<16x16x128xbf16> to vector<256x128xbf16>
    %c1_20 = arith.constant 1 : index
    %c1_21 = arith.constant 1 : index
    %c0_22 = arith.constant 0 : index
    %c0_23 = arith.constant 0 : index
    %32 = vector.load %arg3[%c1_20, %c1_21, %c0_22, %c0_23] : memref<3x3x128x128xbf16, #tpu.memory_space<vmem>>, vector<1x1x128x128xbf16>
    %33 = vector.shape_cast %32 : vector<1x1x128x128xbf16> to vector<128x128xbf16>
    %cst_24 = arith.constant dense<0.000000e+00> : vector<256x128xf32>
    %34 = tpu.matmul %31, %33, %cst_24 {dimension_numbers = #tpu.dot_dimension_numbers<[1], [0], [0], [1], [0, 0, 1, 1], [], []>} : vector<256x128xbf16>, vector<128x128xbf16>, vector<256x128xf32> -> vector<256x128xf32>
    %35 = arith.addf %29, %34 : vector<256x128xf32>
    %36 = vector.extract_strided_slice %4 {offsets = [1, 2, 0], sizes = [16, 16, 128], strides = [1, 1, 1]} : vector<18x18x128xbf16> to vector<16x16x128xbf16>
    %37 = vector.shape_cast %36 : vector<16x16x128xbf16> to vector<256x128xbf16>
    %c1_25 = arith.constant 1 : index
    %c2_26 = arith.constant 2 : index
    %c0_27 = arith.constant 0 : index
    %c0_28 = arith.constant 0 : index
    %38 = vector.load %arg3[%c1_25, %c2_26, %c0_27, %c0_28] : memref<3x3x128x128xbf16, #tpu.memory_space<vmem>>, vector<1x1x128x128xbf16>
    %39 = vector.shape_cast %38 : vector<1x1x128x128xbf16> to vector<128x128xbf16>
    %cst_29 = arith.constant dense<0.000000e+00> : vector<256x128xf32>
    %40 = tpu.matmul %37, %39, %cst_29 {dimension_numbers = #tpu.dot_dimension_numbers<[1], [0], [0], [1], [0, 0, 1, 1], [], []>} : vector<256x128xbf16>, vector<128x128xbf16>, vector<256x128xf32> -> vector<256x128xf32>
    %41 = arith.addf %35, %40 : vector<256x128xf32>
    %42 = vector.extract_strided_slice %4 {offsets = [2, 0, 0], sizes = [16, 16, 128], strides = [1, 1, 1]} : vector<18x18x128xbf16> to vector<16x16x128xbf16>
    %43 = vector.shape_cast %42 : vector<16x16x128xbf16> to vector<256x128xbf16>
    %c2_30 = arith.constant 2 : index
    %c0_31 = arith.constant 0 : index
    %c0_32 = arith.constant 0 : index
    %c0_33 = arith.constant 0 : index
    %44 = vector.load %arg3[%c2_30, %c0_31, %c0_32, %c0_33] : memref<3x3x128x128xbf16, #tpu.memory_space<vmem>>, vector<1x1x128x128xbf16>
    %45 = vector.shape_cast %44 : vector<1x1x128x128xbf16> to vector<128x128xbf16>
    %cst_34 = arith.constant dense<0.000000e+00> : vector<256x128xf32>
    %46 = tpu.matmul %43, %45, %cst_34 {dimension_numbers = #tpu.dot_dimension_numbers<[1], [0], [0], [1], [0, 0, 1, 1], [], []>} : vector<256x128xbf16>, vector<128x128xbf16>, vector<256x128xf32> -> vector<256x128xf32>
    %47 = arith.addf %41, %46 : vector<256x128xf32>
    %48 = vector.extract_strided_slice %4 {offsets = [2, 1, 0], sizes = [16, 16, 128], strides = [1, 1, 1]} : vector<18x18x128xbf16> to vector<16x16x128xbf16>
    %49 = vector.shape_cast %48 : vector<16x16x128xbf16> to vector<256x128xbf16>
    %c2_35 = arith.constant 2 : index
    %c1_36 = arith.constant 1 : index
    %c0_37 = arith.constant 0 : index
    %c0_38 = arith.constant 0 : index
    %50 = vector.load %arg3[%c2_35, %c1_36, %c0_37, %c0_38] : memref<3x3x128x128xbf16, #tpu.memory_space<vmem>>, vector<1x1x128x128xbf16>
    %51 = vector.shape_cast %50 : vector<1x1x128x128xbf16> to vector<128x128xbf16>
    %cst_39 = arith.constant dense<0.000000e+00> : vector<256x128xf32>
    %52 = tpu.matmul %49, %51, %cst_39 {dimension_numbers = #tpu.dot_dimension_numbers<[1], [0], [0], [1], [0, 0, 1, 1], [], []>} : vector<256x128xbf16>, vector<128x128xbf16>, vector<256x128xf32> -> vector<256x128xf32>
    %53 = arith.addf %47, %52 : vector<256x128xf32>
    %54 = vector.extract_strided_slice %4 {offsets = [2, 2, 0], sizes = [16, 16, 128], strides = [1, 1, 1]} : vector<18x18x128xbf16> to vector<16x16x128xbf16>
    %55 = vector.shape_cast %54 : vector<16x16x128xbf16> to vector<256x128xbf16>
    %c2_40 = arith.constant 2 : index
    %c2_41 = arith.constant 2 : index
    %c0_42 = arith.constant 0 : index
    %c0_43 = arith.constant 0 : index
    %56 = vector.load %arg3[%c2_40, %c2_41, %c0_42, %c0_43] : memref<3x3x128x128xbf16, #tpu.memory_space<vmem>>, vector<1x1x128x128xbf16>
    %57 = vector.shape_cast %56 : vector<1x1x128x128xbf16> to vector<128x128xbf16>
    %cst_44 = arith.constant dense<0.000000e+00> : vector<256x128xf32>
    %58 = tpu.matmul %55, %57, %cst_44 {dimension_numbers = #tpu.dot_dimension_numbers<[1], [0], [0], [1], [0, 0, 1, 1], [], []>} : vector<256x128xbf16>, vector<128x128xbf16>, vector<256x128xf32> -> vector<256x128xf32>
    %59 = arith.addf %53, %58 : vector<256x128xf32>
    %c0_45 = arith.constant 0 : index
    %c0_46 = arith.constant 0 : index
    %60 = vector.load %arg4[%c0_45, %c0_46] : memref<1x128xf32, #tpu.memory_space<vmem>>, vector<1x128xf32>
    %61 = vector.broadcast %60 : vector<1x128xf32> to vector<256x128xf32>
    %62 = arith.addf %59, %61 : vector<256x128xf32>
    %cst_47 = arith.constant 0.000000e+00 : f32
    %63 = vector.broadcast %cst_47 : f32 to vector<256x128xf32>
    %64 = arith.maximumf %62, %63 : vector<256x128xf32>
    %c0_48 = arith.constant 0 : index
    %c0_49 = arith.constant 0 : index
    %65 = vector.load %arg5[%c0_48, %c0_49] : memref<1x128xf32, #tpu.memory_space<vmem>>, vector<1x128xf32>
    %66 = vector.broadcast %65 : vector<1x128xf32> to vector<256x128xf32>
    %67 = arith.mulf %64, %66 : vector<256x128xf32>
    %c0_50 = arith.constant 0 : index
    %c0_51 = arith.constant 0 : index
    %68 = vector.load %arg6[%c0_50, %c0_51] : memref<1x128xf32, #tpu.memory_space<vmem>>, vector<1x128xf32>
    %69 = vector.broadcast %68 : vector<1x128xf32> to vector<256x128xf32>
    %70 = arith.addf %67, %69 : vector<256x128xf32>
    %71 = vector.shape_cast %70 : vector<256x128xf32> to vector<16x16x128xf32>
    %c0_52 = arith.constant 0 : index
    %c0_53 = arith.constant 0 : index
    %c0_54 = arith.constant 0 : index
    %c0_55 = arith.constant 0 : index
    %72 = vector.load %arg7[%c0_52, %c0_53, %c0_54, %c0_55] : memref<1x16x16x128xf32, #tpu.memory_space<vmem>>, vector<1x16x16x128xf32>
    %73 = vector.shape_cast %72 : vector<1x16x16x128xf32> to vector<16x16x128xf32>
    %74 = vector.shape_cast %71 : vector<16x16x128xf32> to vector<1x16x16x128xf32>
    tpu.vector_store %arg7[%c0_52, %c0_53, %c0_54, %c0_55], %74 {strides = array<i32>} : memref<1x16x16x128xf32, #tpu.memory_space<vmem>>, vector<1x16x16x128xf32>,
    return
  }
  func.func @transform_0(%arg0: i32, %arg1: i32) -> (i32, i32, i32, i32) {
    %c0_i32 = arith.constant 0 : i32
    %c0_i32_0 = arith.constant 0 : i32
    %c0_i32_1 = arith.constant 0 : i32
    %c0_i32_2 = arith.constant 0 : i32
    return %arg0, %c0_i32, %c0_i32_0, %c0_i32_1 : i32, i32, i32, i32
  }
  func.func @transform_1(%arg0: i32, %arg1: i32) -> (i32, i32, i32, i32) {
    %c0_i32 = arith.constant 0 : i32
    %c0_i32_0 = arith.constant 0 : i32
    %c0_i32_1 = arith.constant 0 : i32
    %c0_i32_2 = arith.constant 0 : i32
    %c0_i32_3 = arith.constant 0 : i32
    return %c0_i32, %c0_i32_0, %c0_i32_1, %c0_i32_2 : i32, i32, i32, i32
  }
  func.func @transform_2(%arg0: i32, %arg1: i32) -> (i32, i32) {
    %c0_i32 = arith.constant 0 : i32
    %c0_i32_0 = arith.constant 0 : i32
    %c0_i32_1 = arith.constant 0 : i32
    return %c0_i32, %c0_i32_0 : i32, i32
  }
  func.func @transform_3(%arg0: i32, %arg1: i32) -> (i32, i32) {
    %c0_i32 = arith.constant 0 : i32
    %c0_i32_0 = arith.constant 0 : i32
    %c0_i32_1 = arith.constant 0 : i32
    return %c0_i32, %c0_i32_0 : i32, i32
  }
  func.func @transform_4(%arg0: i32, %arg1: i32) -> (i32, i32) {
    %c0_i32 = arith.constant 0 : i32
    %c0_i32_0 = arith.constant 0 : i32
    %c0_i32_1 = arith.constant 0 : i32
    return %c0_i32, %c0_i32_0 : i32, i32
  }
  func.func @transform_5(%arg0: i32, %arg1: i32) -> (i32, i32, i32, i32) {
    %c0_i32 = arith.constant 0 : i32
    %c0_i32_0 = arith.constant 0 : i32
    %c0_i32_1 = arith.constant 0 : i32
    return %arg0, %arg1, %c0_i32, %c0_i32_0 : i32, i32, i32, i32
  }
}

</mosaic_0001>

<bundles_post_ra>
// kernel: decode_stack_forward.3
= control target key start
LH: loop header
LB: loop body
LE: loop exit
PB: predicated region body
PF: predicated region fallthrough
CT: control target
= control target key end

     0   :  { %s1073_s12 = smov 0   ;;  %s1075_s13 = smov 0   ;;  %s1288_s0 = inlined_call_operand.vmem [shape: bf16[2,8,8,128], index: 0, kind: input, shape index: {}]   ;;  %s1289_s1 = inlined_call_operand.vmem [shape: bf16[2,128,256], index: 1, kind: input, shape index: {}]   ;;  %s1290_s2 = inlined_call_operand.vmem [shape: f32[1,256], index: 2, kind: input, shape index: {}]   ;;  %s1291_s3 = inlined_call_operand.vmem [shape: bf16[2,8,2,8,256], index: 3, kind: output, shape index: {}]  }
   0x1   :  { %s1077_s14 = smov 0  }
   0x2 LB: > { %s25_s15 = sadd.s32 1, %s1046_s13  ;;  %p850_p0 = scmp.ge.s32.totalorder %s1050_s14, 1  ;;  %s1050_s14 = sphi %s1077_s14, %s13_s14   ;;  %s1046_s13 = sphi %s1075_s13, %s1293_s13   ;;  %s1042_s12 = sphi %s1073_s12, %s1292_s12  }
   0x3   : > { %p27_p1 = scmp.ge.s32.totalorder %s25_s15, 2  ;;  %p158_p2 = scmp.lt.s32.totalorder %s1050_s14, 3 }
   0x5   : > { %s1295_s15 = smov (%p27_p1, %s25_s15), 0  ;;  %p159_p3 = pnand %p850_p0, %p158_p2 }
   0x6   : > { %p192_p4 = scmp.lt.s32.totalorder (!%p159_p3), %s1042_s12, 1 }
   0x7   : > { %162 = sbr.rel (%p159_p3) target bundleno = 274 (0x112), region = 32 }
   0xc   : > { %v976_v0 = vld [vmem:[%s1289_s1 + $0x74] ss:$8 sps:$4 sm:$0xff]   ;;  %v1052_v2 = vmov 0   ;;  %v980_v3 = vld [vmem:[%s1289_s1 + $0x70] ss:$8 sps:$4 sm:$0xff]   ;;  %s1297_s12 = smov (!%p192_p4, %s1042_s12), 1  ;;  %v239_v37 = vlaneseq }
   0xd   : > { %v978_v1 = vld [vmem:[%s1289_s1 + $0xf4] ss:$8 sps:$4 sm:$0xff]   ;;  %385 = vmatprep.mubr.bf16.mxu0 %v1052_v2  ;;  %639 = vmatprep.mubr.bf16.mxu1 %v1052_v2  ;;  %v981_v4 = vld [vmem:[%s1289_s1 + $0xf0] ss:$8 sps:$4 sm:$0xff]   ;;  %v982_v5 = vld [vmem:[%s1289_s1 + $0x64] ss:$8 sps:$4 sm:$0xff]  }
   0xe   : > { %353 = vmatprep.subr.bf16.mxu0 %v976_v0  ;;  %607 = vmatprep.subr.bf16.mxu1 %v978_v1  ;;  %v984_v6 = vld [vmem:[%s1289_s1 + $0xe4] ss:$8 sps:$4 sm:$0xff]   ;;  %v986_v7 = vld [vmem:[%s1289_s1 + $0x60] ss:$8 sps:$4 sm:$0xff]   ;;  %v988_v9 = vld [vmem:[%s1289_s1 + $0x54] ss:$8 sps:$4 sm:$0xff]  }
   0xf   : > { %354 = vmatpush1.bf16.msra.mxu0 %v980_v3  ;;  %608 = vmatpush1.bf16.msra.mxu1 %v981_v4  ;;  %v987_v8 = vld [vmem:[%s1289_s1 + $0xe0] ss:$8 sps:$4 sm:$0xff]   ;;  %v990_v10 = vld [vmem:[%s1289_s1 + $0xd4] ss:$8 sps:$4 sm:$0xff]   ;;  %v992_v11 = vld [vmem:[%s1289_s1 + $0x50] ss:$8 sps:$4 sm:$0xff]  }
  0x10   : > { %355 = vmatprep.subr.bf16.mxu0 %v982_v5  ;;  %609 = vmatprep.subr.bf16.mxu1 %v984_v6  ;;  %v993_v12 = vld [vmem:[%s1289_s1 + $0xd0] ss:$8 sps:$4 sm:$0xff]   ;;  %v994_v13 = vld [vmem:[%s1289_s1 + $0x44] ss:$8 sps:$4 sm:$0xff]   ;;  %v998_v15 = vld [vmem:[%s1289_s1 + $0x40] ss:$8 sps:$4 sm:$0xff]  }
  0x11   : > { %v996_v14 = vld [vmem:[%s1289_s1 + $0xc4] ss:$8 sps:$4 sm:$0xff]   ;;  %v999_v16 = vld [vmem:[%s1289_s1 + $0xc0] ss:$8 sps:$4 sm:$0xff]   ;;  %v1000_v17 = vld [vmem:[%s1289_s1 + $0x34] ss:$8 sps:$4 sm:$0xff]  }
  0x12   : > { %v1002_v18 = vld [vmem:[%s1289_s1 + $0xb4] ss:$8 sps:$4 sm:$0xff]   ;;  %v1004_v19 = vld [vmem:[%s1289_s1 + $0x30] ss:$8 sps:$4 sm:$0xff]   ;;  %v1006_v21 = vld [vmem:[%s1289_s1 + $0x24] ss:$8 sps:$4 sm:$0xff]  }
  0x13   : > { %356 = vmatpush1.bf16.msra.mxu0 %v986_v7  ;;  %610 = vmatpush1.bf16.msra.mxu1 %v987_v8  ;;  %v1005_v20 = vld [vmem:[%s1289_s1 + $0xb0] ss:$8 sps:$4 sm:$0xff]   ;;  %v1008_v22 = vld [vmem:[%s1289_s1 + $0xa4] ss:$8 sps:$4 sm:$0xff]   ;;  %s933_s10 = sshll.u32 %s1297_s12, 5  ;;  %v240_v38 = vshrl.u32 %v239_v37, 7 }
  0x14   : > { %357 = vmatprep.subr.bf16.mxu0 %v988_v9  ;;  %611 = vmatprep.subr.bf16.mxu1 %v990_v10  ;;  %v1010_v23 = vld [vmem:[%s1289_s1 + $0x20] ss:$8 sps:$4 sm:$0xff]   ;;  %v1012_v25 = vld [vmem:[%s1289_s1 + $0x14] ss:$8 sps:$4 sm:$0xff]   ;;  %s1178_s23 = scalar_lea.vmem %s1288_s0, %s933_s10  ;;  %v1016_v27 = vld [vmem:[%s1289_s1 + $0x10] ss:$8 sps:$4 sm:$0xff]  }
  0x15   : > { %v1011_v24 = vld [vmem:[%s1289_s1 + $0xa0] ss:$8 sps:$4 sm:$0xff]   ;;  %v1014_v26 = vld [vmem:[%s1289_s1 + $0x94] ss:$8 sps:$4 sm:$0xff]   ;;  %v1017_v28 = vld [vmem:[%s1289_s1 + $0x90] ss:$8 sps:$4 sm:$0xff]  }
  0x16   : > { %v1018_v29 = vld [vmem:[%s1289_s1 + $0x4] ss:$8 sps:$4 sm:$0xff]   ;;  %v1022_v31 = vld [vmem:[%s1289_s1] ss:$8 sps:$4 sm:$0xff]   ;;  %v1026_v35 = vld [vmem:[%s1178_s23 + $0x10] sm:$0xff]   ;;  %v241_v39 = vsub.s32 0, %v240_v38 }
  0x17   : > { %358 = vmatpush1.bf16.msra.mxu0 %v992_v11  ;;  %612 = vmatpush1.bf16.msra.mxu1 %v993_v12  ;;  %v1020_v30 = vld [vmem:[%s1289_s1 + $0x84] ss:$8 sps:$4 sm:$0xff]   ;;  %v1023_v32 = vld [vmem:[%s1289_s1 + $0x80] ss:$8 sps:$4 sm:$0xff]   ;;  %v1027_v36 = vld [vmem:[%s1178_s23 + $0x18] sm:$0xff]   ;;  %v245_v40 = vsub.s32 1, %v240_v38 }
  0x18   : > { %359 = vmatprep.subr.bf16.mxu0 %v994_v13  ;;  %613 = vmatprep.subr.bf16.mxu1 %v996_v14  ;;  %v1024_v33 = vld [vmem:[%s1178_s23] sm:$0xff]   ;;  %v1025_v34 = vld [vmem:[%s1178_s23 + $0x8] sm:$0xff]   ;;  %s934_s19 = sshll.u32 %s1297_s12, 7 }
  0x19   : > { %v237_v41 = vld [vmem:[%s1290_s2] sm:$0x3]  ;;  %s1233_s22 = scalar_lea.vmem %s1291_s3, %s934_s19 }
  0x1a   : > { %v515_v42 = vld [vmem:[%s1290_s2] sm:$0x3]  ;;  %v1217_v43 = vrot.slane %v237_v41, %v241_v39  ;;  %v1221_v45 = vrot.slane %v237_v41, %v245_v40 }
  0x1b   : > { %360 = vmatpush1.bf16.msra.mxu0 %v998_v15  ;;  %614 = vmatpush1.bf16.msra.mxu1 %v999_v16  ;;  %v1219_v44 = vrot.slane %v515_v42, %v241_v39  ;;  %v1223_v46 = vrot.slane %v515_v42, %v245_v40 }
  0x1c   : > { %361 = vmatprep.subr.bf16.mxu0 %v1000_v17  ;;  %615 = vmatprep.subr.bf16.mxu1 %v1002_v18 }
  0x1f   : > { %362 = vmatpush1.bf16.msra.mxu0 %v1004_v19  ;;  %616 = vmatpush1.bf16.msra.mxu1 %v1005_v20 }
  0x20   : > { %363 = vmatprep.subr.bf16.mxu0 %v1006_v21  ;;  %617 = vmatprep.subr.bf16.mxu1 %v1008_v22 }
  0x23   : > { %364 = vmatpush1.bf16.msra.mxu0 %v1010_v23  ;;  %618 = vmatpush1.bf16.msra.mxu1 %v1011_v24 }
  0x24   : > { %365 = vmatprep.subr.bf16.mxu0 %v1012_v25  ;;  %619 = vmatprep.subr.bf16.mxu1 %v1014_v26 }
  0x27   : > { %366 = vmatpush1.bf16.msra.mxu0 %v1016_v27  ;;  %620 = vmatpush1.bf16.msra.mxu1 %v1017_v28 }
  0x28   : > { %367 = vmatprep.subr.bf16.mxu0 %v1018_v29  ;;  %621 = vmatprep.subr.bf16.mxu1 %v1020_v30 }
  0x2b   : > { %368 = vmatpush1.bf16.msra.mxu0 %v1022_v31  ;;  %622 = vmatpush1.bf16.msra.mxu1 %v1023_v32 }
  0x2e   : > { %386 = vmatmul.mubr.bf16.vlgmr.msra.gmra.mxu0 %v1024_v33  ;;  %640 = vmatmul.mubr.bf16.vlgmr.msra.gmra.mxu1 %v1024_v33 }
  0x2f   : > { %395 = vmatprep.mubr.bf16.mxu0 %v1052_v2  ;;  %649 = vmatprep.mubr.bf16.mxu1 %v1052_v2 }
  0x36   : > { %396 = vmatmul.mubr.bf16.gmra.mxu0 %v1025_v34  ;;  %650 = vmatmul.mubr.bf16.gmra.mxu1 %v1025_v34 }
  0x37   : > { %405 = vmatprep.mubr.bf16.mxu0 %v1052_v2  ;;  %659 = vmatprep.mubr.bf16.mxu1 %v1052_v2 }
  0x3e   : > { %406 = vmatmul.mubr.bf16.gmra.mxu0 %v1026_v35  ;;  %660 = vmatmul.mubr.bf16.gmra.mxu1 %v1026_v35 }
  0x3f   : > { %415 = vmatprep.mubr.bf16.mxu0 %v1052_v2  ;;  %669 = vmatprep.mubr.bf16.mxu1 %v1052_v2 }
  0x46   : > { %416 = vmatmul.mubr.bf16.gmra.mxu0 %v1027_v36  ;;  %670 = vmatmul.mubr.bf16.gmra.mxu1 %v1027_v36 }
  0xee   : > { %v387_v47 = vpop.f32.mrf.mxu0  ;;  %v641_v48 = vpop.f32.mrf.mxu1 }
  0xef   : > { %v388_v51 = vadd.f32 %v387_v47, %v1217_v43  ;;  %v642_v52 = vadd.f32 %v641_v48, %v1219_v44 }
  0xf0   : > { %v389_v49 = vpop.f32.mrf.mxu0  ;;  %v643_v50 = vpop.f32.mrf.mxu1 }
  0xf1   : > { %v390_v53 = vadd.f32 %v389_v49, %v1221_v45  ;;  %v644_v54 = vadd.f32 %v643_v50, %v1223_v46 }
  0xf2   : > { %v391_v55 = vpop.f32.mrf.mxu0  ;;  %v645_v56 = vpop.f32.mrf.mxu1 }
  0xf3   : > { %v935_v57 = vpack.c.bf16 %v390_v53, %v388_v51  ;;  %v943_v58 = vpack.c.bf16 %v644_v54, %v642_v52  ;;  %v392_v61 = vadd.f32 %v391_v55, %v1217_v43  ;;  %v646_v62 = vadd.f32 %v645_v56, %v1219_v44 }
  0xf4   : > { %v393_v59 = vpop.f32.mrf.mxu0  ;;  %v647_v60 = vpop.f32.mrf.mxu1 }
  0xf5   : > { %490 = vst [vmem:[%s1233_s22] sm:$0xff] %v935_v57  ;;  %923 = vst [vmem:[%s1233_s22 + $0x8] sm:$0xff] %v943_v58  ;;  %v394_v63 = vadd.f32 %v393_v59, %v1221_v45  ;;  %v648_v0 = vadd.f32 %v647_v60, %v1223_v46 }
  0xf6   : > { %v397_v1 = vpop.f32.mrf.mxu0  ;;  %v651_v2 = vpop.f32.mrf.mxu1 }
  0xf7   : > { %v936_v3 = vpack.c.bf16 %v394_v63, %v392_v61  ;;  %v944_v4 = vpack.c.bf16 %v648_v0, %v646_v62  ;;  %v398_v7 = vadd.f32 %v397_v1, %v1217_v43  ;;  %v652_v8 = vadd.f32 %v651_v2, %v1219_v44 }
  0xf8   : > { %v399_v5 = vpop.f32.mrf.mxu0  ;;  %v653_v6 = vpop.f32.mrf.mxu1 }
  0xf9   : > { %491 = vst [vmem:[%s1233_s22 + $0x10] sm:$0xff] %v936_v3  ;;  %924 = vst [vmem:[%s1233_s22 + $0x18] sm:$0xff] %v944_v4  ;;  %v400_v9 = vadd.f32 %v399_v5, %v1221_v45  ;;  %v654_v10 = vadd.f32 %v653_v6, %v1223_v46 }
  0xfa   : > { %v401_v11 = vpop.f32.mrf.mxu0  ;;  %v655_v12 = vpop.f32.mrf.mxu1 }
  0xfb   : > { %v937_v13 = vpack.c.bf16 %v400_v9, %v398_v7  ;;  %v945_v14 = vpack.c.bf16 %v654_v10, %v652_v8  ;;  %v402_v17 = vadd.f32 %v401_v11, %v1217_v43  ;;  %v656_v18 = vadd.f32 %v655_v12, %v1219_v44 }
  0xfc   : > { %v403_v15 = vpop.f32.mrf.mxu0  ;;  %v657_v16 = vpop.f32.mrf.mxu1 }
  0xfd   : > { %492 = vst [vmem:[%s1233_s22 + $0x20] sm:$0xff] %v937_v13  ;;  %925 = vst [vmem:[%s1233_s22 + $0x28] sm:$0xff] %v945_v14  ;;  %v404_v19 = vadd.f32 %v403_v15, %v1221_v45  ;;  %v658_v20 = vadd.f32 %v657_v16, %v1223_v46 }
  0xfe   : > { %v407_v21 = vpop.f32.mrf.mxu0  ;;  %v661_v22 = vpop.f32.mrf.mxu1 }
  0xff   : > { %v938_v23 = vpack.c.bf16 %v404_v19, %v402_v17  ;;  %v946_v24 = vpack.c.bf16 %v658_v20, %v656_v18  ;;  %v408_v27 = vadd.f32 %v407_v21, %v1217_v43  ;;  %v662_v28 = vadd.f32 %v661_v22, %v1219_v44 }
 0x100   : > { %v409_v25 = vpop.f32.mrf.mxu0  ;;  %v663_v26 = vpop.f32.mrf.mxu1 }
 0x101   : > { %493 = vst [vmem:[%s1233_s22 + $0x30] sm:$0xff] %v938_v23  ;;  %926 = vst [vmem:[%s1233_s22 + $0x38] sm:$0xff] %v946_v24  ;;  %v410_v29 = vadd.f32 %v409_v25, %v1221_v45  ;;  %v664_v30 = vadd.f32 %v663_v26, %v1223_v46 }
 0x102   : > { %v411_v31 = vpop.f32.mrf.mxu0  ;;  %v665_v32 = vpop.f32.mrf.mxu1 }
 0x103   : > { %v939_v33 = vpack.c.bf16 %v410_v29, %v408_v27  ;;  %v947_v34 = vpack.c.bf16 %v664_v30, %v662_v28  ;;  %v412_v37 = vadd.f32 %v411_v31, %v1217_v43  ;;  %v666_v38 = vadd.f32 %v665_v32, %v1219_v44 }
 0x104   : > { %v413_v35 = vpop.f32.mrf.mxu0  ;;  %v667_v36 = vpop.f32.mrf.mxu1 }
 0x105   : > { %494 = vst [vmem:[%s1233_s22 + $0x40] sm:$0xff] %v939_v33  ;;  %927 = vst [vmem:[%s1233_s22 + $0x48] sm:$0xff] %v947_v34  ;;  %v414_v39 = vadd.f32 %v413_v35, %v1221_v45  ;;  %v668_v40 = vadd.f32 %v667_v36, %v1223_v46 }
 0x106   : > { %v417_v41 = vpop.f32.mrf.mxu0  ;;  %v671_v42 = vpop.f32.mrf.mxu1 }
 0x107   : > { %v940_v47 = vpack.c.bf16 %v414_v39, %v412_v37  ;;  %v948_v48 = vpack.c.bf16 %v668_v40, %v666_v38  ;;  %v418_v51 = vadd.f32 %v417_v41, %v1217_v43  ;;  %v672_v52 = vadd.f32 %v671_v42, %v1219_v44 }
 0x108   : > { %v419_v49 = vpop.f32.mrf.mxu0  ;;  %v673_v50 = vpop.f32.mrf.mxu1 }
 0x109   : > { %495 = vst [vmem:[%s1233_s22 + $0x50] sm:$0xff] %v940_v47  ;;  %928 = vst [vmem:[%s1233_s22 + $0x58] sm:$0xff] %v948_v48  ;;  %v420_v53 = vadd.f32 %v419_v49, %v1221_v45  ;;  %v674_v54 = vadd.f32 %v673_v50, %v1223_v46 }
 0x10a   : > { %v421_v55 = vpop.f32.mrf.mxu0  ;;  %v675_v56 = vpop.f32.mrf.mxu1 }
 0x10b   : > { %v941_v57 = vpack.c.bf16 %v420_v53, %v418_v51  ;;  %v949_v58 = vpack.c.bf16 %v674_v54, %v672_v52  ;;  %v422_v61 = vadd.f32 %v421_v55, %v1217_v43  ;;  %v676_v62 = vadd.f32 %v675_v56, %v1219_v44 }
 0x10c   : > { %v423_v59 = vpop.f32.mrf.mxu0  ;;  %v677_v60 = vpop.f32.mrf.mxu1 }
 0x10d   : > { %496 = vst [vmem:[%s1233_s22 + $0x60] sm:$0xff] %v941_v57  ;;  %929 = vst [vmem:[%s1233_s22 + $0x68] sm:$0xff] %v949_v58  ;;  %v424_v63 = vadd.f32 %v423_v59, %v1221_v45  ;;  %v678_v0 = vadd.f32 %v677_v60, %v1223_v46 }
 0x10f   : > { %v942_v1 = vpack.c.bf16 %v424_v63, %v422_v61  ;;  %v950_v2 = vpack.c.bf16 %v678_v0, %v676_v62 }
 0x111   : > { %497 = vst [vmem:[%s1233_s22 + $0x70] sm:$0xff] %v942_v1  ;;  %930 = vst [vmem:[%s1233_s22 + $0x78] sm:$0xff] %v950_v2 }
 0x112 PF: > { %s13_s14 = sadd.s32 1, %s1050_s14   ;;  %s1292_s12 = smov %s1046_s13 }
 0x113   : > { %p10_p5 = scmp.ge.s32.totalorder %s13_s14, 4   ;;  %s1293_s13 = smov %s1295_s15 }
 0x115   :  { %12 = sbr.rel (!%p10_p5) target bundleno = 2 (0x2), region = 64 }

// kernel: decode_stack_forward.4
= control target key start
LH: loop header
LB: loop body
LE: loop exit
PB: predicated region body
PF: predicated region fallthrough
CT: control target
= control target key end

     0   :  { %s6628_s21 = smov 0   ;;  %s6630_s22 = smov 0   ;;  %s8478_s0 = inlined_call_operand.vmem [shape: bf16[2,18,18,128], index: 0, kind: input, shape index: {}]   ;;  %s8479_s1 = inlined_call_operand.vmem [shape: bf16[2,18,18,128], index: 1, kind: input, shape index: {}]   ;;  %s8480_s2 = inlined_call_operand.vmem [shape: bf16[3,3,256,128], index: 2, kind: input, shape index: {}]   ;;  %s8481_s3 = inlined_call_operand.vmem [shape: f32[1,128], index: 3, kind: input, shape index: {}]   ;;  %s8482_s4 = inlined_call_operand.vmem [shape: f32[1,128], index: 4, kind: input, shape index: {}]   ;;  %s8483_s5 = inlined_call_operand.vmem [shape: f32[1,128], index: 5, kind: input, shape index: {}]   ;;  %s8484_s6 = inlined_call_operand.vmem [shape: bf16[2,16,16,128], index: 6, kind: output, shape index: {}]  }
   0x1   :  { %s6632_s23 = smov 0  }
   0x2 LB: > { %s28_s24 = sadd.s32 1, %s6587_s22  ;;  %p4599_p0 = scmp.ge.s32.totalorder %s6591_s23, 1  ;;  %s6591_s23 = sphi %s6632_s23, %s16_s23   ;;  %s6587_s22 = sphi %s6630_s22, %s8767_s22   ;;  %s6583_s21 = sphi %s6628_s21, %s8766_s21  }
   0x3   : > { %p30_p1 = scmp.ge.s32.totalorder %s28_s24, 2  ;;  %p236_p2 = scmp.lt.s32.totalorder %s6591_s23, 3 }
   0x5   : > { %s8769_s24 = smov (%p30_p1, %s28_s24), 0  ;;  %p237_p3 = pnand %p4599_p0, %p236_p2 }
   0x7   : > { %240 = sbr.rel (%p237_p3) target bundleno = 859 (0x35b), region = 44 }
   0xc   : > { %v6290_v0 = vld [vmem:[%s8480_s2 + $0xf8] sm:$0xff]   ;;  %v6292_v2 = vld [vmem:[%s8480_s2 + $0xf0] sm:$0xff]   ;;  %p276_p4 = scmp.lt.s32.totalorder %s6583_s21, 1  ;;  %v6294_v4 = vld [vmem:[%s8480_s2 + $0xe8] sm:$0xff]   ;;  %vm768_vm0 = vsmask.f32 7424 }
   0xd   : > { %v6291_v1 = vld [vmem:[%s8480_s2 + $0xb8] sm:$0xff]   ;;  %5241 = vmatprep.subr.bf16.mxu0 %v6290_v0  ;;  %6249 = vmatprep.subr.bf16.mxu1 %v6290_v0  ;;  %v6293_v3 = vld [vmem:[%s8480_s2 + $0xb0] sm:$0xff]   ;;  %v6295_v5 = vld [vmem:[%s8480_s2 + $0xa8] sm:$0xff]   ;;  %vm1732_vm1 = vcmask 1046528  }
   0xe   : > { %5242 = vmatpush3.bf16.msra.mxu0 %v6291_v1  ;;  %6257 = vmatpush3.bf16.msra.mxu1 %v6291_v1  ;;  %s8771_s21 = smov (!%p276_p4, %s6583_s21), 1  ;;  %v6296_v6 = vld [vmem:[%s8480_s2 + $0xe0] sm:$0xff]   ;;  %v6298_v8 = vld [vmem:[%s8480_s2 + $0xd8] sm:$0xff]   ;;  %v6300_v10 = vld [vmem:[%s8480_s2 + $0xd0] sm:$0xff]  }
   0xf   : > { %5243 = vmatprep.subr.bf16.mxu0 %v6292_v2  ;;  %6250 = vmatprep.subr.bf16.mxu1 %v6292_v2  ;;  %s6265_s15 = smul.u32 216, %s8771_s21  ;;  %v6297_v7 = vld [vmem:[%s8480_s2 + $0xa0] sm:$0xff]   ;;  %v6299_v9 = vld [vmem:[%s8480_s2 + $0x98] sm:$0xff]   ;;  %v6301_v11 = vld [vmem:[%s8480_s2 + $0x90] sm:$0xff]   ;;  %s5113_s9 = sshll.u32 %s8771_s21, 7 }
  0x10   : > { %v6302_v14 = vld [vmem:[%s8480_s2 + $0xc8] sm:$0xff]   ;;  %v6304_v33 = vld [vmem:[%s8480_s2 + $0xc0] sm:$0xff]   ;;  %v6314_v44 = vld [vmem:[%s8480_s2 + $0x78] sm:$0xff]   ;;  %s8334_s21 = scalar_lea.vmem %s8484_s6, %s5113_s9 }
  0x11   : > { %s6682_s28 = scalar_lea.vmem %s8479_s1, %s6265_s15  ;;  %s6699_s11 = scalar_lea.vmem %s8478_s0, %s6265_s15  ;;  %v6303_v21 = vld [vmem:[%s8480_s2 + $0x88] sm:$0xff]   ;;  %v6305_v37 = vld [vmem:[%s8480_s2 + $0x80] sm:$0xff]   ;;  %v6316_v45 = vld [vmem:[%s8480_s2 + $0x178] sm:$0xff]  }
  0x12   : > { %5244 = vmatpush3.bf16.msra.mxu0 %v6293_v3  ;;  %6258 = vmatpush3.bf16.msra.mxu1 %v6293_v3  ;;  %v6691_v12 = vld [vmem:[%s6682_s28] sm:$0xff]   ;;  %v6694_v13 = vld [vmem:[%s6682_s28 + $0x8] ss:$0 sps:$4 sm:$0x11]   ;;  %v6315_v52 = vld [vmem:[%s8480_s2 + $0x38] sm:$0xff]  }
  0x13   : > { %5245 = vmatprep.subr.bf16.mxu0 %v6294_v4  ;;  %6251 = vmatprep.subr.bf16.mxu1 %v6294_v4  ;;  %v782_v15 = vshrl.u32 %v6691_v12, 16  ;;  %v784_v16 = vshll.u32 %v6691_v12, 16  ;;  %v789_v17 = vshll.u32 %v6694_v13, 16  ;;  %v6308_v18 = vld [vmem:[%s6682_s28 + $0x60] sm:$0xff]   ;;  %v6317_v53 = vld [vmem:[%s8480_s2 + $0x138] sm:$0xff]   ;;  %v6744_v54 = vld [vmem:[%s6682_s28 + $0xc] sm:$0xff]  }
  0x14   : > { %v6309_v19 = vld [vmem:[%s6682_s28 + $0x68] ss:$0 sps:$4 sm:$0x11]   ;;  %v6710_v20 = vld [vmem:[%s6699_s11] sm:$0xff]   ;;  %v974_v24 = vshrl.u32 %v6308_v18, 16  ;;  %v976_v25 = vshll.u32 %v6308_v18, 16 }
  0x15   : > { %v786_v22 = vrot.slane %v784_v16, 1  ;;  %v791_v23 = vrot.slane %v789_v17, 1  ;;  %v981_v26 = vshll.u32 %v6309_v19, 16  ;;  %v6311_v27 = vld [vmem:[%s6699_s11 + $0x8] ss:$0 sps:$4 sm:$0x11]  }
  0x16   : > { %5246 = vmatpush3.bf16.msra.mxu0 %v6295_v5  ;;  %6259 = vmatpush3.bf16.msra.mxu1 %v6295_v5  ;;  %v770_v28 = vshrl.u32 %v6710_v20, 16  ;;  %v772_v29 = vshll.u32 %v6710_v20, 16  ;;  %v978_v31 = vrot.slane %v976_v25, 1  ;;  %v6312_v32 = vld [vmem:[%s6699_s11 + $0x60] sm:$0xff]   ;;  %v777_v36 = vshll.u32 %v6311_v27, 16  ;;  %v6320_v58 = vld [vmem:[%s6682_s28 + $0x6c] sm:$0xff]  }
  0x17   : > { %5247 = vmatprep.subr.bf16.mxu0 %v6296_v6  ;;  %6252 = vmatprep.subr.bf16.mxu1 %v6296_v6  ;;  %v787_v30 = vor.u32 %v786_v22, %v782_v15  ;;  %v983_v34 = vrot.slane %v981_v26, 1  ;;  %v6313_v40 = vld [vmem:[%s6699_s11 + $0x68] ss:$0 sps:$4 sm:$0x11]   ;;  %v962_v41 = vshrl.u32 %v6312_v32, 16  ;;  %v964_v42 = vshll.u32 %v6312_v32, 16 }
  0x18   : > { %v774_v35 = vrot.slane %v772_v29, 1  ;;  %v979_v39 = vor.u32 %v978_v31, %v974_v24  ;;  %v779_v43 = vrot.slane %v777_v36, 1  ;;  %v969_v49 = vshll.u32 %v6313_v40, 16  ;;  %v6751_v57 = vld [vmem:[%s6682_s28 + $0x14] ss:$0 sps:$4 sm:$0x11]  }
  0x19   : > { %v792_v38 = vsel %vm768_vm0, %v787_v30, %v791_v23  ;;  %v966_v48 = vrot.slane %v964_v42, 1  ;;  %v806_v59 = vshrl.u32 %v6744_v54, 16  ;;  %v808_v60 = vshll.u32 %v6744_v54, 16  ;;  %v6321_v62 = vld [vmem:[%s6682_s28 + $0x74] ss:$0 sps:$4 sm:$0x11]  }
  0x1a   : > { %5248 = vmatpush3.bf16.msra.mxu0 %v6297_v7  ;;  %6260 = vmatpush3.bf16.msra.mxu1 %v6297_v7  ;;  %v6734_v46 = vsel %vm768_vm0, %v979_v39, %v983_v34  ;;  %v775_v47 = vor.u32 %v774_v35, %v770_v28  ;;  %v971_v51 = vrot.slane %v969_v49, 1  ;;  %v813_v61 = vshll.u32 %v6751_v57, 16  ;;  %v6760_v2 = vld [vmem:[%s6699_s11 + $0xc] sm:$0xff]   ;;  %v6325_v24 = vld [vmem:[%s6699_s11 + $0x74] ss:$0 sps:$4 sm:$0x11]  }
  0x1b   : > { %5249 = vmatprep.subr.bf16.mxu0 %v6298_v8  ;;  %6253 = vmatprep.subr.bf16.mxu1 %v6298_v8  ;;  %8581 = vst [vmem:[#allocation2_spill] sm:$0xff] %v6734_v46  ;;  %v967_v50 = vor.u32 %v966_v48, %v962_v41  ;;  %v998_v63 = vshrl.u32 %v6320_v58, 16  ;;  %v1000_v0 = vshll.u32 %v6320_v58, 16  ;;  %v810_v1 = vrot.slane %v808_v60, 1  ;;  %v6324_v6 = vld [vmem:[%s6699_s11 + $0x6c] sm:$0xff]   ;;  %v6795_v34 = vld [vmem:[%s6682_s28 + $0x18] sm:$0xff]  }
  0x1c   : > { %1346 = vmatprep.mubr.bf16.mxu0 %v792_v38  ;;  %1410 = vmatprep.mubr.bf16.mxu1 %v6734_v46  ;;  %v780_v55 = vsel %vm768_vm0, %v775_v47, %v779_v43  ;;  %v815_v3 = vrot.slane %v813_v61, 1  ;;  %v1005_v5 = vshll.u32 %v6321_v62, 16  ;;  %v6764_v8 = vld [vmem:[%s6699_s11 + $0x14] ss:$0 sps:$4 sm:$0x11]   ;;  %v986_v16 = vshrl.u32 %v6324_v6, 16 }
  0x1d   : > { %v6748_v56 = vsel %vm768_vm0, %v967_v50, %v971_v51  ;;  %v1002_v4 = vrot.slane %v1000_v0, 1  ;;  %v811_v7 = vor.u32 %v810_v1, %v806_v59  ;;  %v801_v19 = vshll.u32 %v6764_v8, 16  ;;  %v6327_v22 = vld [vmem:[%s8480_s2 + $0x30] sm:$0xff]   ;;  %v6798_v35 = vld [vmem:[%s6682_s28 + $0x20] ss:$0 sps:$4 sm:$0x11]  }
  0x1e   : > { %5250 = vmatpush3.bf16.msra.mxu0 %v6299_v9  ;;  %6261 = vmatpush3.bf16.msra.mxu1 %v6299_v9  ;;  %8582 = vst [vmem:[#allocation3_spill] sm:$0xff] %v6748_v56  ;;  %v794_v9 = vshrl.u32 %v6760_v2, 16  ;;  %v1007_v15 = vrot.slane %v1005_v5, 1  ;;  %v6328_v25 = vld [vmem:[%s8480_s2 + $0x170] sm:$0xff]   ;;  %v993_v29 = vshll.u32 %v6325_v24, 16  ;;  %v6332_v36 = vld [vmem:[%s6682_s28 + $0x78] sm:$0xff]  }
  0x1f   : > { %5251 = vmatprep.subr.bf16.mxu0 %v6300_v10  ;;  %6254 = vmatprep.subr.bf16.mxu1 %v6300_v10  ;;  %v796_v10 = vshll.u32 %v6760_v2, 16  ;;  %v6772_v17 = vsel %vm768_vm0, %v811_v7, %v815_v3  ;;  %v803_v27 = vrot.slane %v801_v19, 1  ;;  %v6329_v30 = vld [vmem:[%s8480_s2 + $0x130] sm:$0xff]   ;;  %v830_v38 = vshrl.u32 %v6795_v34, 16  ;;  %v6336_v58 = vld [vmem:[%s6699_s11 + $0x78] sm:$0xff]   ;;  %v6338_v3 = vld [vmem:[%s8480_s2 + $0x68] sm:$0xff]  }
  0x20   : > { %v832_v39 = vshll.u32 %v6795_v34, 16  ;;  %v837_v40 = vshll.u32 %v6798_v35, 16  ;;  %v6333_v41 = vld [vmem:[%s6682_s28 + $0x80] ss:$0 sps:$4 sm:$0x11]   ;;  %v1022_v43 = vshrl.u32 %v6332_v36, 16 }
  0x21   : > { %v798_v18 = vrot.slane %v796_v10, 1  ;;  %v1029_v48 = vshll.u32 %v6333_v41, 16  ;;  %v6813_v51 = vld [vmem:[%s6699_s11 + $0x20] ss:$0 sps:$4 sm:$0x11]   ;;  %v1010_v0 = vshrl.u32 %v6336_v58, 16 }
  0x22   : > { %5252 = vmatpush3.bf16.msra.mxu0 %v6301_v11  ;;  %6262 = vmatpush3.bf16.msra.mxu1 %v6301_v11  ;;  %v6326_v11 = vld [vmem:[%s8480_s2 + $0x70] sm:$0xff]   ;;  %v834_v42 = vrot.slane %v832_v39, 1  ;;  %v839_v47 = vrot.slane %v837_v40, 1  ;;  %v825_v62 = vshll.u32 %v6813_v51, 16  ;;  %v1012_v1 = vshll.u32 %v6336_v58, 16  ;;  %v6339_v7 = vld [vmem:[%s8480_s2 + $0x28] sm:$0xff]  }
  0x23   : > { %5253 = vmatprep.subr.bf16.mxu0 %v6302_v14  ;;  %6255 = vmatprep.subr.bf16.mxu1 %v6302_v14  ;;  %v1003_v14 = vor.u32 %v1002_v4, %v998_v63  ;;  %v799_v26 = vor.u32 %v798_v18, %v794_v9  ;;  %v6337_v63 = vld [vmem:[%s6699_s11 + $0x80] ss:$0 sps:$4 sm:$0x11]   ;;  %v6341_v18 = vld [vmem:[%s8480_s2 + $0x128] sm:$0xff]  }
  0x24   : > { %v835_v49 = vor.u32 %v834_v42, %v830_v38  ;;  %v1014_v9 = vrot.slane %v1012_v1, 1  ;;  %v1017_v10 = vshll.u32 %v6337_v63, 16  ;;  %v6845_v19 = vld [vmem:[%s6682_s28 + $0x24] sm:$0xff]   ;;  %v6864_v42 = vld [vmem:[%s6699_s11 + $0x2c] ss:$0 sps:$4 sm:$0x11]  }
  0x25   : > { %v6780_v23 = vsel %vm768_vm0, %v1003_v14, %v1007_v15  ;;  %v6791_v31 = vsel %vm768_vm0, %v799_v26, %v803_v27  ;;  %v6340_v14 = vld [vmem:[%s8480_s2 + $0x168] sm:$0xff]   ;;  %v856_v26 = vshll.u32 %v6845_v19, 16  ;;  %v6352_v63 = vld [vmem:[%s8480_s2 + $0x160] sm:$0xff]  }
  0x26   : > { %5254 = vmatpush3.bf16.msra.mxu0 %v6303_v21  ;;  %6263 = vmatpush3.bf16.msra.mxu1 %v6303_v21  ;;  %v988_v21 = vshll.u32 %v6324_v6, 16  ;;  %8583 = vst [vmem:[#allocation4_spill] sm:$0xff] %v6780_v23  ;;  %v6819_v59 = vsel %vm768_vm0, %v835_v49, %v839_v47  ;;  %v827_v6 = vrot.slane %v825_v62, 1  ;;  %v1015_v15 = vor.u32 %v1014_v9, %v1010_v0  ;;  %v6344_v24 = vld [vmem:[%s6682_s28 + $0x84] sm:$0xff]  }
  0x27   : > { %5255 = vmatprep.subr.bf16.mxu0 %v6304_v33  ;;  %6256 = vmatprep.subr.bf16.mxu1 %v6304_v33  ;;  %v995_v33 = vrot.slane %v993_v29, 1  ;;  %8585 = vst [vmem:[#allocation6_spill] sm:$0xff] %v6819_v59  ;;  %v1046_v29 = vshrl.u32 %v6344_v24, 16  ;;  %v6348_v40 = vld [vmem:[%s6699_s11 + $0x84] sm:$0xff]  }
  0x28   : > { %v990_v28 = vrot.slane %v988_v21, 1  ;;  %v6350_v47 = vld [vmem:[%s8480_s2 + $0x60] sm:$0xff]   ;;  %v1036_v58 = vshll.u32 %v6348_v40, 16  ;;  %v6349_v62 = vld [vmem:[%s6699_s11 + $0x8c] ss:$0 sps:$4 sm:$0x11]  }
  0x2a   : > { %5256 = vmatpush3.bf16.msra.mxu0 %v6305_v37  ;;  %6264 = vmatpush3.bf16.msra.mxu1 %v6305_v37  ;;  %v991_v32 = vor.u32 %v990_v28, %v986_v16  ;;  %v1019_v16 = vrot.slane %v1017_v10, 1  ;;  %v6345_v28 = vld [vmem:[%s6682_s28 + $0x8c] ss:$0 sps:$4 sm:$0x11]  }
  0x2b   : > { %5353 = vmatprep.subr.bf16.mxu1 %v6314_v44  ;;  %5465 = vmatprep.subr.bf16.mxu0 %v6316_v45  ;;  %v1024_v44 = vshll.u32 %v6332_v36, 16  ;;  %v6810_v45 = vld [vmem:[%s6699_s11 + $0x18] sm:$0xff]   ;;  %v1053_v39 = vshll.u32 %v6345_v28, 16 }
  0x2c   : > { %v6802_v37 = vsel %vm768_vm0, %v991_v32, %v995_v33  ;;  %v6848_v21 = vsel %vm768_vm0, %v1015_v15, %v1019_v16  ;;  %v858_v32 = vrot.slane %v856_v26, 1  ;;  %v6860_v33 = vld [vmem:[%s6699_s11 + $0x24] sm:$0xff]   ;;  %v6898_v15 = vld [vmem:[%s6682_s28 + $0x38] ss:$0 sps:$4 sm:$0x11]   ;;  %v6356_v16 = vld [vmem:[%s6682_s28 + $0x90] sm:$0xff]  }
  0x2d   : > { %1347 = vmatmul.mubr.bf16.vlgmr.msra.gmra.mxu0 %v780_v55  ;;  %1411 = vmatmul.mubr.bf16.vlgmr.msra.gmra.mxu1 %v6748_v56  ;;  %8584 = vst [vmem:[#allocation5_spill] sm:$0xff] %v6802_v37  ;;  %v1026_v50 = vrot.slane %v1024_v44, 1  ;;  %v1031_v55 = vrot.slane %v1029_v48, 1  ;;  %8588 = vst [vmem:[#allocation9_spill] sm:$0xff] %v6848_v21  ;;  %v844_v44 = vshll.u32 %v6860_v33, 16  ;;  %v1055_v49 = vrot.slane %v1053_v39, 1 }
  0x2e   : > { %5354 = vmatpush3.bf16.msra.mxu1 %v6315_v52  ;;  %5466 = vmatpush3.bf16.msra.mxu0 %v6317_v53  ;;  %v818_v52 = vshrl.u32 %v6810_v45, 16  ;;  %v820_v53 = vshll.u32 %v6810_v45, 16  ;;  %v885_v26 = vshll.u32 %v6898_v15, 16 }
  0x2f   : > { %5355 = vmatprep.subr.bf16.mxu1 %v6326_v11  ;;  %1354 = vmatprep.mubr.bf16.mxu0 %v6772_v17  ;;  %v1027_v60 = vor.u32 %v1026_v50, %v1022_v43  ;;  %v842_v43 = vshrl.u32 %v6860_v33, 16  ;;  %v1034_v50 = vshrl.u32 %v6348_v40, 16 }
  0x30   : > { %1418 = vmatprep.mubr.bf16.mxu1 %v6780_v23  ;;  %5467 = vmatprep.subr.bf16.mxu0 %v6328_v25  ;;  %v822_v61 = vrot.slane %v820_v53, 1  ;;  %v854_v25 = vshrl.u32 %v6845_v19, 16  ;;  %v846_v53 = vrot.slane %v844_v44, 1  ;;  %v6399_v23 = vld [vmem:[%s8480_s2] sm:$0xff]  }
  0x31   : > { %v6828_v4 = vsel %vm768_vm0, %v1027_v60, %v1031_v55  ;;  %v849_v55 = vshll.u32 %v6864_v42, 16  ;;  %v6351_v60 = vld [vmem:[%s8480_s2 + $0x20] sm:$0xff]  }
  0x32   : > { %5356 = vmatpush3.bf16.msra.mxu1 %v6327_v22  ;;  %5468 = vmatpush3.bf16.msra.mxu0 %v6329_v30  ;;  %8586 = vst [vmem:[#allocation7_spill] sm:$0xff] %v6828_v4  ;;  %v823_v5 = vor.u32 %v822_v61, %v818_v52  ;;  %v6851_v22 = vld [vmem:[%s6682_s28 + $0x2c] ss:$0 sps:$4 sm:$0x11]   ;;  %v1048_v30 = vshll.u32 %v6344_v24, 16  ;;  %v859_v41 = vor.u32 %v858_v32, %v854_v25  ;;  %v6910_v32 = vld [vmem:[%s6699_s11 + $0x30] sm:$0xff]  }
  0x33   : > { %5357 = vmatprep.subr.bf16.mxu1 %v6338_v3  ;;  %5469 = vmatprep.subr.bf16.mxu0 %v6340_v14  ;;  %v861_v27 = vshll.u32 %v6851_v22, 16  ;;  %v847_v0 = vor.u32 %v846_v53, %v842_v43  ;;  %v851_v1 = vrot.slane %v849_v55, 1  ;;  %v1038_v3 = vrot.slane %v1036_v58, 1  ;;  %v6895_v14 = vld [vmem:[%s6682_s28 + $0x30] sm:$0xff]  }
  0x34   : > { %v6835_v11 = vsel %vm768_vm0, %v823_v5, %v827_v6  ;;  %v1050_v38 = vrot.slane %v1048_v30, 1  ;;  %v1041_v5 = vshll.u32 %v6349_v62, 16  ;;  %v6353_v6 = vld [vmem:[%s8480_s2 + $0x120] sm:$0xff]   ;;  %v878_v24 = vshrl.u32 %v6895_v14, 16 }
  0x35   : > { %1355 = vmatmul.mubr.bf16.gmra.mxu0 %v6791_v31  ;;  %1419 = vmatmul.mubr.bf16.gmra.mxu1 %v6802_v37  ;;  %8587 = vst [vmem:[#allocation8_spill] sm:$0xff] %v6835_v11  ;;  %v863_v36 = vrot.slane %v861_v27, 1  ;;  %v1039_v9 = vor.u32 %v1038_v3, %v1034_v50  ;;  %v880_v25 = vshll.u32 %v6895_v14, 16  ;;  %v6357_v27 = vld [vmem:[%s6682_s28 + $0x98] ss:$0 sps:$4 sm:$0x11]  }
  0x36   : > { %1362 = vmatprep.mubr.bf16.mxu0 %v6819_v59  ;;  %1426 = vmatprep.mubr.bf16.mxu1 %v6828_v4  ;;  %v1051_v48 = vor.u32 %v1050_v38, %v1046_v29  ;;  %v1043_v10 = vrot.slane %v1041_v5, 1  ;;  %v1070_v29 = vshrl.u32 %v6356_v16, 16  ;;  %v1072_v30 = vshll.u32 %v6356_v16, 16  ;;  %v6361_v58 = vld [vmem:[%s6699_s11 + $0x98] ss:$0 sps:$4 sm:$0x11]  }
  0x37   : > { %5358 = vmatpush3.bf16.msra.mxu1 %v6339_v7  ;;  %5470 = vmatpush3.bf16.msra.mxu0 %v6341_v18  ;;  %v6872_v52 = vsel %vm768_vm0, %v859_v41, %v863_v36  ;;  %v6891_v7 = vsel %vm768_vm0, %v847_v0, %v851_v1  ;;  %v882_v28 = vrot.slane %v880_v25, 1  ;;  %v887_v36 = vrot.slane %v885_v26, 1  ;;  %v6913_v41 = vld [vmem:[%s6699_s11 + $0x38] ss:$0 sps:$4 sm:$0x11]  }
  0x38   : > { %8589 = vst [vmem:[#allocation10_spill] sm:$0xff] %v6872_v52  ;;  %5359 = vmatprep.subr.bf16.mxu1 %v6350_v47  ;;  %v6880_v61 = vsel %vm768_vm0, %v1051_v48, %v1055_v49  ;;  %5471 = vmatprep.subr.bf16.mxu0 %v6352_v63  ;;  %8591 = vst [vmem:[#allocation12_spill] sm:$0xff] %v6891_v7  ;;  %v6902_v18 = vsel %vm768_vm0, %v1039_v9, %v1043_v10  ;;  %v1077_v38 = vshll.u32 %v6357_v27, 16  ;;  %v6360_v48 = vld [vmem:[%s6699_s11 + $0x90] sm:$0xff]   ;;  %v6362_v63 = vld [vmem:[%s8480_s2 + $0x58] sm:$0xff]  }
  0x39   : > { %8590 = vst [vmem:[#allocation11_spill] sm:$0xff] %v6880_v61  ;;  %8592 = vst [vmem:[#allocation13_spill] sm:$0xff] %v6902_v18  ;;  %v883_v39 = vor.u32 %v882_v28, %v878_v24  ;;  %v1074_v40 = vrot.slane %v1072_v30, 1  ;;  %v866_v43 = vshrl.u32 %v6910_v32, 16  ;;  %v868_v44 = vshll.u32 %v6910_v32, 16  ;;  %v6363_v5 = vld [vmem:[%s8480_s2 + $0x18] sm:$0xff]  }
  0x3a   : > { %v1079_v47 = vrot.slane %v1077_v38, 1  ;;  %v873_v55 = vshll.u32 %v6913_v41, 16  ;;  %v1060_v62 = vshll.u32 %v6360_v48, 16  ;;  %v1065_v9 = vshll.u32 %v6361_v58, 16  ;;  %v6364_v16 = vld [vmem:[%s8480_s2 + $0x158] sm:$0xff]  }
  0x3b   : > { %5360 = vmatpush3.bf16.msra.mxu1 %v6351_v60  ;;  %5472 = vmatpush3.bf16.msra.mxu0 %v6353_v6  ;;  %v6919_v49 = vsel %vm768_vm0, %v883_v39, %v887_v36  ;;  %v1075_v50 = vor.u32 %v1074_v40, %v1070_v29  ;;  %v870_v53 = vrot.slane %v868_v44, 1  ;;  %v1058_v60 = vshrl.u32 %v6360_v48, 16  ;;  %v6365_v26 = vld [vmem:[%s8480_s2 + $0x118] sm:$0xff]   ;;  %v6952_v30 = vld [vmem:[%s6682_s28 + $0x44] ss:$0 sps:$4 sm:$0x11]  }
  0x3c   : > { %8593 = vst [vmem:[#allocation14_spill] sm:$0xff] %v6919_v49  ;;  %v875_v3 = vrot.slane %v873_v55, 1  ;;  %v1062_v6 = vrot.slane %v1060_v62, 1  ;;  %5361 = vmatprep.subr.bf16.mxu1 %v6362_v63  ;;  %v1067_v25 = vrot.slane %v1065_v9, 1  ;;  %5473 = vmatprep.subr.bf16.mxu0 %v6364_v16  ;;  %v6945_v27 = vld [vmem:[%s6682_s28 + $0x3c] sm:$0xff]   ;;  %v909_v40 = vshll.u32 %v6952_v30, 16 }
  0x3d   : > { %1363 = vmatmul.mubr.bf16.gmra.mxu0 %v6835_v11  ;;  %1427 = vmatmul.mubr.bf16.gmra.mxu1 %v6848_v21  ;;  %v6928_v0 = vsel %vm768_vm0, %v1075_v50, %v1079_v47  ;;  %v871_v1 = vor.u32 %v870_v53, %v866_v43  ;;  %v6368_v36 = vld [vmem:[%s6682_s28 + $0x9c] sm:$0xff]   ;;  %v902_v38 = vshrl.u32 %v6945_v27, 16  ;;  %v904_v39 = vshll.u32 %v6945_v27, 16  ;;  %v6369_v43 = vld [vmem:[%s6682_s28 + $0xa4] ss:$0 sps:$4 sm:$0x11]  }
  0x3e   : > { %1370 = vmatprep.mubr.bf16.mxu0 %v6872_v52  ;;  %1434 = vmatprep.mubr.bf16.mxu1 %v6880_v61  ;;  %8594 = vst [vmem:[#allocation15_spill] sm:$0xff] %v6928_v0  ;;  %v1063_v24 = vor.u32 %v1062_v6, %v1058_v60  ;;  %v1094_v44 = vshrl.u32 %v6368_v36, 16  ;;  %v1096_v47 = vshll.u32 %v6368_v36, 16  ;;  %v6961_v50 = vld [vmem:[%s6699_s11 + $0x3c] sm:$0xff]   ;;  %v911_v53 = vrot.slane %v909_v40, 1 }
  0x3f   : > { %v6935_v10 = vsel %vm768_vm0, %v871_v1, %v875_v3  ;;  %5362 = vmatpush3.bf16.msra.mxu1 %v6363_v5  ;;  %5474 = vmatpush3.bf16.msra.mxu0 %v6365_v26  ;;  %v906_v48 = vrot.slane %v904_v39, 1  ;;  %v1101_v58 = vshll.u32 %v6369_v43, 16  ;;  %v6372_v60 = vld [vmem:[%s6699_s11 + $0x9c] sm:$0xff]   ;;  %v6965_v63 = vld [vmem:[%s6699_s11 + $0x44] ss:$0 sps:$4 sm:$0x11]  }
  0x40   : > { %8595 = vst [vmem:[#allocation16_spill] sm:$0xff] %v6935_v10  ;;  %v6949_v29 = vsel %vm768_vm0, %v1063_v24, %v1067_v25  ;;  %v1098_v55 = vrot.slane %v1096_v47, 1  ;;  %v890_v1 = vshrl.u32 %v6961_v50, 16  ;;  %v892_v3 = vshll.u32 %v6961_v50, 16  ;;  %v6374_v5 = vld [vmem:[%s8480_s2 + $0x50] sm:$0xff]  }
  0x41   : > { %8596 = vst [vmem:[#allocation17_spill] sm:$0xff] %v6949_v29  ;;  %v907_v62 = vor.u32 %v906_v48, %v902_v38  ;;  %v1103_v9 = vrot.slane %v1101_v58, 1  ;;  %v1082_v16 = vshrl.u32 %v6372_v60, 16  ;;  %v897_v26 = vshll.u32 %v6965_v63, 16  ;;  %5363 = vmatprep.subr.bf16.mxu1 %v6374_v5  ;;  %v6375_v38 = vld [vmem:[%s8480_s2 + $0x10] sm:$0xff]   ;;  %v6380_v5 = vld [vmem:[%s6682_s28 + $0xa8] sm:$0xff]  }
  0x42   : > { %v1099_v6 = vor.u32 %v1098_v55, %v1094_v44  ;;  %v894_v25 = vrot.slane %v892_v3, 1  ;;  %v1084_v36 = vshll.u32 %v6372_v60, 16  ;;  %v6373_v40 = vld [vmem:[%s6699_s11 + $0xa4] ss:$0 sps:$4 sm:$0x11]   ;;  %v6376_v43 = vld [vmem:[%s8480_s2 + $0x150] sm:$0xff]  }
  0x43   : > { %v6973_v24 = vsel %vm768_vm0, %v907_v62, %v911_v53  ;;  %v899_v47 = vrot.slane %v897_v26, 1  ;;  %5364 = vmatpush3.bf16.msra.mxu1 %v6375_v38  ;;  %v1089_v53 = vshll.u32 %v6373_v40, 16  ;;  %5475 = vmatprep.subr.bf16.mxu0 %v6376_v43  ;;  %v6377_v55 = vld [vmem:[%s8480_s2 + $0x110] sm:$0xff]   ;;  %v6996_v3 = vld [vmem:[%s6682_s28 + $0x48] sm:$0xff]   ;;  %v1118_v38 = vshrl.u32 %v6380_v5, 16 }
  0x44   : > { %8597 = vst [vmem:[#allocation18_spill] sm:$0xff] %v6973_v24  ;;  %v6981_v39 = vsel %vm768_vm0, %v1099_v6, %v1103_v9  ;;  %v895_v44 = vor.u32 %v894_v25, %v890_v1  ;;  %v1086_v48 = vrot.slane %v1084_v36, 1  ;;  %5476 = vmatpush3.bf16.msra.mxu0 %v6377_v55  ;;  %v6999_v1 = vld [vmem:[%s6682_s28 + $0x50] ss:$0 sps:$4 sm:$0x11]   ;;  %v926_v9 = vshrl.u32 %v6996_v3, 16 }
  0x45   : > { %1371 = vmatmul.mubr.bf16.gmra.mxu0 %v6891_v7  ;;  %1435 = vmatmul.mubr.bf16.gmra.mxu1 %v6902_v18  ;;  %8598 = vst [vmem:[#allocation19_spill] sm:$0xff] %v6981_v39  ;;  %v1091_v62 = vrot.slane %v1089_v53, 1  ;;  %v928_v25 = vshll.u32 %v6996_v3, 16  ;;  %v6381_v26 = vld [vmem:[%s6682_s28 + $0xb0] ss:$0 sps:$4 sm:$0x11]  }
  0x46   : > { %1378 = vmatprep.mubr.bf16.mxu0 %v6919_v49  ;;  %1442 = vmatprep.mubr.bf16.mxu1 %v6928_v0  ;;  %v6992_v58 = vsel %vm768_vm0, %v895_v44, %v899_v47  ;;  %v1087_v60 = vor.u32 %v1086_v48, %v1082_v16  ;;  %v933_v16 = vshll.u32 %v6999_v1, 16  ;;  %v1120_v40 = vshll.u32 %v6380_v5, 16  ;;  %v7011_v43 = vld [vmem:[%s6699_s11 + $0x48] sm:$0xff]   ;;  %v7014_v55 = vld [vmem:[%s6699_s11 + $0x50] ss:$0 sps:$4 sm:$0x11]  }
  0x47   : > { %8599 = vst [vmem:[#allocation20_spill] sm:$0xff] %v6992_v58  ;;  %v930_v36 = vrot.slane %v928_v25, 1  ;;  %v1125_v47 = vshll.u32 %v6381_v26, 16  ;;  %v7076_v0 = vld [vmem:[%s6699_s11 + $0x5c] ss:$0 sps:$4 sm:$0x11]  }
  0x48   : > { %v7003_v6 = vsel %vm768_vm0, %v1087_v60, %v1091_v62  ;;  %v935_v44 = vrot.slane %v933_v16, 1  ;;  %v1122_v53 = vrot.slane %v1120_v40, 1  ;;  %v914_v60 = vshrl.u32 %v7011_v43, 16  ;;  %v6385_v16 = vld [vmem:[%s6699_s11 + $0xb0] ss:$0 sps:$4 sm:$0x11]  }
  0x49   : > { %8600 = vst [vmem:[#allocation21_spill] sm:$0xff] %v7003_v6  ;;  %v931_v48 = vor.u32 %v930_v36, %v926_v9  ;;  %v916_v62 = vshll.u32 %v7011_v43, 16  ;;  %v1127_v28 = vrot.slane %v1125_v47, 1  ;;  %v6386_v36 = vld [vmem:[%s8480_s2 + $0x48] sm:$0xff]  }
  0x4a   : > { %v1123_v25 = vor.u32 %v1122_v53, %v1118_v38  ;;  %v6387_v38 = vld [vmem:[%s8480_s2 + $0x8] sm:$0xff]   ;;  %v1113_v53 = vshll.u32 %v6385_v16, 16  ;;  %5365 = vmatprep.subr.bf16.mxu1 %v6386_v36 }
  0x4b   : > { %v918_v5 = vrot.slane %v916_v62, 1  ;;  %5366 = vmatpush3.bf16.msra.mxu1 %v6387_v38  ;;  %v7064_v38 = vld [vmem:[%s6682_s28 + $0xbc] ss:$0 sps:$4 sm:$0x11]  }
  0x4c   : > { %v7029_v40 = vsel %vm768_vm0, %v1123_v25, %v1127_v28  ;;  %v6388_v28 = vld [vmem:[%s8480_s2 + $0x148] sm:$0xff]   ;;  %v1115_v62 = vrot.slane %v1113_v53, 1  ;;  %v1149_v16 = vshll.u32 %v7064_v38, 16 }
  0x4d   : > { %1379 = vmatmul.mubr.bf16.gmra.mxu0 %v6935_v10  ;;  %1443 = vmatmul.mubr.bf16.gmra.mxu1 %v6949_v29  ;;  %v921_v29 = vshll.u32 %v7014_v55, 16  ;;  %8602 = vst [vmem:[#allocation23_spill] sm:$0xff] %v7029_v40  ;;  %v919_v47 = vor.u32 %v918_v5, %v914_v60  ;;  %v6389_v25 = vld [vmem:[%s8480_s2 + $0x108] sm:$0xff]   ;;  %v7047_v5 = vld [vmem:[%s6682_s28 + $0x54] sm:$0xff]  }
  0x4e   : > { %1386 = vmatprep.mubr.bf16.mxu0 %v6973_v24  ;;  %1450 = vmatprep.mubr.bf16.mxu1 %v6981_v39  ;;  %v7020_v39 = vsel %vm768_vm0, %v931_v48, %v935_v44  ;;  %v950_v36 = vshrl.u32 %v7047_v5, 16  ;;  %v1151_v4 = vrot.slane %v1149_v16, 1  ;;  %v7097_v16 = vld [vmem:[%s6699_s11 + $0xbc] ss:$0 sps:$4 sm:$0x11]  }
  0x4f   : > { %8601 = vst [vmem:[#allocation22_spill] sm:$0xff] %v7020_v39  ;;  %v923_v44 = vrot.slane %v921_v29, 1  ;;  %v1737_v29 = vrot.slane %v6694_v13, 1  ;;  %5477 = vmatprep.subr.bf16.mxu0 %v6388_v28  ;;  %v7054_v13 = vld [vmem:[%s6682_s28 + $0x5c] ss:$0 sps:$4 sm:$0x11]  }
  0x50   : > { %5478 = vmatpush3.bf16.msra.mxu0 %v6389_v25 }
  0x55   : > { %1387 = vmatmul.mubr.bf16.gmra.mxu0 %v6992_v58  ;;  %1451 = vmatmul.mubr.bf16.gmra.mxu1 %v7003_v6  ;;  %v6384_v6 = vld [vmem:[%s6699_s11 + $0xa8] sm:$0xff]  }
  0x56   : > { %1394 = vmatprep.mubr.bf16.mxu0 %v7020_v39  ;;  %v1106_v9 = vshrl.u32 %v6384_v6, 16  ;;  %v1108_v26 = vshll.u32 %v6384_v6, 16  ;;  %1458 = vmatprep.mubr.bf16.mxu1 %v7029_v40  ;;  %v7036_v6 = vsel %vm768_vm0, %v919_v47, %v923_v44  ;;  %v952_v47 = vshll.u32 %v7047_v5, 16 }
  0x57   : > { %8603 = vst [vmem:[#allocation24_spill] sm:$0xff] %v7036_v6  ;;  %v957_v44 = vshll.u32 %v7054_v13, 16 }
  0x58   : > { %v1110_v48 = vrot.slane %v1108_v26, 1  ;;  %v954_v28 = vrot.slane %v952_v47, 1  ;;  %v6398_v47 = vld [vmem:[%s8480_s2 + $0x40] sm:$0xff]  }
  0x59   : > { %5367 = vmatprep.subr.bf16.mxu1 %v6398_v47  ;;  %v1137_v47 = vshll.u32 %v7097_v16, 16 }
  0x5a   : > { %v1111_v60 = vor.u32 %v1110_v48, %v1106_v9  ;;  %v7057_v9 = vld [vmem:[%s6682_s28 + $0xb4] sm:$0xff]   ;;  %v955_v40 = vor.u32 %v954_v28, %v950_v36  ;;  %v945_v36 = vshll.u32 %v7076_v0, 16  ;;  %5368 = vmatpush3.bf16.msra.mxu1 %v6399_v23 }
  0x5b   : > { %v1142_v48 = vshrl.u32 %v7057_v9, 16  ;;  %v1144_v53 = vshll.u32 %v7057_v9, 16  ;;  %v6402_v23 = vld [vmem:[%s8480_s2 + $0x1f8] sm:$0xff]  }
  0x5c   : > { %v7051_v26 = vsel %vm768_vm0, %v1111_v60, %v1115_v62  ;;  %v7069_v60 = vld [vmem:[%s6699_s11 + $0x54] sm:$0xff]   ;;  %v959_v62 = vrot.slane %v957_v44, 1  ;;  %5577 = vmatprep.subr.bf16.mxu1 %v6402_v23  ;;  %v6508_v23 = vld [vmem:[%s6699_s11] sm:$0xff]  }
  0x5d   : > { %1395 = vmatmul.mubr.bf16.gmra.mxu0 %v7036_v6  ;;  %8604 = vst [vmem:[#allocation25_spill] sm:$0xff] %v7051_v26  ;;  %1459 = vmatmul.mubr.bf16.gmra.mxu1 %v7051_v26  ;;  %v1146_v25 = vrot.slane %v1144_v53, 1  ;;  %v7073_v26 = vld [vmem:[%s6699_s11 + $0xb4] sm:$0xff]   ;;  %v938_v18 = vshrl.u32 %v7069_v60, 16  ;;  %v940_v61 = vshll.u32 %v7069_v60, 16 }
  0x5e   : > { %v1130_v44 = vshrl.u32 %v7073_v26, 16  ;;  %v7085_v53 = vsel %vm768_vm0, %v955_v40, %v959_v62  ;;  %v1132_v28 = vshll.u32 %v7073_v26, 16  ;;  %v947_v62 = vrot.slane %v945_v36, 1 }
  0x5f   : > { %v1147_v21 = vor.u32 %v1146_v25, %v1142_v48  ;;  %8605 = vst [vmem:[#allocation26_spill] sm:$0xff] %v7085_v53  ;;  %v942_v37 = vrot.slane %v940_v61, 1  ;;  %1402 = vmatprep.mubr.bf16.mxu0 %v7085_v53  ;;  %v6400_v61 = vld [vmem:[%s8480_s2 + $0x140] sm:$0xff]  }
  0x60   : > { %v1134_v25 = vrot.slane %v1132_v28, 1  ;;  %5479 = vmatprep.subr.bf16.mxu0 %v6400_v61  ;;  %v1743_v28 = vrot.slane %v6751_v57, 1  ;;  %v6507_v61 = vld [vmem:[%s6682_s28] sm:$0xff]   ;;  %v6408_v57 = vld [vmem:[%s8480_s2 + $0x270] sm:$0xff]  }
  0x61   : > { %v7094_v48 = vsel %vm768_vm0, %v1147_v21, %v1151_v4  ;;  %v943_v40 = vor.u32 %v942_v37, %v938_v18  ;;  %v6401_v4 = vld [vmem:[%s8480_s2 + $0x100] sm:$0xff]   ;;  %v8607_v21 = vrot.slane %v6691_v12, 1  ;;  %v1139_v37 = vrot.slane %v1137_v47, 1  ;;  %v6506_v18 = vld [vmem:[%s6699_s11 + $0x8] ss:$0 sps:$4 sm:$0x11]  }
  0x62   : > { %8606 = vst [vmem:[#allocation27_spill] sm:$0xff] %v7094_v48  ;;  %1466 = vmatprep.mubr.bf16.mxu1 %v7094_v48  ;;  %v1135_v48 = vor.u32 %v1134_v25, %v1130_v44  ;;  %5480 = vmatpush3.bf16.msra.mxu0 %v6401_v4  ;;  %v1734_v36 = vrot.slane %v6506_v18, 1  ;;  %v1742_v12 = vrot.slane %v6744_v54, 1  ;;  %v6404_v44 = vld [vmem:[%s8480_s2 + $0x278] sm:$0xff]   ;;  %v1740_v25 = vrot.slane %v6764_v8, 1  ;;  %v7159_v8 = vld [vmem:[%s6682_s28 + $0xc] sm:$0xff]  }
  0x63   : > { %v1738_v56 = vsel %vm1732_vm1, %v8607_v21, %v1737_v29  ;;  %v7111_v46 = vsel %vm768_vm0, %v943_v40, %v947_v62  ;;  %5689 = vmatprep.subr.bf16.mxu0 %v6404_v44  ;;  %v1739_v62 = vrot.slane %v6760_v2, 1  ;;  %v1748_v47 = vrot.slane %v6795_v34, 1  ;;  %v6406_v21 = vld [vmem:[%s8480_s2 + $0x1f0] sm:$0xff]   ;;  %v6412_v2 = vld [vmem:[%s8480_s2 + $0x268] sm:$0xff]  }
  0x64   : > { %8608 = vst [vmem:[#allocation28_spill] sm:$0xff] %v7111_v46  ;;  %v7120_v29 = vsel %vm768_vm0, %v1135_v48, %v1139_v37  ;;  %v6405_v48 = vld [vmem:[%s8480_s2 + $0x238] sm:$0xff]   ;;  %v7135_v40 = vsel %vm1732_vm1, %v1742_v12, %v1743_v28  ;;  %v1749_v4 = vrot.slane %v6798_v35, 1  ;;  %v6409_v37 = vld [vmem:[%s8480_s2 + $0x230] sm:$0xff]   ;;  %v6413_v44 = vld [vmem:[%s8480_s2 + $0x228] sm:$0xff]  }
  0x65   : > { %1403 = vmatmul.mubr.bf16.gmra.mxu0 %v7111_v46  ;;  %8609 = vst [vmem:[#allocation29_spill] sm:$0xff] %v7120_v29  ;;  %1467 = vmatmul.mubr.bf16.gmra.mxu1 %v7120_v29  ;;  %v6407_v35 = vld [vmem:[%s8480_s2 + $0x1b0] sm:$0xff]   ;;  %v7166_v18 = vsel %vm1732_vm1, %v1739_v62, %v1740_v25  ;;  %v6411_v28 = vld [vmem:[%s8480_s2 + $0x1a8] sm:$0xff]   ;;  %v6417_v62 = vld [vmem:[%s8480_s2 + $0x220] sm:$0xff]  }
  0x66   : > { %2022 = vmatprep.mubr.bf16.mxu0 %v1738_v56  ;;  %1603 = vmatprep.mubr.bf16.mxu1 %v6507_v61  ;;  %v8610_v56 = vrot.slane %v6710_v20, 1  ;;  %v6403_v20 = vld [vmem:[%s8480_s2 + $0x1b8] sm:$0xff]   ;;  %v7172_v12 = vsel %vm1732_vm1, %v1748_v47, %v1749_v4  ;;  %v6416_v61 = vld [vmem:[%s8480_s2 + $0x260] sm:$0xff]   ;;  %v7196_v25 = vld [vmem:[%s6699_s11 + $0xc] sm:$0xff]  }
  0x67   : > { %v6420_v47 = vld [vmem:[%s8480_s2 + $0x258] sm:$0xff]  }
  0x68   : > { %v1735_v54 = vsel %vm1732_vm1, %v8610_v56, %v1734_v36  ;;  %v6410_v36 = vld [vmem:[%s8480_s2 + $0x1e8] sm:$0xff]   ;;  %v1745_v56 = vrot.slane %v6810_v45, 1  ;;  %v6415_v45 = vld [vmem:[%s8480_s2 + $0x1a0] sm:$0xff]  }
  0x6d   : > { %2023 = vmatmul.mubr.bf16.vlgmr.msra.gmra.mxu0 %v1735_v54  ;;  %1604 = vmatmul.mubr.bf16.vlgmr.msra.gmra.mxu1 %v6508_v23  ;;  %v1746_v54 = vrot.slane %v6813_v51, 1  ;;  %v6418_v51 = vld [vmem:[%s8480_s2 + $0x1d8] sm:$0xff]   ;;  %v6422_v23 = vld [vmem:[%s8480_s2 + $0x1d0] sm:$0xff]  }
  0x6e   : > { %5690 = vmatpush3.bf16.msra.mxu0 %v6405_v48  ;;  %2030 = vmatprep.mubr.bf16.mxu0 %v7135_v40  ;;  %v1754_v48 = vrot.slane %v6845_v19, 1 }
  0x6f   : > { %5691 = vmatprep.subr.bf16.mxu0 %v6408_v57  ;;  %5578 = vmatpush3.bf16.msra.mxu1 %v6403_v20  ;;  %v6414_v57 = vld [vmem:[%s8480_s2 + $0x1e0] sm:$0xff]   ;;  %v1755_v20 = vrot.slane %v6851_v22, 1  ;;  %v7207_v22 = vsel %vm1732_vm1, %v1745_v56, %v1746_v54 }
  0x70   : > { %1611 = vmatprep.mubr.bf16.mxu1 %v7159_v8  ;;  %5579 = vmatprep.subr.bf16.mxu1 %v6406_v21  ;;  %v1751_v21 = vrot.slane %v6860_v33, 1 }
  0x71   : > { %v7213_v4 = vsel %vm1732_vm1, %v1754_v48, %v1755_v20  ;;  %v1757_v48 = vrot.slane %v6910_v32, 1  ;;  %v1758_v20 = vrot.slane %v6913_v41, 1  ;;  %v6431_v41 = vld [vmem:[%s8480_s2 + $0x180] sm:$0xff]  }
  0x72   : > { %5692 = vmatpush3.bf16.msra.mxu0 %v6409_v37  ;;  %v6419_v37 = vld [vmem:[%s8480_s2 + $0x198] sm:$0xff]  }
  0x73   : > { %5693 = vmatprep.subr.bf16.mxu0 %v6412_v2  ;;  %5580 = vmatpush3.bf16.msra.mxu1 %v6407_v35  ;;  %v1752_v2 = vrot.slane %v6864_v42, 1  ;;  %v6424_v35 = vld [vmem:[%s8480_s2 + $0x250] sm:$0xff]  }
  0x74   : > { %5581 = vmatprep.subr.bf16.mxu1 %v6410_v36  ;;  %v1760_v36 = vrot.slane %v6895_v14, 1  ;;  %v6423_v42 = vld [vmem:[%s8480_s2 + $0x190] sm:$0xff]  }
  0x75   : > { %2031 = vmatmul.mubr.bf16.gmra.mxu0 %v7166_v18  ;;  %1612 = vmatmul.mubr.bf16.gmra.mxu1 %v7196_v25  ;;  %v7245_v56 = vsel %vm1732_vm1, %v1751_v21, %v1752_v2  ;;  %v6433_v21 = vld [vmem:[%s8480_s2 + $0x200] sm:$0xff]   ;;  %v1764_v2 = vrot.slane %v6965_v63, 1  ;;  %v1778_v63 = vrot.slane %v7047_v5, 1 }
  0x76   : > { %2038 = vmatprep.mubr.bf16.mxu0 %v7172_v12  ;;  %5694 = vmatpush3.bf16.msra.mxu0 %v6413_v44  ;;  %v1761_v44 = vrot.slane %v6898_v15, 1  ;;  %v6426_v15 = vld [vmem:[%s8480_s2 + $0x1c8] sm:$0xff]  }
  0x77   : > { %5695 = vmatprep.subr.bf16.mxu0 %v6416_v61  ;;  %1619 = vmatprep.mubr.bf16.mxu1 %v6795_v34  ;;  %v6421_v34 = vld [vmem:[%s8480_s2 + $0x218] sm:$0xff]  }
  0x78   : > { %5582 = vmatpush3.bf16.msra.mxu1 %v6411_v28  ;;  %v6425_v28 = vld [vmem:[%s8480_s2 + $0x210] sm:$0xff]   ;;  %v7237_v61 = vld [vmem:[%s6699_s11 + $0x18] sm:$0xff]   ;;  %v7251_v54 = vsel %vm1732_vm1, %v1760_v36, %v1761_v44  ;;  %v1773_v36 = vrot.slane %v6999_v1, 1  ;;  %v1769_v44 = vrot.slane %v7011_v43, 1 }
  0x79   : > { %5583 = vmatprep.subr.bf16.mxu1 %v6414_v57  ;;  %v6429_v57 = vld [vmem:[%s8480_s2 + $0x208] sm:$0xff]  }
  0x7a   : > { %5696 = vmatpush3.bf16.msra.mxu0 %v6417_v62  ;;  %v6427_v62 = vld [vmem:[%s8480_s2 + $0x188] sm:$0xff]  }
  0x7b   : > { %5697 = vmatprep.subr.bf16.mxu0 %v6420_v47  ;;  %v1767_v47 = vrot.slane %v6952_v30, 1  ;;  %v7283_v30 = vsel %vm1732_vm1, %v1757_v48, %v1758_v20  ;;  %v7321_v20 = vld [vmem:[%s6699_s11 + $0x60] sm:$0xff]  }
  0x7c   : > { %5584 = vmatpush3.bf16.msra.mxu1 %v6415_v45  ;;  %v1766_v45 = vrot.slane %v6945_v27, 1  ;;  %8611 = vst [vmem:[#allocation30_spill] sm:$0xff] %v7283_v30 }
  0x7d   : > { %2039 = vmatmul.mubr.bf16.gmra.mxu0 %v7207_v22  ;;  %5585 = vmatprep.subr.bf16.mxu1 %v6418_v51  ;;  %v6430_v51 = vld [vmem:[%s8480_s2 + $0x1c0] sm:$0xff]  }
  0x7e   : > { %2046 = vmatprep.mubr.bf16.mxu0 %v7213_v4  ;;  %5698 = vmatpush3.bf16.msra.mxu0 %v6421_v34  ;;  %v6432_v34 = vld [vmem:[%s8480_s2 + $0x240] sm:$0xff]  }
  0x7f   : > { %1620 = vmatmul.mubr.bf16.gmra.mxu1 %v7237_v61  ;;  %5699 = vmatprep.subr.bf16.mxu0 %v6424_v35  ;;  %v1772_v35 = vrot.slane %v6996_v3, 1 }
  0x80   : > { %1627 = vmatprep.mubr.bf16.mxu1 %v6845_v19  ;;  %5586 = vmatpush3.bf16.msra.mxu1 %v6419_v37  ;;  %v6428_v19 = vld [vmem:[%s8480_s2 + $0x248] sm:$0xff]   ;;  %v7289_v37 = vsel %vm1732_vm1, %v1766_v45, %v1767_v47 }
  0x81   : > { %5587 = vmatprep.subr.bf16.mxu1 %v6422_v23  ;;  %8612 = vst [vmem:[#allocation31_spill] sm:$0xff] %v7289_v37  ;;  %v1763_v23 = vrot.slane %v6961_v50, 1  ;;  %v7310_v1 = vsel %vm1732_vm1, %v1772_v35, %v1773_v36  ;;  %v7338_v47 = vld [vmem:[%s6682_s28 + $0x6c] sm:$0xff]  }
  0x82   : > { %5700 = vmatpush3.bf16.msra.mxu0 %v6425_v28  ;;  %v1770_v28 = vrot.slane %v7014_v55, 1  ;;  %8614 = vst [vmem:[#allocation33_spill] sm:$0xff] %v7310_v1  ;;  %v6513_v55 = vld [vmem:[%s6682_s28 + $0x68] ss:$0 sps:$4 sm:$0x11]  }
  0x83   : > { %5701 = vmatprep.subr.bf16.mxu0 %v6428_v19  ;;  %v1775_v19 = vrot.slane %v7069_v60, 1 }
  0x84   : > { %5588 = vmatpush3.bf16.msra.mxu1 %v6423_v42  ;;  %v7305_v42 = vsel %vm1732_vm1, %v1763_v23, %v1764_v2  ;;  %v7349_v23 = vld [vmem:[%s6682_s28 + $0x78] sm:$0xff]  }
  0x85   : > { %2047 = vmatmul.mubr.bf16.gmra.mxu0 %v7245_v56  ;;  %5589 = vmatprep.subr.bf16.mxu1 %v6426_v15  ;;  %8613 = vst [vmem:[#allocation32_spill] sm:$0xff] %v7305_v42  ;;  %v1779_v15 = vrot.slane %v7054_v13, 1  ;;  %v1781_v13 = vrot.slane %v7321_v20, 1  ;;  %v1796_v2 = vrot.slane %v7349_v23, 1 }
  0x86   : > { %2054 = vmatprep.mubr.bf16.mxu0 %v7251_v54  ;;  %5702 = vmatpush3.bf16.msra.mxu0 %v6429_v57  ;;  %v1785_v57 = vrot.slane %v6513_v55, 1  ;;  %v7387_v55 = vld [vmem:[%s6682_s28 + $0x84] sm:$0xff]  }
  0x87   : > { %1628 = vmatmul.mubr.bf16.gmra.mxu1 %v6860_v33  ;;  %5703 = vmatprep.subr.bf16.mxu0 %v6432_v34  ;;  %v6434_v33 = vld [vmem:[%s8480_s2 + $0x2f8] sm:$0xff]  }
  0x88   : > { %1635 = vmatprep.mubr.bf16.mxu1 %v6895_v14  ;;  %5590 = vmatpush3.bf16.msra.mxu1 %v6427_v62  ;;  %v6436_v14 = vld [vmem:[%s8480_s2 + $0x378] sm:$0xff]   ;;  %v6515_v62 = vld [vmem:[%s6699_s11 + $0x68] ss:$0 sps:$4 sm:$0x11]  }
  0x89   : > { %5591 = vmatprep.subr.bf16.mxu1 %v6430_v51  ;;  %v1782_v45 = vrot.slane %v6515_v62, 1  ;;  %v7332_v51 = vsel %vm1732_vm1, %v1778_v63, %v1779_v15  ;;  %v7373_v63 = vld [vmem:[%s6699_s11 + $0x78] sm:$0xff]   ;;  %v6523_v15 = vld [vmem:[%s6699_s11 + $0x80] ss:$0 sps:$4 sm:$0x11]  }
  0x8a   : > { %5704 = vmatpush3.bf16.msra.mxu0 %v6433_v21  ;;  %8616 = vst [vmem:[#allocation35_spill] sm:$0xff] %v7332_v51 }
  0x8b   : > { %5913 = vmatprep.subr.bf16.mxu0 %v6436_v14 }
  0x8c   : > { %5592 = vmatpush3.bf16.msra.mxu1 %v6431_v41  ;;  %v6517_v41 = vld [vmem:[%s6682_s28 + $0x74] ss:$0 sps:$4 sm:$0x11]  }
  0x8d   : > { %2055 = vmatmul.mubr.bf16.gmra.mxu0 %v7283_v30  ;;  %5801 = vmatprep.subr.bf16.mxu1 %v6434_v33  ;;  %v1791_v34 = vrot.slane %v6517_v41, 1  ;;  %v6519_v33 = vld [vmem:[%s6699_s11 + $0x74] ss:$0 sps:$4 sm:$0x11]   ;;  %v7402_v41 = vld [vmem:[%s6699_s11 + $0x84] sm:$0xff]  }
  0x8e   : > { %2062 = vmatprep.mubr.bf16.mxu0 %v7289_v37  ;;  %v1788_v14 = vrot.slane %v6519_v33, 1  ;;  %v8646_v37 = vld [vmem:[#allocation2_spill] sm:$0xff] }
  0x8f   : > { %1636 = vmatmul.mubr.bf16.gmra.mxu1 %v6910_v32  ;;  %v1776_v32 = vrot.slane %v7076_v0, 1  ;;  %v7329_v0 = vsel %vm1732_vm1, %v1769_v44, %v1770_v28 }
  0x90   : > { %1643 = vmatprep.mubr.bf16.mxu1 %v6945_v27  ;;  %v7315_v27 = vld [vmem:[%s6682_s28 + $0x60] sm:$0xff]   ;;  %8615 = vst [vmem:[#allocation34_spill] sm:$0xff] %v7329_v0 }
  0x91   : > { %v1784_v48 = vrot.slane %v7315_v27, 1  ;;  %v7354_v36 = vsel %vm1732_vm1, %v1775_v19, %v1776_v32  ;;  %v1794_v19 = vrot.slane %v6523_v15, 1 }
  0x92   : > { %8617 = vst [vmem:[#allocation36_spill] sm:$0xff] %v7354_v36 }
  0x93   : > { %v7357_v44 = vsel %vm1732_vm1, %v1784_v48, %v1785_v57  ;;  %v1802_v57 = vrot.slane %v7387_v55, 1 }
  0x94   : > { %8618 = vst [vmem:[#allocation37_spill] sm:$0xff] %v7357_v44 }
  0x95   : > { %2063 = vmatmul.mubr.bf16.gmra.mxu0 %v7305_v42  ;;  %v1824_v42 = vrot.slane %v7097_v16, 1 }
  0x96   : > { %2070 = vmatprep.mubr.bf16.mxu0 %v7310_v1 }
  0x97   : > { %1644 = vmatmul.mubr.bf16.gmra.mxu1 %v6961_v50  ;;  %v1790_v50 = vrot.slane %v7338_v47, 1 }
  0x98   : > { %1651 = vmatprep.mubr.bf16.mxu1 %v6996_v3  ;;  %v7343_v3 = vld [vmem:[%s6699_s11 + $0x6c] sm:$0xff]  }
  0x99   : > { %v1787_v21 = vrot.slane %v7343_v3, 1  ;;  %v7367_v28 = vsel %vm1732_vm1, %v1790_v50, %v1791_v34  ;;  %v1799_v34 = vrot.slane %v7402_v41, 1 }
  0x9a   : > { %8620 = vst [vmem:[#allocation39_spill] sm:$0xff] %v7367_v28 }
  0x9b   : > { %v7379_v32 = vsel %vm1732_vm1, %v1787_v21, %v1788_v14  ;;  %v6527_v21 = vld [vmem:[%s6699_s11 + $0x8c] ss:$0 sps:$4 sm:$0x11]   ;;  %v7407_v14 = vld [vmem:[%s6682_s28 + $0x90] sm:$0xff]  }
  0x9c   : > { %8621 = vst [vmem:[#allocation40_spill] sm:$0xff] %v7379_v32  ;;  %v1800_v33 = vrot.slane %v6527_v21, 1  ;;  %v7427_v21 = vld [vmem:[%s6682_s28 + $0x9c] sm:$0xff]  }
  0x9d   : > { %2071 = vmatmul.mubr.bf16.gmra.mxu0 %v7329_v0  ;;  %v6539_v0 = vld [vmem:[%s6699_s11 + $0xb0] ss:$0 sps:$4 sm:$0x11]  }
  0x9e   : > { %2078 = vmatprep.mubr.bf16.mxu0 %v7332_v51  ;;  %v1818_v1 = vrot.slane %v6539_v0, 1 }
  0x9f   : > { %1652 = vmatmul.mubr.bf16.gmra.mxu1 %v7011_v43  ;;  %v6521_v43 = vld [vmem:[%s6682_s28 + $0x80] ss:$0 sps:$4 sm:$0x11]  }
  0xa0   : > { %1659 = vmatprep.mubr.bf16.mxu1 %v7047_v5  ;;  %v1797_v35 = vrot.slane %v6521_v43, 1  ;;  %v7364_v5 = vsel %vm1732_vm1, %v1781_v13, %v1782_v45  ;;  %v6525_v13 = vld [vmem:[%s6682_s28 + $0x8c] ss:$0 sps:$4 sm:$0x11]  }
  0xa1   : > { %8619 = vst [vmem:[#allocation38_spill] sm:$0xff] %v7364_v5  ;;  %v1803_v62 = vrot.slane %v6525_v13, 1  ;;  %v6529_v43 = vld [vmem:[%s6682_s28 + $0x98] ss:$0 sps:$4 sm:$0x11]  }
  0xa2   : > { %v7382_v48 = vsel %vm1732_vm1, %v1796_v2, %v1797_v35  ;;  %v1808_v2 = vrot.slane %v7407_v14, 1  ;;  %v1809_v35 = vrot.slane %v6529_v43, 1  ;;  %v6531_v13 = vld [vmem:[%s6699_s11 + $0x98] ss:$0 sps:$4 sm:$0x11]  }
  0xa3   : > { %8622 = vst [vmem:[#allocation41_spill] sm:$0xff] %v7382_v48  ;;  %v7397_v50 = vsel %vm1732_vm1, %v1802_v57, %v1803_v62  ;;  %v1806_v62 = vrot.slane %v6531_v13, 1 }
  0xa4   : > { %8624 = vst [vmem:[#allocation43_spill] sm:$0xff] %v7397_v50  ;;  %v7417_v15 = vsel %vm1732_vm1, %v1808_v2, %v1809_v35 }
  0xa5   : > { %2079 = vmatmul.mubr.bf16.gmra.mxu0 %v7354_v36  ;;  %8626 = vst [vmem:[#allocation45_spill] sm:$0xff] %v7417_v15  ;;  %v7470_v36 = vld [vmem:[%s6699_s11 + $0xa8] sm:$0xff]  }
  0xa6   : > { %2086 = vmatprep.mubr.bf16.mxu0 %v7357_v44  ;;  %v1817_v51 = vrot.slane %v7470_v36, 1 }
  0xa7   : > { %1660 = vmatmul.mubr.bf16.gmra.mxu1 %v7069_v60  ;;  %v1793_v60 = vrot.slane %v7373_v63, 1 }
  0xa8   : > { %1667 = vmatprep.mubr.bf16.mxu1 %v7315_v27 }
  0xa9   : > { %v7394_v45 = vsel %vm1732_vm1, %v1793_v60, %v1794_v19  ;;  %v7414_v60 = vsel %vm1732_vm1, %v1799_v34, %v1800_v33  ;;  %v7422_v19 = vld [vmem:[%s6699_s11 + $0x90] sm:$0xff]   ;;  %v1814_v34 = vrot.slane %v7427_v21, 1  ;;  %v6533_v33 = vld [vmem:[%s6682_s28 + $0xa4] ss:$0 sps:$4 sm:$0x11]  }
  0xaa   : > { %8623 = vst [vmem:[#allocation42_spill] sm:$0xff] %v7394_v45  ;;  %8625 = vst [vmem:[#allocation44_spill] sm:$0xff] %v7414_v60  ;;  %v1805_v57 = vrot.slane %v7422_v19, 1  ;;  %v1815_v43 = vrot.slane %v6533_v33, 1  ;;  %v7442_v33 = vld [vmem:[%s6699_s11 + $0x9c] sm:$0xff]  }
  0xac   : > { %v7434_v2 = vsel %vm1732_vm1, %v1805_v57, %v1806_v62  ;;  %v7437_v35 = vsel %vm1732_vm1, %v1814_v34, %v1815_v43  ;;  %v7451_v34 = vld [vmem:[%s6682_s28 + $0xa8] sm:$0xff]  }
  0xad   : > { %2087 = vmatmul.mubr.bf16.gmra.mxu0 %v7364_v5  ;;  %8627 = vst [vmem:[#allocation46_spill] sm:$0xff] %v7434_v2  ;;  %8628 = vst [vmem:[#allocation47_spill] sm:$0xff] %v7437_v35  ;;  %v1820_v43 = vrot.slane %v7451_v34, 1 }
  0xae   : > { %2094 = vmatprep.mubr.bf16.mxu0 %v7367_v28 }
  0xaf   : > { %1668 = vmatmul.mubr.bf16.gmra.mxu1 %v7321_v20 }
  0xb0   : > { %1675 = vmatprep.mubr.bf16.mxu1 %v7338_v47 }
  0xb5   : > { %2095 = vmatmul.mubr.bf16.gmra.mxu0 %v7379_v32 }
  0xb6   : > { %2102 = vmatprep.mubr.bf16.mxu0 %v7382_v48  ;;  %v6535_v48 = vld [vmem:[%s6699_s11 + $0xa4] ss:$0 sps:$4 sm:$0x11]  }
  0xb7   : > { %1676 = vmatmul.mubr.bf16.gmra.mxu1 %v7343_v3  ;;  %v1812_v32 = vrot.slane %v6535_v48, 1 }
  0xb8   : > { %1683 = vmatprep.mubr.bf16.mxu1 %v7349_v23 }
  0xbd   : > { %2103 = vmatmul.mubr.bf16.gmra.mxu0 %v7394_v45  ;;  %v1811_v45 = vrot.slane %v7442_v33, 1 }
  0xbe   : > { %2110 = vmatprep.mubr.bf16.mxu0 %v7397_v50 }
  0xbf   : > { %1684 = vmatmul.mubr.bf16.gmra.mxu1 %v7373_v63 }
  0xc0   : > { %1691 = vmatprep.mubr.bf16.mxu1 %v7387_v55 }
  0xc5   : > { %2111 = vmatmul.mubr.bf16.gmra.mxu0 %v7414_v60 }
  0xc6   : > { %2118 = vmatprep.mubr.bf16.mxu0 %v7417_v15 }
  0xc7   : > { %1692 = vmatmul.mubr.bf16.gmra.mxu1 %v7402_v41 }
  0xc8   : > { %1699 = vmatprep.mubr.bf16.mxu1 %v7407_v14 }
  0xcd   : > { %2119 = vmatmul.mubr.bf16.gmra.mxu0 %v7434_v2  ;;  %v6537_v2 = vld [vmem:[%s6682_s28 + $0xb0] ss:$0 sps:$4 sm:$0x11]  }
  0xce   : > { %2126 = vmatprep.mubr.bf16.mxu0 %v7437_v35  ;;  %v1821_v28 = vrot.slane %v6537_v2, 1 }
  0xcf   : > { %1700 = vmatmul.mubr.bf16.gmra.mxu1 %v7422_v19 }
  0xd0   : > { %1707 = vmatprep.mubr.bf16.mxu1 %v7427_v21 }
  0xd7   : > { %1708 = vmatmul.mubr.bf16.gmra.mxu1 %v7442_v33 }
  0xd8   : > { %1715 = vmatprep.mubr.bf16.mxu1 %v7451_v34 }
  0xdf   : > { %1716 = vmatmul.mubr.bf16.gmra.mxu1 %v7470_v36 }
  0xed   : > { %v5257_v13 = vpop.f32.mrf.mxu0  ;;  %v5305_v15 = vpop.f32.mrf.mxu1 }
  0xef   : > { %v5258_v60 = vpop.f32.mrf.mxu0  ;;  %v5306_v50 = vpop.f32.mrf.mxu1 }
  0xf0   : > { %v7446_v57 = vadd.f32 %v5258_v60, %v5257_v13  ;;  %v7448_v62 = vadd.f32 %v5306_v50, %v5305_v15  ;;  %v7458_v60 = vsel %vm1732_vm1, %v1811_v45, %v1812_v32  ;;  %v7465_v13 = vsel %vm1732_vm1, %v1820_v43, %v1821_v28 }
  0xf1   : > { %v5260_v5 = vpop.f32.mrf.mxu0  ;;  %v5308_v35 = vpop.f32.mrf.mxu1  ;;  %8629 = vst [vmem:[#allocation48_spill] sm:$0xff] %v7458_v60  ;;  %8630 = vst [vmem:[#allocation49_spill] sm:$0xff] %v7465_v13  ;;  %2127 = vmatmul.mubr.bf16.gmra.mxu0 %v7458_v60 }
  0xf2   : > { %2134 = vmatprep.mubr.bf16.mxu0 %v7465_v13 }
  0xf3   : > { %v5261_v44 = vpop.f32.mrf.mxu0  ;;  %v5309_v48 = vpop.f32.mrf.mxu1 }
  0xf4   : > { %v7460_v50 = vadd.f32 %v5261_v44, %v5260_v5  ;;  %v7462_v15 = vadd.f32 %v5309_v48, %v5308_v35  ;;  %v1826_v44 = vrot.slane %v7057_v9, 1  ;;  %v1827_v5 = vrot.slane %v7064_v38, 1 }
  0xf5   : > { %v5263_v2 = vpop.f32.mrf.mxu0  ;;  %v5311_v45 = vpop.f32.mrf.mxu1  ;;  %v7481_v48 = vsel %vm1732_vm1, %v1817_v51, %v1818_v1  ;;  %v7498_v51 = vld [vmem:[%s6682_s28 + $0xb4] sm:$0xff]  }
  0xf6   : > { %8631 = vst [vmem:[#allocation50_spill] sm:$0xff] %v7481_v48  ;;  %v7486_v9 = vsel %vm1732_vm1, %v1826_v44, %v1827_v5  ;;  %1723 = vmatprep.mubr.bf16.mxu1 %v7498_v51 }
  0xf7   : > { %v5264_v32 = vpop.f32.mrf.mxu0  ;;  %v5312_v43 = vpop.f32.mrf.mxu1  ;;  %8632 = vst [vmem:[#allocation51_spill] sm:$0xff] %v7486_v9  ;;  %1724 = vmatmul.mubr.bf16.gmra.mxu1 %v7073_v26 }
  0xf8   : > { %v7476_v35 = vadd.f32 %v5264_v32, %v5263_v2  ;;  %v7483_v13 = vadd.f32 %v5312_v43, %v5311_v45  ;;  %v1823_v32 = vrot.slane %v7073_v26, 1  ;;  %2344 = vmatprep.mubr.bf16.mxu1 %v7159_v8  ;;  %v6435_v26 = vld [vmem:[%s8480_s2 + $0x2b8] sm:$0xff]   ;;  %v6438_v8 = vld [vmem:[%s8480_s2 + $0x2f0] sm:$0xff]  }
  0xf9   : > { %v5266_v28 = vpop.f32.mrf.mxu0  ;;  %v5314_v38 = vpop.f32.mrf.mxu1  ;;  %2135 = vmatmul.mubr.bf16.gmra.mxu0 %v7481_v48 }
  0xfa   : > { %2142 = vmatprep.mubr.bf16.mxu0 %v7486_v9  ;;  %v7502_v5 = vsel %vm1732_vm1, %v1823_v32, %v1824_v42  ;;  %v6437_v42 = vld [vmem:[%s8480_s2 + $0x338] sm:$0xff]  }
  0xfb   : > { %v5267_v0 = vpop.f32.mrf.mxu0  ;;  %v5315_v2 = vpop.f32.mrf.mxu1  ;;  %8633 = vst [vmem:[#allocation52_spill] sm:$0xff] %v7502_v5 }
  0xfc   : > { %v7488_v60 = vadd.f32 %v5267_v0, %v5266_v28  ;;  %v7494_v1 = vadd.f32 %v5315_v2, %v5314_v38 }
  0xfd   : > { %v5269_v44 = vpop.f32.mrf.mxu0  ;;  %v5317_v28 = vpop.f32.mrf.mxu1 }
  0xff   : > { %v5270_v45 = vpop.f32.mrf.mxu0  ;;  %v5318_v16 = vpop.f32.mrf.mxu1  ;;  %2345 = vmatmul.mubr.bf16.vlgmr.msra.gmra.mxu1 %v7196_v25 }
 0x100   : > { %v7504_v43 = vadd.f32 %v5270_v45, %v5269_v44  ;;  %v7508_v38 = vadd.f32 %v5318_v16, %v5317_v28  ;;  %v6441_v45 = vld [vmem:[%s8480_s2 + $0x330] sm:$0xff]   ;;  %5802 = vmatpush3.bf16.msra.mxu1 %v6435_v26  ;;  %v7538_v28 = vld [vmem:[%s6682_s28 + $0x18] sm:$0xff]  }
 0x101   : > { %2143 = vmatmul.mubr.bf16.gmra.mxu0 %v7502_v5  ;;  %v5272_v0 = vpop.f32.mrf.mxu0  ;;  %v5320_v9 = vpop.f32.mrf.mxu1  ;;  %2352 = vmatprep.mubr.bf16.mxu1 %v7538_v28  ;;  %v6446_v5 = vld [vmem:[%s8480_s2 + $0x2e0] sm:$0xff]  }
 0x102   : > { %2692 = vmatprep.mubr.bf16.mxu0 %v6772_v17  ;;  %v6440_v17 = vld [vmem:[%s8480_s2 + $0x370] sm:$0xff]   ;;  %5803 = vmatprep.subr.bf16.mxu1 %v6438_v8 }
 0x103   : > { %v5273_v2 = vpop.f32.mrf.mxu0  ;;  %v5321_v32 = vpop.f32.mrf.mxu1 }
 0x104   : > { %v7511_v48 = vadd.f32 %v5273_v2, %v5272_v0  ;;  %v7520_v44 = vadd.f32 %v5321_v32, %v5320_v9  ;;  %v6439_v0 = vld [vmem:[%s8480_s2 + $0x2b0] sm:$0xff]   ;;  %v6442_v32 = vld [vmem:[%s8480_s2 + $0x2e8] sm:$0xff]  }
 0x105   : > { %v5275_v9 = vpop.f32.mrf.mxu0  ;;  %v5323_v2 = vpop.f32.mrf.mxu1  ;;  %5804 = vmatpush3.bf16.msra.mxu1 %v6439_v0  ;;  %v6449_v0 = vld [vmem:[%s8480_s2 + $0x320] sm:$0xff]  }
 0x106   : > { %8634 = vst [vmem:[#allocation53_spill] sm:$0xff] %v7520_v44  ;;  %5805 = vmatprep.subr.bf16.mxu1 %v6442_v32 }
 0x107   : > { %v5276_v16 = vpop.f32.mrf.mxu0  ;;  %v5324_v26 = vpop.f32.mrf.mxu1  ;;  %2353 = vmatmul.mubr.bf16.gmra.mxu1 %v7237_v61  ;;  %v6453_v61 = vld [vmem:[%s8480_s2 + $0x318] sm:$0xff]  }
 0x108   : > { %v7556_v8 = vadd.f32 %v5324_v26, %v5323_v2  ;;  %v6452_v26 = vld [vmem:[%s8480_s2 + $0x358] sm:$0xff]  }
 0x109   : > { %2693 = vmatmul.mubr.bf16.vlgmr.msra.gmra.mxu0 %v6791_v31  ;;  %v6444_v31 = vld [vmem:[%s8480_s2 + $0x368] sm:$0xff]   ;;  %v5278_v25 = vpop.f32.mrf.mxu0 }
 0x10a   : > { %5914 = vmatpush3.bf16.msra.mxu0 %v6437_v42  ;;  %2700 = vmatprep.mubr.bf16.mxu0 %v6819_v59  ;;  %v7544_v42 = vadd.f32 %v5276_v16, %v5275_v9  ;;  %v6448_v59 = vld [vmem:[%s8480_s2 + $0x360] sm:$0xff]   ;;  %8635 = vst [vmem:[#allocation54_spill] sm:$0xff] %v7556_v8  ;;  %v6443_v9 = vld [vmem:[%s8480_s2 + $0x2a8] sm:$0xff]  }
 0x10b   : > { %5915 = vmatprep.subr.bf16.mxu0 %v6440_v17  ;;  %v6445_v17 = vld [vmem:[%s8480_s2 + $0x328] sm:$0xff]   ;;  %5806 = vmatpush3.bf16.msra.mxu1 %v6443_v9  ;;  %v6456_v9 = vld [vmem:[%s8480_s2 + $0x350] sm:$0xff]  }
 0x10c   : > { %5807 = vmatprep.subr.bf16.mxu1 %v6446_v5  ;;  %v6451_v5 = vld [vmem:[%s8480_s2 + $0x298] sm:$0xff]  }
 0x10e   : > { %5916 = vmatpush3.bf16.msra.mxu0 %v6441_v45  ;;  %v5279_v45 = vpop.f32.mrf.mxu0 }
 0x10f   : > { %5917 = vmatprep.subr.bf16.mxu0 %v6444_v31  ;;  %v5326_v31 = vpop.f32.mrf.mxu1  ;;  %v7562_v16 = vadd.f32 %v5279_v45, %v5278_v25  ;;  %v7575_v25 = vld [vmem:[%s6682_s28 + $0x24] sm:$0xff]  }
 0x110   : > { %2360 = vmatprep.mubr.bf16.mxu1 %v7575_v25  ;;  %v5281_v45 = vpop.f32.mrf.mxu0 }
 0x111   : > { %2701 = vmatmul.mubr.bf16.gmra.mxu0 %v6835_v11  ;;  %v5327_v2 = vpop.f32.mrf.mxu1 }
 0x112   : > { %2708 = vmatprep.mubr.bf16.mxu0 %v6872_v52  ;;  %5918 = vmatpush3.bf16.msra.mxu0 %v6445_v17  ;;  %v7578_v32 = vadd.f32 %v5327_v2, %v5326_v31  ;;  %v6447_v17 = vld [vmem:[%s8480_s2 + $0x2a0] sm:$0xff]   ;;  %v5282_v31 = vpop.f32.mrf.mxu0 }
 0x113   : > { %5919 = vmatprep.subr.bf16.mxu0 %v6448_v59  ;;  %v6450_v59 = vld [vmem:[%s8480_s2 + $0x2d8] sm:$0xff]   ;;  %5808 = vmatpush3.bf16.msra.mxu1 %v6447_v17  ;;  %v5329_v2 = vpop.f32.mrf.mxu1  ;;  %v6457_v17 = vld [vmem:[%s8480_s2 + $0x310] sm:$0xff]  }
 0x114   : > { %8636 = vst [vmem:[#allocation55_spill] sm:$0xff] %v7578_v32  ;;  %5809 = vmatprep.subr.bf16.mxu1 %v6450_v59  ;;  %v5284_v52 = vpop.f32.mrf.mxu0  ;;  %v6460_v59 = vld [vmem:[%s8480_s2 + $0x348] sm:$0xff]  }
 0x116   : > { %5920 = vmatpush3.bf16.msra.mxu0 %v6449_v0  ;;  %v6454_v0 = vld [vmem:[%s8480_s2 + $0x2d0] sm:$0xff]   ;;  %v5285_v11 = vpop.f32.mrf.mxu0 }
 0x117   : > { %5921 = vmatprep.subr.bf16.mxu0 %v6452_v26  ;;  %v7600_v26 = vadd.f32 %v5282_v31, %v5281_v45  ;;  %v5330_v45 = vpop.f32.mrf.mxu1  ;;  %5810 = vmatpush3.bf16.msra.mxu1 %v6451_v5  ;;  %v7624_v8 = vadd.f32 %v5285_v11, %v5284_v52  ;;  %v6461_v5 = vld [vmem:[%s8480_s2 + $0x308] sm:$0xff]  }
 0x118   : > { %v7619_v31 = vadd.f32 %v5330_v45, %v5329_v2  ;;  %5811 = vmatprep.subr.bf16.mxu1 %v6454_v0  ;;  %v6464_v2 = vld [vmem:[%s8480_s2 + $0x340] sm:$0xff]   ;;  %v6459_v11 = vld [vmem:[%s8480_s2 + $0x288] sm:$0xff]   ;;  %v7646_v45 = vld [vmem:[%s6699_s11 + $0x30] sm:$0xff]  }
 0x119   : > { %2709 = vmatmul.mubr.bf16.gmra.mxu0 %v6891_v7  ;;  %v7606_v7 = vld [vmem:[%s6699_s11 + $0x24] sm:$0xff]   ;;  %v5332_v32 = vpop.f32.mrf.mxu1 }
 0x11a   : > { %2716 = vmatprep.mubr.bf16.mxu0 %v6919_v49  ;;  %5922 = vmatpush3.bf16.msra.mxu0 %v6453_v61  ;;  %v7613_v49 = vld [vmem:[%s6682_s28 + $0x30] sm:$0xff]   ;;  %8637 = vst [vmem:[#allocation56_spill] sm:$0xff] %v7619_v31  ;;  %v7673_v31 = vld [vmem:[%s6682_s28 + $0x48] sm:$0xff]  }
 0x11b   : > { %2361 = vmatmul.mubr.bf16.gmra.mxu1 %v7606_v7  ;;  %5923 = vmatprep.subr.bf16.mxu0 %v6456_v9  ;;  %v6455_v61 = vld [vmem:[%s8480_s2 + $0x290] sm:$0xff]   ;;  %v6458_v9 = vld [vmem:[%s8480_s2 + $0x2c8] sm:$0xff]   ;;  %v5333_v0 = vpop.f32.mrf.mxu1  ;;  %8641 = vst [vmem:[#allocation60_spill] sm:$0xff] %v7673_v31 }
 0x11c   : > { %2368 = vmatprep.mubr.bf16.mxu1 %v7613_v49  ;;  %5812 = vmatpush3.bf16.msra.mxu1 %v6455_v61  ;;  %v7637_v52 = vadd.f32 %v5333_v0, %v5332_v32  ;;  %v6472_v32 = vld [vmem:[%s8480_s2 + $0x478] sm:$0xff]  }
 0x11d   : > { %5813 = vmatprep.subr.bf16.mxu1 %v6458_v9  ;;  %v7653_v61 = vld [vmem:[%s6682_s28 + $0x3c] sm:$0xff]  }
 0x11e   : > { %5924 = vmatpush3.bf16.msra.mxu0 %v6457_v17  ;;  %8638 = vst [vmem:[#allocation57_spill] sm:$0xff] %v7637_v52  ;;  %v6462_v17 = vld [vmem:[%s8480_s2 + $0x2c0] sm:$0xff]  }
 0x11f   : > { %5925 = vmatprep.subr.bf16.mxu0 %v6460_v59  ;;  %v6465_v59 = vld [vmem:[%s8480_s2 + $0x300] sm:$0xff]  }
 0x120   : > { %5814 = vmatpush3.bf16.msra.mxu1 %v6459_v11  ;;  %v6463_v9 = vld [vmem:[%s8480_s2 + $0x280] sm:$0xff]  }
 0x121   : > { %2717 = vmatmul.mubr.bf16.gmra.mxu0 %v6935_v10  ;;  %5815 = vmatprep.subr.bf16.mxu1 %v6462_v17  ;;  %v7667_v52 = vld [vmem:[%s6699_s11 + $0x3c] sm:$0xff]  }
 0x122   : > { %2724 = vmatprep.mubr.bf16.mxu0 %v6973_v24  ;;  %5926 = vmatpush3.bf16.msra.mxu0 %v6461_v5  ;;  %v5287_v5 = vpop.f32.mrf.mxu0  ;;  %v5335_v24 = vpop.f32.mrf.mxu1  ;;  %8639 = vst [vmem:[#allocation58_spill] sm:$0xff] %v7667_v52 }
 0x123   : > { %2369 = vmatmul.mubr.bf16.gmra.mxu1 %v7646_v45  ;;  %5927 = vmatprep.subr.bf16.mxu0 %v6464_v2  ;;  %v6470_v2 = vld [vmem:[%s8480_s2 + $0x3f8] sm:$0xff]  }
 0x124   : > { %2376 = vmatprep.mubr.bf16.mxu1 %v7653_v61  ;;  %v5288_v0 = vpop.f32.mrf.mxu0  ;;  %5816 = vmatpush3.bf16.msra.mxu1 %v6463_v9  ;;  %v5336_v17 = vpop.f32.mrf.mxu1 }
 0x125   : > { %v7663_v10 = vadd.f32 %v5288_v0, %v5287_v5  ;;  %6025 = vmatprep.subr.bf16.mxu1 %v6470_v2 }
 0x126   : > { %5928 = vmatpush3.bf16.msra.mxu0 %v6465_v59  ;;  %v5290_v11 = vpop.f32.mrf.mxu0  ;;  %v7670_v59 = vadd.f32 %v5336_v17, %v5335_v24  ;;  %v5338_v5 = vpop.f32.mrf.mxu1  ;;  %v7687_v24 = vld [vmem:[%s6682_s28 + $0x54] sm:$0xff]  }
 0x127   : > { %6137 = vmatprep.subr.bf16.mxu0 %v6472_v32  ;;  %8644 = vst [vmem:[#allocation63_spill] sm:$0xff] %v7687_v24 }
 0x128   : > { %8640 = vst [vmem:[#allocation59_spill] sm:$0xff] %v7670_v59  ;;  %v5291_v32 = vpop.f32.mrf.mxu0  ;;  %v5339_v0 = vpop.f32.mrf.mxu1 }
 0x129   : > { %2725 = vmatmul.mubr.bf16.gmra.mxu0 %v6992_v58  ;;  %v7676_v9 = vadd.f32 %v5291_v32, %v5290_v11  ;;  %v7683_v58 = vld [vmem:[%s6699_s11 + $0x48] sm:$0xff]  }
 0x12a   : > { %2732 = vmatprep.mubr.bf16.mxu0 %v7020_v39  ;;  %v7678_v39 = vadd.f32 %v5339_v0, %v5338_v5  ;;  %v5293_v2 = vpop.f32.mrf.mxu0  ;;  %8643 = vst [vmem:[#allocation62_spill] sm:$0xff] %v7683_v58  ;;  %v5341_v11 = vpop.f32.mrf.mxu1 }
 0x12b   : > { %2377 = vmatmul.mubr.bf16.gmra.mxu1 %v7667_v52  ;;  %v8654_v52 = vld [vmem:[#allocation9_spill] sm:$0xff] }
 0x12c   : > { %2384 = vmatprep.mubr.bf16.mxu1 %v7673_v31  ;;  %8642 = vst [vmem:[#allocation61_spill] sm:$0xff] %v7678_v39  ;;  %v5294_v17 = vpop.f32.mrf.mxu0  ;;  %v5342_v0 = vpop.f32.mrf.mxu1 }
 0x12d   : > { %v7690_v32 = vadd.f32 %v5294_v17, %v5293_v2  ;;  %v8649_v17 = vld [vmem:[#allocation3_spill] sm:$0xff] }
 0x12e   : > { %v5296_v5 = vpop.f32.mrf.mxu0  ;;  %v5344_v39 = vpop.f32.mrf.mxu1 }
 0x131   : > { %2733 = vmatmul.mubr.bf16.gmra.mxu0 %v7036_v6  ;;  %v7693_v6 = vadd.f32 %v5342_v0, %v5341_v11  ;;  %v8650_v11 = vld [vmem:[#allocation4_spill] sm:$0xff] }
 0x132   : > { %2740 = vmatprep.mubr.bf16.mxu0 %v7085_v53  ;;  %v5297_v53 = vpop.f32.mrf.mxu0 }
 0x133   : > { %2385 = vmatmul.mubr.bf16.gmra.mxu1 %v7683_v58  ;;  %8645 = vst [vmem:[#allocation64_spill] sm:$0xff] %v7693_v6  ;;  %v7695_v59 = vadd.f32 %v5297_v53, %v5296_v5  ;;  %v7699_v58 = vld [vmem:[%s6699_s11 + $0x54] sm:$0xff]  }
 0x134   : > { %2392 = vmatprep.mubr.bf16.mxu1 %v7687_v24  ;;  %8647 = vst [vmem:[#allocation65_spill] sm:$0xff] %v7699_v58  ;;  %v5345_v24 = vpop.f32.mrf.mxu1  ;;  %v5299_v2 = vpop.f32.mrf.mxu0 }
 0x135   : > { %v7702_v44 = vadd.f32 %v5345_v24, %v5344_v39 }
 0x136   : > { %v5300_v0 = vpop.f32.mrf.mxu0 }
 0x137   : > { %8648 = vst [vmem:[#allocation66_spill] sm:$0xff] %v7702_v44  ;;  %v7708_v53 = vadd.f32 %v5300_v0, %v5299_v2 }
 0x138   : > { %v5302_v5 = vpop.f32.mrf.mxu0 }
 0x139   : > { %2741 = vmatmul.mubr.bf16.gmra.mxu0 %v7111_v46  ;;  %v5347_v46 = vpop.f32.mrf.mxu1 }
 0x13a   : > { %2748 = vmatprep.mubr.bf16.mxu0 %v8646_v37  ;;  %v5303_v39 = vpop.f32.mrf.mxu0 }
 0x13b   : > { %2393 = vmatmul.mubr.bf16.gmra.mxu1 %v7699_v58  ;;  %v5348_v37 = vpop.f32.mrf.mxu1  ;;  %v8653_v58 = vld [vmem:[#allocation7_spill] sm:$0xff] }
 0x13c   : > { %2400 = vmatprep.mubr.bf16.mxu1 %v7315_v27  ;;  %v7711_v6 = vadd.f32 %v5348_v37, %v5347_v46  ;;  %v7713_v27 = vadd.f32 %v5303_v39, %v5302_v5  ;;  %v5481_v44 = vpop.f32.mrf.mxu0 }
 0x13d   : > { %v5350_v24 = vpop.f32.mrf.mxu1 }
 0x13e   : > { %8651 = vst [vmem:[#allocation67_spill] sm:$0xff] %v7711_v6 }
 0x141   : > { %2749 = vmatmul.mubr.bf16.gmra.mxu0 %v8649_v17  ;;  %v8652_v17 = vld [vmem:[#allocation5_spill] sm:$0xff] }
 0x142   : > { %2756 = vmatprep.mubr.bf16.mxu0 %v8650_v11  ;;  %v5351_v11 = vpop.f32.mrf.mxu1 }
 0x143   : > { %2401 = vmatmul.mubr.bf16.gmra.mxu1 %v7321_v20  ;;  %v7717_v30 = vadd.f32 %v5351_v11, %v5350_v24  ;;  %v5482_v20 = vpop.f32.mrf.mxu0  ;;  %v8655_v24 = vld [vmem:[#allocation11_spill] sm:$0xff] }
 0x144   : > { %2408 = vmatprep.mubr.bf16.mxu1 %v7338_v47  ;;  %v5369_v2 = vpop.f32.mrf.mxu1  ;;  %v5483_v47 = vadd.f32 %v5482_v20, %v5481_v44 }
 0x145   : > { %v5484_v0 = vpop.f32.mrf.mxu0 }
 0x146   : > { %v5370_v46 = vpop.f32.mrf.mxu1 }
 0x147   : > { %v5371_v37 = vadd.f32 %v5370_v46, %v5369_v2  ;;  %v5485_v5 = vpop.f32.mrf.mxu0 }
 0x148   : > { %v5372_v39 = vpop.f32.mrf.mxu1  ;;  %v5486_v6 = vadd.f32 %v5485_v5, %v5484_v0 }
 0x149   : > { %2757 = vmatmul.mubr.bf16.gmra.mxu0 %v8652_v17  ;;  %v1606_v17 = vadd.f32 %v5371_v37, %v7446_v57  ;;  %v5487_v31 = vpop.f32.mrf.mxu0 }
 0x14a   : > { %2764 = vmatprep.mubr.bf16.mxu0 %v8653_v58  ;;  %v5373_v11 = vpop.f32.mrf.mxu1 }
 0x14b   : > { %2409 = vmatmul.mubr.bf16.gmra.mxu1 %v7343_v3  ;;  %v7724_v58 = vadd.f32 %v5483_v47, %v1606_v17  ;;  %v5374_v3 = vadd.f32 %v5373_v11, %v5372_v39  ;;  %v5488_v44 = vpop.f32.mrf.mxu0  ;;  %v8656_v39 = vld [vmem:[#allocation13_spill] sm:$0xff] }
 0x14c   : > { %2416 = vmatprep.mubr.bf16.mxu1 %v7349_v23  ;;  %v5375_v20 = vpop.f32.mrf.mxu1  ;;  %v5489_v23 = vadd.f32 %v5488_v44, %v5487_v31 }
 0x14d   : > { %v1609_v2 = vadd.f32 %v5374_v3, %v7460_v50  ;;  %v5490_v46 = vpop.f32.mrf.mxu0 }
 0x14e   : > { %v5376_v57 = vpop.f32.mrf.mxu1 }
 0x14f   : > { %v7729_v0 = vadd.f32 %v5486_v6, %v1609_v2  ;;  %v5377_v37 = vadd.f32 %v5376_v57, %v5375_v20  ;;  %v5491_v5 = vpop.f32.mrf.mxu0 }
 0x151   : > { %2765 = vmatmul.mubr.bf16.gmra.mxu0 %v8654_v52  ;;  %v5378_v52 = vpop.f32.mrf.mxu1  ;;  %v1614_v17 = vadd.f32 %v5377_v37, %v7476_v35  ;;  %v5493_v47 = vpop.f32.mrf.mxu0 }
 0x152   : > { %2772 = vmatprep.mubr.bf16.mxu0 %v8655_v24  ;;  %v5492_v24 = vadd.f32 %v5491_v5, %v5490_v46 }
 0x153   : > { %2417 = vmatmul.mubr.bf16.gmra.mxu1 %v7373_v63  ;;  %v5379_v11 = vpop.f32.mrf.mxu1  ;;  %v8657_v63 = vld [vmem:[#allocation15_spill] sm:$0xff]  ;;  %v7734_v31 = vadd.f32 %v5489_v23, %v1614_v17  ;;  %v5494_v3 = vpop.f32.mrf.mxu0  ;;  %v8658_v17 = vld [vmem:[#allocation17_spill] sm:$0xff] }
 0x154   : > { %2424 = vmatprep.mubr.bf16.mxu1 %v7387_v55  ;;  %v5380_v50 = vadd.f32 %v5379_v11, %v5378_v52  ;;  %v5495_v6 = vadd.f32 %v5494_v3, %v5493_v47  ;;  %v8659_v47 = vld [vmem:[#allocation19_spill] sm:$0xff] }
 0x155   : > { %v5381_v55 = vpop.f32.mrf.mxu1  ;;  %v5496_v20 = vpop.f32.mrf.mxu0 }
 0x156   : > { %v1617_v44 = vadd.f32 %v5380_v50, %v7488_v60 }
 0x157   : > { %v5382_v35 = vpop.f32.mrf.mxu1  ;;  %v5497_v57 = vpop.f32.mrf.mxu0 }
 0x158   : > { %v7739_v2 = vadd.f32 %v5492_v24, %v1617_v44  ;;  %v5383_v46 = vadd.f32 %v5382_v35, %v5381_v55  ;;  %v5498_v5 = vadd.f32 %v5497_v57, %v5496_v20 }
 0x159   : > { %2773 = vmatmul.mubr.bf16.gmra.mxu0 %v8656_v39  ;;  %v5384_v37 = vpop.f32.mrf.mxu1  ;;  %v5499_v52 = vpop.f32.mrf.mxu0 }
 0x15a   : > { %2780 = vmatprep.mubr.bf16.mxu0 %v8657_v63  ;;  %v1622_v23 = vadd.f32 %v5383_v46, %v7504_v43  ;;  %v7752_v46 = vld [vmem:[%s6682_s28 + $0xc0] sm:$0xff]  }
 0x15b   : > { %2425 = vmatmul.mubr.bf16.gmra.mxu1 %v7402_v41  ;;  %v5385_v41 = vpop.f32.mrf.mxu1 }
 0x15c   : > { %2432 = vmatprep.mubr.bf16.mxu1 %v7407_v14  ;;  %v7744_v60 = vadd.f32 %v5495_v6, %v1622_v23  ;;  %v5386_v11 = vadd.f32 %v5385_v41, %v5384_v37  ;;  %v5500_v14 = vpop.f32.mrf.mxu0 }
 0x15d   : > { %v5387_v50 = vpop.f32.mrf.mxu1  ;;  %v5501_v24 = vadd.f32 %v5500_v14, %v5499_v52  ;;  %v8661_v52 = vld [vmem:[#allocation23_spill] sm:$0xff]  ;;  %v2520_v14 = vshll.u32 %v7752_v46, 16 }
 0x15e   : > { %v1625_v3 = vadd.f32 %v5386_v11, %v7511_v48  ;;  %v5502_v55 = vpop.f32.mrf.mxu0  ;;  %v7760_v11 = vld [vmem:[%s6682_s28 + $0xc8] ss:$0 sps:$4 sm:$0x11]  }
 0x15f   : > { %v5388_v43 = vpop.f32.mrf.mxu1 }
 0x160   : > { %v7749_v44 = vadd.f32 %v5498_v5, %v1625_v3  ;;  %v5389_v20 = vadd.f32 %v5388_v43, %v5387_v50  ;;  %v5503_v35 = vpop.f32.mrf.mxu0 }
 0x161   : > { %2781 = vmatmul.mubr.bf16.gmra.mxu0 %v8658_v17  ;;  %v5390_v6 = vpop.f32.mrf.mxu1  ;;  %v5504_v57 = vadd.f32 %v5503_v35, %v5502_v55 }
 0x162   : > { %2788 = vmatprep.mubr.bf16.mxu0 %v8659_v47  ;;  %v1630_v37 = vadd.f32 %v5389_v20, %v7544_v42  ;;  %v5505_v23 = vpop.f32.mrf.mxu0  ;;  %v7768_v20 = vld [vmem:[%s6699_s11 + $0xc0] sm:$0xff]   ;;  %v7777_v47 = vld [vmem:[%s6699_s11 + $0xc8] ss:$0 sps:$4 sm:$0x11]  }
 0x163   : > { %2433 = vmatmul.mubr.bf16.gmra.mxu1 %v7422_v19  ;;  %v8660_v19 = vld [vmem:[#allocation21_spill] sm:$0xff]  ;;  %v5391_v48 = vpop.f32.mrf.mxu1 }
 0x164   : > { %2440 = vmatprep.mubr.bf16.mxu1 %v7427_v21  ;;  %v7757_v21 = vadd.f32 %v5501_v24, %v1630_v37  ;;  %v5392_v41 = vadd.f32 %v5391_v48, %v5390_v6  ;;  %v5506_v5 = vpop.f32.mrf.mxu0  ;;  %v2518_v24 = vshrl.u32 %v7752_v46, 16  ;;  %v2522_v48 = vrot.slane %v2520_v14, 1 }
 0x165   : > { %v5393_v50 = vpop.f32.mrf.mxu1  ;;  %v5507_v3 = vadd.f32 %v5506_v5, %v5505_v23  ;;  %v8662_v5 = vld [vmem:[#allocation25_spill] sm:$0xff] }
 0x166   : > { %v1633_v42 = vadd.f32 %v5392_v41, %v7562_v16  ;;  %v5508_v55 = vpop.f32.mrf.mxu0 }
 0x167   : > { %v5394_v43 = vpop.f32.mrf.mxu1 }
 0x168   : > { %v7770_v35 = vadd.f32 %v5504_v57, %v1633_v42  ;;  %v5395_v6 = vadd.f32 %v5394_v43, %v5393_v50  ;;  %v5509_v37 = vpop.f32.mrf.mxu0  ;;  %v2508_v57 = vshll.u32 %v7768_v20, 16  ;;  %v2523_v43 = vor.u32 %v2522_v48, %v2518_v24 }
 0x169   : > { %2789 = vmatmul.mubr.bf16.gmra.mxu0 %v8660_v19  ;;  %v5510_v23 = vadd.f32 %v5509_v37, %v5508_v55  ;;  %v8663_v19 = vld [vmem:[#allocation27_spill] sm:$0xff] }
 0x16a   : > { %2796 = vmatprep.mubr.bf16.mxu0 %v8661_v52  ;;  %v2525_v52 = vshll.u32 %v7760_v11, 16  ;;  %v1638_v16 = vadd.f32 %v5395_v6, %v7600_v26  ;;  %v5511_v41 = vpop.f32.mrf.mxu0 }
 0x16b   : > { %2441 = vmatmul.mubr.bf16.gmra.mxu1 %v7442_v33  ;;  %v5396_v33 = vpop.f32.mrf.mxu1 }
 0x16c   : > { %2448 = vmatprep.mubr.bf16.mxu1 %v7451_v34  ;;  %v7780_v42 = vadd.f32 %v5507_v3, %v1638_v16  ;;  %v5512_v14 = vpop.f32.mrf.mxu0  ;;  %v2527_v17 = vrot.slane %v2525_v52, 1  ;;  %v2513_v3 = vshll.u32 %v7777_v47, 16 }
 0x16d   : > { %v5397_v34 = vpop.f32.mrf.mxu1  ;;  %v5513_v26 = vadd.f32 %v5512_v14, %v5511_v41 }
 0x16e   : > { %v5398_v50 = vadd.f32 %v5397_v34, %v5396_v33  ;;  %v5514_v6 = vpop.f32.mrf.mxu0  ;;  %v7790_v24 = vsel %vm768_vm0, %v2523_v43, %v2527_v17 }
 0x16f   : > { %v5399_v63 = vpop.f32.mrf.mxu1  ;;  %8664 = vst [vmem:[#allocation68_spill] sm:$0xff] %v7790_v24 }
 0x170   : > { %v1641_v55 = vadd.f32 %v5398_v50, %v7624_v8  ;;  %v5515_v52 = vpop.f32.mrf.mxu0 }
 0x171   : > { %2797 = vmatmul.mubr.bf16.gmra.mxu0 %v8662_v5  ;;  %v5400_v37 = vpop.f32.mrf.mxu1  ;;  %v2510_v5 = vrot.slane %v2508_v57, 1  ;;  %v5516_v48 = vadd.f32 %v5515_v52, %v5514_v6  ;;  %v2515_v57 = vrot.slane %v2513_v3, 1 }
 0x172   : > { %2804 = vmatprep.mubr.bf16.mxu0 %v8663_v19  ;;  %v2506_v19 = vshrl.u32 %v7768_v20, 16  ;;  %v7787_v16 = vadd.f32 %v5510_v23, %v1641_v55  ;;  %v5401_v33 = vadd.f32 %v5400_v37, %v5399_v63  ;;  %v5517_v41 = vpop.f32.mrf.mxu0  ;;  %v7798_v55 = vld [vmem:[%s6699_s11 + $0xb4] sm:$0xff]  }
 0x173   : > { %2449 = vmatmul.mubr.bf16.gmra.mxu1 %v7470_v36  ;;  %v5402_v36 = vpop.f32.mrf.mxu1 }
 0x174   : > { %2456 = vmatprep.mubr.bf16.mxu1 %v7498_v51  ;;  %v1646_v8 = vadd.f32 %v5401_v33, %v7663_v10  ;;  %v2511_v34 = vor.u32 %v2510_v5, %v2506_v19  ;;  %v5518_v50 = vpop.f32.mrf.mxu0 }
 0x175   : > { %v5403_v51 = vpop.f32.mrf.mxu1  ;;  %v5519_v17 = vadd.f32 %v5518_v50, %v5517_v41  ;;  %v6473_v50 = vld [vmem:[%s8480_s2 + $0x438] sm:$0xff]  }
 0x176   : > { %v7795_v23 = vadd.f32 %v5513_v26, %v1646_v8  ;;  %v5404_v63 = vadd.f32 %v5403_v51, %v5402_v36  ;;  %v5520_v43 = vpop.f32.mrf.mxu0  ;;  %v7804_v37 = vsel %vm768_vm0, %v2511_v34, %v2515_v57 }
 0x177   : > { %v5405_v14 = vpop.f32.mrf.mxu1  ;;  %8665 = vst [vmem:[#allocation69_spill] sm:$0xff] %v7804_v37 }
 0x178   : > { %v1649_v10 = vadd.f32 %v5404_v63, %v7676_v9  ;;  %v5521_v26 = vpop.f32.mrf.mxu0 }
 0x179   : > { %2805 = vmatmul.mubr.bf16.gmra.mxu0 %v7120_v29  ;;  %v5406_v6 = vpop.f32.mrf.mxu1  ;;  %v5522_v33 = vadd.f32 %v5521_v26, %v5520_v43  ;;  %v6553_v26 = vld [vmem:[%s6699_s11 + $0x18] sm:$0xff]   ;;  %v6556_v29 = vld [vmem:[%s6682_s28 + $0x6c] sm:$0xff]  }
 0x17a   : > { %2812 = vmatprep.mubr.bf16.mxu0 %v7790_v24  ;;  %v7806_v19 = vadd.f32 %v5516_v48, %v1649_v10  ;;  %v5407_v5 = vadd.f32 %v5406_v6, %v5405_v14  ;;  %v5523_v36 = vpop.f32.mrf.mxu0  ;;  %v6476_v10 = vld [vmem:[%s8480_s2 + $0x470] sm:$0xff]  }
 0x17b   : > { %2457 = vmatmul.mubr.bf16.gmra.mxu1 %v7798_v55  ;;  %v5408_v3 = vpop.f32.mrf.mxu1 }
 0x17c   : > { %2464 = vmatprep.mubr.bf16.mxu1 %v7752_v46  ;;  %v1654_v52 = vadd.f32 %v5407_v5, %v7690_v32  ;;  %v5524_v51 = vpop.f32.mrf.mxu0 }
 0x17d   : > { %v5409_v8 = vpop.f32.mrf.mxu1  ;;  %v5525_v48 = vadd.f32 %v5524_v51, %v5523_v36 }
 0x17e   : > { %v7811_v9 = vadd.f32 %v5519_v17, %v1654_v52  ;;  %v5410_v41 = vadd.f32 %v5409_v8, %v5408_v3  ;;  %v5526_v63 = vpop.f32.mrf.mxu0  ;;  %v6477_v52 = vld [vmem:[%s8480_s2 + $0x430] sm:$0xff]  }
 0x17f   : > { %v5411_v34 = vpop.f32.mrf.mxu1 }
 0x180   : > { %v1657_v57 = vadd.f32 %v5410_v41, %v7695_v59  ;;  %v5527_v17 = vpop.f32.mrf.mxu0  ;;  %v6480_v41 = vld [vmem:[%s8480_s2 + $0x468] sm:$0xff]  }
 0x181   : > { %2813 = vmatmul.mubr.bf16.gmra.mxu0 %v7804_v37  ;;  %v5412_v32 = vpop.f32.mrf.mxu1  ;;  %v5528_v6 = vadd.f32 %v5527_v17, %v5526_v63  ;;  %v6555_v37 = vld [vmem:[%s6699_s11 + $0x60] sm:$0xff]  }
 0x182   : > { %3344 = vmatprep.mubr.bf16.mxu0 %v7538_v28  ;;  %v7819_v28 = vadd.f32 %v5522_v33, %v1657_v57  ;;  %v5413_v14 = vadd.f32 %v5412_v32, %v5411_v34  ;;  %v5529_v5 = vpop.f32.mrf.mxu0  ;;  %v6474_v33 = vld [vmem:[%s8480_s2 + $0x3f0] sm:$0xff]   ;;  %v6478_v32 = vld [vmem:[%s8480_s2 + $0x3e8] sm:$0xff]  }
 0x183   : > { %2465 = vmatmul.mubr.bf16.gmra.mxu1 %v7768_v20  ;;  %v5414_v43 = vpop.f32.mrf.mxu1 }
 0x184   : > { %3022 = vmatprep.mubr.bf16.mxu1 %v7135_v40  ;;  %v1662_v59 = vadd.f32 %v5413_v14, %v7708_v53  ;;  %v6471_v40 = vld [vmem:[%s8480_s2 + $0x3b8] sm:$0xff]   ;;  %v5530_v8 = vpop.f32.mrf.mxu0 }
 0x185   : > { %v5415_v3 = vpop.f32.mrf.mxu1 }
 0x186   : > { %v7836_v53 = vadd.f32 %v5525_v48, %v1662_v59  ;;  %v5416_v36 = vadd.f32 %v5415_v3, %v5414_v43  ;;  %v5532_v57 = vpop.f32.mrf.mxu0  ;;  %v6475_v48 = vld [vmem:[%s8480_s2 + $0x3b0] sm:$0xff]   ;;  %v6484_v43 = vld [vmem:[%s8480_s2 + $0x460] sm:$0xff]  }
 0x187   : > { %v5417_v51 = vpop.f32.mrf.mxu1 }
 0x188   : > { %v1665_v34 = vadd.f32 %v5416_v36, %v7713_v27  ;;  %v5533_v14 = vpop.f32.mrf.mxu0  ;;  %v6481_v27 = vld [vmem:[%s8480_s2 + $0x428] sm:$0xff]  }
 0x189   : > { %3345 = vmatmul.mubr.bf16.vlgmr.msra.gmra.mxu0 %v6553_v26  ;;  %v5418_v63 = vpop.f32.mrf.mxu1 }
 0x18a   : > { %6138 = vmatpush3.bf16.msra.mxu0 %v6473_v50  ;;  %3352 = vmatprep.mubr.bf16.mxu0 %v7575_v25  ;;  %v5531_v25 = vadd.f32 %v5530_v8, %v5529_v5  ;;  %v7850_v50 = vadd.f32 %v5528_v6, %v1665_v34  ;;  %v5535_v5 = vpop.f32.mrf.mxu0  ;;  %v6479_v6 = vld [vmem:[%s8480_s2 + $0x3a8] sm:$0xff]   ;;  %v6486_v34 = vld [vmem:[%s8480_s2 + $0x3d8] sm:$0xff]  }
 0x18b   : > { %6139 = vmatprep.subr.bf16.mxu0 %v6476_v10  ;;  %3023 = vmatmul.mubr.bf16.vlgmr.msra.gmra.mxu1 %v7166_v18  ;;  %v5419_v18 = vadd.f32 %v5418_v63, %v5417_v51  ;;  %v5420_v17 = vpop.f32.mrf.mxu1  ;;  %v5534_v10 = vadd.f32 %v5533_v14, %v5532_v57  ;;  %v6483_v51 = vld [vmem:[%s8480_s2 + $0x3a0] sm:$0xff]   ;;  %v6492_v14 = vld [vmem:[%s8480_s2 + $0x450] sm:$0xff]  }
 0x18c   : > { %6026 = vmatpush3.bf16.msra.mxu1 %v6471_v40  ;;  %3030 = vmatprep.mubr.bf16.mxu1 %v7172_v12  ;;  %v6482_v40 = vld [vmem:[%s8480_s2 + $0x3e0] sm:$0xff]  }
 0x18d   : > { %6027 = vmatprep.subr.bf16.mxu1 %v6474_v33  ;;  %v1670_v59 = vadd.f32 %v5419_v18, %v7448_v62  ;;  %v5421_v26 = vpop.f32.mrf.mxu1  ;;  %v5536_v62 = vpop.f32.mrf.mxu0 }
 0x18e   : > { %6140 = vmatpush3.bf16.msra.mxu0 %v6477_v52  ;;  %v5422_v33 = vadd.f32 %v5421_v26, %v5420_v17  ;;  %v5537_v36 = vadd.f32 %v5536_v62, %v5535_v5 }
 0x18f   : > { %6141 = vmatprep.subr.bf16.mxu0 %v6480_v41  ;;  %v7867_v3 = vadd.f32 %v5531_v25, %v1670_v59  ;;  %v5423_v52 = vpop.f32.mrf.mxu1  ;;  %v5538_v41 = vpop.f32.mrf.mxu0  ;;  %v6490_v59 = vld [vmem:[%s8480_s2 + $0x3d0] sm:$0xff]  }
 0x190   : > { %6028 = vmatpush3.bf16.msra.mxu1 %v6475_v48  ;;  %v1673_v8 = vadd.f32 %v5422_v33, %v7462_v15  ;;  %v6489_v15 = vld [vmem:[%s8480_s2 + $0x418] sm:$0xff]  }
 0x191   : > { %3353 = vmatmul.mubr.bf16.gmra.mxu0 %v7606_v7  ;;  %6029 = vmatprep.subr.bf16.mxu1 %v6478_v32  ;;  %v6485_v7 = vld [vmem:[%s8480_s2 + $0x420] sm:$0xff]   ;;  %v5424_v25 = vpop.f32.mrf.mxu1  ;;  %v5539_v63 = vpop.f32.mrf.mxu0 }
 0x192   : > { %3360 = vmatprep.mubr.bf16.mxu0 %v7613_v49  ;;  %6142 = vmatpush3.bf16.msra.mxu0 %v6481_v27  ;;  %v6488_v49 = vld [vmem:[%s8480_s2 + $0x458] sm:$0xff]   ;;  %v7884_v57 = vadd.f32 %v5534_v10, %v1673_v8  ;;  %v5425_v48 = vadd.f32 %v5424_v25, %v5423_v52  ;;  %v5540_v18 = vadd.f32 %v5539_v63, %v5538_v41 }
 0x193   : > { %3031 = vmatmul.mubr.bf16.gmra.mxu1 %v7207_v22  ;;  %6143 = vmatprep.subr.bf16.mxu0 %v6484_v43  ;;  %v5426_v32 = vpop.f32.mrf.mxu1  ;;  %v5541_v17 = vpop.f32.mrf.mxu0  ;;  %v6487_v10 = vld [vmem:[%s8480_s2 + $0x398] sm:$0xff]  }
 0x194   : > { %3038 = vmatprep.mubr.bf16.mxu1 %v7213_v4  ;;  %6030 = vmatpush3.bf16.msra.mxu1 %v6479_v6  ;;  %v1678_v27 = vadd.f32 %v5425_v48, %v7483_v13 }
 0x195   : > { %6031 = vmatprep.subr.bf16.mxu1 %v6482_v40  ;;  %v5427_v43 = vpop.f32.mrf.mxu1  ;;  %v5542_v13 = vpop.f32.mrf.mxu0 }
 0x196   : > { %6144 = vmatpush3.bf16.msra.mxu0 %v6485_v7  ;;  %v7901_v5 = vadd.f32 %v5537_v36, %v1678_v27  ;;  %v5428_v6 = vadd.f32 %v5427_v43, %v5426_v32  ;;  %v5543_v40 = vadd.f32 %v5542_v13, %v5541_v17  ;;  %v6491_v7 = vld [vmem:[%s8480_s2 + $0x390] sm:$0xff]   ;;  %v6494_v36 = vld [vmem:[%s8480_s2 + $0x3c8] sm:$0xff]   ;;  %v6498_v27 = vld [vmem:[%s8480_s2 + $0x3c0] sm:$0xff]  }
 0x197   : > { %6145 = vmatprep.subr.bf16.mxu0 %v6488_v49  ;;  %v5429_v26 = vpop.f32.mrf.mxu1  ;;  %v5544_v62 = vpop.f32.mrf.mxu0  ;;  %v6495_v32 = vld [vmem:[%s8480_s2 + $0x388] sm:$0xff]   ;;  %v6501_v43 = vld [vmem:[%s8480_s2 + $0x400] sm:$0xff]  }
 0x198   : > { %6032 = vmatpush3.bf16.msra.mxu1 %v6483_v51  ;;  %v1681_v33 = vadd.f32 %v5428_v6, %v7494_v1  ;;  %v6497_v1 = vld [vmem:[%s8480_s2 + $0x408] sm:$0xff]   ;;  %v8668_v6 = vld [vmem:[#allocation30_spill] sm:$0xff] }
 0x199   : > { %3361 = vmatmul.mubr.bf16.gmra.mxu0 %v7646_v45  ;;  %6033 = vmatprep.subr.bf16.mxu1 %v6486_v34  ;;  %v6493_v45 = vld [vmem:[%s8480_s2 + $0x410] sm:$0xff]   ;;  %v5430_v52 = vpop.f32.mrf.mxu1  ;;  %v5545_v41 = vpop.f32.mrf.mxu0  ;;  %v6500_v34 = vld [vmem:[%s8480_s2 + $0x440] sm:$0xff]  }
 0x19a   : > { %3368 = vmatprep.mubr.bf16.mxu0 %v7653_v61  ;;  %6146 = vmatpush3.bf16.msra.mxu0 %v6489_v15  ;;  %v6496_v61 = vld [vmem:[%s8480_s2 + $0x448] sm:$0xff]   ;;  %v7918_v49 = vadd.f32 %v5540_v18, %v1681_v33  ;;  %v5431_v8 = vadd.f32 %v5430_v52, %v5429_v26  ;;  %v5546_v25 = vadd.f32 %v5545_v41, %v5544_v62  ;;  %v8666_v15 = vld [vmem:[#allocation58_spill] sm:$0xff] }
 0x19b   : > { %3039 = vmatmul.mubr.bf16.gmra.mxu1 %v7245_v56  ;;  %6147 = vmatprep.subr.bf16.mxu0 %v6492_v14  ;;  %v5432_v51 = vpop.f32.mrf.mxu1  ;;  %v5547_v63 = vpop.f32.mrf.mxu0  ;;  %v8667_v14 = vld [vmem:[#allocation60_spill] sm:$0xff]  ;;  %v8670_v33 = vld [vmem:[#allocation31_spill] sm:$0xff] }
 0x19c   : > { %3046 = vmatprep.mubr.bf16.mxu1 %v7251_v54  ;;  %6034 = vmatpush3.bf16.msra.mxu1 %v6487_v10  ;;  %v1686_v48 = vadd.f32 %v5431_v8, %v7508_v38 }
 0x19d   : > { %6035 = vmatprep.subr.bf16.mxu1 %v6490_v59  ;;  %v5433_v18 = vpop.f32.mrf.mxu1  ;;  %v5548_v38 = vpop.f32.mrf.mxu0 }
 0x19e   : > { %6148 = vmatpush3.bf16.msra.mxu0 %v6493_v45  ;;  %v7935_v17 = vadd.f32 %v5543_v40, %v1686_v48  ;;  %v5434_v10 = vadd.f32 %v5433_v18, %v5432_v51  ;;  %v5549_v13 = vadd.f32 %v5548_v38, %v5547_v63  ;;  %v8669_v45 = vld [vmem:[#allocation53_spill] sm:$0xff]  ;;  %v6499_v40 = vld [vmem:[%s8480_s2 + $0x380] sm:$0xff]   ;;  %v8675_v38 = vld [vmem:[#allocation55_spill] sm:$0xff] }
 0x19f   : > { %6149 = vmatprep.subr.bf16.mxu0 %v6496_v61  ;;  %v5435_v59 = vpop.f32.mrf.mxu1  ;;  %v5550_v61 = vpop.f32.mrf.mxu0  ;;  %v8672_v48 = vld [vmem:[#allocation62_spill] sm:$0xff] }
 0x1a0   : > { %6036 = vmatpush3.bf16.msra.mxu1 %v6491_v7  ;;  %v1689_v26 = vadd.f32 %v5434_v10, %v8669_v45  ;;  %v8676_v45 = vld [vmem:[#allocation33_spill] sm:$0xff] }
 0x1a1   : > { %3369 = vmatmul.mubr.bf16.gmra.mxu0 %v8666_v15  ;;  %6037 = vmatprep.subr.bf16.mxu1 %v6494_v36  ;;  %v5436_v62 = vpop.f32.mrf.mxu1  ;;  %v5551_v36 = vpop.f32.mrf.mxu0  ;;  %v8673_v15 = vld [vmem:[#allocation63_spill] sm:$0xff] }
 0x1a2   : > { %3376 = vmatprep.mubr.bf16.mxu0 %v8667_v14  ;;  %6150 = vmatpush3.bf16.msra.mxu0 %v6497_v1  ;;  %v7946_v7 = vadd.f32 %v5546_v25, %v1689_v26  ;;  %v5437_v52 = vadd.f32 %v5436_v62, %v5435_v59  ;;  %v5552_v41 = vadd.f32 %v5551_v36, %v5550_v61  ;;  %v8671_v1 = vld [vmem:[#allocation54_spill] sm:$0xff]  ;;  %v8677_v36 = vld [vmem:[#allocation56_spill] sm:$0xff] }
 0x1a3   : > { %3047 = vmatmul.mubr.bf16.gmra.mxu1 %v8668_v6  ;;  %6151 = vmatprep.subr.bf16.mxu0 %v6500_v34  ;;  %v5438_v8 = vpop.f32.mrf.mxu1  ;;  %v5553_v34 = vpop.f32.mrf.mxu0 }
 0x1a4   : > { %3054 = vmatprep.mubr.bf16.mxu1 %v8670_v33  ;;  %6038 = vmatpush3.bf16.msra.mxu1 %v6495_v32  ;;  %v1694_v51 = vadd.f32 %v5437_v52, %v8671_v1 }
 0x1a5   : > { %6039 = vmatprep.subr.bf16.mxu1 %v6498_v27  ;;  %v5439_v63 = vpop.f32.mrf.mxu1  ;;  %v5554_v14 = vpop.f32.mrf.mxu0  ;;  %v8674_v27 = vld [vmem:[#allocation32_spill] sm:$0xff] }
 0x1a6   : > { %6152 = vmatpush3.bf16.msra.mxu0 %v6501_v43  ;;  %v7951_v32 = vadd.f32 %v5549_v13, %v1694_v51  ;;  %v5440_v18 = vadd.f32 %v5439_v63, %v5438_v8  ;;  %v5555_v10 = vadd.f32 %v5554_v14, %v5553_v34  ;;  %v8678_v51 = vld [vmem:[#allocation65_spill] sm:$0xff]  ;;  %v6554_v63 = vld [vmem:[%s6682_s28 + $0x60] sm:$0xff]  }
 0x1a7   : > { %v5441_v25 = vpop.f32.mrf.mxu1  ;;  %v5556_v59 = vpop.f32.mrf.mxu0 }
 0x1a8   : > { %6040 = vmatpush3.bf16.msra.mxu1 %v6499_v40  ;;  %v1697_v43 = vadd.f32 %v5440_v18, %v8675_v38  ;;  %v8680_v38 = vld [vmem:[#allocation57_spill] sm:$0xff] }
 0x1a9   : > { %3377 = vmatmul.mubr.bf16.gmra.mxu0 %v8672_v48  ;;  %v5442_v26 = vpop.f32.mrf.mxu1  ;;  %v5557_v62 = vpop.f32.mrf.mxu0 }
 0x1aa   : > { %3384 = vmatprep.mubr.bf16.mxu0 %v8673_v15  ;;  %v7956_v61 = vadd.f32 %v5552_v41, %v1697_v43  ;;  %v5443_v40 = vadd.f32 %v5442_v26, %v5441_v25  ;;  %v5558_v13 = vadd.f32 %v5557_v62, %v5556_v59  ;;  %v8679_v41 = vld [vmem:[#allocation34_spill] sm:$0xff]  ;;  %v8681_v26 = vld [vmem:[#allocation35_spill] sm:$0xff] }
 0x1ab   : > { %3055 = vmatmul.mubr.bf16.gmra.mxu1 %v8674_v27  ;;  %v5444_v52 = vpop.f32.mrf.mxu1 }
 0x1ac   : > { %3062 = vmatprep.mubr.bf16.mxu1 %v8676_v45  ;;  %v1702_v8 = vadd.f32 %v5443_v40, %v8677_v36 }
 0x1ad   : > { %v5445_v48 = vpop.f32.mrf.mxu1 }
 0x1ae   : > { %v7961_v34 = vadd.f32 %v5555_v10, %v1702_v8  ;;  %v5446_v15 = vadd.f32 %v5445_v48, %v5444_v52  ;;  %v8683_v52 = vld [vmem:[#allocation59_spill] sm:$0xff] }
 0x1af   : > { %v5447_v14 = vpop.f32.mrf.mxu1 }
 0x1b0   : > { %v1705_v43 = vadd.f32 %v5446_v15, %v8680_v38 }
 0x1b1   : > { %v5559_v1 = vpop.f32.mrf.mxu0  ;;  %3385 = vmatmul.mubr.bf16.gmra.mxu0 %v8678_v51  ;;  %v5448_v40 = vpop.f32.mrf.mxu1 }
 0x1b2   : > { %3392 = vmatprep.mubr.bf16.mxu0 %v6554_v63  ;;  %v7966_v62 = vadd.f32 %v5558_v13, %v1705_v43  ;;  %v5449_v36 = vadd.f32 %v5448_v40, %v5447_v14  ;;  %v8685_v13 = vld [vmem:[#allocation36_spill] sm:$0xff]  ;;  %v8686_v43 = vld [vmem:[#allocation61_spill] sm:$0xff] }
 0x1b3   : > { %v5560_v18 = vpop.f32.mrf.mxu0  ;;  %3063 = vmatmul.mubr.bf16.gmra.mxu1 %v8679_v41  ;;  %v5450_v10 = vpop.f32.mrf.mxu1 }
 0x1b4   : > { %v5561_v25 = vadd.f32 %v5560_v18, %v5559_v1  ;;  %3070 = vmatprep.mubr.bf16.mxu1 %v8681_v26  ;;  %8682 = vst [vmem:[#allocation58_spill] sm:$0xff] %v7966_v62  ;;  %v1710_v48 = vadd.f32 %v5449_v36, %v8683_v52  ;;  %v8687_v36 = vld [vmem:[#allocation37_spill] sm:$0xff] }
 0x1b5   : > { %v5562_v59 = vpop.f32.mrf.mxu0  ;;  %v5451_v24 = vpop.f32.mrf.mxu1 }
 0x1b6   : > { %v7971_v1 = vadd.f32 %v5561_v25, %v1710_v48  ;;  %v5452_v15 = vadd.f32 %v5451_v24, %v5450_v10  ;;  %v8689_v24 = vld [vmem:[#allocation64_spill] sm:$0xff] }
 0x1b7   : > { %v5563_v51 = vpop.f32.mrf.mxu0  ;;  %v5453_v38 = vpop.f32.mrf.mxu1 }
 0x1b8   : > { %v5564_v8 = vadd.f32 %v5563_v51, %v5562_v59  ;;  %8684 = vst [vmem:[#allocation60_spill] sm:$0xff] %v7971_v1  ;;  %v1713_v59 = vadd.f32 %v5452_v15, %v8686_v43  ;;  %v6557_v1 = vld [vmem:[%s6699_s11 + $0x6c] sm:$0xff]  }
 0x1b9   : > { %v5565_v63 = vpop.f32.mrf.mxu0  ;;  %3393 = vmatmul.mubr.bf16.gmra.mxu0 %v6555_v37  ;;  %v5454_v51 = vpop.f32.mrf.mxu1 }
 0x1ba   : > { %3400 = vmatprep.mubr.bf16.mxu0 %v6556_v29  ;;  %v7976_v37 = vadd.f32 %v5564_v8, %v1713_v59  ;;  %v5455_v52 = vadd.f32 %v5454_v51, %v5453_v38  ;;  %v8691_v8 = vld [vmem:[#allocation38_spill] sm:$0xff] }
 0x1bb   : > { %v5566_v18 = vpop.f32.mrf.mxu0  ;;  %3071 = vmatmul.mubr.bf16.gmra.mxu1 %v8685_v13  ;;  %v5456_v25 = vpop.f32.mrf.mxu1  ;;  %v6558_v13 = vld [vmem:[%s6682_s28 + $0x78] sm:$0xff]   ;;  %v8692_v59 = vld [vmem:[#allocation66_spill] sm:$0xff] }
 0x1bc   : > { %v5567_v14 = vadd.f32 %v5566_v18, %v5565_v63  ;;  %3078 = vmatprep.mubr.bf16.mxu1 %v8687_v36  ;;  %8688 = vst [vmem:[#allocation30_spill] sm:$0xff] %v7976_v37  ;;  %v1718_v10 = vadd.f32 %v5455_v52, %v8689_v24  ;;  %v8693_v52 = vld [vmem:[#allocation39_spill] sm:$0xff]  ;;  %v6559_v37 = vld [vmem:[%s6699_s11 + $0x78] sm:$0xff]  }
 0x1bd   : > { %v5568_v40 = vpop.f32.mrf.mxu0  ;;  %v5457_v62 = vpop.f32.mrf.mxu1  ;;  %v6560_v36 = vld [vmem:[%s6682_s28 + $0x84] sm:$0xff]  }
 0x1be   : > { %v7981_v63 = vadd.f32 %v5567_v14, %v1718_v10  ;;  %v5458_v15 = vadd.f32 %v5457_v62, %v5456_v25  ;;  %v8695_v62 = vld [vmem:[#allocation67_spill] sm:$0xff] }
 0x1bf   : > { %v5569_v29 = vpop.f32.mrf.mxu0  ;;  %v5459_v43 = vpop.f32.mrf.mxu1 }
 0x1c0   : > { %v5570_v48 = vadd.f32 %v5569_v29, %v5568_v40  ;;  %8690 = vst [vmem:[#allocation53_spill] sm:$0xff] %v7981_v63  ;;  %v1721_v40 = vadd.f32 %v5458_v15, %v8692_v59 }
 0x1c1   : > { %v5571_v39 = vpop.f32.mrf.mxu0  ;;  %3401 = vmatmul.mubr.bf16.gmra.mxu0 %v6557_v1  ;;  %v5460_v29 = vpop.f32.mrf.mxu1 }
 0x1c2   : > { %3408 = vmatprep.mubr.bf16.mxu0 %v6558_v13  ;;  %v7986_v1 = vadd.f32 %v5570_v48, %v1721_v40  ;;  %v5461_v24 = vadd.f32 %v5460_v29, %v5459_v43  ;;  %v8697_v48 = vld [vmem:[#allocation40_spill] sm:$0xff]  ;;  %v8698_v29 = vld [vmem:[#allocation41_spill] sm:$0xff] }
 0x1c3   : > { %v5572_v18 = vpop.f32.mrf.mxu0  ;;  %3079 = vmatmul.mubr.bf16.gmra.mxu1 %v8691_v8  ;;  %v5462_v14 = vpop.f32.mrf.mxu1 }
 0x1c4   : > { %v5573_v38 = vadd.f32 %v5572_v18, %v5571_v39  ;;  %3086 = vmatprep.mubr.bf16.mxu1 %v8693_v52  ;;  %8694 = vst [vmem:[#allocation31_spill] sm:$0xff] %v7986_v1  ;;  %v1726_v25 = vadd.f32 %v5461_v24, %v8695_v62  ;;  %v6562_v1 = vld [vmem:[%s6682_s28 + $0x90] sm:$0xff]  }
 0x1c5   : > { %v5574_v51 = vpop.f32.mrf.mxu0  ;;  %v5463_v8 = vpop.f32.mrf.mxu1 }
 0x1c6   : > { %v7991_v39 = vadd.f32 %v5573_v38, %v1726_v25  ;;  %v5464_v15 = vadd.f32 %v5463_v8, %v5462_v14  ;;  %v6561_v25 = vld [vmem:[%s6699_s11 + $0x84] sm:$0xff]  }
 0x1c7   : > { %v5575_v13 = vpop.f32.mrf.mxu0  ;;  %v5593_v59 = vpop.f32.mrf.mxu1 }
 0x1c8   : > { %v5576_v10 = vadd.f32 %v5575_v13, %v5574_v51  ;;  %8696 = vst [vmem:[#allocation54_spill] sm:$0xff] %v7991_v39  ;;  %v1729_v40 = vadd.f32 %v5464_v15, %v7717_v30 }
 0x1c9   : > { %v5705_v63 = vpop.f32.mrf.mxu0  ;;  %3409 = vmatmul.mubr.bf16.gmra.mxu0 %v6559_v37  ;;  %v5594_v24 = vpop.f32.mrf.mxu1 }
 0x1ca   : > { %3416 = vmatprep.mubr.bf16.mxu0 %v6560_v36  ;;  %v7996_v37 = vadd.f32 %v5576_v10, %v1729_v40  ;;  %v5595_v13 = vadd.f32 %v5594_v24, %v5593_v59  ;;  %v8701_v10 = vld [vmem:[#allocation42_spill] sm:$0xff] }
 0x1cb   : > { %v5706_v18 = vpop.f32.mrf.mxu0  ;;  %3087 = vmatmul.mubr.bf16.gmra.mxu1 %v8697_v48  ;;  %v5596_v38 = vpop.f32.mrf.mxu1 }
 0x1cc   : > { %v5707_v43 = vadd.f32 %v5706_v18, %v5705_v63  ;;  %3094 = vmatprep.mubr.bf16.mxu1 %v8698_v29  ;;  %8699 = vst [vmem:[#allocation62_spill] sm:$0xff] %v7996_v37  ;;  %v2473_v8 = vadd.f32 %v5595_v13, %v7724_v58  ;;  %v8702_v58 = vld [vmem:[#allocation43_spill] sm:$0xff]  ;;  %v6564_v37 = vld [vmem:[%s6682_s28 + $0x9c] sm:$0xff]  }
 0x1cd   : > { %v5708_v51 = vpop.f32.mrf.mxu0  ;;  %v5597_v39 = vpop.f32.mrf.mxu1 }
 0x1ce   : > { %v8001_v63 = vadd.f32 %v5707_v43, %v2473_v8  ;;  %v5598_v30 = vadd.f32 %v5597_v39, %v5596_v38 }
 0x1cf   : > { %v5709_v36 = vpop.f32.mrf.mxu0  ;;  %v5599_v18 = vpop.f32.mrf.mxu1 }
 0x1d0   : > { %v5710_v62 = vadd.f32 %v5709_v36, %v5708_v51  ;;  %8700 = vst [vmem:[#allocation63_spill] sm:$0xff] %v8001_v63  ;;  %v2474_v40 = vadd.f32 %v5598_v30, %v7729_v0 }
 0x1d1   : > { %v5711_v14 = vpop.f32.mrf.mxu0  ;;  %3417 = vmatmul.mubr.bf16.gmra.mxu0 %v6561_v25  ;;  %v5600_v24 = vpop.f32.mrf.mxu1  ;;  %v6563_v25 = vld [vmem:[%s6699_s11 + $0x90] sm:$0xff]  }
 0x1d2   : > { %3424 = vmatprep.mubr.bf16.mxu0 %v6562_v1  ;;  %v8006_v13 = vadd.f32 %v5710_v62, %v2474_v40  ;;  %v5601_v36 = vadd.f32 %v5600_v24, %v5599_v18  ;;  %v8705_v62 = vld [vmem:[#allocation44_spill] sm:$0xff] }
 0x1d3   : > { %v5712_v15 = vpop.f32.mrf.mxu0  ;;  %3095 = vmatmul.mubr.bf16.gmra.mxu1 %v8701_v10  ;;  %v5602_v43 = vpop.f32.mrf.mxu1 }
 0x1d4   : > { %v5713_v59 = vadd.f32 %v5712_v15, %v5711_v14  ;;  %3102 = vmatprep.mubr.bf16.mxu1 %v8702_v58  ;;  %8703 = vst [vmem:[#allocation32_spill] sm:$0xff] %v8006_v13  ;;  %v2475_v39 = vadd.f32 %v5601_v36, %v7734_v31  ;;  %v8706_v31 = vld [vmem:[#allocation45_spill] sm:$0xff]  ;;  %v6566_v13 = vld [vmem:[%s6682_s28 + $0xa8] sm:$0xff]  }
 0x1d5   : > { %v5714_v51 = vpop.f32.mrf.mxu0  ;;  %v5603_v63 = vpop.f32.mrf.mxu1 }
 0x1d6   : > { %v8011_v14 = vadd.f32 %v5713_v59, %v2475_v39  ;;  %v5604_v0 = vadd.f32 %v5603_v63, %v5602_v43 }
 0x1d7   : > { %v5715_v1 = vpop.f32.mrf.mxu0 }
 0x1d8   : > { %v5716_v8 = vadd.f32 %v5715_v1, %v5714_v51  ;;  %8704 = vst [vmem:[#allocation55_spill] sm:$0xff] %v8011_v14  ;;  %v2476_v40 = vadd.f32 %v5604_v0, %v7739_v2 }
 0x1d9   : > { %v5717_v38 = vpop.f32.mrf.mxu0  ;;  %3425 = vmatmul.mubr.bf16.gmra.mxu0 %v6563_v25  ;;  %v6565_v25 = vld [vmem:[%s6699_s11 + $0x9c] sm:$0xff]  }
 0x1da   : > { %3432 = vmatprep.mubr.bf16.mxu0 %v6564_v37  ;;  %v8016_v36 = vadd.f32 %v5716_v8, %v2476_v40  ;;  %v8709_v8 = vld [vmem:[#allocation46_spill] sm:$0xff] }
 0x1db   : > { %v5718_v30 = vpop.f32.mrf.mxu0  ;;  %v5605_v15 = vpop.f32.mrf.mxu1  ;;  %3103 = vmatmul.mubr.bf16.gmra.mxu1 %v8705_v62 }
 0x1dc   : > { %v5719_v18 = vadd.f32 %v5718_v30, %v5717_v38  ;;  %3110 = vmatprep.mubr.bf16.mxu1 %v8706_v31  ;;  %8707 = vst [vmem:[#allocation33_spill] sm:$0xff] %v8016_v36  ;;  %v6568_v36 = vld [vmem:[%s6682_s28 + $0xb4] sm:$0xff]  }
 0x1dd   : > { %v5720_v51 = vpop.f32.mrf.mxu0  ;;  %v5606_v24 = vpop.f32.mrf.mxu1 }
 0x1de   : > { %v5607_v1 = vadd.f32 %v5606_v24, %v5605_v15 }
 0x1df   : > { %v5721_v37 = vpop.f32.mrf.mxu0  ;;  %v5608_v59 = vpop.f32.mrf.mxu1 }
 0x1e0   : > { %v5722_v39 = vadd.f32 %v5721_v37, %v5720_v51  ;;  %v2477_v63 = vadd.f32 %v5607_v1, %v7744_v60  ;;  %v8710_v60 = vld [vmem:[#allocation47_spill] sm:$0xff] }
 0x1e1   : > { %v5723_v43 = vpop.f32.mrf.mxu0  ;;  %3433 = vmatmul.mubr.bf16.gmra.mxu0 %v6565_v25  ;;  %v5609_v14 = vpop.f32.mrf.mxu1  ;;  %v6567_v25 = vld [vmem:[%s6699_s11 + $0xa8] sm:$0xff]  }
 0x1e2   : > { %3440 = vmatprep.mubr.bf16.mxu0 %v6566_v13  ;;  %v8021_v38 = vadd.f32 %v5719_v18, %v2477_v63  ;;  %v5610_v2 = vadd.f32 %v5609_v14, %v5608_v59 }
 0x1e3   : > { %v5724_v0 = vpop.f32.mrf.mxu0  ;;  %v5611_v30 = vpop.f32.mrf.mxu1  ;;  %3111 = vmatmul.mubr.bf16.gmra.mxu1 %v8709_v8 }
 0x1e4   : > { %8708 = vst [vmem:[#allocation56_spill] sm:$0xff] %v8021_v38  ;;  %v5725_v15 = vadd.f32 %v5724_v0, %v5723_v43  ;;  %v2478_v40 = vadd.f32 %v5610_v2, %v7749_v44  ;;  %3118 = vmatprep.mubr.bf16.mxu1 %v8710_v60  ;;  %v8711_v60 = vld [vmem:[#allocation48_spill] sm:$0xff] }
 0x1e5   : > { %v5726_v51 = vpop.f32.mrf.mxu0  ;;  %v5612_v24 = vpop.f32.mrf.mxu1 }
 0x1e6   : > { %v8026_v1 = vadd.f32 %v5722_v39, %v2478_v40  ;;  %v5613_v37 = vadd.f32 %v5612_v24, %v5611_v30 }
 0x1e7   : > { %v5727_v13 = vpop.f32.mrf.mxu0  ;;  %v5614_v18 = vpop.f32.mrf.mxu1 }
 0x1e8   : > { %v5728_v63 = vadd.f32 %v5727_v13, %v5726_v51  ;;  %v2479_v14 = vadd.f32 %v5613_v37, %v7757_v21  ;;  %v8712_v51 = vld [vmem:[#allocation49_spill] sm:$0xff] }
 0x1e9   : > { %v5729_v59 = vpop.f32.mrf.mxu0  ;;  %3441 = vmatmul.mubr.bf16.gmra.mxu0 %v6567_v25  ;;  %v5615_v38 = vpop.f32.mrf.mxu1 }
 0x1ea   : > { %3448 = vmatprep.mubr.bf16.mxu0 %v6568_v36  ;;  %v8031_v43 = vadd.f32 %v5725_v15, %v2479_v14  ;;  %v5616_v44 = vadd.f32 %v5615_v38, %v5614_v18 }
 0x1eb   : > { %v5730_v2 = vpop.f32.mrf.mxu0  ;;  %v5617_v0 = vpop.f32.mrf.mxu1  ;;  %3119 = vmatmul.mubr.bf16.gmra.mxu1 %v8711_v60 }
 0x1ec   : > { %v5731_v39 = vadd.f32 %v5730_v2, %v5729_v59  ;;  %v2480_v30 = vadd.f32 %v5616_v44, %v7770_v35  ;;  %3126 = vmatprep.mubr.bf16.mxu1 %v8712_v51 }
 0x1ed   : > { %v5732_v40 = vpop.f32.mrf.mxu0  ;;  %v5618_v21 = vpop.f32.mrf.mxu1 }
 0x1ee   : > { %v8036_v24 = vadd.f32 %v5728_v63, %v2480_v30  ;;  %v5619_v37 = vadd.f32 %v5618_v21, %v5617_v0  ;;  %v8713_v63 = vld [vmem:[#allocation50_spill] sm:$0xff]  ;;  %v2856_v21 = vrot.slane %v7752_v46, 1 }
 0x1ef   : > { %v5733_v13 = vpop.f32.mrf.mxu0  ;;  %v5620_v25 = vpop.f32.mrf.mxu1 }
 0x1f0   : > { %v5734_v36 = vadd.f32 %v5733_v13, %v5732_v40  ;;  %v2481_v15 = vadd.f32 %v5619_v37, %v7780_v42  ;;  %v8714_v40 = vld [vmem:[#allocation51_spill] sm:$0xff] }
 0x1f1   : > { %v5735_v38 = vpop.f32.mrf.mxu0  ;;  %3449 = vmatmul.mubr.bf16.gmra.mxu0 %v7798_v55  ;;  %v5621_v18 = vpop.f32.mrf.mxu1  ;;  %v2857_v55 = vrot.slane %v7760_v11, 1  ;;  %v8049_v37 = vld [vmem:[%s6682_s28 + $0xcc] sm:$0xff]  }
 0x1f2   : > { %3456 = vmatprep.mubr.bf16.mxu0 %v7752_v46  ;;  %v8041_v35 = vadd.f32 %v5731_v39, %v2481_v15  ;;  %v5622_v14 = vadd.f32 %v5621_v18, %v5620_v25 }
 0x1f3   : > { %v5736_v59 = vpop.f32.mrf.mxu0  ;;  %v5623_v44 = vpop.f32.mrf.mxu1  ;;  %3127 = vmatmul.mubr.bf16.gmra.mxu1 %v8713_v63 }
 0x1f4   : > { %v5737_v2 = vadd.f32 %v5736_v59, %v5735_v38  ;;  %v2482_v0 = vadd.f32 %v5622_v14, %v7787_v16  ;;  %3134 = vmatprep.mubr.bf16.mxu1 %v8714_v40  ;;  %v8056_v14 = vsel %vm1732_vm1, %v2856_v21, %v2857_v55  ;;  %v2854_v21 = vrot.slane %v7777_v47, 1  ;;  %v8067_v55 = vld [vmem:[%s6699_s11 + $0xcc] sm:$0xff]  }
 0x1f5   : > { %v5738_v30 = vpop.f32.mrf.mxu0  ;;  %v5624_v42 = vpop.f32.mrf.mxu1 }
 0x1f6   : > { %v8051_v39 = vadd.f32 %v5734_v36, %v2482_v0  ;;  %v5625_v13 = vadd.f32 %v5624_v42, %v5623_v44  ;;  %v8716_v0 = vld [vmem:[#allocation52_spill] sm:$0xff] }
 0x1f7   : > { %v5739_v25 = vpop.f32.mrf.mxu0  ;;  %v5626_v15 = vpop.f32.mrf.mxu1 }
 0x1f8   : > { %v5740_v18 = vadd.f32 %v5739_v25, %v5738_v30  ;;  %v2483_v38 = vadd.f32 %v5625_v13, %v7795_v23  ;;  %v2853_v13 = vrot.slane %v7768_v20, 1 }
 0x1f9   : > { %v5741_v59 = vpop.f32.mrf.mxu0  ;;  %3457 = vmatmul.mubr.bf16.gmra.mxu0 %v7768_v20  ;;  %v5627_v16 = vpop.f32.mrf.mxu1 }
 0x1fa   : > { %3464 = vmatprep.mubr.bf16.mxu0 %v8049_v37  ;;  %v8059_v46 = vadd.f32 %v5737_v2, %v2483_v38  ;;  %v5628_v11 = vadd.f32 %v5627_v16, %v5626_v15 }
 0x1fb   : > { %v5742_v36 = vpop.f32.mrf.mxu0  ;;  %v5629_v44 = vpop.f32.mrf.mxu1  ;;  %3135 = vmatmul.mubr.bf16.gmra.mxu1 %v8716_v0 }
 0x1fc   : > { %8715 = vst [vmem:[#allocation65_spill] sm:$0xff] %v8059_v46  ;;  %v5743_v30 = vadd.f32 %v5742_v36, %v5741_v59  ;;  %v2484_v23 = vadd.f32 %v5628_v11, %v7806_v19  ;;  %3142 = vmatprep.mubr.bf16.mxu1 %v8056_v14  ;;  %v8073_v19 = vsel %vm1732_vm1, %v2853_v13, %v2854_v21 }
 0x1fd   : > { %v5744_v42 = vpop.f32.mrf.mxu0  ;;  %v5630_v25 = vpop.f32.mrf.mxu1 }
 0x1fe   : > { %v8069_v2 = vadd.f32 %v5740_v18, %v2484_v23  ;;  %v5631_v15 = vadd.f32 %v5630_v25, %v5629_v44  ;;  %v8718_v25 = vld [vmem:[#allocation6_spill] sm:$0xff] }
 0x1ff   : > { %v5745_v38 = vpop.f32.mrf.mxu0  ;;  %v5632_v16 = vpop.f32.mrf.mxu1 }
 0x200   : > { %8717 = vst [vmem:[#allocation34_spill] sm:$0xff] %v8069_v2  ;;  %v5746_v46 = vadd.f32 %v5745_v38, %v5744_v42  ;;  %v2485_v59 = vadd.f32 %v5631_v15, %v7811_v9 }
 0x201   : > { %v5747_v36 = vpop.f32.mrf.mxu0  ;;  %3465 = vmatmul.mubr.bf16.gmra.mxu0 %v8067_v55  ;;  %v5633_v20 = vpop.f32.mrf.mxu1 }
 0x202   : > { %4022 = vmatprep.mubr.bf16.mxu0 %v7172_v12  ;;  %v8077_v47 = vadd.f32 %v5743_v30, %v2485_v59  ;;  %v5634_v11 = vadd.f32 %v5633_v20, %v5632_v16 }
 0x203   : > { %v5748_v18 = vpop.f32.mrf.mxu0  ;;  %v5635_v23 = vpop.f32.mrf.mxu1  ;;  %3143 = vmatmul.mubr.bf16.gmra.mxu1 %v8073_v19 }
 0x204   : > { %v5749_v44 = vadd.f32 %v5748_v18, %v5747_v36  ;;  %v2486_v42 = vadd.f32 %v5634_v11, %v7819_v28  ;;  %3692 = vmatprep.mubr.bf16.mxu1 %v8718_v25  ;;  %v8719_v18 = vld [vmem:[#allocation8_spill] sm:$0xff] }
 0x205   : > { %v5750_v9 = vpop.f32.mrf.mxu0  ;;  %v5636_v13 = vpop.f32.mrf.mxu1 }
 0x206   : > { %v8082_v21 = vadd.f32 %v5746_v46, %v2486_v42  ;;  %v5637_v15 = vadd.f32 %v5636_v13, %v5635_v23 }
 0x207   : > { %v5751_v38 = vpop.f32.mrf.mxu0  ;;  %v5638_v2 = vpop.f32.mrf.mxu1 }
 0x208   : > { %v5752_v12 = vadd.f32 %v5751_v38, %v5750_v9  ;;  %v2487_v30 = vadd.f32 %v5637_v15, %v7836_v53  ;;  %v8720_v9 = vld [vmem:[#allocation10_spill] sm:$0xff] }
 0x209   : > { %v5753_v16 = vpop.f32.mrf.mxu0  ;;  %4023 = vmatmul.mubr.bf16.vlgmr.msra.gmra.mxu0 %v7207_v22  ;;  %v5639_v59 = vpop.f32.mrf.mxu1 }
 0x20a   : > { %4030 = vmatprep.mubr.bf16.mxu0 %v7213_v4  ;;  %v8087_v36 = vadd.f32 %v5749_v44, %v2487_v30  ;;  %v5640_v28 = vadd.f32 %v5639_v59, %v5638_v2 }
 0x20b   : > { %v5754_v20 = vpop.f32.mrf.mxu0  ;;  %v5641_v11 = vpop.f32.mrf.mxu1  ;;  %3693 = vmatmul.mubr.bf16.vlgmr.msra.gmra.mxu1 %v8719_v18  ;;  %v8722_v18 = vld [vmem:[#allocation14_spill] sm:$0xff] }
 0x20c   : > { %v5755_v46 = vadd.f32 %v5754_v20, %v5753_v16  ;;  %v2488_v23 = vadd.f32 %v5640_v28, %v7850_v50  ;;  %3700 = vmatprep.mubr.bf16.mxu1 %v8720_v9  ;;  %v8721_v28 = vld [vmem:[#allocation12_spill] sm:$0xff] }
 0x20d   : > { %v5756_v42 = vpop.f32.mrf.mxu0  ;;  %v5642_v53 = vpop.f32.mrf.mxu1 }
 0x20e   : > { %v8092_v25 = vadd.f32 %v5752_v12, %v2488_v23  ;;  %v5643_v22 = vadd.f32 %v5642_v53, %v5641_v11 }
 0x20f   : > { %v5757_v13 = vpop.f32.mrf.mxu0  ;;  %v5644_v15 = vpop.f32.mrf.mxu1 }
 0x210   : > { %v5758_v4 = vadd.f32 %v5757_v13, %v5756_v42  ;;  %v2489_v44 = vadd.f32 %v5643_v22, %v7867_v3 }
 0x211   : > { %v5759_v2 = vpop.f32.mrf.mxu0  ;;  %4031 = vmatmul.mubr.bf16.gmra.mxu0 %v7245_v56  ;;  %v5645_v38 = vpop.f32.mrf.mxu1 }
 0x212   : > { %4038 = vmatprep.mubr.bf16.mxu0 %v7251_v54  ;;  %v8097_v30 = vadd.f32 %v5755_v46, %v2489_v44  ;;  %v5646_v50 = vadd.f32 %v5645_v38, %v5644_v15 }
 0x213   : > { %v5760_v16 = vpop.f32.mrf.mxu0  ;;  %v5647_v59 = vpop.f32.mrf.mxu1  ;;  %3701 = vmatmul.mubr.bf16.gmra.mxu1 %v8721_v28 }
 0x214   : > { %v5761_v12 = vadd.f32 %v5760_v16, %v5759_v2  ;;  %v2490_v20 = vadd.f32 %v5646_v50, %v7884_v57  ;;  %3708 = vmatprep.mubr.bf16.mxu1 %v8722_v18  ;;  %v8723_v2 = vld [vmem:[#allocation16_spill] sm:$0xff]  ;;  %v8724_v16 = vld [vmem:[#allocation18_spill] sm:$0xff] }
 0x215   : > { %v5762_v11 = vpop.f32.mrf.mxu0  ;;  %v5648_v3 = vpop.f32.mrf.mxu1 }
 0x216   : > { %v8102_v23 = vadd.f32 %v5758_v4, %v2490_v20  ;;  %v5649_v56 = vadd.f32 %v5648_v3, %v5647_v59 }
 0x217   : > { %v5763_v42 = vpop.f32.mrf.mxu0  ;;  %v5650_v9 = vpop.f32.mrf.mxu1 }
 0x218   : > { %v5764_v54 = vadd.f32 %v5763_v42, %v5762_v11  ;;  %v2491_v46 = vadd.f32 %v5649_v56, %v7901_v5 }
 0x219   : > { %v5765_v53 = vpop.f32.mrf.mxu0  ;;  %4039 = vmatmul.mubr.bf16.gmra.mxu0 %v8668_v6  ;;  %v5651_v22 = vpop.f32.mrf.mxu1 }
 0x21a   : > { %4046 = vmatprep.mubr.bf16.mxu0 %v8670_v33  ;;  %v8107_v13 = vadd.f32 %v5761_v12, %v2491_v46  ;;  %v5652_v57 = vadd.f32 %v5651_v22, %v5650_v9  ;;  %v8725_v9 = vld [vmem:[#allocation20_spill] sm:$0xff]  ;;  %v8726_v22 = vld [vmem:[#allocation22_spill] sm:$0xff] }
 0x21b   : > { %v5766_v15 = vpop.f32.mrf.mxu0  ;;  %v5653_v44 = vpop.f32.mrf.mxu1  ;;  %3709 = vmatmul.mubr.bf16.gmra.mxu1 %v8723_v2 }
 0x21c   : > { %v5767_v4 = vadd.f32 %v5766_v15, %v5765_v53  ;;  %v2492_v38 = vadd.f32 %v5652_v57, %v7918_v49  ;;  %3716 = vmatprep.mubr.bf16.mxu1 %v8724_v16 }
 0x21d   : > { %v5768_v50 = vpop.f32.mrf.mxu0  ;;  %v5654_v5 = vpop.f32.mrf.mxu1 }
 0x21e   : > { %v8112_v59 = vadd.f32 %v5764_v54, %v2492_v38  ;;  %v5655_v6 = vadd.f32 %v5654_v5, %v5653_v44 }
 0x21f   : > { %v5769_v28 = vpop.f32.mrf.mxu0  ;;  %v5656_v20 = vpop.f32.mrf.mxu1 }
 0x220   : > { %v5770_v33 = vadd.f32 %v5769_v28, %v5768_v50  ;;  %v2493_v12 = vadd.f32 %v5655_v6, %v7935_v17  ;;  %v8727_v6 = vld [vmem:[#allocation24_spill] sm:$0xff] }
 0x221   : > { %v5771_v11 = vpop.f32.mrf.mxu0  ;;  %4047 = vmatmul.mubr.bf16.gmra.mxu0 %v8674_v27  ;;  %v5657_v18 = vpop.f32.mrf.mxu1 }
 0x222   : > { %4054 = vmatprep.mubr.bf16.mxu0 %v8676_v45  ;;  %v8117_v3 = vadd.f32 %v5767_v4, %v2493_v12  ;;  %v5658_v49 = vadd.f32 %v5657_v18, %v5656_v20  ;;  %v8728_v12 = vld [vmem:[#allocation26_spill] sm:$0xff] }
 0x223   : > { %v5772_v56 = vpop.f32.mrf.mxu0  ;;  %v5659_v42 = vpop.f32.mrf.mxu1  ;;  %3717 = vmatmul.mubr.bf16.gmra.mxu1 %v8725_v9  ;;  %v8729_v9 = vld [vmem:[#allocation36_spill] sm:$0xff] }
 0x224   : > { %v5773_v54 = vadd.f32 %v5772_v56, %v5771_v11  ;;  %v2494_v46 = vadd.f32 %v5658_v49, %v7946_v7  ;;  %3724 = vmatprep.mubr.bf16.mxu1 %v8726_v22 }
 0x225   : > { %v5774_v53 = vpop.f32.mrf.mxu0  ;;  %v5660_v17 = vpop.f32.mrf.mxu1 }
 0x226   : > { %v8122_v57 = vadd.f32 %v5770_v33, %v2494_v46  ;;  %v5661_v27 = vadd.f32 %v5660_v17, %v5659_v42  ;;  %v8730_v46 = vld [vmem:[#allocation37_spill] sm:$0xff] }
 0x227   : > { %v5775_v15 = vpop.f32.mrf.mxu0  ;;  %v5662_v44 = vpop.f32.mrf.mxu1 }
 0x228   : > { %v5776_v45 = vadd.f32 %v5775_v15, %v5774_v53  ;;  %v2495_v2 = vadd.f32 %v5661_v27, %v7951_v32  ;;  %v8731_v27 = vld [vmem:[#allocation28_spill] sm:$0xff] }
 0x229   : > { %v5777_v4 = vpop.f32.mrf.mxu0  ;;  %4055 = vmatmul.mubr.bf16.gmra.mxu0 %v8679_v41  ;;  %v5663_v38 = vpop.f32.mrf.mxu1 }
 0x22a   : > { %4062 = vmatprep.mubr.bf16.mxu0 %v8681_v26  ;;  %v8127_v50 = vadd.f32 %v5773_v54, %v2495_v2  ;;  %v5664_v7 = vadd.f32 %v5663_v38, %v5662_v44  ;;  %v8732_v44 = vld [vmem:[#allocation58_spill] sm:$0xff] }
 0x22b   : > { %v5778_v16 = vpop.f32.mrf.mxu0  ;;  %v5665_v5 = vpop.f32.mrf.mxu1  ;;  %3725 = vmatmul.mubr.bf16.gmra.mxu1 %v8727_v6 }
 0x22c   : > { %v5779_v28 = vadd.f32 %v5778_v16, %v5777_v4  ;;  %v2496_v20 = vadd.f32 %v5664_v7, %v7956_v61  ;;  %3732 = vmatprep.mubr.bf16.mxu1 %v8728_v12  ;;  %v8733_v4 = vld [vmem:[#allocation2_spill] sm:$0xff] }
 0x22d   : > { %v5780_v33 = vpop.f32.mrf.mxu0  ;;  %v5666_v32 = vpop.f32.mrf.mxu1  ;;  %v8735_v12 = vld [vmem:[#allocation38_spill] sm:$0xff] }
 0x22e   : > { %v8132_v11 = vadd.f32 %v5776_v45, %v2496_v20  ;;  %v5667_v41 = vadd.f32 %v5666_v32, %v5665_v5 }
 0x22f   : > { %v5781_v18 = vpop.f32.mrf.mxu0  ;;  %v5668_v49 = vpop.f32.mrf.mxu1 }
 0x230   : > { %v5782_v26 = vadd.f32 %v5781_v18, %v5780_v33  ;;  %v2497_v56 = vadd.f32 %v5667_v41, %v7961_v34 }
 0x231   : > { %v5783_v42 = vpop.f32.mrf.mxu0  ;;  %4063 = vmatmul.mubr.bf16.gmra.mxu0 %v8729_v9  ;;  %v5669_v54 = vpop.f32.mrf.mxu1  ;;  %v8737_v9 = vld [vmem:[#allocation30_spill] sm:$0xff] }
 0x232   : > { %4070 = vmatprep.mubr.bf16.mxu0 %v8730_v46  ;;  %v8137_v53 = vadd.f32 %v5779_v28, %v2497_v56  ;;  %v5670_v61 = vadd.f32 %v5669_v54, %v5668_v49  ;;  %v8734_v28 = vld [vmem:[#allocation60_spill] sm:$0xff] }
 0x233   : > { %v5784_v22 = vpop.f32.mrf.mxu0  ;;  %v5671_v17 = vpop.f32.mrf.mxu1  ;;  %3733 = vmatmul.mubr.bf16.gmra.mxu1 %v8731_v27 }
 0x234   : > { %v5785_v15 = vadd.f32 %v5784_v22, %v5783_v42  ;;  %v2498_v45 = vadd.f32 %v5670_v61, %v8732_v44  ;;  %3740 = vmatprep.mubr.bf16.mxu1 %v8733_v4  ;;  %v8736_v42 = vld [vmem:[#allocation3_spill] sm:$0xff]  ;;  %v8738_v61 = vld [vmem:[#allocation4_spill] sm:$0xff] }
 0x235   : > { %v5786_v2 = vpop.f32.mrf.mxu0  ;;  %v5672_v34 = vpop.f32.mrf.mxu1 }
 0x236   : > { %v8142_v38 = vadd.f32 %v5782_v26, %v2498_v45  ;;  %v5673_v7 = vadd.f32 %v5672_v34, %v5671_v17 }
 0x237   : > { %v5787_v16 = vpop.f32.mrf.mxu0  ;;  %v5674_v5 = vpop.f32.mrf.mxu1 }
 0x238   : > { %v5788_v6 = vadd.f32 %v5787_v16, %v5786_v2  ;;  %v2499_v20 = vadd.f32 %v5673_v7, %v8734_v28 }
 0x239   : > { %v5789_v33 = vpop.f32.mrf.mxu0  ;;  %4071 = vmatmul.mubr.bf16.gmra.mxu0 %v8735_v12  ;;  %v5675_v32 = vpop.f32.mrf.mxu1 }
 0x23a   : > { %4078 = vmatprep.mubr.bf16.mxu0 %v8693_v52  ;;  %v8147_v41 = vadd.f32 %v5785_v15, %v2499_v20  ;;  %v5676_v18 = vadd.f32 %v5675_v32, %v5674_v5  ;;  %v8739_v15 = vld [vmem:[#allocation53_spill] sm:$0xff] }
 0x23b   : > { %v5790_v49 = vpop.f32.mrf.mxu0  ;;  %v5677_v56 = vpop.f32.mrf.mxu1  ;;  %3741 = vmatmul.mubr.bf16.gmra.mxu1 %v8736_v42  ;;  %v8740_v20 = vld [vmem:[#allocation5_spill] sm:$0xff] }
 0x23c   : > { %v5791_v26 = vadd.f32 %v5790_v49, %v5789_v33  ;;  %v2500_v54 = vadd.f32 %v5676_v18, %v8737_v9  ;;  %3748 = vmatprep.mubr.bf16.mxu1 %v8738_v61  ;;  %v8741_v33 = vld [vmem:[#allocation31_spill] sm:$0xff] }
 0x23d   : > { %v5792_v46 = vpop.f32.mrf.mxu0  ;;  %v5678_v22 = vpop.f32.mrf.mxu1  ;;  %v8742_v18 = vld [vmem:[#allocation7_spill] sm:$0xff] }
 0x23e   : > { %v8152_v17 = vadd.f32 %v5788_v6, %v2500_v54  ;;  %v5679_v27 = vadd.f32 %v5678_v22, %v5677_v56 }
 0x23f   : > { %v5793_v44 = vpop.f32.mrf.mxu0  ;;  %v5680_v45 = vpop.f32.mrf.mxu1 }
 0x240   : > { %v5794_v52 = vadd.f32 %v5793_v44, %v5792_v46  ;;  %v2501_v2 = vadd.f32 %v5679_v27, %v8739_v15  ;;  %v8744_v15 = vld [vmem:[#allocation9_spill] sm:$0xff] }
 0x241   : > { %v5795_v4 = vpop.f32.mrf.mxu0  ;;  %4079 = vmatmul.mubr.bf16.gmra.mxu0 %v8697_v48  ;;  %v5681_v34 = vpop.f32.mrf.mxu1 }
 0x242   : > { %4086 = vmatprep.mubr.bf16.mxu0 %v8698_v29  ;;  %v8157_v7 = vadd.f32 %v5791_v26, %v2501_v2  ;;  %v5682_v16 = vadd.f32 %v5681_v34, %v5680_v45  ;;  %v8743_v26 = vld [vmem:[#allocation54_spill] sm:$0xff] }
 0x243   : > { %v5796_v5 = vpop.f32.mrf.mxu0  ;;  %v5683_v28 = vpop.f32.mrf.mxu1  ;;  %3749 = vmatmul.mubr.bf16.gmra.mxu1 %v8740_v20  ;;  %v8745_v2 = vld [vmem:[#allocation62_spill] sm:$0xff] }
 0x244   : > { %v5797_v6 = vadd.f32 %v5796_v5, %v5795_v4  ;;  %v2502_v12 = vadd.f32 %v5682_v16, %v8741_v33  ;;  %3756 = vmatprep.mubr.bf16.mxu1 %v8742_v18  ;;  %v8746_v16 = vld [vmem:[#allocation11_spill] sm:$0xff] }
 0x245   : > { %v5798_v32 = vpop.f32.mrf.mxu0  ;;  %v5684_v49 = vpop.f32.mrf.mxu1 }
 0x246   : > { %v8162_v56 = vadd.f32 %v5794_v52, %v2502_v12  ;;  %v5685_v48 = vadd.f32 %v5684_v49, %v5683_v28 }
 0x247   : > { %v5799_v42 = vpop.f32.mrf.mxu0  ;;  %v5686_v9 = vpop.f32.mrf.mxu1 }
 0x248   : > { %v5800_v29 = vadd.f32 %v5799_v42, %v5798_v32  ;;  %v2503_v54 = vadd.f32 %v5685_v48, %v8743_v26  ;;  %v8748_v26 = vld [vmem:[#allocation13_spill] sm:$0xff] }
 0x249   : > { %v5929_v46 = vpop.f32.mrf.mxu0  ;;  %4087 = vmatmul.mubr.bf16.gmra.mxu0 %v8701_v10  ;;  %v5687_v61 = vpop.f32.mrf.mxu1 }
 0x24a   : > { %4094 = vmatprep.mubr.bf16.mxu0 %v8702_v58  ;;  %v8167_v22 = vadd.f32 %v5797_v6, %v2503_v54  ;;  %v5688_v27 = vadd.f32 %v5687_v61, %v5686_v9  ;;  %v8747_v6 = vld [vmem:[#allocation63_spill] sm:$0xff]  ;;  %v8749_v54 = vld [vmem:[#allocation32_spill] sm:$0xff] }
 0x24b   : > { %v5930_v44 = vpop.f32.mrf.mxu0  ;;  %v5817_v45 = vpop.f32.mrf.mxu1  ;;  %3757 = vmatmul.mubr.bf16.gmra.mxu1 %v8744_v15 }
 0x24c   : > { %v5931_v52 = vadd.f32 %v5930_v44, %v5929_v46  ;;  %v2504_v4 = vadd.f32 %v5688_v27, %v8745_v2  ;;  %3764 = vmatprep.mubr.bf16.mxu1 %v8746_v16  ;;  %v8750_v27 = vld [vmem:[#allocation15_spill] sm:$0xff] }
 0x24d   : > { %v5932_v34 = vpop.f32.mrf.mxu0  ;;  %v5818_v5 = vpop.f32.mrf.mxu1 }
 0x24e   : > { %v8172_v28 = vadd.f32 %v5800_v29, %v2504_v4  ;;  %v5819_v10 = vadd.f32 %v5818_v5, %v5817_v45  ;;  %v8752_v5 = vld [vmem:[#allocation47_spill] sm:$0xff] }
 0x24f   : > { %v5933_v20 = vpop.f32.mrf.mxu0  ;;  %v5820_v33 = vpop.f32.mrf.mxu1 }
 0x250   : > { %v5934_v58 = vadd.f32 %v5933_v20, %v5932_v34  ;;  %v3151_v12 = vadd.f32 %v5819_v10, %v8747_v6 }
 0x251   : > { %v5935_v32 = vpop.f32.mrf.mxu0  ;;  %4095 = vmatmul.mubr.bf16.gmra.mxu0 %v8705_v62  ;;  %v5821_v18 = vpop.f32.mrf.mxu1 }
 0x252   : > { %4102 = vmatprep.mubr.bf16.mxu0 %v8706_v31  ;;  %v8177_v49 = vadd.f32 %v5931_v52, %v3151_v12  ;;  %v5822_v48 = vadd.f32 %v5821_v18, %v5820_v33  ;;  %v8751_v52 = vld [vmem:[#allocation55_spill] sm:$0xff]  ;;  %v8753_v12 = vld [vmem:[#allocation17_spill] sm:$0xff] }
 0x253   : > { %v5936_v42 = vpop.f32.mrf.mxu0  ;;  %v5823_v9 = vpop.f32.mrf.mxu1  ;;  %3765 = vmatmul.mubr.bf16.gmra.mxu1 %v8748_v26 }
 0x254   : > { %v5937_v29 = vadd.f32 %v5936_v42, %v5935_v32  ;;  %v3152_v46 = vadd.f32 %v5822_v48, %v8749_v54  ;;  %3772 = vmatprep.mubr.bf16.mxu1 %v8750_v27  ;;  %v8754_v32 = vld [vmem:[#allocation33_spill] sm:$0xff]  ;;  %v8755_v42 = vld [vmem:[#allocation19_spill] sm:$0xff] }
 0x255   : > { %v5938_v61 = vpop.f32.mrf.mxu0  ;;  %v5824_v44 = vpop.f32.mrf.mxu1 }
 0x256   : > { %v8182_v45 = vadd.f32 %v5934_v58, %v3152_v46  ;;  %v5825_v62 = vadd.f32 %v5824_v44, %v5823_v9 }
 0x257   : > { %v5939_v15 = vpop.f32.mrf.mxu0  ;;  %v5826_v2 = vpop.f32.mrf.mxu1 }
 0x258   : > { %v5940_v31 = vadd.f32 %v5939_v15, %v5938_v61  ;;  %v3153_v4 = vadd.f32 %v5825_v62, %v8751_v52 }
 0x259   : > { %v5941_v34 = vpop.f32.mrf.mxu0  ;;  %4103 = vmatmul.mubr.bf16.gmra.mxu0 %v8709_v8  ;;  %v5827_v16 = vpop.f32.mrf.mxu1 }
 0x25a   : > { %4110 = vmatprep.mubr.bf16.mxu0 %v8752_v5  ;;  %v8187_v10 = vadd.f32 %v5937_v29, %v3153_v4  ;;  %v5828_v20 = vadd.f32 %v5827_v16, %v5826_v2  ;;  %v8756_v29 = vld [vmem:[#allocation56_spill] sm:$0xff] }
 0x25b   : > { %v5942_v33 = vpop.f32.mrf.mxu0  ;;  %v5829_v6 = vpop.f32.mrf.mxu1  ;;  %3773 = vmatmul.mubr.bf16.gmra.mxu1 %v8753_v12 }
 0x25c   : > { %v5943_v58 = vadd.f32 %v5942_v33, %v5941_v34  ;;  %v3154_v18 = vadd.f32 %v5828_v20, %v8754_v32  ;;  %3780 = vmatprep.mubr.bf16.mxu1 %v8755_v42  ;;  %v8757_v34 = vld [vmem:[#allocation21_spill] sm:$0xff]  ;;  %v8758_v20 = vld [vmem:[#allocation23_spill] sm:$0xff] }
 0x25d   : > { %v5944_v48 = vpop.f32.mrf.mxu0  ;;  %v5830_v9 = vpop.f32.mrf.mxu1 }
 0x25e   : > { %v8192_v26 = vadd.f32 %v5940_v31, %v3154_v18  ;;  %v5831_v8 = vadd.f32 %v5830_v9, %v5829_v6 }
 0x25f   : > { %v5945_v54 = vpop.f32.mrf.mxu0  ;;  %v5832_v46 = vpop.f32.mrf.mxu1 }
 0x260   : > { %v5946_v61 = vadd.f32 %v5945_v54, %v5944_v48  ;;  %v3155_v27 = vadd.f32 %v5831_v8, %v8756_v29  ;;  %v8759_v54 = vld [vmem:[#allocation25_spill] sm:$0xff] }
 0x261   : > { %v5947_v44 = vpop.f32.mrf.mxu0  ;;  %4111 = vmatmul.mubr.bf16.gmra.mxu0 %v8711_v60  ;;  %v5833_v62 = vpop.f32.mrf.mxu1 }
 0x262   : > { %4118 = vmatprep.mubr.bf16.mxu0 %v8712_v51  ;;  %v8197_v15 = vadd.f32 %v5943_v58, %v3155_v27  ;;  %v5834_v2 = vadd.f32 %v5833_v62, %v5832_v46  ;;  %v8760_v27 = vld [vmem:[#allocation27_spill] sm:$0xff] }
 0x263   : > { %v5948_v52 = vpop.f32.mrf.mxu0  ;;  %v5835_v4 = vpop.f32.mrf.mxu1  ;;  %3781 = vmatmul.mubr.bf16.gmra.mxu1 %v8757_v34 }
 0x264   : > { %v5949_v31 = vadd.f32 %v5948_v52, %v5947_v44  ;;  %v3156_v16 = vadd.f32 %v5834_v2, %v8026_v1  ;;  %3788 = vmatprep.mubr.bf16.mxu1 %v8758_v20  ;;  %v6504_v44 = vld [vmem:[%s6682_s28 + $0xd4] ss:$0 sps:$4 sm:$0x11]  }
 0x265   : > { %v5950_v5 = vpop.f32.mrf.mxu0  ;;  %v5836_v33 = vpop.f32.mrf.mxu1  ;;  %v3525_v20 = vshll.u32 %v6504_v44, 16 }
 0x266   : > { %v8202_v6 = vadd.f32 %v5946_v61, %v3156_v16  ;;  %v5837_v60 = vadd.f32 %v5836_v33, %v5835_v4 }
 0x267   : > { %v5951_v12 = vpop.f32.mrf.mxu0  ;;  %v5838_v32 = vpop.f32.mrf.mxu1 }
 0x268   : > { %v5952_v51 = vadd.f32 %v5951_v12, %v5950_v5  ;;  %v3157_v58 = vadd.f32 %v5837_v60, %v8031_v43 }
 0x269   : > { %v5953_v18 = vpop.f32.mrf.mxu0  ;;  %4119 = vmatmul.mubr.bf16.gmra.mxu0 %v8713_v63  ;;  %v5839_v48 = vpop.f32.mrf.mxu1  ;;  %v3520_v63 = vshll.u32 %v8049_v37, 16 }
 0x26a   : > { %4126 = vmatprep.mubr.bf16.mxu0 %v8714_v40  ;;  %v8207_v1 = vadd.f32 %v5949_v31, %v3157_v58  ;;  %v5840_v42 = vadd.f32 %v5839_v48, %v5838_v32  ;;  %v3856_v32 = vrot.slane %v8049_v37, 1 }
 0x26b   : > { %v5954_v9 = vpop.f32.mrf.mxu0  ;;  %v5841_v8 = vpop.f32.mrf.mxu1  ;;  %3789 = vmatmul.mubr.bf16.gmra.mxu1 %v8759_v54  ;;  %v3522_v5 = vrot.slane %v3520_v63, 1  ;;  %v8763_v63 = vld [vmem:[#allocation65_spill] sm:$0xff] }
 0x26c   : > { %v5955_v46 = vadd.f32 %v5954_v9, %v5953_v18  ;;  %v3158_v61 = vadd.f32 %v5840_v42, %v8036_v24  ;;  %3796 = vmatprep.mubr.bf16.mxu1 %v8760_v27  ;;  %v3518_v24 = vshrl.u32 %v8049_v37, 16  ;;  %v8762_v42 = vld [vmem:[#allocation68_spill] sm:$0xff]  ;;  %v3508_v9 = vshll.u32 %v8067_v55, 16 }
 0x26d   : > { %v5956_v29 = vpop.f32.mrf.mxu0  ;;  %v5842_v43 = vpop.f32.mrf.mxu1 }
 0x26e   : > { %v8214_v62 = vadd.f32 %v5952_v51, %v3158_v61  ;;  %v5843_v40 = vadd.f32 %v5842_v43, %v5841_v8  ;;  %v3857_v51 = vrot.slane %v6504_v44, 1  ;;  %v3523_v54 = vor.u32 %v3522_v5, %v3518_v24 }
 0x26f   : > { %v5957_v2 = vpop.f32.mrf.mxu0  ;;  %v5844_v52 = vpop.f32.mrf.mxu1 }
 0x270   : > { %v5958_v4 = vadd.f32 %v5957_v2, %v5956_v29  ;;  %v3159_v34 = vadd.f32 %v5843_v40, %v8041_v35  ;;  %v8761_v35 = vld [vmem:[#allocation29_spill] sm:$0xff]  ;;  %v3858_v27 = vsel %vm1732_vm1, %v3856_v32, %v3857_v51  ;;  %v3506_v2 = vshrl.u32 %v8067_v55, 16 }
 0x271   : > { %v5959_v31 = vpop.f32.mrf.mxu0  ;;  %4127 = vmatmul.mubr.bf16.gmra.mxu0 %v8716_v0  ;;  %v5845_v16 = vpop.f32.mrf.mxu1  ;;  %v8764_v32 = vld [vmem:[#allocation69_spill] sm:$0xff] }
 0x272   : > { %4134 = vmatprep.mubr.bf16.mxu0 %v8056_v14  ;;  %v8220_v33 = vadd.f32 %v5955_v46, %v3159_v34  ;;  %v5846_v60 = vadd.f32 %v5845_v16, %v5844_v52  ;;  %v6505_v14 = vld [vmem:[%s6699_s11 + $0xd4] ss:$0 sps:$4 sm:$0x11]   ;;  %v3527_v46 = vrot.slane %v3525_v20, 1  ;;  %v3510_v52 = vrot.slane %v3508_v9, 1 }
 0x273   : > { %v5960_v12 = vpop.f32.mrf.mxu0  ;;  %v5847_v58 = vpop.f32.mrf.mxu1  ;;  %3797 = vmatmul.mubr.bf16.gmra.mxu1 %v8761_v35  ;;  %v3513_v34 = vshll.u32 %v6505_v14, 16  ;;  %v3854_v24 = vrot.slane %v6505_v14, 1 }
 0x274   : > { %v5961_v18 = vadd.f32 %v5960_v12, %v5959_v31  ;;  %v3160_v0 = vadd.f32 %v5846_v60, %v8051_v39  ;;  %3804 = vmatprep.mubr.bf16.mxu1 %v8762_v42  ;;  %v3528_v16 = vsel %vm768_vm0, %v3523_v54, %v3527_v46 }
 0x275   : > { %v5962_v48 = vpop.f32.mrf.mxu0  ;;  %v5848_v8 = vpop.f32.mrf.mxu1 }
 0x276   : > { %v8228_v61 = vadd.f32 %v5958_v4, %v3160_v0  ;;  %v5849_v29 = vadd.f32 %v5848_v8, %v5847_v58  ;;  %v3853_v4 = vrot.slane %v8067_v55, 1  ;;  %v3511_v0 = vor.u32 %v3510_v52, %v3506_v2 }
 0x277   : > { %v5963_v37 = vpop.f32.mrf.mxu0  ;;  %v5850_v43 = vpop.f32.mrf.mxu1 }
 0x278   : > { %v5964_v44 = vadd.f32 %v5963_v37, %v5962_v48  ;;  %v3161_v40 = vadd.f32 %v5849_v29, %v8763_v63  ;;  %v3515_v48 = vrot.slane %v3513_v34, 1  ;;  %v3855_v9 = vsel %vm1732_vm1, %v3853_v4, %v3854_v24 }
 0x279   : > { %v5965_v39 = vpop.f32.mrf.mxu0  ;;  %4135 = vmatmul.mubr.bf16.gmra.mxu0 %v8073_v19  ;;  %v5851_v31 = vpop.f32.mrf.mxu1  ;;  %v8765_v19 = vld [vmem:[#allocation34_spill] sm:$0xff] }
 0x27a   : > { %4142 = vmatprep.mubr.bf16.mxu0 %v3858_v27  ;;  %v8236_v5 = vadd.f32 %v5961_v18, %v3161_v40  ;;  %v5852_v20 = vadd.f32 %v5851_v31, %v5850_v43  ;;  %v3516_v37 = vsel %vm768_vm0, %v3511_v0, %v3515_v48 }
 0x27b   : > { %v5966_v60 = vpop.f32.mrf.mxu0  ;;  %v5853_v12 = vpop.f32.mrf.mxu1  ;;  %3805 = vmatmul.mubr.bf16.gmra.mxu1 %v8764_v32 }
 0x27c   : > { %v5967_v51 = vadd.f32 %v5966_v60, %v5965_v39  ;;  %v3162_v58 = vadd.f32 %v5852_v20, %v8765_v19  ;;  %3812 = vmatprep.mubr.bf16.mxu1 %v3528_v16 }
 0x27d   : > { %v5968_v35 = vpop.f32.mrf.mxu0  ;;  %v5854_v42 = vpop.f32.mrf.mxu1 }
 0x27e   : > { %v8241_v8 = vadd.f32 %v5964_v44, %v3162_v58  ;;  %v5855_v55 = vadd.f32 %v5854_v42, %v5853_v12 }
 0x27f   : > { %v5969_v18 = vpop.f32.mrf.mxu0  ;;  %v5856_v14 = vpop.f32.mrf.mxu1 }
 0x280   : > { %v5970_v54 = vadd.f32 %v5969_v18, %v5968_v35  ;;  %v3163_v46 = vadd.f32 %v5855_v55, %v8077_v47 }
 0x281   : > { %v5971_v29 = vpop.f32.mrf.mxu0  ;;  %4143 = vmatmul.mubr.bf16.gmra.mxu0 %v3855_v9  ;;  %v5857_v27 = vpop.f32.mrf.mxu1 }
 0x282   : > { %v8245_v43 = vadd.f32 %v5967_v51, %v3163_v46  ;;  %v5858_v63 = vadd.f32 %v5857_v27, %v5856_v14 }
 0x283   : > { %v5972_v40 = vpop.f32.mrf.mxu0  ;;  %v5859_v39 = vpop.f32.mrf.mxu1  ;;  %3813 = vmatmul.mubr.bf16.gmra.mxu1 %v3516_v37 }
 0x284   : > { %v5973_v2 = vadd.f32 %v5972_v40, %v5971_v29  ;;  %v3164_v44 = vadd.f32 %v5858_v63, %v8082_v21 }
 0x285   : > { %v5974_v52 = vpop.f32.mrf.mxu0  ;;  %v5860_v34 = vpop.f32.mrf.mxu1 }
 0x286   : > { %v8248_v31 = vadd.f32 %v5970_v54, %v3164_v44  ;;  %v5861_v16 = vadd.f32 %v5860_v34, %v5859_v39 }
 0x287   : > { %v5975_v47 = vpop.f32.mrf.mxu0  ;;  %v5862_v4 = vpop.f32.mrf.mxu1 }
 0x288   : > { %v5976_v24 = vadd.f32 %v5975_v47, %v5974_v52  ;;  %v3165_v20 = vadd.f32 %v5861_v16, %v8087_v36 }
 0x289   : > { %v5977_v60 = vpop.f32.mrf.mxu0  ;;  %v5863_v12 = vpop.f32.mrf.mxu1 }
 0x28a   : > { %v8251_v32 = vadd.f32 %v5973_v2, %v3165_v20  ;;  %v5864_v51 = vadd.f32 %v5863_v12, %v5862_v4 }
 0x28b   : > { %v5978_v19 = vpop.f32.mrf.mxu0  ;;  %v5865_v58 = vpop.f32.mrf.mxu1 }
 0x28c   : > { %v5979_v35 = vadd.f32 %v5978_v19, %v5977_v60  ;;  %v3166_v21 = vadd.f32 %v5864_v51, %v8092_v25 }
 0x28d   : > { %v5980_v0 = vpop.f32.mrf.mxu0  ;;  %v5866_v48 = vpop.f32.mrf.mxu1 }
 0x28e   : > { %v8254_v42 = vadd.f32 %v5976_v24, %v3166_v21  ;;  %v5867_v9 = vadd.f32 %v5866_v48, %v5865_v58 }
 0x28f   : > { %v5981_v55 = vpop.f32.mrf.mxu0  ;;  %v5868_v18 = vpop.f32.mrf.mxu1 }
 0x290   : > { %v5982_v14 = vadd.f32 %v5981_v55, %v5980_v0  ;;  %v3167_v36 = vadd.f32 %v5867_v9, %v8097_v30 }
 0x291   : > { %v5983_v54 = vpop.f32.mrf.mxu0  ;;  %v5869_v46 = vpop.f32.mrf.mxu1 }
 0x292   : > { %v8257_v29 = vadd.f32 %v5979_v35, %v3167_v36  ;;  %v5870_v37 = vadd.f32 %v5869_v46, %v5868_v18 }
 0x293   : > { %v5984_v27 = vpop.f32.mrf.mxu0  ;;  %v5871_v63 = vpop.f32.mrf.mxu1 }
 0x294   : > { %v5985_v40 = vadd.f32 %v5984_v27, %v5983_v54  ;;  %v3168_v25 = vadd.f32 %v5870_v37, %v8102_v23 }
 0x295   : > { %v5986_v39 = vpop.f32.mrf.mxu0  ;;  %v5872_v2 = vpop.f32.mrf.mxu1 }
 0x296   : > { %v8260_v44 = vadd.f32 %v5982_v14, %v3168_v25  ;;  %v5873_v52 = vadd.f32 %v5872_v2, %v5871_v63 }
 0x297   : > { %v5987_v34 = vpop.f32.mrf.mxu0  ;;  %v5874_v16 = vpop.f32.mrf.mxu1 }
 0x298   : > { %v5988_v47 = vadd.f32 %v5987_v34, %v5986_v39  ;;  %v3169_v30 = vadd.f32 %v5873_v52, %v8107_v13 }
 0x299   : > { %v5989_v4 = vpop.f32.mrf.mxu0  ;;  %v5875_v24 = vpop.f32.mrf.mxu1 }
 0x29a   : > { %v8263_v20 = vadd.f32 %v5985_v40, %v3169_v30  ;;  %v5876_v60 = vadd.f32 %v5875_v24, %v5874_v16 }
 0x29b   : > { %v5990_v12 = vpop.f32.mrf.mxu0  ;;  %v5877_v51 = vpop.f32.mrf.mxu1 }
 0x29c   : > { %v5991_v19 = vadd.f32 %v5990_v12, %v5989_v4  ;;  %v3170_v23 = vadd.f32 %v5876_v60, %v8112_v59 }
 0x29d   : > { %v5992_v58 = vpop.f32.mrf.mxu0  ;;  %v5878_v35 = vpop.f32.mrf.mxu1 }
 0x29e   : > { %v8266_v21 = vadd.f32 %v5988_v47, %v3170_v23  ;;  %v5879_v0 = vadd.f32 %v5878_v35, %v5877_v51 }
 0x29f   : > { %v5993_v48 = vpop.f32.mrf.mxu0  ;;  %v5880_v9 = vpop.f32.mrf.mxu1 }
 0x2a0   : > { %v5994_v55 = vadd.f32 %v5993_v48, %v5992_v58  ;;  %v3171_v13 = vadd.f32 %v5879_v0, %v8117_v3 }
 0x2a1   : > { %v5995_v18 = vpop.f32.mrf.mxu0  ;;  %v5881_v14 = vpop.f32.mrf.mxu1 }
 0x2a2   : > { %v8269_v36 = vadd.f32 %v5991_v19, %v3171_v13  ;;  %v5882_v54 = vadd.f32 %v5881_v14, %v5880_v9 }
 0x2a3   : > { %v5996_v46 = vpop.f32.mrf.mxu0  ;;  %v5883_v37 = vpop.f32.mrf.mxu1 }
 0x2a4   : > { %v5997_v27 = vadd.f32 %v5996_v46, %v5995_v18  ;;  %v3172_v59 = vadd.f32 %v5882_v54, %v8122_v57 }
 0x2a5   : > { %v5998_v63 = vpop.f32.mrf.mxu0  ;;  %v5884_v40 = vpop.f32.mrf.mxu1 }
 0x2a6   : > { %v8272_v25 = vadd.f32 %v5994_v55, %v3172_v59  ;;  %v5885_v39 = vadd.f32 %v5884_v40, %v5883_v37 }
 0x2a7   : > { %v5999_v2 = vpop.f32.mrf.mxu0  ;;  %v5886_v52 = vpop.f32.mrf.mxu1 }
 0x2a8   : > { %v6000_v34 = vadd.f32 %v5999_v2, %v5998_v63  ;;  %v3173_v3 = vadd.f32 %v5885_v39, %v8127_v50 }
 0x2a9   : > { %v6001_v16 = vpop.f32.mrf.mxu0  ;;  %v5887_v47 = vpop.f32.mrf.mxu1 }
 0x2aa   : > { %v8275_v30 = vadd.f32 %v5997_v27, %v3173_v3  ;;  %v5888_v4 = vadd.f32 %v5887_v47, %v5886_v52 }
 0x2ab   : > { %v6002_v24 = vpop.f32.mrf.mxu0  ;;  %v5889_v60 = vpop.f32.mrf.mxu1 }
 0x2ac   : > { %v6003_v12 = vadd.f32 %v6002_v24, %v6001_v16  ;;  %v3174_v57 = vadd.f32 %v5888_v4, %v8132_v11 }
 0x2ad   : > { %v6004_v51 = vpop.f32.mrf.mxu0  ;;  %v5890_v19 = vpop.f32.mrf.mxu1 }
 0x2ae   : > { %v8278_v23 = vadd.f32 %v6000_v34, %v3174_v57  ;;  %v5891_v58 = vadd.f32 %v5890_v19, %v5889_v60 }
 0x2af   : > { %v6005_v35 = vpop.f32.mrf.mxu0  ;;  %v5892_v0 = vpop.f32.mrf.mxu1 }
 0x2b0   : > { %v6006_v48 = vadd.f32 %v6005_v35, %v6004_v51  ;;  %v3175_v50 = vadd.f32 %v5891_v58, %v8137_v53 }
 0x2b1   : > { %v6007_v9 = vpop.f32.mrf.mxu0  ;;  %v5893_v55 = vpop.f32.mrf.mxu1 }
 0x2b2   : > { %v8281_v13 = vadd.f32 %v6003_v12, %v3175_v50  ;;  %v5894_v18 = vadd.f32 %v5893_v55, %v5892_v0 }
 0x2b3   : > { %v6008_v14 = vpop.f32.mrf.mxu0  ;;  %v5895_v54 = vpop.f32.mrf.mxu1 }
 0x2b4   : > { %v6009_v46 = vadd.f32 %v6008_v14, %v6007_v9  ;;  %v3176_v11 = vadd.f32 %v5894_v18, %v8142_v38 }
 0x2b5   : > { %v6010_v37 = vpop.f32.mrf.mxu0  ;;  %v5896_v27 = vpop.f32.mrf.mxu1 }
 0x2b6   : > { %v8284_v59 = vadd.f32 %v6006_v48, %v3176_v11  ;;  %v5897_v63 = vadd.f32 %v5896_v27, %v5895_v54 }
 0x2b7   : > { %v6011_v40 = vpop.f32.mrf.mxu0  ;;  %v5898_v39 = vpop.f32.mrf.mxu1 }
 0x2b8   : > { %v6012_v2 = vadd.f32 %v6011_v40, %v6010_v37  ;;  %v3177_v53 = vadd.f32 %v5897_v63, %v8147_v41 }
 0x2b9   : > { %v6013_v52 = vpop.f32.mrf.mxu0  ;;  %v5899_v34 = vpop.f32.mrf.mxu1 }
 0x2ba   : > { %v8287_v3 = vadd.f32 %v6009_v46, %v3177_v53  ;;  %v5900_v16 = vadd.f32 %v5899_v34, %v5898_v39 }
 0x2bb   : > { %v6014_v47 = vpop.f32.mrf.mxu0  ;;  %v5901_v4 = vpop.f32.mrf.mxu1 }
 0x2bc   : > { %v6015_v24 = vadd.f32 %v6014_v47, %v6013_v52  ;;  %v3178_v38 = vadd.f32 %v5900_v16, %v8152_v17 }
 0x2bd   : > { %v6016_v60 = vpop.f32.mrf.mxu0  ;;  %v5902_v12 = vpop.f32.mrf.mxu1 }
 0x2be   : > { %v8290_v57 = vadd.f32 %v6012_v2, %v3178_v38  ;;  %v5903_v51 = vadd.f32 %v5902_v12, %v5901_v4 }
 0x2bf   : > { %v6017_v19 = vpop.f32.mrf.mxu0  ;;  %v5904_v58 = vpop.f32.mrf.mxu1 }
 0x2c0   : > { %v6018_v35 = vadd.f32 %v6017_v19, %v6016_v60  ;;  %v3179_v41 = vadd.f32 %v5903_v51, %v8157_v7 }
 0x2c1   : > { %v6019_v0 = vpop.f32.mrf.mxu0  ;;  %v5905_v48 = vpop.f32.mrf.mxu1 }
 0x2c2   : > { %v8293_v50 = vadd.f32 %v6015_v24, %v3179_v41  ;;  %v5906_v9 = vadd.f32 %v5905_v48, %v5904_v58  ;;  %v8308_v58 = vld [vmem:[%s8481_s3] ss:$0 sm:$0xff] }
 0x2c3   : > { %v6020_v55 = vpop.f32.mrf.mxu0  ;;  %v5907_v18 = vpop.f32.mrf.mxu1 }
 0x2c4   : > { %v6021_v14 = vadd.f32 %v6020_v55, %v6019_v0  ;;  %v3180_v17 = vadd.f32 %v5906_v9, %v8162_v56 }
 0x2c5   : > { %v6022_v54 = vpop.f32.mrf.mxu0  ;;  %v5908_v46 = vpop.f32.mrf.mxu1 }
 0x2c6   : > { %v8296_v11 = vadd.f32 %v6018_v35, %v3180_v17  ;;  %v5909_v37 = vadd.f32 %v5908_v46, %v5907_v18 }
 0x2c7   : > { %v6023_v27 = vpop.f32.mrf.mxu0  ;;  %v5910_v63 = vpop.f32.mrf.mxu1 }
 0x2c8   : > { %v6024_v40 = vadd.f32 %v6023_v27, %v6022_v54  ;;  %v3181_v7 = vadd.f32 %v5909_v37, %v8167_v22  ;;  %v8315_v54 = vld [vmem:[%s8482_s4] ss:$0 sm:$0xff] }
 0x2c9   : > { %v6153_v39 = vpop.f32.mrf.mxu0  ;;  %v5911_v2 = vpop.f32.mrf.mxu1 }
 0x2ca   : > { %v8299_v53 = vadd.f32 %v6021_v14, %v3181_v7  ;;  %v5912_v52 = vadd.f32 %v5911_v2, %v5910_v63 }
 0x2cb   : > { %v6154_v34 = vpop.f32.mrf.mxu0  ;;  %v6041_v16 = vpop.f32.mrf.mxu1 }
 0x2cc   : > { %v3182_v47 = vadd.f32 %v5912_v52, %v8172_v28  ;;  %v6155_v19 = vadd.f32 %v6154_v34, %v6153_v39  ;;  %v8323_v34 = vld [vmem:[%s8483_s5] ss:$0 sm:$0xff] }
 0x2cd   : > { %v6156_v56 = vpop.f32.mrf.mxu0  ;;  %v6042_v4 = vpop.f32.mrf.mxu1 }
 0x2ce   : > { %v8302_v24 = vadd.f32 %v6024_v40, %v3182_v47  ;;  %v6043_v38 = vadd.f32 %v6042_v4, %v6041_v16 }
 0x2cf   : > { %v6157_v60 = vpop.f32.mrf.mxu0  ;;  %v6044_v12 = vpop.f32.mrf.mxu1 }
 0x2d0   : > { %v3821_v51 = vadd.f32 %v6043_v38, %v8177_v49  ;;  %v6158_v18 = vadd.f32 %v6157_v60, %v6156_v56 }
 0x2d1   : > { %v6159_v22 = vpop.f32.mrf.mxu0  ;;  %v6045_v35 = vpop.f32.mrf.mxu1 }
 0x2d2   : > { %v4151_v41 = vadd.f32 %v6155_v19, %v3821_v51  ;;  %v6046_v0 = vadd.f32 %v6045_v35, %v6044_v12 }
 0x2d3   : > { %v6160_v28 = vpop.f32.mrf.mxu0  ;;  %v6047_v48 = vpop.f32.mrf.mxu1 }
 0x2d4   : > { %v4190_v9 = vadd.f32 %v8308_v58, %v4151_v41  ;;  %v3822_v55 = vadd.f32 %v6046_v0, %v8182_v45  ;;  %v6161_v39 = vadd.f32 %v6160_v28, %v6159_v22 }
 0x2d5   : > { %v6162_v14 = vpop.f32.mrf.mxu0  ;;  %v6048_v17 = vpop.f32.mrf.mxu1 }
 0x2d6   : > { %v4222_v49 = vmax.f32 %v4190_v9, 0.0  ;;  %v4152_v46 = vadd.f32 %v6158_v18, %v3822_v55  ;;  %v6049_v37 = vadd.f32 %v6048_v17, %v6047_v48 }
 0x2d7   : > { %v6163_v27 = vpop.f32.mrf.mxu0  ;;  %v6050_v63 = vpop.f32.mrf.mxu1 }
 0x2d8   : > { %v4191_v40 = vadd.f32 %v8308_v58, %v4152_v46  ;;  %v3823_v7 = vadd.f32 %v6049_v37, %v8187_v10  ;;  %v4261_v2 = vmul.f32 %v8315_v54, %v4222_v49  ;;  %v6164_v51 = vadd.f32 %v6163_v27, %v6162_v14 }
 0x2d9   : > { %v6165_v45 = vpop.f32.mrf.mxu0  ;;  %v6051_v52 = vpop.f32.mrf.mxu1 }
 0x2da   : > { %v4223_v16 = vmax.f32 %v4191_v40, 0.0  ;;  %v4153_v47 = vadd.f32 %v6161_v39, %v3823_v7  ;;  %v6052_v56 = vadd.f32 %v6051_v52, %v6050_v63  ;;  %v4300_v22 = vadd.f32 %v8323_v34, %v4261_v2 }
 0x2db   : > { %v6166_v4 = vpop.f32.mrf.mxu0  ;;  %v6053_v38 = vpop.f32.mrf.mxu1 }
 0x2dc   : > { %v4262_v60 = vmul.f32 %v8315_v54, %v4223_v16  ;;  %v4192_v10 = vadd.f32 %v8308_v58, %v4153_v47  ;;  %v3824_v12 = vadd.f32 %v6052_v56, %v8192_v26  ;;  %v6167_v17 = vadd.f32 %v6166_v4, %v6165_v45 }
 0x2dd   : > { %v6168_v19 = vpop.f32.mrf.mxu0  ;;  %v6054_v35 = vpop.f32.mrf.mxu1 }
 0x2de   : > { %v4301_v41 = vadd.f32 %v8323_v34, %v4262_v60  ;;  %v4224_v0 = vmax.f32 %v4192_v10, 0.0  ;;  %v4154_v28 = vadd.f32 %v6164_v51, %v3824_v12  ;;  %v6055_v48 = vadd.f32 %v6054_v35, %v6053_v38 }
 0x2df   : > { %v6169_v9 = vpop.f32.mrf.mxu0  ;;  %v6056_v55 = vpop.f32.mrf.mxu1 }
 0x2e0   : > { %v5149_v18 = vpack.c.bf16 %v4301_v41, %v4300_v22  ;;  %v4193_v26 = vadd.f32 %v8308_v58, %v4154_v28  ;;  %v3825_v14 = vadd.f32 %v6055_v48, %v8197_v15  ;;  %v4263_v46 = vmul.f32 %v8315_v54, %v4224_v0 }
 0x2e1   : > { %v6171_v49 = vpop.f32.mrf.mxu0  ;;  %v6057_v37 = vpop.f32.mrf.mxu1  ;;  %v6170_v47 = vadd.f32 %v6169_v9, %v6168_v19 }
 0x2e2   : > { %5150 = vst [vmem:[%s8334_s21] sm:$0xff] %v5149_v18   ;;  %v4225_v27 = vmax.f32 %v4193_v26, 0.0  ;;  %v4155_v63 = vadd.f32 %v6167_v17, %v3825_v14  ;;  %v6058_v40 = vadd.f32 %v6057_v37, %v6056_v55  ;;  %v4302_v15 = vadd.f32 %v8323_v34, %v4263_v46 }
 0x2e3   : > { %v6172_v7 = vpop.f32.mrf.mxu0  ;;  %v6059_v39 = vpop.f32.mrf.mxu1 }
 0x2e4   : > { %v4264_v2 = vmul.f32 %v8315_v54, %v4225_v27  ;;  %v4194_v52 = vadd.f32 %v8308_v58, %v4155_v63  ;;  %v3826_v16 = vadd.f32 %v6058_v40, %v8202_v6  ;;  %v6173_v0 = vadd.f32 %v6172_v7, %v6171_v49 }
 0x2e5   : > { %v6174_v56 = vpop.f32.mrf.mxu0  ;;  %v6060_v45 = vpop.f32.mrf.mxu1 }
 0x2e6   : > { %v4303_v4 = vadd.f32 %v8323_v34, %v4264_v2  ;;  %v4226_v38 = vmax.f32 %v4194_v52, 0.0  ;;  %v4156_v60 = vadd.f32 %v6170_v47, %v3826_v16  ;;  %v6061_v10 = vadd.f32 %v6060_v45, %v6059_v39 }
 0x2e7   : > { %v6175_v12 = vpop.f32.mrf.mxu0  ;;  %v6062_v51 = vpop.f32.mrf.mxu1 }
 0x2e8   : > { %v5154_v22 = vpack.c.bf16 %v4303_v4, %v4302_v15  ;;  %v4195_v35 = vadd.f32 %v8308_v58, %v4156_v60  ;;  %v3827_v41 = vadd.f32 %v6061_v10, %v8207_v1  ;;  %v4265_v19 = vmul.f32 %v8315_v54, %v4226_v38 }
 0x2e9   : > { %v6177_v6 = vpop.f32.mrf.mxu0  ;;  %v6063_v28 = vpop.f32.mrf.mxu1  ;;  %v6176_v37 = vadd.f32 %v6175_v12, %v6174_v56 }
 0x2ea   : > { %5226 = vst [vmem:[%s8334_s21 + $0x8] sm:$0xff] %v5154_v22   ;;  %v4227_v48 = vmax.f32 %v4195_v35, 0.0  ;;  %v4157_v9 = vadd.f32 %v6173_v0, %v3827_v41  ;;  %v6064_v55 = vadd.f32 %v6063_v28, %v6062_v51  ;;  %v4304_v1 = vadd.f32 %v8323_v34, %v4265_v19 }
 0x2eb   : > { %v6178_v18 = vpop.f32.mrf.mxu0  ;;  %v6065_v26 = vpop.f32.mrf.mxu1 }
 0x2ec   : > { %v4266_v14 = vmul.f32 %v8315_v54, %v4227_v48  ;;  %v4196_v17 = vadd.f32 %v8308_v58, %v4157_v9  ;;  %v3828_v46 = vadd.f32 %v6064_v55, %v8214_v62  ;;  %v6179_v45 = vadd.f32 %v6178_v18, %v6177_v6 }
 0x2ed   : > { %v6180_v27 = vpop.f32.mrf.mxu0  ;;  %v6066_v49 = vpop.f32.mrf.mxu1 }
 0x2ee   : > { %v4305_v63 = vadd.f32 %v8323_v34, %v4266_v14  ;;  %v4228_v40 = vmax.f32 %v4196_v17, 0.0  ;;  %v4158_v7 = vadd.f32 %v6176_v37, %v3828_v46  ;;  %v6067_v39 = vadd.f32 %v6066_v49, %v6065_v26 }
 0x2ef   : > { %v6181_v2 = vpop.f32.mrf.mxu0  ;;  %v6068_v52 = vpop.f32.mrf.mxu1 }
 0x2f0   : > { %v5159_v16 = vpack.c.bf16 %v4305_v63, %v4304_v1  ;;  %v4197_v47 = vadd.f32 %v8308_v58, %v4158_v7  ;;  %v3829_v15 = vadd.f32 %v6067_v39, %v8220_v33  ;;  %v4267_v56 = vmul.f32 %v8315_v54, %v4228_v40 }
 0x2f1   : > { %v6183_v62 = vpop.f32.mrf.mxu0  ;;  %v6069_v4 = vpop.f32.mrf.mxu1  ;;  %v6182_v0 = vadd.f32 %v6181_v2, %v6180_v27 }
 0x2f2   : > { %5227 = vst [vmem:[%s8334_s21 + $0x10] sm:$0xff] %v5159_v16   ;;  %v4229_v38 = vmax.f32 %v4197_v47, 0.0  ;;  %v4159_v60 = vadd.f32 %v6179_v45, %v3829_v15  ;;  %v6070_v10 = vadd.f32 %v6069_v4, %v6068_v52  ;;  %v4306_v33 = vadd.f32 %v8323_v34, %v4267_v56 }
 0x2f3   : > { %v6184_v12 = vpop.f32.mrf.mxu0  ;;  %v6071_v51 = vpop.f32.mrf.mxu1 }
 0x2f4   : > { %v4268_v22 = vmul.f32 %v8315_v54, %v4229_v38  ;;  %v4198_v35 = vadd.f32 %v8308_v58, %v4159_v60  ;;  %v3830_v41 = vadd.f32 %v6070_v10, %v8228_v61  ;;  %v6185_v37 = vadd.f32 %v6184_v12, %v6183_v62 }
 0x2f5   : > { %v6186_v19 = vpop.f32.mrf.mxu0  ;;  %v6072_v6 = vpop.f32.mrf.mxu1 }
 0x2f6   : > { %v4307_v28 = vadd.f32 %v8323_v34, %v4268_v22  ;;  %v4230_v48 = vmax.f32 %v4198_v35, 0.0  ;;  %v4160_v9 = vadd.f32 %v6182_v0, %v3830_v41  ;;  %v6073_v55 = vadd.f32 %v6072_v6, %v6071_v51 }
 0x2f7   : > { %v6187_v18 = vpop.f32.mrf.mxu0  ;;  %v6074_v26 = vpop.f32.mrf.mxu1 }
 0x2f8   : > { %v5164_v14 = vpack.c.bf16 %v4307_v28, %v4306_v33  ;;  %v4199_v17 = vadd.f32 %v8308_v58, %v4160_v9  ;;  %v3831_v46 = vadd.f32 %v6073_v55, %v8236_v5  ;;  %v4269_v27 = vmul.f32 %v8315_v54, %v4230_v48 }
 0x2f9   : > { %v6189_v61 = vpop.f32.mrf.mxu0  ;;  %v6075_v1 = vpop.f32.mrf.mxu1  ;;  %v6188_v47 = vadd.f32 %v6187_v18, %v6186_v19 }
 0x2fa   : > { %5228 = vst [vmem:[%s8334_s21 + $0x18] sm:$0xff] %v5164_v14   ;;  %v4231_v49 = vmax.f32 %v4199_v17, 0.0  ;;  %v4161_v63 = vadd.f32 %v6185_v37, %v3831_v46  ;;  %v6076_v40 = vadd.f32 %v6075_v1, %v6074_v26  ;;  %v4308_v5 = vadd.f32 %v8323_v34, %v4269_v27 }
 0x2fb   : > { %v6190_v7 = vpop.f32.mrf.mxu0  ;;  %v6077_v39 = vpop.f32.mrf.mxu1 }
 0x2fc   : > { %v4270_v2 = vmul.f32 %v8315_v54, %v4231_v49  ;;  %v4200_v52 = vadd.f32 %v8308_v58, %v4161_v63  ;;  %v3832_v16 = vadd.f32 %v6076_v40, %v8241_v8  ;;  %v6191_v35 = vadd.f32 %v6190_v7, %v6189_v61 }
 0x2fd   : > { %v6192_v15 = vpop.f32.mrf.mxu0  ;;  %v6078_v45 = vpop.f32.mrf.mxu1 }
 0x2fe   : > { %v4309_v62 = vadd.f32 %v8323_v34, %v4270_v2  ;;  %v4232_v56 = vmax.f32 %v4200_v52, 0.0  ;;  %v4162_v4 = vadd.f32 %v6188_v47, %v3832_v16  ;;  %v6079_v38 = vadd.f32 %v6078_v45, %v6077_v39 }
 0x2ff   : > { %v6193_v60 = vpop.f32.mrf.mxu0  ;;  %v6080_v10 = vpop.f32.mrf.mxu1 }
 0x300   : > { %v5169_v12 = vpack.c.bf16 %v4309_v62, %v4308_v5  ;;  %v4201_v51 = vadd.f32 %v8308_v58, %v4162_v4  ;;  %v3833_v22 = vadd.f32 %v6079_v38, %v8245_v43  ;;  %v4271_v41 = vmul.f32 %v8315_v54, %v4232_v56 }
 0x301   : > { %v6195_v8 = vpop.f32.mrf.mxu0  ;;  %v6081_v0 = vpop.f32.mrf.mxu1  ;;  %v6194_v26 = vadd.f32 %v6193_v60, %v6192_v15 }
 0x302   : > { %5229 = vst [vmem:[%s8334_s21 + $0x20] sm:$0xff] %v5169_v12   ;;  %v4233_v19 = vmax.f32 %v4201_v51, 0.0  ;;  %v4163_v33 = vadd.f32 %v6191_v35, %v3833_v22  ;;  %v6082_v6 = vadd.f32 %v6081_v0, %v6080_v10  ;;  %v4310_v43 = vadd.f32 %v8323_v34, %v4271_v41 }
 0x303   : > { %v6196_v28 = vpop.f32.mrf.mxu0  ;;  %v6083_v48 = vpop.f32.mrf.mxu1 }
 0x304   : > { %v4272_v9 = vmul.f32 %v8315_v54, %v4233_v19  ;;  %v4202_v55 = vadd.f32 %v8308_v58, %v4163_v33  ;;  %v3834_v18 = vadd.f32 %v6082_v6, %v8248_v31  ;;  %v6197_v39 = vadd.f32 %v6196_v28, %v6195_v8 }
 0x305   : > { %v6198_v14 = vpop.f32.mrf.mxu0  ;;  %v6084_v17 = vpop.f32.mrf.mxu1 }
 0x306   : > { %v4311_v46 = vadd.f32 %v8323_v34, %v4272_v9  ;;  %v4234_v37 = vmax.f32 %v4202_v55, 0.0  ;;  %v4164_v61 = vadd.f32 %v6194_v26, %v3834_v18  ;;  %v6085_v27 = vadd.f32 %v6084_v17, %v6083_v48 }
 0x307   : > { %v6199_v1 = vpop.f32.mrf.mxu0  ;;  %v6086_v49 = vpop.f32.mrf.mxu1 }
 0x308   : > { %v5174_v63 = vpack.c.bf16 %v4311_v46, %v4310_v43  ;;  %v4203_v40 = vadd.f32 %v8308_v58, %v4164_v61  ;;  %v3835_v7 = vadd.f32 %v6085_v27, %v8251_v32  ;;  %v4273_v2 = vmul.f32 %v8315_v54, %v4234_v37 }
 0x309   : > { %v6201_v31 = vpop.f32.mrf.mxu0  ;;  %v6087_v52 = vpop.f32.mrf.mxu1  ;;  %v6200_v38 = vadd.f32 %v6199_v1, %v6198_v14 }
 0x30a   : > { %5230 = vst [vmem:[%s8334_s21 + $0x28] sm:$0xff] %v5174_v63   ;;  %v4235_v16 = vmax.f32 %v4203_v40, 0.0  ;;  %v4165_v47 = vadd.f32 %v6197_v39, %v3835_v7  ;;  %v6088_v15 = vadd.f32 %v6087_v52, %v6086_v49  ;;  %v4312_v32 = vadd.f32 %v8323_v34, %v4273_v2 }
 0x30b   : > { %v6202_v5 = vpop.f32.mrf.mxu0  ;;  %v6089_v45 = vpop.f32.mrf.mxu1 }
 0x30c   : > { %v4274_v62 = vmul.f32 %v8315_v54, %v4235_v16  ;;  %v4204_v56 = vadd.f32 %v8308_v58, %v4165_v47  ;;  %v3836_v4 = vadd.f32 %v6088_v15, %v8254_v42  ;;  %v6203_v6 = vadd.f32 %v6202_v5, %v6201_v31 }
 0x30d   : > { %v6204_v60 = vpop.f32.mrf.mxu0  ;;  %v6090_v10 = vpop.f32.mrf.mxu1 }
 0x30e   : > { %v4313_v12 = vadd.f32 %v8323_v34, %v4274_v62  ;;  %v4236_v51 = vmax.f32 %v4204_v56, 0.0  ;;  %v4166_v22 = vadd.f32 %v6200_v38, %v3836_v4  ;;  %v6091_v35 = vadd.f32 %v6090_v10, %v6089_v45 }
 0x30f   : > { %v6205_v8 = vpop.f32.mrf.mxu0  ;;  %v6092_v41 = vpop.f32.mrf.mxu1 }
 0x310   : > { %v5179_v0 = vpack.c.bf16 %v4313_v12, %v4312_v32  ;;  %v4205_v19 = vadd.f32 %v8308_v58, %v4166_v22  ;;  %v3837_v33 = vadd.f32 %v6091_v35, %v8257_v29  ;;  %v4275_v28 = vmul.f32 %v8315_v54, %v4236_v51 }
 0x311   : > { %v6207_v42 = vpop.f32.mrf.mxu0  ;;  %v6093_v48 = vpop.f32.mrf.mxu1  ;;  %v6206_v37 = vadd.f32 %v6205_v8, %v6204_v60 }
 0x312   : > { %5231 = vst [vmem:[%s8334_s21 + $0x30] sm:$0xff] %v5179_v0   ;;  %v4237_v9 = vmax.f32 %v4205_v19, 0.0  ;;  %v4167_v55 = vadd.f32 %v6203_v6, %v3837_v33  ;;  %v6094_v18 = vadd.f32 %v6093_v48, %v6092_v41  ;;  %v4314_v29 = vadd.f32 %v8323_v34, %v4275_v28 }
 0x313   : > { %v6208_v26 = vpop.f32.mrf.mxu0  ;;  %v6095_v14 = vpop.f32.mrf.mxu1 }
 0x314   : > { %v4276_v43 = vmul.f32 %v8315_v54, %v4237_v9  ;;  %v4206_v17 = vadd.f32 %v8308_v58, %v4167_v55  ;;  %v3838_v46 = vadd.f32 %v6094_v18, %v8260_v44  ;;  %v6209_v16 = vadd.f32 %v6208_v26, %v6207_v42 }
 0x315   : > { %v6210_v61 = vpop.f32.mrf.mxu0  ;;  %v6096_v27 = vpop.f32.mrf.mxu1 }
 0x316   : > { %v4315_v1 = vadd.f32 %v8323_v34, %v4276_v43  ;;  %v4238_v49 = vmax.f32 %v4206_v17, 0.0  ;;  %v4168_v63 = vadd.f32 %v6206_v37, %v3838_v46  ;;  %v6097_v40 = vadd.f32 %v6096_v27, %v6095_v14 }
 0x317   : > { %v6211_v7 = vpop.f32.mrf.mxu0  ;;  %v6098_v39 = vpop.f32.mrf.mxu1 }
 0x318   : > { %v5184_v31 = vpack.c.bf16 %v4315_v1, %v4314_v29  ;;  %v4207_v2 = vadd.f32 %v8308_v58, %v4168_v63  ;;  %v3839_v52 = vadd.f32 %v6097_v40, %v8263_v20  ;;  %v4277_v47 = vmul.f32 %v8315_v54, %v4238_v49 }
 0x319   : > { %v6213_v44 = vpop.f32.mrf.mxu0  ;;  %v6099_v15 = vpop.f32.mrf.mxu1  ;;  %v6212_v10 = vadd.f32 %v6211_v7, %v6210_v61 }
 0x31a   : > { %5232 = vst [vmem:[%s8334_s21 + $0x38] sm:$0xff] %v5184_v31   ;;  %v4239_v5 = vmax.f32 %v4207_v2, 0.0  ;;  %v4169_v45 = vadd.f32 %v6209_v16, %v3839_v52  ;;  %v6100_v62 = vadd.f32 %v6099_v15, %v6098_v39  ;;  %v4316_v20 = vadd.f32 %v8323_v34, %v4277_v47 }
 0x31b   : > { %v6214_v56 = vpop.f32.mrf.mxu0  ;;  %v6101_v4 = vpop.f32.mrf.mxu1 }
 0x31c   : > { %v4278_v38 = vmul.f32 %v8315_v54, %v4239_v5  ;;  %v4208_v60 = vadd.f32 %v8308_v58, %v4169_v45  ;;  %v3840_v32 = vadd.f32 %v6100_v62, %v8266_v21  ;;  %v6215_v28 = vadd.f32 %v6214_v56, %v6213_v44 }
 0x31d   : > { %v6216_v12 = vpop.f32.mrf.mxu0  ;;  %v6102_v51 = vpop.f32.mrf.mxu1 }
 0x31e   : > { %v4317_v22 = vadd.f32 %v8323_v34, %v4278_v38  ;;  %v4240_v35 = vmax.f32 %v4208_v60, 0.0  ;;  %v4170_v8 = vadd.f32 %v6212_v10, %v3840_v32  ;;  %v6103_v41 = vadd.f32 %v6102_v51, %v6101_v4 }
 0x31f   : > { %v6217_v0 = vpop.f32.mrf.mxu0  ;;  %v6104_v19 = vpop.f32.mrf.mxu1 }
 0x320   : > { %v5189_v33 = vpack.c.bf16 %v4317_v22, %v4316_v20  ;;  %v4209_v6 = vadd.f32 %v8308_v58, %v4170_v8  ;;  %v3841_v42 = vadd.f32 %v6103_v41, %v8269_v36  ;;  %v4279_v48 = vmul.f32 %v8315_v54, %v4240_v35 }
 0x321   : > { %v6219_v21 = vpop.f32.mrf.mxu0  ;;  %v6105_v9 = vpop.f32.mrf.mxu1  ;;  %v6218_v61 = vadd.f32 %v6217_v0, %v6216_v12 }
 0x322   : > { %5233 = vst [vmem:[%s8334_s21 + $0x40] sm:$0xff] %v5189_v33   ;;  %v4241_v55 = vmax.f32 %v4209_v6, 0.0  ;;  %v4171_v18 = vadd.f32 %v6215_v28, %v3841_v42  ;;  %v6106_v26 = vadd.f32 %v6105_v9, %v6104_v19  ;;  %v4318_v36 = vadd.f32 %v8323_v34, %v4279_v48 }
 0x323   : > { %v6220_v14 = vpop.f32.mrf.mxu0  ;;  %v6107_v43 = vpop.f32.mrf.mxu1 }
 0x324   : > { %v4280_v17 = vmul.f32 %v8315_v54, %v4241_v55  ;;  %v4210_v46 = vadd.f32 %v8308_v58, %v4171_v18  ;;  %v3842_v37 = vadd.f32 %v6106_v26, %v8272_v25  ;;  %v6221_v16 = vadd.f32 %v6220_v14, %v6219_v21 }
 0x325   : > { %v6222_v29 = vpop.f32.mrf.mxu0  ;;  %v6108_v27 = vpop.f32.mrf.mxu1 }
 0x326   : > { %v4319_v1 = vadd.f32 %v8323_v34, %v4280_v17  ;;  %v4242_v49 = vmax.f32 %v4210_v46, 0.0  ;;  %v4172_v63 = vadd.f32 %v6218_v61, %v3842_v37  ;;  %v6109_v40 = vadd.f32 %v6108_v27, %v6107_v43 }
 0x327   : > { %v6223_v7 = vpop.f32.mrf.mxu0  ;;  %v6110_v39 = vpop.f32.mrf.mxu1 }
 0x328   : > { %v5194_v31 = vpack.c.bf16 %v4319_v1, %v4318_v36  ;;  %v4211_v2 = vadd.f32 %v8308_v58, %v4172_v63  ;;  %v3843_v52 = vadd.f32 %v6109_v40, %v8275_v30  ;;  %v4281_v44 = vmul.f32 %v8315_v54, %v4242_v49 }
 0x329   : > { %v6225_v25 = vpop.f32.mrf.mxu0  ;;  %v6111_v47 = vpop.f32.mrf.mxu1  ;;  %v6224_v32 = vadd.f32 %v6223_v7, %v6222_v29 }
 0x32a   : > { %5234 = vst [vmem:[%s8334_s21 + $0x48] sm:$0xff] %v5194_v31   ;;  %v4243_v15 = vmax.f32 %v4211_v2, 0.0  ;;  %v4173_v5 = vadd.f32 %v6221_v16, %v3843_v52  ;;  %v6112_v45 = vadd.f32 %v6111_v47, %v6110_v39  ;;  %v4320_v30 = vadd.f32 %v8323_v34, %v4281_v44 }
 0x32b   : > { %v6226_v62 = vpop.f32.mrf.mxu0  ;;  %v6113_v56 = vpop.f32.mrf.mxu1 }
 0x32c   : > { %v4282_v4 = vmul.f32 %v8315_v54, %v4243_v15  ;;  %v4212_v38 = vadd.f32 %v8308_v58, %v4173_v5  ;;  %v3844_v60 = vadd.f32 %v6112_v45, %v8278_v23  ;;  %v6227_v6 = vadd.f32 %v6226_v62, %v6225_v25 }
 0x32d   : > { %v6228_v10 = vpop.f32.mrf.mxu0  ;;  %v6114_v12 = vpop.f32.mrf.mxu1 }
 0x32e   : > { %v4321_v20 = vadd.f32 %v8323_v34, %v4282_v4  ;;  %v4244_v51 = vmax.f32 %v4212_v38, 0.0  ;;  %v4174_v22 = vadd.f32 %v6224_v32, %v3844_v60  ;;  %v6115_v35 = vadd.f32 %v6114_v12, %v6113_v56 }
 0x32f   : > { %v6229_v8 = vpop.f32.mrf.mxu0  ;;  %v6116_v41 = vpop.f32.mrf.mxu1 }
 0x330   : > { %v5199_v0 = vpack.c.bf16 %v4321_v20, %v4320_v30  ;;  %v4213_v19 = vadd.f32 %v8308_v58, %v4174_v22  ;;  %v3845_v33 = vadd.f32 %v6115_v35, %v8281_v13  ;;  %v4283_v42 = vmul.f32 %v8315_v54, %v4244_v51 }
 0x331   : > { %v6231_v23 = vpop.f32.mrf.mxu0  ;;  %v6117_v28 = vpop.f32.mrf.mxu1  ;;  %v6230_v17 = vadd.f32 %v6229_v8, %v6228_v10 }
 0x332   : > { %5235 = vst [vmem:[%s8334_s21 + $0x50] sm:$0xff] %v5199_v0   ;;  %v4245_v21 = vmax.f32 %v4213_v19, 0.0  ;;  %v4175_v48 = vadd.f32 %v6227_v6, %v3845_v33  ;;  %v6118_v9 = vadd.f32 %v6117_v28, %v6116_v41  ;;  %v4322_v13 = vadd.f32 %v8323_v34, %v4283_v42 }
 0x333   : > { %v6232_v55 = vpop.f32.mrf.mxu0  ;;  %v6119_v18 = vpop.f32.mrf.mxu1 }
 0x334   : > { %v4284_v26 = vmul.f32 %v8315_v54, %v4245_v21  ;;  %v4214_v14 = vadd.f32 %v8308_v58, %v4175_v48  ;;  %v3846_v43 = vadd.f32 %v6118_v9, %v8284_v59  ;;  %v6233_v39 = vadd.f32 %v6232_v55, %v6231_v23 }
 0x335   : > { %v6234_v46 = vpop.f32.mrf.mxu0  ;;  %v6120_v37 = vpop.f32.mrf.mxu1 }
 0x336   : > { %v4323_v61 = vadd.f32 %v8323_v34, %v4284_v26  ;;  %v4246_v29 = vmax.f32 %v4214_v14, 0.0  ;;  %v4176_v36 = vadd.f32 %v6230_v17, %v3846_v43  ;;  %v6121_v27 = vadd.f32 %v6120_v37, %v6119_v18 }
 0x337   : > { %v6235_v1 = vpop.f32.mrf.mxu0  ;;  %v6122_v49 = vpop.f32.mrf.mxu1 }
 0x338   : > { %v5204_v63 = vpack.c.bf16 %v4323_v61, %v4322_v13  ;;  %v4215_v40 = vadd.f32 %v8308_v58, %v4176_v36  ;;  %v3847_v7 = vadd.f32 %v6121_v27, %v8287_v3  ;;  %v4285_v31 = vmul.f32 %v8315_v54, %v4246_v29 }
 0x339   : > { %v6237_v59 = vpop.f32.mrf.mxu0  ;;  %v6123_v2 = vpop.f32.mrf.mxu1  ;;  %v6236_v62 = vadd.f32 %v6235_v1, %v6234_v46 }
 0x33a   : > { %5236 = vst [vmem:[%s8334_s21 + $0x58] sm:$0xff] %v5204_v63   ;;  %v4247_v52 = vmax.f32 %v4215_v40, 0.0  ;;  %v4177_v16 = vadd.f32 %v6233_v39, %v3847_v7  ;;  %v6124_v25 = vadd.f32 %v6123_v2, %v6122_v49  ;;  %v4324_v3 = vadd.f32 %v8323_v34, %v4285_v31 }
 0x33b   : > { %v6238_v44 = vpop.f32.mrf.mxu0  ;;  %v6125_v47 = vpop.f32.mrf.mxu1 }
 0x33c   : > { %v4286_v15 = vmul.f32 %v8315_v54, %v4247_v52  ;;  %v4216_v5 = vadd.f32 %v8308_v58, %v4177_v16  ;;  %v3848_v45 = vadd.f32 %v6124_v25, %v8290_v57  ;;  %v6239_v35 = vadd.f32 %v6238_v44, %v6237_v59 }
 0x33d   : > { %v6240_v56 = vpop.f32.mrf.mxu0  ;;  %v6126_v4 = vpop.f32.mrf.mxu1 }
 0x33e   : > { %v4325_v38 = vadd.f32 %v8323_v34, %v4286_v15  ;;  %v4248_v60 = vmax.f32 %v4216_v5, 0.0  ;;  %v4178_v32 = vadd.f32 %v6236_v62, %v3848_v45  ;;  %v6127_v10 = vadd.f32 %v6126_v4, %v6125_v47 }
 0x33f   : > { %v6241_v30 = vpop.f32.mrf.mxu0  ;;  %v6128_v12 = vpop.f32.mrf.mxu1 }
 0x340   : > { %v5209_v20 = vpack.c.bf16 %v4325_v38, %v4324_v3  ;;  %v4217_v51 = vadd.f32 %v8308_v58, %v4178_v32  ;;  %v3849_v22 = vadd.f32 %v6127_v10, %v8293_v50  ;;  %v4287_v8 = vmul.f32 %v8315_v54, %v4248_v60 }
 0x341   : > { %v6243_v57 = vpop.f32.mrf.mxu0  ;;  %v6129_v41 = vpop.f32.mrf.mxu1  ;;  %v6242_v48 = vadd.f32 %v6241_v30, %v6240_v56 }
 0x342   : > { %5237 = vst [vmem:[%s8334_s21 + $0x60] sm:$0xff] %v5209_v20   ;;  %v4249_v0 = vmax.f32 %v4217_v51, 0.0  ;;  %v4179_v19 = vadd.f32 %v6239_v35, %v3849_v22  ;;  %v6130_v33 = vadd.f32 %v6129_v41, %v6128_v12  ;;  %v4326_v50 = vadd.f32 %v8323_v34, %v4287_v8 }
 0x343   : > { %v6244_v6 = vpop.f32.mrf.mxu0  ;;  %v6131_v23 = vpop.f32.mrf.mxu1 }
 0x344   : > { %v4288_v42 = vmul.f32 %v8315_v54, %v4249_v0  ;;  %v4218_v28 = vadd.f32 %v8308_v58, %v4179_v19  ;;  %v3850_v21 = vadd.f32 %v6130_v33, %v8296_v11  ;;  %v6245_v61 = vadd.f32 %v6244_v6, %v6243_v57 }
 0x345   : > { %v6132_v9 = vpop.f32.mrf.mxu1  ;;  %v6246_v55 = vpop.f32.mrf.mxu0 }
 0x346   : > { %v4327_v18 = vadd.f32 %v8323_v34, %v4288_v42  ;;  %v4250_v26 = vmax.f32 %v4218_v28, 0.0  ;;  %v4180_v14 = vadd.f32 %v6242_v48, %v3850_v21  ;;  %v6133_v43 = vadd.f32 %v6132_v9, %v6131_v23 }
 0x347   : > { %v6134_v17 = vpop.f32.mrf.mxu1  ;;  %v6247_v11 = vpop.f32.mrf.mxu0 }
 0x348   : > { %v5214_v46 = vpack.c.bf16 %v4327_v18, %v4326_v50  ;;  %v4219_v13 = vadd.f32 %v8308_v58, %v4180_v14  ;;  %v3851_v37 = vadd.f32 %v6133_v43, %v8299_v53  ;;  %v4289_v36 = vmul.f32 %v8315_v54, %v4250_v26 }
 0x349   : > { %v6135_v29 = vpop.f32.mrf.mxu1  ;;  %v6248_v39 = vadd.f32 %v6247_v11, %v6246_v55 }
 0x34a   : > { %5238 = vst [vmem:[%s8334_s21 + $0x68] sm:$0xff] %v5214_v46   ;;  %v4251_v27 = vmax.f32 %v4219_v13, 0.0  ;;  %v4181_v1 = vadd.f32 %v6245_v61, %v3851_v37  ;;  %v6136_v49 = vadd.f32 %v6135_v29, %v6134_v17  ;;  %v4328_v53 = vadd.f32 %v8323_v34, %v4289_v36 }
 0x34c   : > { %v4290_v63 = vmul.f32 %v8315_v54, %v4251_v27  ;;  %v4220_v40 = vadd.f32 %v8308_v58, %v4181_v1  ;;  %v3852_v7 = vadd.f32 %v6136_v49, %v8302_v24 }
 0x34e   : > { %v4329_v59 = vadd.f32 %v8323_v34, %v4290_v63  ;;  %v4252_v31 = vmax.f32 %v4220_v40, 0.0  ;;  %v4182_v2 = vadd.f32 %v6248_v39, %v3852_v7 }
 0x350   : > { %v5219_v52 = vpack.c.bf16 %v4329_v59, %v4328_v53  ;;  %v4221_v16 = vadd.f32 %v8308_v58, %v4182_v2  ;;  %v4291_v25 = vmul.f32 %v8315_v54, %v4252_v31 }
 0x352   : > { %5239 = vst [vmem:[%s8334_s21 + $0x70] sm:$0xff] %v5219_v52   ;;  %v4253_v44 = vmax.f32 %v4221_v16, 0.0  ;;  %v4330_v15 = vadd.f32 %v8323_v34, %v4291_v25 }
 0x354   : > { %v4292_v47 = vmul.f32 %v8315_v54, %v4253_v44 }
 0x356   : > { %v4331_v24 = vadd.f32 %v8323_v34, %v4292_v47 }
 0x358   : > { %v5224_v5 = vpack.c.bf16 %v4331_v24, %v4330_v15 }
 0x35a   : > { %5240 = vst [vmem:[%s8334_s21 + $0x78] sm:$0xff] %v5224_v5  }
 0x35b PF: > { %s16_s23 = sadd.s32 1, %s6591_s23   ;;  %s8766_s21 = smov %s6587_s22 }
 0x35c   : > { %p13_p5 = scmp.ge.s32.totalorder %s16_s23, 4   ;;  %s8767_s22 = smov %s8769_s24 }
 0x35e   :  { %15 = sbr.rel (!%p13_p5) target bundleno = 2 (0x2), region = 87 }

// kernel: decode_stack_forward.5
= control target key start
LH: loop header
LB: loop body
LE: loop exit
PB: predicated region body
PF: predicated region fallthrough
CT: control target
= control target key end

     0   :  { %s4798_s18 = smov 0   ;;  %s4800_s19 = smov 0   ;;  %s6398_s0 = inlined_call_operand.vmem [shape: bf16[2,18,18,128], index: 0, kind: input, shape index: {}]   ;;  %s6399_s1 = inlined_call_operand.vmem [shape: bf16[3,3,128,128], index: 1, kind: input, shape index: {}]   ;;  %s6400_s2 = inlined_call_operand.vmem [shape: f32[1,128], index: 2, kind: input, shape index: {}]   ;;  %s6401_s3 = inlined_call_operand.vmem [shape: f32[1,128], index: 3, kind: input, shape index: {}]   ;;  %s6402_s4 = inlined_call_operand.vmem [shape: f32[1,128], index: 4, kind: input, shape index: {}]   ;;  %s6403_s5 = inlined_call_operand.vmem [shape: f32[2,16,16,128], index: 5, kind: output, shape index: {}]  }
   0x1   :  { %s4802_s20 = smov 0  }
   0x2 LB: > { %s27_s21 = sadd.s32 1, %s4762_s19  ;;  %p3674_p0 = scmp.ge.s32.totalorder %s4766_s20, 1  ;;  %s4766_s20 = sphi %s4802_s20, %s15_s20   ;;  %s4762_s19 = sphi %s4800_s19, %s6589_s19   ;;  %s4758_s18 = sphi %s4798_s18, %s6588_s18  }
   0x3   : > { %p29_p1 = scmp.ge.s32.totalorder %s27_s21, 2  ;;  %p201_p2 = scmp.lt.s32.totalorder %s4766_s20, 3 }
   0x5   : > { %s6591_s21 = smov (%p29_p1, %s27_s21), 0  ;;  %p202_p3 = pnand %p3674_p0, %p201_p2 }
   0x7   : > { %205 = sbr.rel (%p202_p3) target bundleno = 562 (0x232), region = 40 }
   0xc   : > { %v4645_v0 = vld [vmem:[%s6399_s1 + $0x78] sm:$0xff]   ;;  %p234_p4 = scmp.lt.s32.totalorder %s4758_s18, 1  ;;  %v4646_v1 = vld [vmem:[%s6399_s1 + $0x70] sm:$0xff]   ;;  %v4647_v2 = vld [vmem:[%s6399_s1 + $0x68] sm:$0xff]   ;;  %vm325_vm0 = vsmask.f32 3328 }
   0xd   : > { %4172 = vmatprep.subr.bf16.mxu0 %v4645_v0  ;;  %4604 = vmatprep.subr.bf16.mxu1 %v4645_v0  ;;  %v4648_v3 = vld [vmem:[%s6399_s1 + $0x60] sm:$0xff]   ;;  %vm326_vm1 = vsmask.f32 7440  ;;  %v4649_v9 = vld [vmem:[%s6399_s1 + $0x58] sm:$0xff]   ;;  %v4650_v28 = vld [vmem:[%s6399_s1 + $0x50] sm:$0xff]   ;;  %v6440_v29 = vmov 0 }
   0xe   : > { %s6593_s18 = smov (!%p234_p4, %s4758_s18), 1  ;;  %4173 = vmatpush3.bf16.msra.mxu0 %v4645_v0  ;;  %4612 = vmatpush3.bf16.msra.mxu1 %v4645_v0  ;;  %vm4865_vm2 = vmor %vm325_vm0, %vm326_vm1  ;;  %v4651_v59 = vld [vmem:[%s6399_s1 + $0x48] sm:$0xff]   ;;  %vm1323_vm3 = vcmask 1042432   ;;  %vm1324_vm4 = vcmask 1046532  }
   0xf   : > { %4174 = vmatprep.subr.bf16.mxu0 %v4646_v1  ;;  %4605 = vmatprep.subr.bf16.mxu1 %v4646_v1  ;;  %s4620_s28 = smul.u32 216, %s6593_s18  ;;  %v6441_v29 = vsel %vm4865_vm2, 4294967295, %v6440_v29  ;;  %vm5211_vm5 = vmor %vm1323_vm3, %vm1324_vm4  ;;  %s3955_s8 = sshll.u32 %s6593_s18, 8 }
  0x10   : > { %6442 = vst [vmem:[#allocation2_spill] sm:$0xff] %v6441_v29  ;;  %s6192_s12 = scalar_lea.vmem %s6403_s5, %s3955_s8 }
  0x11   : > { %s4831_s6 = scalar_lea.vmem %s6398_s0, %s4620_s28 }
  0x12   : > { %4175 = vmatpush3.bf16.msra.mxu0 %v4646_v1  ;;  %4613 = vmatpush3.bf16.msra.mxu1 %v4646_v1  ;;  %v4837_v4 = vld [vmem:[%s4831_s6] sm:$0xf]  ;;  %v4840_v5 = vld [vmem:[%s4831_s6 + $0x4] sm:$0xf]  ;;  %v4843_v6 = vld [vmem:[%s4831_s6 + $0x8] sm:$0x1] }
  0x13   : > { %4176 = vmatprep.subr.bf16.mxu0 %v4647_v2  ;;  %4606 = vmatprep.subr.bf16.mxu1 %v4647_v2  ;;  %v329_v7 = vshrl.u32 %v4837_v4, 16  ;;  %v332_v8 = vshll.u32 %v4837_v4, 16  ;;  %v338_v10 = vshll.u32 %v4840_v5, 16  ;;  %v342_v11 = vshrl.u32 %v4840_v5, 16  ;;  %v279_v14 = vld [vmem:[%s4831_s6 + $0x60] sm:$0xf] }
  0x14   : > { %v348_v12 = vshll.u32 %v4843_v6, 16  ;;  %v280_v17 = vld [vmem:[%s4831_s6 + $0x64] sm:$0xf]  ;;  %v281_v18 = vld [vmem:[%s4831_s6 + $0x68] sm:$0x1]  ;;  %v521_v22 = vshrl.u32 %v279_v14, 16 }
  0x15   : > { %v331_v15 = vrot.slane %v329_v7, 4  ;;  %v334_v16 = vrot.slane %v332_v8, 5  ;;  %v340_v19 = vrot.slane %v338_v10, 5  ;;  %v344_v20 = vrot.slane %v342_v11, 4  ;;  %v4858_v23 = vld [vmem:[%s4831_s6 + $0xc] sm:$0xf] }
  0x16   : > { %4177 = vmatpush3.bf16.msra.mxu0 %v4647_v2  ;;  %4614 = vmatpush3.bf16.msra.mxu1 %v4647_v2  ;;  %v350_v21 = vrot.slane %v348_v12, 5  ;;  %v524_v25 = vshll.u32 %v279_v14, 16  ;;  %v530_v26 = vshll.u32 %v280_v17, 16  ;;  %v534_v27 = vshrl.u32 %v280_v17, 16  ;;  %v4870_v33 = vld [vmem:[%s4831_s6 + $0x10] sm:$0xf] }
  0x17   : > { %4178 = vmatprep.subr.bf16.mxu0 %v4648_v3  ;;  %4607 = vmatprep.subr.bf16.mxu1 %v4648_v3  ;;  %v335_v24 = vor.u32 %v334_v16, %v331_v15  ;;  %v345_v30 = vor.u32 %v344_v20, %v340_v19  ;;  %v523_v31 = vrot.slane %v521_v22, 4  ;;  %v540_v32 = vshll.u32 %v281_v18, 16  ;;  %v4874_v39 = vld [vmem:[%s4831_s6 + $0x14] sm:$0x1]  ;;  %v282_v44 = vld [vmem:[%s4831_s6 + $0x6c] sm:$0xf] }
  0x18   : > { %v353_v34 = vshrl.u32 %v4858_v23, 16  ;;  %v526_v36 = vrot.slane %v524_v25, 5  ;;  %v532_v37 = vrot.slane %v530_v26, 5  ;;  %v536_v38 = vrot.slane %v534_v27, 4  ;;  %v283_v49 = vld [vmem:[%s4831_s6 + $0x70] sm:$0xf] }
  0x19   : > { %v336_v35 = vrot.slane %v335_v24, 4  ;;  %v346_v40 = vrot.slane %v345_v30, 4  ;;  %v542_v41 = vrot.slane %v540_v32, 5  ;;  %v356_v43 = vshll.u32 %v4858_v23, 16  ;;  %v284_v54 = vld [vmem:[%s4831_s6 + $0x74] sm:$0x1] }
  0x1a   : > { %4179 = vmatpush3.bf16.msra.mxu0 %v4648_v3  ;;  %4615 = vmatpush3.bf16.msra.mxu1 %v4648_v3  ;;  %v355_v42 = vrot.slane %v353_v34, 4  ;;  %v527_v46 = vor.u32 %v526_v36, %v523_v31  ;;  %v537_v47 = vor.u32 %v536_v38, %v532_v37  ;;  %v362_v48 = vshll.u32 %v4870_v33, 16  ;;  %v4898_v16 = vld [vmem:[%s4831_s6 + $0x18] sm:$0xf]  ;;  %v4652_v17 = vld [vmem:[%s6399_s1 + $0x40] sm:$0xff]  }
  0x1b   : > { %4180 = vmatprep.subr.bf16.mxu0 %v4649_v9  ;;  %4608 = vmatprep.subr.bf16.mxu1 %v4649_v9  ;;  %v341_v45 = vsel %vm4865_vm2, %v336_v35, %v340_v19  ;;  %v351_v50 = vsel %vm4865_vm2, %v346_v40, %v350_v21  ;;  %v358_v51 = vrot.slane %v356_v43, 5  ;;  %v366_v52 = vshrl.u32 %v4870_v33, 16  ;;  %v4906_v21 = vld [vmem:[%s4831_s6 + $0x1c] sm:$0xf]  ;;  %v4914_v27 = vld [vmem:[%s4831_s6 + $0x20] sm:$0x1] }
  0x1c   : > { %v372_v53 = vshll.u32 %v4874_v39, 16  ;;  %v3694_v55 = vcombine.low %v341_v45, %v351_v50  ;;  %v528_v56 = vrot.slane %v527_v46, 4  ;;  %v538_v57 = vrot.slane %v537_v47, 4  ;;  %v285_v35 = vld [vmem:[%s4831_s6 + $0x78] sm:$0xf] }
  0x1d   : > { %v364_v58 = vrot.slane %v362_v48, 5  ;;  %v359_v60 = vor.u32 %v358_v51, %v355_v42  ;;  %v368_v61 = vrot.slane %v366_v52, 4  ;;  %v545_v2 = vshrl.u32 %v282_v44, 16  ;;  %v4653_v42 = vld [vmem:[%s6399_s1 + $0x38] sm:$0xff]  }
  0x1e   : > { %4181 = vmatpush3.bf16.msra.mxu0 %v4649_v9  ;;  %4616 = vmatpush3.bf16.msra.mxu1 %v4649_v9  ;;  %v374_v62 = vrot.slane %v372_v53, 5  ;;  %v533_v0 = vsel %vm4865_vm2, %v528_v56, %v532_v37  ;;  %v543_v1 = vsel %vm4865_vm2, %v538_v57, %v542_v41  ;;  %v548_v3 = vshll.u32 %v282_v44, 16  ;;  %v4926_v41 = vld [vmem:[%s4831_s6 + $0x7c] sm:$0xf]  ;;  %v4940_v57 = vld [vmem:[%s4831_s6 + $0x24] sm:$0xf] }
  0x1f   : > { %4182 = vmatprep.subr.bf16.mxu0 %v4650_v28  ;;  %4609 = vmatprep.subr.bf16.mxu1 %v4650_v28  ;;  %v4895_v7 = vcombine.low %v533_v0, %v543_v1  ;;  %v360_v8 = vrot.slane %v359_v60, 4  ;;  %v369_v9 = vor.u32 %v368_v61, %v364_v58  ;;  %v554_v10 = vshll.u32 %v283_v49, 16  ;;  %v4654_v43 = vld [vmem:[%s6399_s1 + $0xb8] sm:$0xff]   ;;  %v4949_v0 = vld [vmem:[%s4831_s6 + $0x28] sm:$0xf] }
  0x20   : > { %4188 = vmatprep.mubr.bf16.mxu0 %v3694_v55  ;;  %v547_v11 = vrot.slane %v545_v2, 4  ;;  %v550_v12 = vrot.slane %v548_v3, 5  ;;  %v558_v14 = vshrl.u32 %v283_v49, 16  ;;  %v564_v15 = vshll.u32 %v284_v54, 16  ;;  %v287_v55 = vld [vmem:[%s4831_s6 + $0x80] sm:$0x1] }
  0x21   : > { %6443 = vst [vmem:[#allocation3_spill] sm:$0xff] %v4895_v7  ;;  %v365_v18 = vsel %vm4865_vm2, %v360_v8, %v364_v58  ;;  %v370_v19 = vrot.slane %v369_v9, 4  ;;  %v556_v20 = vrot.slane %v554_v10, 5  ;;  %v4910_v22 = vcombine.low %v4858_v23, %v4870_v33  ;;  %4204 = vmatprep.mubr.bf16.mxu1 %v4895_v7  ;;  %v4656_v2 = vld [vmem:[%s6399_s1 + $0xb0] sm:$0xff]   ;;  %v4957_v10 = vld [vmem:[%s4831_s6 + $0x2c] sm:$0x1] }
  0x22   : > { %4183 = vmatpush3.bf16.msra.mxu0 %v4650_v28  ;;  %4617 = vmatpush3.bf16.msra.mxu1 %v4650_v28  ;;  %v551_v24 = vor.u32 %v550_v12, %v547_v11  ;;  %v560_v25 = vrot.slane %v558_v14, 4  ;;  %v566_v26 = vrot.slane %v564_v15, 5  ;;  %v377_v28 = vshrl.u32 %v4898_v16, 16  ;;  %v4960_v11 = vld [vmem:[%s4831_s6 + $0x84] sm:$0xf] }
  0x23   : > { %4184 = vmatprep.subr.bf16.mxu0 %v4651_v59  ;;  %4610 = vmatprep.subr.bf16.mxu1 %v4651_v59  ;;  %v375_v30 = vsel %vm4865_vm2, %v370_v19, %v374_v62  ;;  %v380_v31 = vshll.u32 %v4898_v16, 16  ;;  %v386_v32 = vshll.u32 %v4906_v21, 16  ;;  %v390_v34 = vshrl.u32 %v4906_v21, 16 }
  0x24   : > { %v4923_v36 = vcombine.low %v365_v18, %v375_v30  ;;  %v552_v37 = vrot.slane %v551_v24, 4  ;;  %v561_v38 = vor.u32 %v560_v25, %v556_v20  ;;  %v379_v40 = vrot.slane %v377_v28, 4  ;;  %v4964_v18 = vld [vmem:[%s4831_s6 + $0x88] sm:$0xf] }
  0x25   : > { %v382_v44 = vrot.slane %v380_v31, 5  ;;  %v388_v45 = vrot.slane %v386_v32, 5  ;;  %v392_v46 = vrot.slane %v390_v34, 4  ;;  %v396_v47 = vshll.u32 %v4914_v27, 16  ;;  %v4658_v28 = vld [vmem:[%s6399_s1 + $0xa8] sm:$0xff]  }
  0x26   : > { %4185 = vmatpush3.bf16.msra.mxu0 %v4651_v59  ;;  %4618 = vmatpush3.bf16.msra.mxu1 %v4651_v59  ;;  %6444 = vst [vmem:[#allocation4_spill] sm:$0xff] %v4923_v36  ;;  %v557_v48 = vsel %vm4865_vm2, %v552_v37, %v556_v20  ;;  %v562_v49 = vrot.slane %v561_v38, 4  ;;  %v569_v50 = vshrl.u32 %v285_v35, 16  ;;  %v572_v51 = vshll.u32 %v285_v35, 16  ;;  %v4655_v59 = vld [vmem:[%s6399_s1 + $0x30] sm:$0xff]  }
  0x27   : > { %4186 = vmatprep.subr.bf16.mxu0 %v4652_v17  ;;  %4611 = vmatprep.subr.bf16.mxu1 %v4652_v17  ;;  %v383_v52 = vor.u32 %v382_v44, %v379_v40  ;;  %v393_v53 = vor.u32 %v392_v46, %v388_v45  ;;  %v398_v54 = vrot.slane %v396_v47, 5  ;;  %v578_v56 = vshll.u32 %v4926_v41, 16  ;;  %v4984_v44 = vld [vmem:[%s4831_s6 + $0x8c] sm:$0x1] }
  0x28   : > { %v567_v58 = vsel %vm4865_vm2, %v562_v49, %v566_v26  ;;  %v571_v60 = vrot.slane %v569_v50, 4  ;;  %v574_v61 = vrot.slane %v572_v51, 5  ;;  %v582_v62 = vshrl.u32 %v4926_v41, 16  ;;  %v4657_v26 = vld [vmem:[%s6399_s1 + $0x28] sm:$0xff]   ;;  %v4994_v51 = vld [vmem:[%s4831_s6 + $0x30] sm:$0xf] }
  0x29   : > { %v4951_v1 = vcombine.low %v557_v48, %v567_v58  ;;  %v384_v3 = vrot.slane %v383_v52, 4  ;;  %v394_v8 = vrot.slane %v393_v53, 4  ;;  %v580_v9 = vrot.slane %v578_v56, 5 }
  0x2a   : > { %4187 = vmatpush3.bf16.msra.mxu0 %v4652_v17  ;;  %4619 = vmatpush3.bf16.msra.mxu1 %v4652_v17  ;;  %v575_v12 = vor.u32 %v574_v61, %v571_v60  ;;  %v584_v14 = vrot.slane %v582_v62, 4  ;;  %v588_v15 = vshll.u32 %v287_v55, 16  ;;  %v401_v17 = vshrl.u32 %v4940_v57, 16  ;;  %v4660_v62 = vld [vmem:[%s6399_s1 + $0xa0] sm:$0xff]  }
  0x2b   : > { %6445 = vst [vmem:[#allocation5_spill] sm:$0xff] %v4951_v1  ;;  %4220 = vmatprep.subr.bf16.mxu1 %v4653_v42  ;;  %4268 = vmatprep.subr.bf16.mxu0 %v4654_v43  ;;  %v389_v19 = vsel %vm4865_vm2, %v384_v3, %v388_v45  ;;  %v399_v20 = vsel %vm4865_vm2, %v394_v8, %v398_v54  ;;  %v404_v24 = vshll.u32 %v4940_v57, 16  ;;  %v410_v25 = vshll.u32 %v4949_v0, 16 }
  0x2c   : > { %v4980_v30 = vcombine.low %v389_v19, %v399_v20  ;;  %v576_v31 = vrot.slane %v575_v12, 4  ;;  %v585_v32 = vor.u32 %v584_v14, %v580_v9  ;;  %v590_v34 = vrot.slane %v588_v15, 5  ;;  %v5016_v19 = vld [vmem:[%s4831_s6 + $0x38] sm:$0x1] }
  0x2d   : > { %4189 = vmatmul.mubr.bf16.vlgmr.msra.gmra.mxu0 %v4923_v36  ;;  %4205 = vmatmul.mubr.bf16.vlgmr.msra.gmra.mxu1 %v4951_v1  ;;  %v403_v35 = vrot.slane %v401_v17, 4  ;;  %v406_v37 = vrot.slane %v404_v24, 5  ;;  %v412_v38 = vrot.slane %v410_v25, 5  ;;  %v414_v40 = vshrl.u32 %v4949_v0, 16  ;;  %v5162_v1 = vld [vmem:[%s4831_s6 + $0x58] sm:$0xf] }
  0x2e   : > { %4221 = vmatpush3.bf16.msra.mxu1 %v4653_v42  ;;  %4269 = vmatpush3.bf16.msra.mxu0 %v4654_v43  ;;  %6446 = vst [vmem:[#allocation6_spill] sm:$0xff] %v4980_v30  ;;  %v581_v42 = vsel %vm4865_vm2, %v576_v31, %v580_v9  ;;  %v586_v43 = vrot.slane %v585_v32, 4  ;;  %v420_v45 = vshll.u32 %v4957_v10, 16  ;;  %v593_v46 = vshrl.u32 %v4960_v11, 16 }
  0x2f   : > { %4222 = vmatprep.subr.bf16.mxu1 %v4655_v59  ;;  %4270 = vmatprep.subr.bf16.mxu0 %v4656_v2  ;;  %v407_v47 = vor.u32 %v406_v37, %v403_v35  ;;  %v416_v48 = vrot.slane %v414_v40, 4  ;;  %v596_v49 = vshll.u32 %v4960_v11, 16  ;;  %v602_v50 = vshll.u32 %v4964_v18, 16 }
  0x30   : > { %4192 = vmatprep.mubr.bf16.mxu0 %v4980_v30  ;;  %v591_v52 = vsel %vm4865_vm2, %v586_v43, %v590_v34  ;;  %v422_v53 = vrot.slane %v420_v45, 5  ;;  %v595_v54 = vrot.slane %v593_v46, 4  ;;  %v606_v55 = vshrl.u32 %v4964_v18, 16  ;;  %v5021_v34 = vld [vmem:[%s4831_s6 + $0x90] sm:$0xf] }
  0x31   : > { %v4999_v56 = vcombine.low %v581_v42, %v591_v52  ;;  %v408_v58 = vrot.slane %v407_v47, 4  ;;  %v417_v60 = vor.u32 %v416_v48, %v412_v38  ;;  %v598_v61 = vrot.slane %v596_v49, 5  ;;  %v5027_v42 = vld [vmem:[%s4831_s6 + $0x94] sm:$0xf]  ;;  %v5036_v47 = vld [vmem:[%s4831_s6 + $0x98] sm:$0x1] }
  0x32   : > { %4223 = vmatpush3.bf16.msra.mxu1 %v4655_v59  ;;  %4271 = vmatpush3.bf16.msra.mxu0 %v4656_v2  ;;  %v4659_v59 = vld [vmem:[%s6399_s1 + $0x20] sm:$0xff]   ;;  %v5008_v2 = vld [vmem:[%s4831_s6 + $0x34] sm:$0xf]  ;;  %v604_v3 = vrot.slane %v602_v50, 5  ;;  %v608_v8 = vrot.slane %v606_v55, 4  ;;  %v612_v9 = vshll.u32 %v4984_v44, 16 }
  0x33   : > { %6447 = vst [vmem:[#allocation7_spill] sm:$0xff] %v4999_v56  ;;  %4224 = vmatprep.subr.bf16.mxu1 %v4657_v26  ;;  %4272 = vmatprep.subr.bf16.mxu0 %v4658_v28  ;;  %v425_v12 = vshrl.u32 %v4994_v51, 16  ;;  %v413_v14 = vsel %vm4865_vm2, %v408_v58, %v412_v38  ;;  %v418_v15 = vrot.slane %v417_v60, 4  ;;  %v599_v17 = vor.u32 %v598_v61, %v595_v54  ;;  %v4662_v48 = vld [vmem:[%s6399_s1 + $0x98] sm:$0xff]   ;;  %v5048_v55 = vld [vmem:[%s4831_s6 + $0x40] sm:$0xf] }
  0x34   : > { %4208 = vmatprep.mubr.bf16.mxu1 %v4999_v56  ;;  %v428_v20 = vshll.u32 %v4994_v51, 16  ;;  %v609_v24 = vor.u32 %v608_v8, %v604_v3  ;;  %v614_v25 = vrot.slane %v612_v9, 5  ;;  %v434_v32 = vshll.u32 %v5008_v2, 16  ;;  %v5045_v54 = vld [vmem:[%s4831_s6 + $0x3c] sm:$0xf]  ;;  %v4663_v58 = vld [vmem:[%s6399_s1 + $0x10] sm:$0xff]  }
  0x35   : > { %v427_v31 = vrot.slane %v425_v12, 4  ;;  %v423_v35 = vsel %vm4865_vm2, %v418_v15, %v422_v53  ;;  %v600_v37 = vrot.slane %v599_v17, 4  ;;  %v438_v40 = vshrl.u32 %v5008_v2, 16  ;;  %v4664_v9 = vld [vmem:[%s6399_s1 + $0x90] sm:$0xff]  }
  0x36   : > { %4225 = vmatpush3.bf16.msra.mxu1 %v4657_v26  ;;  %4273 = vmatpush3.bf16.msra.mxu0 %v4658_v28  ;;  %v430_v38 = vrot.slane %v428_v20, 5  ;;  %v4661_v26 = vld [vmem:[%s6399_s1 + $0x18] sm:$0xff]   ;;  %v5032_v28 = vcombine.low %v413_v14, %v423_v35  ;;  %v610_v43 = vrot.slane %v609_v24, 4  ;;  %v436_v45 = vrot.slane %v434_v32, 5 }
  0x37   : > { %4226 = vmatprep.subr.bf16.mxu1 %v4659_v59  ;;  %4274 = vmatprep.subr.bf16.mxu0 %v4660_v62  ;;  %v444_v46 = vshll.u32 %v5016_v19, 16  ;;  %v605_v49 = vsel %vm4865_vm2, %v600_v37, %v604_v3  ;;  %v440_v52 = vrot.slane %v438_v40, 4  ;;  %v617_v53 = vshrl.u32 %v5021_v34, 16  ;;  %v5069_v32 = vld [vmem:[%s4831_s6 + $0x9c] sm:$0xf] }
  0x38   : > { %6448 = vst [vmem:[#allocation8_spill] sm:$0xff] %v5032_v28  ;;  %v431_v50 = vor.u32 %v430_v38, %v427_v31  ;;  %4193 = vmatmul.mubr.bf16.gmra.mxu0 %v5032_v28  ;;  %v615_v60 = vsel %vm4865_vm2, %v610_v43, %v614_v25  ;;  %v620_v3 = vshll.u32 %v5021_v34, 16  ;;  %v626_v8 = vshll.u32 %v5027_v42, 16  ;;  %v5066_v31 = vld [vmem:[%s4831_s6 + $0x44] sm:$0x1] }
  0x39   : > { %v446_v61 = vrot.slane %v444_v46, 5  ;;  %v5061_v12 = vcombine.low %v605_v49, %v615_v60  ;;  %v441_v15 = vor.u32 %v440_v52, %v436_v45  ;;  %v619_v17 = vrot.slane %v617_v53, 4  ;;  %v5077_v40 = vld [vmem:[%s4831_s6 + $0xa0] sm:$0xf] }
  0x3a   : > { %4227 = vmatpush3.bf16.msra.mxu1 %v4659_v59  ;;  %4275 = vmatpush3.bf16.msra.mxu0 %v4660_v62  ;;  %v432_v14 = vrot.slane %v431_v50, 4  ;;  %v622_v20 = vrot.slane %v620_v3, 5  ;;  %v628_v59 = vrot.slane %v626_v8, 5  ;;  %v630_v24 = vshrl.u32 %v5027_v42, 16  ;;  %v4665_v3 = vld [vmem:[%s6399_s1 + $0x8] sm:$0xff]  }
  0x3b   : > { %6449 = vst [vmem:[#allocation9_spill] sm:$0xff] %v5061_v12  ;;  %4228 = vmatprep.subr.bf16.mxu1 %v4661_v26  ;;  %v636_v25 = vshll.u32 %v5036_v47, 16  ;;  %4276 = vmatprep.subr.bf16.mxu0 %v4662_v48  ;;  %v442_v35 = vrot.slane %v441_v15, 4  ;;  %v449_v37 = vshrl.u32 %v5045_v54, 16  ;;  %v452_v38 = vshll.u32 %v5045_v54, 16 }
  0x3c   : > { %4209 = vmatmul.mubr.bf16.gmra.mxu1 %v5061_v12  ;;  %v437_v62 = vsel %vm4865_vm2, %v432_v14, %v436_v45  ;;  %v623_v43 = vor.u32 %v622_v20, %v619_v17  ;;  %v632_v46 = vrot.slane %v630_v24, 4  ;;  %v458_v50 = vshll.u32 %v5048_v55, 16 }
  0x3d   : > { %v638_v49 = vrot.slane %v636_v25, 5  ;;  %v447_v52 = vsel %vm4865_vm2, %v442_v35, %v446_v61  ;;  %v451_v53 = vrot.slane %v449_v37, 4  ;;  %v454_v60 = vrot.slane %v452_v38, 5  ;;  %v5097_v35 = vld [vmem:[%s4831_s6 + $0xa4] sm:$0x1] }
  0x3e   : > { %4229 = vmatpush3.bf16.msra.mxu1 %v4661_v26  ;;  %v462_v45 = vshrl.u32 %v5048_v55, 16  ;;  %4277 = vmatpush3.bf16.msra.mxu0 %v4662_v48  ;;  %v5086_v8 = vcombine.low %v437_v62, %v447_v52  ;;  %v624_v14 = vrot.slane %v623_v43, 4  ;;  %v633_v15 = vor.u32 %v632_v46, %v628_v59  ;;  %v4666_v26 = vld [vmem:[%s6399_s1 + $0x88] sm:$0xff]  }
  0x3f   : > { %4230 = vmatprep.subr.bf16.mxu1 %v4663_v58  ;;  %v460_v17 = vrot.slane %v458_v50, 5  ;;  %4278 = vmatprep.subr.bf16.mxu0 %v4664_v9  ;;  %v455_v61 = vor.u32 %v454_v60, %v451_v53  ;;  %v468_v48 = vshll.u32 %v5066_v31, 16  ;;  %v641_v24 = vshrl.u32 %v5069_v32, 16  ;;  %v5102_v53 = vld [vmem:[%s4831_s6 + $0x48] sm:$0xf] }
  0x40   : > { %6450 = vst [vmem:[#allocation10_spill] sm:$0xff] %v5086_v8  ;;  %v464_v20 = vrot.slane %v462_v45, 4  ;;  %4196 = vmatprep.mubr.bf16.mxu0 %v5086_v8  ;;  %v629_v25 = vsel %vm4865_vm2, %v624_v14, %v628_v59  ;;  %v634_v62 = vrot.slane %v633_v15, 4  ;;  %v644_v37 = vshll.u32 %v5069_v32, 16  ;;  %v4667_v59 = vld [vmem:[%s6399_s1] sm:$0xff]  }
  0x41   : > { %v650_v38 = vshll.u32 %v5077_v40, 16  ;;  %v456_v43 = vrot.slane %v455_v61, 4  ;;  %v470_v50 = vrot.slane %v468_v48, 5  ;;  %v643_v52 = vrot.slane %v641_v24, 4  ;;  %v5111_v15 = vld [vmem:[%s4831_s6 + $0x4c] sm:$0xf] }
  0x42   : > { %4231 = vmatpush3.bf16.msra.mxu1 %v4663_v58  ;;  %v465_v46 = vor.u32 %v464_v20, %v460_v17  ;;  %4279 = vmatpush3.bf16.msra.mxu0 %v4664_v9  ;;  %v639_v60 = vsel %vm4865_vm2, %v634_v62, %v638_v49  ;;  %v646_v45 = vrot.slane %v644_v37, 5  ;;  %v654_v58 = vshrl.u32 %v5077_v40, 16  ;;  %v4668_v9 = vld [vmem:[%s6399_s1 + $0x80] sm:$0xff]   ;;  %v5122_v37 = vld [vmem:[%s4831_s6 + $0x50] sm:$0x1] }
  0x43   : > { %4232 = vmatprep.subr.bf16.mxu1 %v4665_v3  ;;  %v652_v14 = vrot.slane %v650_v38, 5  ;;  %4280 = vmatprep.subr.bf16.mxu0 %v4666_v26  ;;  %v5116_v61 = vcombine.low %v629_v25, %v639_v60  ;;  %v461_v20 = vsel %vm4865_vm2, %v456_v43, %v460_v17  ;;  %v660_v49 = vshll.u32 %v5097_v35, 16 }
  0x44   : > { %v466_v48 = vrot.slane %v465_v46, 4  ;;  %v647_v24 = vor.u32 %v646_v45, %v643_v52  ;;  %v656_v62 = vrot.slane %v654_v58, 4  ;;  %v473_v38 = vshrl.u32 %v5102_v53, 16  ;;  %v5132_v46 = vld [vmem:[%s4831_s6 + $0xa8] sm:$0xf]  ;;  %v5137_v52 = vld [vmem:[%s6399_s1 + $0xf8] sm:$0xff]  }
  0x45   : > { %6451 = vst [vmem:[#allocation11_spill] sm:$0xff] %v5116_v61  ;;  %v476_v63 = vshll.u32 %v5102_v53, 16  ;;  %4212 = vmatprep.mubr.bf16.mxu1 %v5116_v61  ;;  %v662_v60 = vrot.slane %v660_v49, 5  ;;  %v482_v17 = vshll.u32 %v5111_v15, 16  ;;  %v486_v43 = vshrl.u32 %v5111_v15, 16  ;;  %6452 = vst [vmem:[#allocation12_spill] sm:$0xff] %v5132_v46 }
  0x46   : > { %4233 = vmatpush3.bf16.msra.mxu1 %v4665_v3  ;;  %v471_v25 = vsel %vm4865_vm2, %v466_v48, %v470_v50  ;;  %4281 = vmatpush3.bf16.msra.mxu0 %v4666_v26  ;;  %v648_v45 = vrot.slane %v647_v24, 4  ;;  %v657_v58 = vor.u32 %v656_v62, %v652_v14  ;;  %v475_v50 = vrot.slane %v473_v38, 4  ;;  %v5142_v48 = vld [vmem:[%s4831_s6 + $0xac] sm:$0xf]  ;;  %v5147_v49 = vld [vmem:[%s6399_s1 + $0x138] sm:$0xff]  }
  0x47   : > { %v5139_v3 = vcombine.low %v461_v20, %v471_v25  ;;  %6454 = vst [vmem:[#allocation14_spill] sm:$0xff] %v5142_v48  ;;  %4234 = vmatprep.subr.bf16.mxu1 %v4667_v59  ;;  %4282 = vmatprep.subr.bf16.mxu0 %v4668_v9  ;;  %v478_v26 = vrot.slane %v476_v63, 5  ;;  %v484_v13 = vrot.slane %v482_v17, 5  ;;  %v488_v61 = vrot.slane %v486_v43, 4  ;;  %v5151_v20 = vld [vmem:[%s4831_s6 + $0xb0] sm:$0x1] }
  0x48   : > { %v492_v12 = vshll.u32 %v5122_v37, 16  ;;  %6455 = vst [vmem:[#allocation15_spill] sm:$0xff] %v5151_v20  ;;  %v5154_v24 = vld [vmem:[%s4831_s6 + $0x54] sm:$0xf]  ;;  %v653_v62 = vsel %vm4865_vm2, %v648_v45, %v652_v14  ;;  %v658_v38 = vrot.slane %v657_v58, 4  ;;  %v665_v25 = vshrl.u32 %v5132_v46, 16 }
  0x49   : > { %6453 = vst [vmem:[#allocation13_spill] sm:$0xff] %v5139_v3  ;;  %4197 = vmatmul.mubr.bf16.gmra.mxu0 %v5139_v3  ;;  %v668_v56 = vshll.u32 %v5132_v46, 16  ;;  %v479_v63 = vor.u32 %v478_v26, %v475_v50  ;;  %v489_v17 = vor.u32 %v488_v61, %v484_v13  ;;  %v674_v7 = vshll.u32 %v5142_v48, 16  ;;  %v5176_v3 = vld [vmem:[%s4831_s6 + $0xb4] sm:$0xf] }
  0x4a   : > { %4235 = vmatpush3.bf16.msra.mxu1 %v4667_v59  ;;  %v494_v43 = vrot.slane %v492_v12, 5  ;;  %4283 = vmatpush3.bf16.msra.mxu0 %v4668_v9  ;;  %v663_v14 = vsel %vm4865_vm2, %v658_v38, %v662_v60  ;;  %v667_v45 = vrot.slane %v665_v25, 4  ;;  %v678_v59 = vshrl.u32 %v5142_v48, 16  ;;  %v5173_v9 = vld [vmem:[%s4831_s6 + $0x5c] sm:$0x1] }
  0x4b   : > { %4316 = vmatprep.subr.bf16.mxu1 %v5137_v52  ;;  %v670_v58 = vrot.slane %v668_v56, 5  ;;  %4364 = vmatprep.subr.bf16.mxu0 %v5147_v49  ;;  %v5170_v61 = vcombine.low %v653_v62, %v663_v14  ;;  %v480_v12 = vrot.slane %v479_v63, 4  ;;  %v490_v50 = vrot.slane %v489_v17, 4  ;;  %v5181_v60 = vld [vmem:[%s4831_s6 + $0xb8] sm:$0xf] }
  0x4c   : > { %v676_v26 = vrot.slane %v674_v7, 5  ;;  %v680_v28 = vrot.slane %v678_v59, 4  ;;  %v684_v30 = vshll.u32 %v5151_v20, 16  ;;  %v497_v56 = vshrl.u32 %v5154_v24, 16  ;;  %v5194_v20 = vld [vmem:[%s4831_s6 + $0xbc] sm:$0x1] }
  0x4d   : > { %6456 = vst [vmem:[#allocation16_spill] sm:$0xff] %v5170_v61  ;;  %v671_v8 = vor.u32 %v670_v58, %v667_v45  ;;  %4213 = vmatmul.mubr.bf16.gmra.mxu1 %v5170_v61  ;;  %v485_v62 = vsel %vm4865_vm2, %v480_v12, %v484_v13  ;;  %v495_v7 = vsel %vm4865_vm2, %v490_v50, %v494_v43  ;;  %v500_v38 = vshll.u32 %v5154_v24, 16 }
  0x4e   : > { %v506_v25 = vshll.u32 %v5162_v1, 16  ;;  %v5190_v63 = vcombine.low %v485_v62, %v495_v7  ;;  %v681_v14 = vor.u32 %v680_v28, %v676_v26  ;;  %v686_v45 = vrot.slane %v684_v30, 5  ;;  %6458 = vst [vmem:[#allocation18_spill] sm:$0xff] %v5194_v20 }
  0x4f   : > { %v672_v17 = vrot.slane %v671_v8, 4  ;;  %v499_v58 = vrot.slane %v497_v56, 4  ;;  %v502_v59 = vrot.slane %v500_v38, 5  ;;  %v510_v61 = vshrl.u32 %v5162_v1, 16 }
  0x50   : > { %6457 = vst [vmem:[#allocation17_spill] sm:$0xff] %v5190_v63  ;;  %v508_v36 = vrot.slane %v506_v25, 5  ;;  %4200 = vmatprep.mubr.bf16.mxu0 %v5190_v63  ;;  %v682_v43 = vrot.slane %v681_v14, 4  ;;  %v516_v12 = vshll.u32 %v5173_v9, 16  ;;  %v689_v50 = vshrl.u32 %v5176_v3, 16 }
  0x51   : > { %v677_v13 = vsel %vm4865_vm2, %v672_v17, %v676_v26  ;;  %v503_v8 = vor.u32 %v502_v59, %v499_v58  ;;  %v512_v28 = vrot.slane %v510_v61, 4  ;;  %v692_v30 = vshll.u32 %v5176_v3, 16 }
  0x52   : > { %v698_v56 = vshll.u32 %v5181_v60, 16  ;;  %v687_v62 = vsel %vm4865_vm2, %v682_v43, %v686_v45  ;;  %v518_v7 = vrot.slane %v516_v12, 5  ;;  %v691_v38 = vrot.slane %v689_v50, 4 }
  0x53   : > { %v702_v25 = vshrl.u32 %v5181_v60, 16  ;;  %v5206_v63 = vcombine.low %v677_v13, %v687_v62  ;;  %v504_v26 = vrot.slane %v503_v8, 4  ;;  %v513_v17 = vor.u32 %v512_v28, %v508_v36 }
  0x54   : > { %v694_v14 = vrot.slane %v692_v30, 5  ;;  %v700_v46 = vrot.slane %v698_v56, 5  ;;  %v708_v61 = vshll.u32 %v5194_v20, 16  ;;  %v6460_v58 = vmov 0 }
  0x55   : > { %6459 = vst [vmem:[#allocation19_spill] sm:$0xff] %v5206_v63  ;;  %v704_v48 = vrot.slane %v702_v25, 4  ;;  %v6461_v58 = vsel %vm5211_vm5, 4294967295, %v6460_v58  ;;  %v3742_v45 = vrot.slane %v4837_v4, 9  ;;  %4216 = vmatprep.mubr.bf16.mxu1 %v5206_v63  ;;  %v509_v59 = vsel %vm4865_vm2, %v504_v26, %v508_v36 }
  0x56   : > { %6462 = vst [vmem:[#allocation20_spill] sm:$0xff] %v6461_v58  ;;  %v514_v13 = vrot.slane %v513_v17, 4  ;;  %v695_v43 = vor.u32 %v694_v14, %v691_v38  ;;  %v1328_v12 = vrot.slane %v4840_v5, 5  ;;  %v710_v8 = vrot.slane %v708_v61, 5 }
  0x57   : > { %v705_v50 = vor.u32 %v704_v48, %v700_v46  ;;  %v3743_v28 = vrot.slane %v4858_v23, 9  ;;  %v1335_v30 = vrot.slane %v4870_v33, 5  ;;  %v6463_v26 = vrot.slane %v4843_v6, 5 }
  0x58   : > { %v519_v56 = vsel %vm4865_vm2, %v514_v13, %v518_v7  ;;  %v696_v62 = vrot.slane %v695_v43, 4  ;;  %v1329_v25 = vsel %vm5211_vm5, %v3742_v45, %v1328_v12  ;;  %v1330_v63 = vrot.slane %v1328_v12, 4 }
  0x59   : > { %v5226_v20 = vcombine.low %v509_v59, %v519_v56  ;;  %v706_v36 = vrot.slane %v705_v50, 4  ;;  %v1337_v38 = vrot.slane %v1335_v30, 4  ;;  %v5236_v33 = vcombine.low %v4898_v16, %v4906_v21 }
  0x5a   : > { %v701_v48 = vsel %vm4865_vm2, %v696_v62, %v700_v46  ;;  %v1332_v23 = vsel %vm5211_vm5, %v1330_v63, %v6463_v26  ;;  %v3744_v7 = vrot.slane %v4898_v16, 9  ;;  %v3718_v14 = vcombine.low %v4837_v4, %v4840_v5 }
  0x5b   : > { %4201 = vmatmul.mubr.bf16.gmra.mxu0 %v5226_v20  ;;  %v711_v17 = vsel %vm4865_vm2, %v706_v36, %v710_v8  ;;  %v3774_v46 = vcombine.low %v1329_v25, %v1332_v23  ;;  %v1342_v6 = vrot.slane %v4906_v21, 5  ;;  %v1336_v63 = vsel %vm5211_vm5, %v3743_v28, %v1335_v30  ;;  %v4675_v36 = vld [vmem:[%s6399_s1 + $0xf0] sm:$0xff]  }
  0x5c   : > { %v5245_v61 = vcombine.low %v701_v48, %v711_v17  ;;  %v6464_v45 = vrot.slane %v4874_v39, 5  ;;  %v1345_v59 = vrot.slane %v4914_v27, 5  ;;  %v1349_v5 = vrot.slane %v4949_v0, 5  ;;  %v6481_v58 = vld [vmem:[#allocation19_spill] sm:$0xff] }
  0x5d   : > { %4284 = vmatprep.mubr.bf16.mxu0 %v3774_v46  ;;  %v1343_v13 = vsel %vm5211_vm5, %v3744_v7, %v1342_v6  ;;  %v1344_v4 = vrot.slane %v1342_v6, 4  ;;  %v3745_v21 = vrot.slane %v4940_v57, 9  ;;  %v1352_v43 = vrot.slane %v4957_v10, 5  ;;  %v4676_v10 = vld [vmem:[%s6399_s1 + $0x130] sm:$0xff]  }
  0x5e   : > { %v1339_v16 = vsel %vm5211_vm5, %v1337_v38, %v6464_v45  ;;  %4217 = vmatmul.mubr.bf16.gmra.mxu1 %v5245_v61  ;;  %v1356_v39 = vrot.slane %v5008_v2, 5  ;;  %v1351_v50 = vrot.slane %v1349_v5, 4  ;;  %v3746_v8 = vrot.slane %v4994_v51, 9 }
  0x5f   : > { %4236 = vmatprep.mubr.bf16.mxu1 %v3718_v14  ;;  %v5261_v12 = vcombine.low %v1336_v63, %v1339_v16  ;;  %v1346_v27 = vsel %vm5211_vm5, %v1344_v4, %v1345_v59  ;;  %v1359_v56 = vrot.slane %v5016_v19, 5  ;;  %v1363_v62 = vrot.slane %v5048_v55, 5  ;;  %v4680_v14 = vld [vmem:[%s6399_s1 + $0x128] sm:$0xff]  }
  0x60   : > { %v5266_v28 = vcombine.low %v1343_v13, %v1346_v27  ;;  %v1358_v30 = vrot.slane %v1356_v39, 4  ;;  %v1350_v25 = vsel %vm5211_vm5, %v3745_v21, %v1349_v5  ;;  %v3747_v38 = vrot.slane %v5045_v54, 9  ;;  %v4679_v16 = vld [vmem:[%s6399_s1 + $0xe8] sm:$0xff]   ;;  %v5308_v13 = vld [vmem:[%s4831_s6 + $0x64] sm:$0xf] }
  0x61   : > { %v1353_v19 = vsel %vm5211_vm5, %v1351_v50, %v1352_v43  ;;  %v1357_v48 = vsel %vm5211_vm5, %v3746_v8, %v1356_v39  ;;  %v1366_v26 = vrot.slane %v5066_v31, 5  ;;  %v1370_v23 = vrot.slane %v5111_v15, 5 }
  0x62   : > { %v1360_v7 = vsel %vm5211_vm5, %v1358_v30, %v1359_v56  ;;  %v1365_v17 = vrot.slane %v1363_v62, 4  ;;  %v3748_v46 = vrot.slane %v5102_v53, 9  ;;  %v1377_v6 = vrot.slane %v5162_v1, 5  ;;  %v5343_v30 = vld [vmem:[%s4831_s6 + $0x60] sm:$0xf] }
  0x63   : > { %4285 = vmatmul.mubr.bf16.vlgmr.msra.gmra.mxu0 %v5261_v12  ;;  %v1372_v31 = vrot.slane %v1370_v23, 4  ;;  %v1373_v63 = vrot.slane %v5122_v37, 5  ;;  %v5301_v45 = vcombine.low %v1357_v48, %v1360_v7  ;;  %v3749_v59 = vrot.slane %v5154_v24, 9 }
  0x64   : > { %4365 = vmatpush3.bf16.msra.mxu0 %v5147_v49  ;;  %4288 = vmatprep.mubr.bf16.mxu0 %v5266_v28  ;;  %v5299_v49 = vcombine.low %v1350_v25, %v1353_v19  ;;  %v1384_v37 = vrot.slane %v5308_v13, 5  ;;  %v1367_v4 = vsel %vm5211_vm5, %v1365_v17, %v1366_v26  ;;  %v1379_v5 = vrot.slane %v1377_v6, 4 }
  0x65   : > { %4366 = vmatprep.subr.bf16.mxu0 %v4676_v10  ;;  %v1380_v21 = vrot.slane %v5173_v9, 5  ;;  %v5318_v43 = vcombine.low %v4940_v57, %v4949_v0  ;;  %v1371_v39 = vsel %vm5211_vm5, %v3748_v46, %v1370_v23  ;;  %v1374_v27 = vsel %vm5211_vm5, %v1372_v31, %v1373_v63  ;;  %v4683_v0 = vld [vmem:[%s6399_s1 + $0xe0] sm:$0xff]  }
  0x66   : > { %4237 = vmatmul.mubr.bf16.vlgmr.msra.gmra.mxu1 %v4910_v22  ;;  %v5326_v50 = vcombine.low %v4994_v51, %v5008_v2  ;;  %v5330_v8 = vcombine.low %v5045_v54, %v5048_v55  ;;  %v5334_v57 = vcombine.low %v5102_v53, %v5111_v15  ;;  %v4684_v9 = vld [vmem:[%s6399_s1 + $0x120] sm:$0xff]   ;;  %v3750_v51 = vrot.slane %v5343_v30, 9  ;;  %v4737_v53 = vld [vmem:[%s4831_s6 + $0x68] sm:$0x1] }
  0x67   : > { %4317 = vmatpush3.bf16.msra.mxu1 %v5137_v52  ;;  %4240 = vmatprep.mubr.bf16.mxu1 %v5236_v33  ;;  %v1364_v52 = vsel %vm5211_vm5, %v3747_v38, %v1363_v62  ;;  %v5351_v54 = vsel %vm5211_vm5, %v3749_v59, %v1377_v6  ;;  %v1386_v55 = vrot.slane %v1384_v37, 4  ;;  %v1387_v15 = vrot.slane %v4737_v53, 5  ;;  %v4688_v62 = vld [vmem:[%s6399_s1 + $0x118] sm:$0xff]   ;;  %v4691_v53 = vld [vmem:[%s6399_s1 + $0xd0] sm:$0xff]  }
  0x68   : > { %4318 = vmatprep.subr.bf16.mxu1 %v4675_v36  ;;  %4367 = vmatpush3.bf16.msra.mxu0 %v4676_v10  ;;  %v5347_v2 = vcombine.low %v1364_v52, %v1367_v4  ;;  %v5355_v56 = vcombine.low %v1371_v39, %v1374_v27  ;;  %v1381_v10 = vsel %vm5211_vm5, %v1379_v5, %v1380_v21  ;;  %v3753_v19 = vrot.slane %v4960_v11, 9  ;;  %v4687_v6 = vld [vmem:[%s6399_s1 + $0xd8] sm:$0xff]   ;;  %v4692_v4 = vld [vmem:[%s6399_s1 + $0x110] sm:$0xff]   ;;  %v6465_v5 = vld [vmem:[#allocation14_spill] sm:$0xff] }
  0x69   : > { %4368 = vmatprep.subr.bf16.mxu0 %v4680_v14  ;;  %v5364_v25 = vcombine.low %v4960_v11, %v4964_v18  ;;  %v1405_v48 = vrot.slane %v4964_v18, 5  ;;  %v1408_v26 = vrot.slane %v4984_v44, 5  ;;  %v1385_v23 = vsel %vm5211_vm5, %v3750_v51, %v1384_v37  ;;  %v6466_v21 = vld [vmem:[#allocation12_spill] sm:$0xff]  ;;  %v6467_v51 = vld [vmem:[#allocation15_spill] sm:$0xff] }
  0x6a   : > { %v1398_v7 = vrot.slane %v4926_v41, 5  ;;  %v5379_v17 = vcombine.low %v5021_v34, %v5027_v42  ;;  %v1388_v11 = vsel %vm5211_vm5, %v1386_v55, %v1387_v15  ;;  %v1412_v46 = vrot.slane %v5027_v42, 5 }
  0x6b   : > { %4289 = vmatmul.mubr.bf16.gmra.mxu0 %v5299_v49  ;;  %4319 = vmatpush3.bf16.msra.mxu1 %v4675_v36  ;;  %v5367_v36 = vld [vmem:[%s4831_s6 + $0x70] sm:$0xf]  ;;  %v1406_v18 = vsel %vm5211_vm5, %v3753_v19, %v1405_v48  ;;  %v1407_v44 = vrot.slane %v1405_v48, 4  ;;  %v1415_v31 = vrot.slane %v5036_v47, 5  ;;  %v3755_v63 = vrot.slane %v5069_v32, 9 }
  0x6c   : > { %4292 = vmatprep.mubr.bf16.mxu0 %v5301_v45  ;;  %4320 = vmatprep.subr.bf16.mxu1 %v4679_v16  ;;  %v1391_v38 = vrot.slane %v5367_v36, 5  ;;  %v1414_v37 = vrot.slane %v1412_v46, 4  ;;  %v1422_v52 = vrot.slane %v5097_v35, 5  ;;  %v5412_v39 = vcombine.low %v6466_v21, %v6465_v5 }
  0x6d   : > { %4369 = vmatpush3.bf16.msra.mxu0 %v4680_v14  ;;  %v3754_v14 = vrot.slane %v5021_v34, 9  ;;  %v5394_v34 = vcombine.low %v5069_v32, %v5077_v40  ;;  %v1409_v59 = vsel %vm5211_vm5, %v1407_v44, %v1408_v26  ;;  %v3756_v27 = vrot.slane %v6466_v21, 9 }
  0x6e   : > { %4241 = vmatmul.mubr.bf16.gmra.mxu1 %v5318_v43  ;;  %4370 = vmatprep.subr.bf16.mxu0 %v4684_v9  ;;  %v5403_v47 = vcombine.low %v1406_v18, %v1409_v59  ;;  %v1416_v35 = vsel %vm5211_vm5, %v1414_v37, %v1415_v31  ;;  %v1429_v55 = vrot.slane %v6467_v51, 5  ;;  %v5430_v19 = vcombine.low %v5176_v3, %v5181_v60  ;;  %v4739_v31 = vld [vmem:[%s4831_s6 + $0x6c] sm:$0xf]  ;;  %v4740_v59 = vld [vmem:[%s4831_s6 + $0x74] sm:$0x1]  ;;  %v4700_v51 = vld [vmem:[%s6399_s1 + $0x100] sm:$0xff]  }
  0x6f   : > { %4244 = vmatprep.mubr.bf16.mxu1 %v5326_v50  ;;  %4321 = vmatpush3.bf16.msra.mxu1 %v4679_v16  ;;  %v1419_v16 = vrot.slane %v5077_v40, 5  ;;  %v1413_v42 = vsel %vm5211_vm5, %v3754_v14, %v1412_v46  ;;  %v3757_v48 = vrot.slane %v5176_v3, 9  ;;  %v1433_v44 = vrot.slane %v5181_v60, 5  ;;  %v4696_v3 = vld [vmem:[%s6399_s1 + $0x108] sm:$0xff]  }
  0x70   : > { %4322 = vmatprep.subr.bf16.mxu1 %v4683_v0  ;;  %v5424_v15 = vcombine.low %v1413_v42, %v1416_v35  ;;  %v5440_v46 = vcombine.low %v5351_v54, %v1381_v10  ;;  %v1394_v60 = vrot.slane %v4740_v59, 5  ;;  %v5453_v37 = vcombine.low %v1385_v23, %v1388_v11  ;;  %v4742_v35 = vld [vmem:[%s4831_s6 + $0x80] sm:$0x1] }
  0x71   : > { %4371 = vmatpush3.bf16.msra.mxu0 %v4684_v9  ;;  %v1420_v32 = vsel %vm5211_vm5, %v3755_v63, %v1419_v16  ;;  %v1421_v40 = vrot.slane %v1419_v16, 4  ;;  %v1426_v9 = vrot.slane %v6465_v5, 5  ;;  %v3751_v63 = vrot.slane %v4739_v31, 9  ;;  %v4695_v5 = vld [vmem:[%s6399_s1 + $0xc8] sm:$0xff]  }
  0x72   : > { %4372 = vmatprep.subr.bf16.mxu0 %v4688_v62  ;;  %v1434_v54 = vsel %vm5211_vm5, %v3757_v48, %v1433_v44  ;;  %v1435_v10 = vrot.slane %v1433_v44, 4  ;;  %v1400_v21 = vrot.slane %v1398_v7, 4  ;;  %v5470_v11 = vcombine.low %v5154_v24, %v5162_v1  ;;  %v4743_v48 = vld [vmem:[%s4831_s6 + $0x7c] sm:$0xf]  ;;  %v5533_v44 = vld [vmem:[%s4831_s6 + $0xc0] sm:$0xf] }
  0x73   : > { %4293 = vmatmul.mubr.bf16.gmra.mxu0 %v5347_v2  ;;  %4323 = vmatpush3.bf16.msra.mxu1 %v4683_v0  ;;  %v1423_v0 = vsel %vm5211_vm5, %v1421_v40, %v1422_v52  ;;  %v1427_v14 = vsel %vm5211_vm5, %v3756_v27, %v1426_v9  ;;  %v1428_v18 = vrot.slane %v1426_v9, 4  ;;  %v1393_v52 = vrot.slane %v1391_v38, 4 }
  0x74   : > { %4296 = vmatprep.mubr.bf16.mxu0 %v5355_v56  ;;  %4324 = vmatprep.subr.bf16.mxu1 %v4687_v6  ;;  %v5433_v26 = vcombine.low %v1420_v32, %v1423_v0  ;;  %v4741_v32 = vld [vmem:[%s4831_s6 + $0x78] sm:$0xf]  ;;  %v1401_v27 = vrot.slane %v4742_v35, 5  ;;  %v1392_v1 = vsel %vm5211_vm5, %v3751_v63, %v1391_v38  ;;  %v5511_v0 = vcombine.low %v4739_v31, %v5367_v36  ;;  %v5528_v36 = vld [vmem:[%s4831_s6 + $0xc4] sm:$0xf] }
  0x75   : > { %4373 = vmatpush3.bf16.msra.mxu0 %v4688_v62  ;;  %v6468_v62 = vld [vmem:[#allocation18_spill] sm:$0xff]  ;;  %v1430_v42 = vsel %vm5211_vm5, %v1428_v18, %v1429_v55  ;;  %v3752_v40 = vrot.slane %v4741_v32, 9  ;;  %v5480_v55 = vcombine.low %v5343_v30, %v5308_v13  ;;  %v1395_v24 = vsel %vm5211_vm5, %v1393_v52, %v1394_v60  ;;  %v4702_v38 = vld [vmem:[%s6399_s1 + $0x1b8] sm:$0xff]   ;;  %v5536_v31 = vld [vmem:[%s4831_s6 + $0xc8] sm:$0x1] }
  0x76   : > { %4245 = vmatmul.mubr.bf16.gmra.mxu1 %v5330_v8  ;;  %4374 = vmatprep.subr.bf16.mxu0 %v4692_v4  ;;  %v1436_v16 = vrot.slane %v6468_v62, 5  ;;  %v1402_v30 = vsel %vm5211_vm5, %v1400_v21, %v1401_v27  ;;  %v2313_v18 = vrot.slane %v5528_v36, 5  ;;  %v3848_v63 = vrot.slane %v5533_v44, 9  ;;  %v6469_v60 = vld [vmem:[#allocation4_spill] sm:$0xff]  ;;  %v6472_v21 = vld [vmem:[#allocation10_spill] sm:$0xff]  ;;  %v6473_v35 = vld [vmem:[#allocation13_spill] sm:$0xff] }
  0x77   : > { %4248 = vmatprep.mubr.bf16.mxu1 %v5334_v57  ;;  %4325 = vmatpush3.bf16.msra.mxu1 %v4687_v6  ;;  %v5461_v6 = vcombine.low %v1427_v14, %v1430_v42  ;;  %v1399_v13 = vsel %vm5211_vm5, %v3752_v40, %v1398_v7  ;;  %v4701_v7 = vld [vmem:[%s6399_s1 + $0x178] sm:$0xff]   ;;  %v5515_v14 = vcombine.low %v4741_v32, %v4743_v48  ;;  %v2316_v62 = vrot.slane %v5536_v31, 5  ;;  %v6471_v52 = vld [vmem:[#allocation8_spill] sm:$0xff]  ;;  %v4706_v40 = vld [vmem:[%s6399_s1 + $0x1a8] sm:$0xff]  }
  0x78   : > { %4326 = vmatprep.subr.bf16.mxu1 %v4691_v53  ;;  %v1437_v23 = vsel %vm5211_vm5, %v1435_v10, %v1436_v16  ;;  %v5505_v41 = vcombine.low %v1399_v13, %v1402_v30  ;;  %v2314_v16 = vsel %vm5211_vm5, %v3848_v63, %v2313_v18  ;;  %v6470_v10 = vld [vmem:[#allocation6_spill] sm:$0xff]  ;;  %v4703_v32 = vld [vmem:[%s6399_s1 + $0x170] sm:$0xff]   ;;  %v4714_v13 = vld [vmem:[%s6399_s1 + $0x188] sm:$0xff]  }
  0x79   : > { %4375 = vmatpush3.bf16.msra.mxu0 %v4692_v4  ;;  %v5472_v9 = vcombine.low %v1434_v54, %v1437_v23  ;;  %v4699_v4 = vld [vmem:[%s6399_s1 + $0xc0] sm:$0xff]   ;;  %v4704_v54 = vld [vmem:[%s6399_s1 + $0x1b0] sm:$0xff]   ;;  %v4710_v23 = vld [vmem:[%s6399_s1 + $0x198] sm:$0xff]  }
  0x7a   : > { %4376 = vmatprep.subr.bf16.mxu0 %v4696_v3  ;;  %v4707_v27 = vld [vmem:[%s6399_s1 + $0x160] sm:$0xff]   ;;  %v4713_v30 = vld [vmem:[%s6399_s1 + $0x148] sm:$0xff]   ;;  %v6476_v48 = vld [vmem:[#allocation5_spill] sm:$0xff] }
  0x7b   : > { %4297 = vmatmul.mubr.bf16.gmra.mxu0 %v5440_v46  ;;  %4327 = vmatpush3.bf16.msra.mxu1 %v4691_v53  ;;  %v5503_v53 = vcombine.low %v1392_v1, %v1395_v24  ;;  %v4712_v1 = vld [vmem:[%s6399_s1 + $0x190] sm:$0xff]   ;;  %v6474_v24 = vld [vmem:[#allocation17_spill] sm:$0xff] }
  0x7c   : > { %4300 = vmatprep.mubr.bf16.mxu0 %v5453_v37  ;;  %4328 = vmatprep.subr.bf16.mxu1 %v4695_v5  ;;  %v4719_v63 = vld [vmem:[%s6399_s1 + $0x238] sm:$0xff]  }
  0x7d   : > { %4377 = vmatpush3.bf16.msra.mxu0 %v4696_v3  ;;  %v2315_v3 = vrot.slane %v2313_v18, 4  ;;  %v4716_v18 = vld [vmem:[%s6399_s1 + $0x140] sm:$0xff]  }
  0x7e   : > { %4249 = vmatmul.mubr.bf16.gmra.mxu1 %v5470_v11  ;;  %4378 = vmatprep.subr.bf16.mxu0 %v4700_v51 }
  0x7f   : > { %4252 = vmatprep.mubr.bf16.mxu1 %v5480_v55  ;;  %4329 = vmatpush3.bf16.msra.mxu1 %v4695_v5  ;;  %v2317_v59 = vsel %vm5211_vm5, %v2315_v3, %v2316_v62  ;;  %v4708_v5 = vld [vmem:[%s6399_s1 + $0x1a0] sm:$0xff]   ;;  %v4718_v3 = vld [vmem:[%s6399_s1 + $0x1f8] sm:$0xff]   ;;  %v6477_v62 = vld [vmem:[#allocation7_spill] sm:$0xff] }
  0x80   : > { %4330 = vmatprep.subr.bf16.mxu1 %v4699_v4  ;;  %v5546_v42 = vcombine.low %v2314_v16, %v2317_v59  ;;  %v6478_v16 = vld [vmem:[#allocation9_spill] sm:$0xff]  ;;  %v2025_v59 = vshrl.u32 %v5533_v44, 16 }
  0x81   : > { %4379 = vmatpush3.bf16.msra.mxu0 %v4700_v51  ;;  %v4709_v51 = vld [vmem:[%s6399_s1 + $0x158] sm:$0xff]  }
  0x82   : > { %4460 = vmatprep.subr.bf16.mxu0 %v4702_v38 }
  0x83   : > { %4301 = vmatmul.mubr.bf16.gmra.mxu0 %v5503_v53  ;;  %4331 = vmatpush3.bf16.msra.mxu1 %v4699_v4  ;;  %v4711_v4 = vld [vmem:[%s6399_s1 + $0x150] sm:$0xff]  }
  0x84   : > { %4304 = vmatprep.mubr.bf16.mxu0 %v5505_v41  ;;  %4412 = vmatprep.subr.bf16.mxu1 %v4701_v7 }
  0x86   : > { %4253 = vmatmul.mubr.bf16.gmra.mxu1 %v5511_v0 }
  0x87   : > { %4256 = vmatprep.mubr.bf16.mxu1 %v5515_v14 }
  0x8b   : > { %4305 = vmatmul.mubr.bf16.gmra.mxu0 %v5403_v47 }
  0x8c   : > { %4308 = vmatprep.mubr.bf16.mxu0 %v5424_v15 }
  0x8e   : > { %4257 = vmatmul.mubr.bf16.gmra.mxu1 %v5364_v25 }
  0x8f   : > { %4260 = vmatprep.mubr.bf16.mxu1 %v5379_v17 }
  0x93   : > { %4309 = vmatmul.mubr.bf16.gmra.mxu0 %v5433_v26 }
  0x94   : > { %4312 = vmatprep.mubr.bf16.mxu0 %v5461_v6 }
  0x96   : > { %4261 = vmatmul.mubr.bf16.gmra.mxu1 %v5394_v34 }
  0x97   : > { %4264 = vmatprep.mubr.bf16.mxu1 %v5412_v39 }
  0x9b   : > { %4313 = vmatmul.mubr.bf16.gmra.mxu0 %v5472_v9 }
  0x9c   : > { %4380 = vmatprep.mubr.bf16.mxu0 %v6469_v60  ;;  %v2028_v60 = vshll.u32 %v5533_v44, 16 }
  0x9e   : > { %4265 = vmatmul.mubr.bf16.gmra.mxu1 %v5430_v19 }
  0x9f   : > { %4332 = vmatprep.mubr.bf16.mxu1 %v4910_v22  ;;  %v4705_v22 = vld [vmem:[%s6399_s1 + $0x168] sm:$0xff]  }
  0xa3   : > { %4381 = vmatmul.mubr.bf16.vlgmr.msra.gmra.mxu0 %v6470_v10 }
  0xa4   : > { %4461 = vmatpush3.bf16.msra.mxu0 %v4702_v38  ;;  %4384 = vmatprep.mubr.bf16.mxu0 %v6471_v52  ;;  %v4717_v38 = vld [vmem:[%s6399_s1 + $0x180] sm:$0xff]  }
  0xa5   : > { %4462 = vmatprep.subr.bf16.mxu0 %v4704_v54 }
  0xa6   : > { %4333 = vmatmul.mubr.bf16.vlgmr.msra.gmra.mxu1 %v5236_v33 }
  0xa7   : > { %4413 = vmatpush3.bf16.msra.mxu1 %v4701_v7  ;;  %4336 = vmatprep.mubr.bf16.mxu1 %v5318_v43  ;;  %v6475_v7 = vld [vmem:[#allocation3_spill] sm:$0xff] }
  0xa8   : > { %4414 = vmatprep.subr.bf16.mxu1 %v4703_v32  ;;  %4463 = vmatpush3.bf16.msra.mxu0 %v4704_v54  ;;  %v2038_v54 = vshrl.u32 %v5528_v36, 16 }
  0xa9   : > { %4464 = vmatprep.subr.bf16.mxu0 %v4706_v40 }
  0xab   : > { %4385 = vmatmul.mubr.bf16.gmra.mxu0 %v6472_v21  ;;  %4415 = vmatpush3.bf16.msra.mxu1 %v4703_v32  ;;  %v2034_v32 = vshll.u32 %v5528_v36, 16 }
  0xac   : > { %4388 = vmatprep.mubr.bf16.mxu0 %v6473_v35  ;;  %4416 = vmatprep.subr.bf16.mxu1 %v4705_v22 }
  0xad   : > { %4465 = vmatpush3.bf16.msra.mxu0 %v4706_v40  ;;  %v2027_v40 = vrot.slane %v2025_v59, 4 }
  0xae   : > { %4337 = vmatmul.mubr.bf16.gmra.mxu1 %v5326_v50  ;;  %4466 = vmatprep.subr.bf16.mxu0 %v4708_v5 }
  0xaf   : > { %4340 = vmatprep.mubr.bf16.mxu1 %v5330_v8  ;;  %4417 = vmatpush3.bf16.msra.mxu1 %v4705_v22  ;;  %v2030_v22 = vrot.slane %v2028_v60, 5 }
  0xb0   : > { %4418 = vmatprep.subr.bf16.mxu1 %v4707_v27 }
  0xb1   : > { %4467 = vmatpush3.bf16.msra.mxu0 %v4708_v5  ;;  %v2036_v5 = vrot.slane %v2034_v32, 5  ;;  %v4721_v32 = vld [vmem:[%s6399_s1 + $0x230] sm:$0xff]  }
  0xb2   : > { %4468 = vmatprep.subr.bf16.mxu0 %v4710_v23 }
  0xb3   : > { %4389 = vmatmul.mubr.bf16.gmra.mxu0 %v6474_v24  ;;  %4419 = vmatpush3.bf16.msra.mxu1 %v4707_v27  ;;  %v2040_v27 = vrot.slane %v2038_v54, 4  ;;  %v5639_v54 = vcombine.low %v5533_v44, %v5528_v36  ;;  %v4720_v36 = vld [vmem:[%s6399_s1 + $0x1f0] sm:$0xff]  }
  0xb4   : > { %4392 = vmatprep.mubr.bf16.mxu0 %v5226_v20  ;;  %4420 = vmatprep.subr.bf16.mxu1 %v4709_v51 }
  0xb5   : > { %4469 = vmatpush3.bf16.msra.mxu0 %v4710_v23  ;;  %v6479_v23 = vld [vmem:[#allocation11_spill] sm:$0xff] }
  0xb6   : > { %4341 = vmatmul.mubr.bf16.gmra.mxu1 %v5334_v57  ;;  %4470 = vmatprep.subr.bf16.mxu0 %v4712_v1 }
  0xb7   : > { %4344 = vmatprep.mubr.bf16.mxu1 %v5470_v11  ;;  %4421 = vmatpush3.bf16.msra.mxu1 %v4709_v51  ;;  %v6480_v51 = vld [vmem:[#allocation16_spill] sm:$0xff] }
  0xb8   : > { %4422 = vmatprep.subr.bf16.mxu1 %v4711_v4 }
  0xb9   : > { %4471 = vmatpush3.bf16.msra.mxu0 %v4712_v1  ;;  %v2031_v1 = vor.u32 %v2030_v22, %v2027_v40  ;;  %v4729_v22 = vld [vmem:[%s6399_s1 + $0x210] sm:$0xff]  }
  0xba   : > { %4472 = vmatprep.subr.bf16.mxu0 %v4714_v13 }
  0xbb   : > { %4393 = vmatmul.mubr.bf16.gmra.mxu0 %v6475_v7  ;;  %4423 = vmatpush3.bf16.msra.mxu1 %v4711_v4  ;;  %v2041_v4 = vor.u32 %v2040_v27, %v2036_v5  ;;  %v4728_v27 = vld [vmem:[%s6399_s1 + $0x1d0] sm:$0xff]  }
  0xbc   : > { %4396 = vmatprep.mubr.bf16.mxu0 %v6476_v48  ;;  %4424 = vmatprep.subr.bf16.mxu1 %v4713_v30 }
  0xbd   : > { %4473 = vmatpush3.bf16.msra.mxu0 %v4714_v13  ;;  %v2044_v13 = vshll.u32 %v5536_v31, 16 }
  0xbe   : > { %4345 = vmatmul.mubr.bf16.gmra.mxu1 %v5480_v55  ;;  %4474 = vmatprep.subr.bf16.mxu0 %v4717_v38 }
  0xbf   : > { %4348 = vmatprep.mubr.bf16.mxu1 %v5511_v0  ;;  %4425 = vmatpush3.bf16.msra.mxu1 %v4713_v30  ;;  %v2032_v30 = vrot.slane %v2031_v1, 4 }
  0xc0   : > { %4426 = vmatprep.subr.bf16.mxu1 %v4716_v18 }
  0xc1   : > { %4475 = vmatpush3.bf16.msra.mxu0 %v4717_v38  ;;  %v2042_v38 = vrot.slane %v2041_v4, 4  ;;  %v2037_v59 = vsel %vm4865_vm2, %v2032_v30, %v2036_v5  ;;  %v4734_v30 = vld [vmem:[%s6399_s1 + $0x200] sm:$0xff]  }
  0xc2   : > { %4556 = vmatprep.subr.bf16.mxu0 %v4719_v63 }
  0xc3   : > { %4397 = vmatmul.mubr.bf16.gmra.mxu0 %v6477_v62  ;;  %4427 = vmatpush3.bf16.msra.mxu1 %v4716_v18  ;;  %v2046_v18 = vrot.slane %v2044_v13, 5 }
  0xc4   : > { %4400 = vmatprep.mubr.bf16.mxu0 %v6478_v16  ;;  %4508 = vmatprep.subr.bf16.mxu1 %v4718_v3 }
  0xc5   : > { %v2047_v60 = vsel %vm4865_vm2, %v2042_v38, %v2046_v18  ;;  %v4733_v18 = vld [vmem:[%s6399_s1 + $0x1c0] sm:$0xff]  }
  0xc6   : > { %4349 = vmatmul.mubr.bf16.gmra.mxu1 %v5515_v14  ;;  %v5635_v31 = vcombine.low %v2037_v59, %v2047_v60 }
  0xc7   : > { %4352 = vmatprep.mubr.bf16.mxu1 %v5364_v25 }
  0xc8   : > { %6482 = vst [vmem:[#allocation14_spill] sm:$0xff] %v5635_v31 }
  0xcb   : > { %4401 = vmatmul.mubr.bf16.gmra.mxu0 %v6479_v23 }
  0xcc   : > { %4404 = vmatprep.mubr.bf16.mxu0 %v6480_v51 }
  0xce   : > { %4353 = vmatmul.mubr.bf16.gmra.mxu1 %v5379_v17 }
  0xcf   : > { %4356 = vmatprep.mubr.bf16.mxu1 %v5394_v34 }
  0xd3   : > { %4405 = vmatmul.mubr.bf16.gmra.mxu0 %v6481_v58 }
  0xd4   : > { %4408 = vmatprep.mubr.bf16.mxu0 %v5245_v61 }
  0xd6   : > { %4357 = vmatmul.mubr.bf16.gmra.mxu1 %v5412_v39 }
  0xd7   : > { %4360 = vmatprep.mubr.bf16.mxu1 %v5430_v19 }
  0xdb   : > { %4409 = vmatmul.mubr.bf16.gmra.mxu0 %v5635_v31 }
  0xdc   : > { %4476 = vmatprep.mubr.bf16.mxu0 %v5236_v33  ;;  %v4723_v33 = vld [vmem:[%s6399_s1 + $0x228] sm:$0xff]  }
  0xde   : > { %4361 = vmatmul.mubr.bf16.gmra.mxu1 %v5639_v54 }
  0xdf   : > { %4428 = vmatprep.mubr.bf16.mxu1 %v5261_v12  ;;  %v4722_v12 = vld [vmem:[%s6399_s1 + $0x1e8] sm:$0xff]  }
  0xe3   : > { %4477 = vmatmul.mubr.bf16.vlgmr.msra.gmra.mxu0 %v5318_v43  ;;  %v4725_v43 = vld [vmem:[%s6399_s1 + $0x220] sm:$0xff]  }
  0xe4   : > { %4557 = vmatpush3.bf16.msra.mxu0 %v4719_v63  ;;  %4480 = vmatprep.mubr.bf16.mxu0 %v5326_v50  ;;  %v4724_v50 = vld [vmem:[%s6399_s1 + $0x1e0] sm:$0xff]  }
  0xe5   : > { %4558 = vmatprep.subr.bf16.mxu0 %v4721_v32 }
  0xe6   : > { %4429 = vmatmul.mubr.bf16.vlgmr.msra.gmra.mxu1 %v5266_v28 }
  0xe7   : > { %4509 = vmatpush3.bf16.msra.mxu1 %v4718_v3  ;;  %4432 = vmatprep.mubr.bf16.mxu1 %v5299_v49  ;;  %v4726_v3 = vld [vmem:[%s6399_s1 + $0x1d8] sm:$0xff]  }
  0xe8   : > { %4510 = vmatprep.subr.bf16.mxu1 %v4720_v36  ;;  %4559 = vmatpush3.bf16.msra.mxu0 %v4721_v32 }
  0xe9   : > { %4560 = vmatprep.subr.bf16.mxu0 %v4723_v33 }
  0xeb   : > { %4481 = vmatmul.mubr.bf16.gmra.mxu0 %v5330_v8  ;;  %4511 = vmatpush3.bf16.msra.mxu1 %v4720_v36  ;;  %v4727_v8 = vld [vmem:[%s6399_s1 + $0x218] sm:$0xff]  }
  0xec   : > { %4484 = vmatprep.mubr.bf16.mxu0 %v5334_v57  ;;  %4512 = vmatprep.subr.bf16.mxu1 %v4722_v12 }
  0xed   : > { %v5669_v44 = vpop.f32.mrf.mxu0  ;;  %4561 = vmatpush3.bf16.msra.mxu0 %v4723_v33  ;;  %v5672_v63 = vpop.f32.mrf.mxu1 }
  0xee   : > { %4433 = vmatmul.mubr.bf16.gmra.mxu1 %v5301_v45  ;;  %4562 = vmatprep.subr.bf16.mxu0 %v4725_v43 }
  0xef   : > { %4436 = vmatprep.mubr.bf16.mxu1 %v5347_v2  ;;  %4513 = vmatpush3.bf16.msra.mxu1 %v4722_v12  ;;  %v5678_v57 = vpop.f32.mrf.mxu0  ;;  %v5683_v40 = vpop.f32.mrf.mxu1 }
  0xf0   : > { %4514 = vmatprep.subr.bf16.mxu1 %v4724_v50 }
  0xf1   : > { %4563 = vmatpush3.bf16.msra.mxu0 %v4725_v43  ;;  %v5689_v5 = vpop.f32.mrf.mxu0  ;;  %v5696_v1 = vpop.f32.mrf.mxu1 }
  0xf2   : > { %4564 = vmatprep.subr.bf16.mxu0 %v4727_v8 }
  0xf3   : > { %4485 = vmatmul.mubr.bf16.gmra.mxu0 %v5470_v11  ;;  %4515 = vmatpush3.bf16.msra.mxu1 %v4724_v50  ;;  %v4731_v11 = vld [vmem:[%s6399_s1 + $0x208] sm:$0xff]   ;;  %v5702_v4 = vpop.f32.mrf.mxu0  ;;  %v5707_v13 = vpop.f32.mrf.mxu1 }
  0xf4   : > { %4488 = vmatprep.mubr.bf16.mxu0 %v5480_v55  ;;  %4516 = vmatprep.subr.bf16.mxu1 %v4726_v3  ;;  %v4730_v55 = vld [vmem:[%s6399_s1 + $0x1c8] sm:$0xff]  }
  0xf5   : > { %4565 = vmatpush3.bf16.msra.mxu0 %v4727_v8  ;;  %v5759_v8 = vld [vmem:[%s4831_s6 + $0xd0] sm:$0xf] }
  0xf6   : > { %4437 = vmatmul.mubr.bf16.gmra.mxu1 %v5355_v56  ;;  %4566 = vmatprep.subr.bf16.mxu0 %v4729_v22 }
  0xf7   : > { %4440 = vmatprep.mubr.bf16.mxu1 %v5440_v46  ;;  %4517 = vmatpush3.bf16.msra.mxu1 %v4726_v3 }
  0xf8   : > { %4518 = vmatprep.subr.bf16.mxu1 %v4728_v27  ;;  %v5713_v38 = vpop.f32.mrf.mxu0 }
  0xf9   : > { %4567 = vmatpush3.bf16.msra.mxu0 %v4729_v22 }
  0xfa   : > { %4568 = vmatprep.subr.bf16.mxu0 %v4731_v11  ;;  %v5723_v60 = vpop.f32.mrf.mxu0 }
  0xfb   : > { %4489 = vmatmul.mubr.bf16.gmra.mxu0 %v5511_v0  ;;  %4519 = vmatpush3.bf16.msra.mxu1 %v4728_v27 }
  0xfc   : > { %4492 = vmatprep.mubr.bf16.mxu0 %v5515_v14  ;;  %4520 = vmatprep.subr.bf16.mxu1 %v4730_v55  ;;  %v5720_v59 = vpop.f32.mrf.mxu1  ;;  %v5728_v14 = vpop.f32.mrf.mxu0 }
  0xfd   : > { %4569 = vmatpush3.bf16.msra.mxu0 %v4731_v11 }
  0xfe   : > { %4441 = vmatmul.mubr.bf16.gmra.mxu1 %v5453_v37  ;;  %4570 = vmatprep.subr.bf16.mxu0 %v4734_v30  ;;  %v5725_v0 = vpop.f32.mrf.mxu1  ;;  %v5735_v36 = vpop.f32.mrf.mxu0 }
  0xff   : > { %4444 = vmatprep.mubr.bf16.mxu1 %v5503_v53  ;;  %4521 = vmatpush3.bf16.msra.mxu1 %v4730_v55 }
 0x100   : > { %4522 = vmatprep.subr.bf16.mxu1 %v4733_v18  ;;  %v5732_v32 = vpop.f32.mrf.mxu1 }
 0x101   : > { %4571 = vmatpush3.bf16.msra.mxu0 %v4734_v30 }
 0x102   : > { %v5737_v33 = vpop.f32.mrf.mxu1 }
 0x103   : > { %4493 = vmatmul.mubr.bf16.gmra.mxu0 %v5364_v25  ;;  %4523 = vmatpush3.bf16.msra.mxu1 %v4733_v18 }
 0x104   : > { %4496 = vmatprep.mubr.bf16.mxu0 %v5379_v17 }
 0x106   : > { %4445 = vmatmul.mubr.bf16.gmra.mxu1 %v5505_v41 }
 0x107   : > { %4448 = vmatprep.mubr.bf16.mxu1 %v5403_v47 }
 0x109   : > { %v5740_v25 = vpop.f32.mrf.mxu0 }
 0x10b   : > { %4497 = vmatmul.mubr.bf16.gmra.mxu0 %v5394_v34  ;;  %v5747_v12 = vpop.f32.mrf.mxu0  ;;  %v5756_v34 = vld [vmem:[%s4831_s6 + $0xcc] sm:$0xf] }
 0x10c   : > { %4500 = vmatprep.mubr.bf16.mxu0 %v5412_v39  ;;  %v3890_v22 = vcombine.low %v5756_v34, %v5759_v8 }
 0x10d   : > { %v5744_v17 = vpop.f32.mrf.mxu1  ;;  %v5752_v50 = vpop.f32.mrf.mxu0 }
 0x10e   : > { %4449 = vmatmul.mubr.bf16.gmra.mxu1 %v5424_v15  ;;  %6483 = vst [vmem:[#allocation12_spill] sm:$0xff] %v5744_v17 }
 0x10f   : > { %4452 = vmatprep.mubr.bf16.mxu1 %v5433_v26  ;;  %v5749_v43 = vpop.f32.mrf.mxu1  ;;  %v5764_v3 = vpop.f32.mrf.mxu0 }
 0x110   : > { %6484 = vst [vmem:[#allocation15_spill] sm:$0xff] %v5749_v43 }
 0x111   : > { %v5762_v39 = vpop.f32.mrf.mxu1 }
 0x112   : > { %6485 = vst [vmem:[#allocation18_spill] sm:$0xff] %v5762_v39 }
 0x113   : > { %4501 = vmatmul.mubr.bf16.gmra.mxu0 %v5430_v19  ;;  %v5769_v19 = vpop.f32.mrf.mxu1 }
 0x114   : > { %4504 = vmatprep.mubr.bf16.mxu0 %v5639_v54  ;;  %6486 = vst [vmem:[#allocation4_spill] sm:$0xff] %v5769_v19 }
 0x116   : > { %4453 = vmatmul.mubr.bf16.gmra.mxu1 %v5461_v6 }
 0x117   : > { %4456 = vmatprep.mubr.bf16.mxu1 %v5472_v9 }
 0x11b   : > { %v5771_v27 = vpop.f32.mrf.mxu0  ;;  %4505 = vmatmul.mubr.bf16.gmra.mxu0 %v3890_v22 }
 0x11c   : > { %4572 = vmatprep.mubr.bf16.mxu0 %v5266_v28 }
 0x11d   : > { %v5774_v54 = vpop.f32.mrf.mxu0 }
 0x11e   : > { %v5776_v11 = vpop.f32.mrf.mxu1  ;;  %4457 = vmatmul.mubr.bf16.gmra.mxu1 %v5546_v42 }
 0x11f   : > { %6487 = vst [vmem:[#allocation6_spill] sm:$0xff] %v5776_v11  ;;  %v5779_v55 = vpop.f32.mrf.mxu0  ;;  %4524 = vmatprep.mubr.bf16.mxu1 %v6470_v10 }
 0x120   : > { %v5782_v30 = vpop.f32.mrf.mxu1 }
 0x121   : > { %6488 = vst [vmem:[#allocation8_spill] sm:$0xff] %v5782_v30  ;;  %v5784_v18 = vpop.f32.mrf.mxu0 }
 0x122   : > { %v5786_v19 = vpop.f32.mrf.mxu1 }
 0x123   : > { %6489 = vst [vmem:[#allocation10_spill] sm:$0xff] %v5786_v19  ;;  %v4286_v39 = vpop.f32.mrf.mxu0  ;;  %4573 = vmatmul.mubr.bf16.vlgmr.msra.gmra.mxu0 %v5299_v49 }
 0x124   : > { %v5789_v28 = vpop.f32.mrf.mxu1  ;;  %4576 = vmatprep.mubr.bf16.mxu0 %v5301_v45 }
 0x125   : > { %6490 = vst [vmem:[#allocation13_spill] sm:$0xff] %v5789_v28  ;;  %v1601_v22 = vpop.f32.mrf.mxu0 }
 0x126   : > { %v4238_v11 = vpop.f32.mrf.mxu1  ;;  %4525 = vmatmul.mubr.bf16.vlgmr.msra.gmra.mxu1 %v6471_v52 }
 0x127   : > { %v1189_v43 = vadd.f32 %v4238_v11, %v5669_v44  ;;  %v4287_v10 = vpop.f32.mrf.mxu0  ;;  %4528 = vmatprep.mubr.bf16.mxu1 %v6472_v21 }
 0x128   : > { %v1180_v30 = vpop.f32.mrf.mxu1 }
 0x129   : > { %v5795_v31 = vadd.f32 %v4286_v39, %v1189_v43  ;;  %v1181_v19 = vadd.f32 %v1180_v30, %v5678_v57  ;;  %v1604_v17 = vpop.f32.mrf.mxu0 }
 0x12a   : > { %v4239_v49 = vpop.f32.mrf.mxu1 }
 0x12b   : > { %v5798_v29 = vadd.f32 %v1601_v22, %v1181_v19  ;;  %v1192_v45 = vadd.f32 %v4239_v49, %v5689_v5  ;;  %v4290_v28 = vpop.f32.mrf.mxu0  ;;  %4577 = vmatmul.mubr.bf16.gmra.mxu0 %v5347_v2 }
 0x12c   : > { %v1183_v52 = vpop.f32.mrf.mxu1  ;;  %4580 = vmatprep.mubr.bf16.mxu0 %v5355_v56 }
 0x12d   : > { %v5803_v44 = vadd.f32 %v4287_v10, %v1192_v45  ;;  %v1184_v21 = vadd.f32 %v1183_v52, %v5702_v4  ;;  %v1617_v43 = vpop.f32.mrf.mxu0 }
 0x12e   : > { %v4242_v39 = vpop.f32.mrf.mxu1  ;;  %4529 = vmatmul.mubr.bf16.gmra.mxu1 %v6473_v35 }
 0x12f   : > { %v5807_v57 = vadd.f32 %v1604_v17, %v1184_v21  ;;  %v1205_v19 = vadd.f32 %v4242_v39, %v5713_v38  ;;  %v4291_v11 = vpop.f32.mrf.mxu0  ;;  %4532 = vmatprep.mubr.bf16.mxu1 %v6474_v24 }
 0x130   : > { %v1196_v5 = vpop.f32.mrf.mxu1 }
 0x131   : > { %v5811_v2 = vadd.f32 %v4290_v28, %v1205_v19  ;;  %v1197_v56 = vadd.f32 %v1196_v5, %v5723_v60  ;;  %v1620_v30 = vpop.f32.mrf.mxu0 }
 0x132   : > { %v4243_v22 = vpop.f32.mrf.mxu1 }
 0x133   : > { %v5814_v10 = vadd.f32 %v1617_v43, %v1197_v56  ;;  %v1208_v4 = vadd.f32 %v4243_v22, %v5728_v14  ;;  %v4294_v49 = vpop.f32.mrf.mxu0  ;;  %4581 = vmatmul.mubr.bf16.gmra.mxu0 %v5440_v46 }
 0x134   : > { %v1199_v35 = vpop.f32.mrf.mxu1  ;;  %4584 = vmatprep.mubr.bf16.mxu0 %v5453_v37 }
 0x135   : > { %v5819_v38 = vadd.f32 %v4291_v11, %v1208_v4  ;;  %v1200_v24 = vadd.f32 %v1199_v35, %v5735_v36  ;;  %v1633_v17 = vpop.f32.mrf.mxu0 }
 0x136   : > { %v4246_v28 = vpop.f32.mrf.mxu1  ;;  %4533 = vmatmul.mubr.bf16.gmra.mxu1 %v5226_v20 }
 0x137   : > { %v5823_v60 = vadd.f32 %v1620_v30, %v1200_v24  ;;  %v1221_v45 = vadd.f32 %v4246_v28, %v5740_v25  ;;  %v4295_v52 = vpop.f32.mrf.mxu0  ;;  %4536 = vmatprep.mubr.bf16.mxu1 %v6475_v7 }
 0x138   : > { %v1212_v14 = vpop.f32.mrf.mxu1 }
 0x139   : > { %v5827_v46 = vadd.f32 %v4294_v49, %v1221_v45  ;;  %v1213_v37 = vadd.f32 %v1212_v14, %v5747_v12  ;;  %v1636_v21 = vpop.f32.mrf.mxu0  ;;  %v2858_v45 = vshrl.u32 %v5759_v8, 16 }
 0x13a   : > { %v4247_v43 = vpop.f32.mrf.mxu1 }
 0x13b   : > { %v5830_v39 = vadd.f32 %v1633_v17, %v1213_v37  ;;  %v1224_v36 = vadd.f32 %v4247_v43, %v5752_v50  ;;  %v4298_v19 = vpop.f32.mrf.mxu0  ;;  %4585 = vmatmul.mubr.bf16.gmra.mxu0 %v5503_v53  ;;  %v2845_v17 = vshrl.u32 %v5756_v34, 16 }
 0x13c   : > { %v1215_v20 = vpop.f32.mrf.mxu1  ;;  %4588 = vmatprep.mubr.bf16.mxu0 %v5505_v41 }
 0x13d   : > { %v5835_v25 = vadd.f32 %v4295_v52, %v1224_v36  ;;  %v1216_v7 = vadd.f32 %v1215_v20, %v5764_v3  ;;  %v1649_v11 = vpop.f32.mrf.mxu0  ;;  %v2847_v43 = vrot.slane %v2845_v17, 4  ;;  %v2860_v20 = vrot.slane %v2858_v45, 4 }
 0x13e   : > { %v4250_v5 = vpop.f32.mrf.mxu1  ;;  %4537 = vmatmul.mubr.bf16.gmra.mxu1 %v6476_v48 }
 0x13f   : > { %v5839_v12 = vadd.f32 %v1636_v21, %v1216_v7  ;;  %v1237_v56 = vadd.f32 %v4250_v5, %v5771_v27  ;;  %v4299_v30 = vpop.f32.mrf.mxu0  ;;  %4540 = vmatprep.mubr.bf16.mxu1 %v6477_v62 }
 0x140   : > { %v1228_v50 = vpop.f32.mrf.mxu1 }
 0x141   : > { %v5843_v53 = vadd.f32 %v4298_v19, %v1237_v56  ;;  %v1229_v41 = vadd.f32 %v1228_v50, %v5774_v54  ;;  %v1652_v22 = vpop.f32.mrf.mxu0  ;;  %v2848_v54 = vshll.u32 %v5756_v34, 16  ;;  %v308_v56 = vld [vmem:[%s4831_s6 + $0xd4] sm:$0x1] }
 0x142   : > { %v4251_v4 = vpop.f32.mrf.mxu1 }
 0x143   : > { %v5846_v49 = vadd.f32 %v1649_v11, %v1229_v41  ;;  %v1240_v3 = vadd.f32 %v4251_v4, %v5779_v55  ;;  %v4302_v35 = vpop.f32.mrf.mxu0  ;;  %4589 = vmatmul.mubr.bf16.gmra.mxu0 %v5403_v47  ;;  %v2854_v55 = vshll.u32 %v5759_v8, 16 }
 0x144   : > { %v1231_v48 = vpop.f32.mrf.mxu1  ;;  %4592 = vmatprep.mubr.bf16.mxu0 %v5424_v15 }
 0x145   : > { %v5851_v27 = vadd.f32 %v4299_v30, %v1240_v3  ;;  %v1232_v62 = vadd.f32 %v1231_v48, %v5784_v18  ;;  %v1665_v24 = vpop.f32.mrf.mxu0  ;;  %v2856_v19 = vrot.slane %v2854_v55, 5  ;;  %v2864_v3 = vshll.u32 %v308_v56, 16 }
 0x146   : > { %v4254_v28 = vpop.f32.mrf.mxu1  ;;  %4541 = vmatmul.mubr.bf16.gmra.mxu1 %v6478_v16  ;;  %v2850_v16 = vrot.slane %v2848_v54, 5 }
 0x147   : > { %v5859_v47 = vadd.f32 %v1652_v22, %v1232_v62  ;;  %v1253_v15 = vadd.f32 %v4254_v28, %v5672_v63  ;;  %v4303_v52 = vpop.f32.mrf.mxu0  ;;  %4544 = vmatprep.mubr.bf16.mxu1 %v6479_v23  ;;  %v3133_v23 = vrot.slane %v5759_v8, 5  ;;  %v2861_v8 = vor.u32 %v2860_v20, %v2856_v19 }
 0x148   : > { %v1244_v18 = vpop.f32.mrf.mxu1  ;;  %v2851_v22 = vor.u32 %v2850_v16, %v2847_v43  ;;  %v3136_v62 = vrot.slane %v308_v56, 5  ;;  %v2866_v45 = vrot.slane %v2864_v3, 5  ;;  %v6495_v56 = vld [vmem:[#allocation15_spill] sm:$0xff] }
 0x149   : > { %v5863_v14 = vadd.f32 %v4302_v35, %v1253_v15  ;;  %v1245_v37 = vadd.f32 %v1244_v18, %v5683_v40  ;;  %v1668_v21 = vpop.f32.mrf.mxu0  ;;  %v3135_v48 = vrot.slane %v3133_v23, 4 }
 0x14a   : > { %v4255_v36 = vpop.f32.mrf.mxu1  ;;  %v2852_v54 = vrot.slane %v2851_v22, 4  ;;  %v6496_v22 = vld [vmem:[#allocation18_spill] sm:$0xff] }
 0x14b   : > { %v5866_v7 = vadd.f32 %v1665_v24, %v1245_v37  ;;  %v1256_v11 = vadd.f32 %v4255_v36, %v5696_v1  ;;  %v4306_v63 = vpop.f32.mrf.mxu0  ;;  %4593 = vmatmul.mubr.bf16.gmra.mxu0 %v5433_v26 }
 0x14c   : > { %v1247_v5 = vpop.f32.mrf.mxu1  ;;  %4596 = vmatprep.mubr.bf16.mxu0 %v5461_v6  ;;  %v3924_v6 = vrot.slane %v5756_v34, 9  ;;  %v2857_v43 = vsel %vm4865_vm2, %v2852_v54, %v2856_v19 }
 0x14d   : > { %v5873_v40 = vadd.f32 %v4303_v52, %v1256_v11  ;;  %v1248_v30 = vadd.f32 %v1247_v5, %v5707_v13  ;;  %v1681_v50 = vpop.f32.mrf.mxu0  ;;  %v6494_v11 = vld [vmem:[#allocation14_spill] sm:$0xff] }
 0x14e   : > { %v4258_v41 = vpop.f32.mrf.mxu1  ;;  %4545 = vmatmul.mubr.bf16.gmra.mxu1 %v6480_v51  ;;  %v3134_v52 = vsel %vm5211_vm5, %v3924_v6, %v3133_v23  ;;  %v6497_v6 = vld [vmem:[#allocation4_spill] sm:$0xff] }
 0x14f   : > { %v5877_v4 = vadd.f32 %v1668_v21, %v1248_v30  ;;  %v1269_v1 = vadd.f32 %v4258_v41, %v5720_v59  ;;  %v4307_v26 = vpop.f32.mrf.mxu0  ;;  %4548 = vmatprep.mubr.bf16.mxu1 %v6481_v58  ;;  %v2862_v58 = vrot.slane %v2861_v8, 4 }
 0x150   : > { %v1260_v35 = vpop.f32.mrf.mxu1 }
 0x151   : > { %v5882_v13 = vadd.f32 %v4306_v63, %v1269_v1  ;;  %v1261_v24 = vadd.f32 %v1260_v35, %v5725_v0  ;;  %v1684_v51 = vpop.f32.mrf.mxu0  ;;  %v3137_v0 = vsel %vm5211_vm5, %v3135_v48, %v3136_v62  ;;  %v2867_v63 = vsel %vm4865_vm2, %v2862_v58, %v2866_v45  ;;  %v6499_v58 = vld [vmem:[#allocation8_spill] sm:$0xff] }
 0x152   : > { %v4259_v17 = vpop.f32.mrf.mxu1  ;;  %v3941_v23 = vcombine.low %v3134_v52, %v3137_v0  ;;  %v3915_v41 = vcombine.low %v2857_v43, %v2867_v63  ;;  %v6500_v0 = vld [vmem:[#allocation10_spill] sm:$0xff]  ;;  %v6501_v43 = vld [vmem:[#allocation13_spill] sm:$0xff] }
 0x153   : > { %v5885_v28 = vadd.f32 %v1681_v50, %v1261_v24  ;;  %v1272_v59 = vadd.f32 %v4259_v17, %v5732_v32  ;;  %v4310_v55 = vpop.f32.mrf.mxu0  ;;  %4597 = vmatmul.mubr.bf16.gmra.mxu0 %v5472_v9 }
 0x154   : > { %v1263_v34 = vpop.f32.mrf.mxu1  ;;  %4600 = vmatprep.mubr.bf16.mxu0 %v5546_v42  ;;  %v6493_v42 = vld [vmem:[#allocation12_spill] sm:$0xff] }
 0x155   : > { %v5894_v18 = vadd.f32 %v4307_v26, %v1272_v59  ;;  %v1264_v37 = vadd.f32 %v1263_v34, %v5737_v33  ;;  %v1697_v21 = vpop.f32.mrf.mxu0 }
 0x156   : > { %v4262_v32 = vpop.f32.mrf.mxu1  ;;  %4549 = vmatmul.mubr.bf16.gmra.mxu1 %v5245_v61 }
 0x157   : > { %v5900_v16 = vadd.f32 %v1684_v51, %v1264_v37  ;;  %v1285_v36 = vadd.f32 %v4262_v32, %v6493_v42  ;;  %v4311_v20 = vpop.f32.mrf.mxu0  ;;  %4552 = vmatprep.mubr.bf16.mxu1 %v6494_v11  ;;  %v6498_v51 = vld [vmem:[#allocation6_spill] sm:$0xff] }
 0x158   : > { %v1276_v5 = vpop.f32.mrf.mxu1 }
 0x159   : > { %v5906_v33 = vadd.f32 %v4310_v55, %v1285_v36  ;;  %v1277_v30 = vadd.f32 %v1276_v5, %v6495_v56  ;;  %v1700_v61 = vpop.f32.mrf.mxu0 }
 0x15a   : > { %v4263_v50 = vpop.f32.mrf.mxu1 }
 0x15b   : > { %v5909_v19 = vadd.f32 %v1697_v21, %v1277_v30  ;;  %v1288_v1 = vadd.f32 %v4263_v50, %v6496_v22  ;;  %v4314_v26 = vpop.f32.mrf.mxu0  ;;  %4601 = vmatmul.mubr.bf16.gmra.mxu0 %v3941_v23 }
 0x15c   : > { %v1279_v8 = vpop.f32.mrf.mxu1 }
 0x15d   : > { %v5912_v3 = vadd.f32 %v4311_v20, %v1288_v1  ;;  %v1280_v35 = vadd.f32 %v1279_v8, %v6497_v6  ;;  %v1713_v48 = vpop.f32.mrf.mxu0 }
 0x15e   : > { %v4266_v62 = vpop.f32.mrf.mxu1  ;;  %4553 = vmatmul.mubr.bf16.gmra.mxu1 %v3915_v41 }
 0x15f   : > { %v5915_v24 = vadd.f32 %v1700_v61, %v1280_v35  ;;  %v1301_v17 = vadd.f32 %v4266_v62, %v6498_v51  ;;  %v4315_v54 = vpop.f32.mrf.mxu0 }
 0x160   : > { %v1292_v59 = vpop.f32.mrf.mxu1 }
 0x161   : > { %v5918_v55 = vadd.f32 %v4314_v26, %v1301_v17  ;;  %v1293_v45 = vadd.f32 %v1292_v59, %v6499_v58  ;;  %v1716_v34 = vpop.f32.mrf.mxu0 }
 0x162   : > { %v4267_v15 = vpop.f32.mrf.mxu1 }
 0x163   : > { %v5921_v52 = vadd.f32 %v1713_v48, %v1293_v45  ;;  %v1304_v37 = vadd.f32 %v4267_v15, %v6500_v0  ;;  %v4382_v21 = vpop.f32.mrf.mxu0 }
 0x164   : > { %v1295_v32 = vpop.f32.mrf.mxu1 }
 0x165   : > { %v5924_v9 = vadd.f32 %v4315_v54, %v1304_v37  ;;  %v1296_v42 = vadd.f32 %v1295_v32, %v6501_v43  ;;  %v2151_v36 = vpop.f32.mrf.mxu0 }
 0x166   : > { %v4334_v20 = vpop.f32.mrf.mxu1 }
 0x167   : > { %v5927_v11 = vadd.f32 %v1716_v34, %v1296_v42  ;;  %v1994_v63 = vadd.f32 %v4334_v20, %v5795_v31  ;;  %v4383_v23 = vpop.f32.mrf.mxu0 }
 0x168   : > { %v1865_v5 = vpop.f32.mrf.mxu1 }
 0x169   : > { %v5930_v56 = vadd.f32 %v4382_v21, %v1994_v63  ;;  %v1992_v30 = vadd.f32 %v1865_v5, %v5798_v29  ;;  %v2154_v61 = vpop.f32.mrf.mxu0 }
 0x16a   : > { %v4335_v50 = vpop.f32.mrf.mxu1 }
 0x16b   : > { %v5933_v41 = vadd.f32 %v2151_v36, %v1992_v30  ;;  %v1995_v22 = vadd.f32 %v4335_v50, %v5803_v44  ;;  %v4386_v1 = vpop.f32.mrf.mxu0 }
 0x16c   : > { %v1868_v26 = vpop.f32.mrf.mxu1 }
 0x16d   : > { %v5936_v8 = vadd.f32 %v4383_v23, %v1995_v22  ;;  %v1993_v6 = vadd.f32 %v1868_v26, %v5807_v57  ;;  %v2167_v35 = vpop.f32.mrf.mxu0 }
 0x16e   : > { %v4338_v31 = vpop.f32.mrf.mxu1 }
 0x16f   : > { %v5939_v48 = vadd.f32 %v2154_v61, %v1993_v6  ;;  %v1998_v62 = vadd.f32 %v4338_v31, %v5811_v2  ;;  %v4387_v51 = vpop.f32.mrf.mxu0 }
 0x170   : > { %v1881_v29 = vpop.f32.mrf.mxu1 }
 0x171   : > { %v5942_v17 = vadd.f32 %v4386_v1, %v1998_v62  ;;  %v1996_v54 = vadd.f32 %v1881_v29, %v5814_v10  ;;  %v2170_v59 = vpop.f32.mrf.mxu0 }
 0x172   : > { %v4339_v44 = vpop.f32.mrf.mxu1 }
 0x173   : > { %v5945_v58 = vadd.f32 %v2167_v35, %v1996_v54  ;;  %v1999_v45 = vadd.f32 %v4339_v44, %v5819_v38  ;;  %v4390_v34 = vpop.f32.mrf.mxu0 }
 0x174   : > { %v1884_v57 = vpop.f32.mrf.mxu1 }
 0x175   : > { %v5948_v15 = vadd.f32 %v4387_v51, %v1999_v45  ;;  %v1997_v0 = vadd.f32 %v1884_v57, %v5823_v60  ;;  %v2183_v37 = vpop.f32.mrf.mxu0 }
 0x176   : > { %v4342_v2 = vpop.f32.mrf.mxu1 }
 0x177   : > { %v5951_v21 = vadd.f32 %v2170_v59, %v1997_v0  ;;  %v2002_v32 = vadd.f32 %v4342_v2, %v5827_v46  ;;  %v4391_v43 = vpop.f32.mrf.mxu0 }
 0x178   : > { %v1897_v10 = vpop.f32.mrf.mxu1 }
 0x179   : > { %v5954_v42 = vadd.f32 %v4390_v34, %v2002_v32  ;;  %v2000_v36 = vadd.f32 %v1897_v10, %v5830_v39  ;;  %v2186_v20 = vpop.f32.mrf.mxu0 }
 0x17a   : > { %v4343_v38 = vpop.f32.mrf.mxu1 }
 0x17b   : > { %v5957_v63 = vadd.f32 %v2183_v37, %v2000_v36  ;;  %v2003_v23 = vadd.f32 %v4343_v38, %v5835_v25  ;;  %v4394_v5 = vpop.f32.mrf.mxu0 }
 0x17c   : > { %v1900_v60 = vpop.f32.mrf.mxu1 }
 0x17d   : > { %v5960_v30 = vadd.f32 %v4391_v43, %v2003_v23  ;;  %v2001_v61 = vadd.f32 %v1900_v60, %v5839_v12  ;;  %v2199_v50 = vpop.f32.mrf.mxu0 }
 0x17e   : > { %v4346_v46 = vpop.f32.mrf.mxu1 }
 0x17f   : > { %v5963_v22 = vadd.f32 %v2186_v20, %v2001_v61  ;;  %v2006_v1 = vadd.f32 %v4346_v46, %v5843_v53  ;;  %v4395_v26 = vpop.f32.mrf.mxu0 }
 0x180   : > { %v1913_v39 = vpop.f32.mrf.mxu1 }
 0x181   : > { %v5966_v6 = vadd.f32 %v4394_v5, %v2006_v1  ;;  %v2004_v35 = vadd.f32 %v1913_v39, %v5846_v49  ;;  %v2202_v31 = vpop.f32.mrf.mxu0 }
 0x182   : > { %v4347_v25 = vpop.f32.mrf.mxu1 }
 0x183   : > { %v5969_v62 = vadd.f32 %v2199_v50, %v2004_v35  ;;  %v2007_v51 = vadd.f32 %v4347_v25, %v5851_v27  ;;  %v4398_v29 = vpop.f32.mrf.mxu0 }
 0x184   : > { %v1916_v12 = vpop.f32.mrf.mxu1 }
 0x185   : > { %v5972_v54 = vadd.f32 %v4395_v26, %v2007_v51  ;;  %v2005_v59 = vadd.f32 %v1916_v12, %v5859_v47  ;;  %v2215_v44 = vpop.f32.mrf.mxu0 }
 0x186   : > { %v4350_v53 = vpop.f32.mrf.mxu1 }
 0x187   : > { %v5975_v45 = vadd.f32 %v2202_v31, %v2005_v59  ;;  %v2010_v34 = vadd.f32 %v4350_v53, %v5863_v14  ;;  %v4399_v57 = vpop.f32.mrf.mxu0 }
 0x188   : > { %v1929_v49 = vpop.f32.mrf.mxu1 }
 0x189   : > { %v5978_v0 = vadd.f32 %v4398_v29, %v2010_v34  ;;  %v2008_v37 = vadd.f32 %v1929_v49, %v5866_v7  ;;  %v2218_v2 = vpop.f32.mrf.mxu0 }
 0x18a   : > { %v4351_v27 = vpop.f32.mrf.mxu1 }
 0x18b   : > { %v5981_v32 = vadd.f32 %v2215_v44, %v2008_v37  ;;  %v2011_v43 = vadd.f32 %v4351_v27, %v5873_v40  ;;  %v4402_v10 = vpop.f32.mrf.mxu0 }
 0x18c   : > { %v1932_v47 = vpop.f32.mrf.mxu1 }
 0x18d   : > { %v5984_v36 = vadd.f32 %v4399_v57, %v2011_v43  ;;  %v2009_v20 = vadd.f32 %v1932_v47, %v5877_v4  ;;  %v2231_v38 = vpop.f32.mrf.mxu0 }
 0x18e   : > { %v4354_v14 = vpop.f32.mrf.mxu1 }
 0x18f   : > { %6502 = vst [vmem:[#allocation17_spill] sm:$0xff] %v5984_v36  ;;  %v5987_v23 = vadd.f32 %v2218_v2, %v2009_v20  ;;  %v2014_v5 = vadd.f32 %v4354_v14, %v5882_v13  ;;  %v4403_v60 = vpop.f32.mrf.mxu0 }
 0x190   : > { %v1945_v7 = vpop.f32.mrf.mxu1 }
 0x191   : > { %6503 = vst [vmem:[#allocation3_spill] sm:$0xff] %v5987_v23  ;;  %v5990_v61 = vadd.f32 %v4402_v10, %v2014_v5  ;;  %v2012_v50 = vadd.f32 %v1945_v7, %v5885_v28  ;;  %v2234_v46 = vpop.f32.mrf.mxu0 }
 0x192   : > { %v4355_v40 = vpop.f32.mrf.mxu1 }
 0x193   : > { %6504 = vst [vmem:[#allocation5_spill] sm:$0xff] %v5990_v61  ;;  %v5993_v1 = vadd.f32 %v2231_v38, %v2012_v50  ;;  %v2015_v26 = vadd.f32 %v4355_v40, %v5894_v18  ;;  %v4406_v39 = vpop.f32.mrf.mxu0 }
 0x194   : > { %v1948_v4 = vpop.f32.mrf.mxu1 }
 0x195   : > { %6505 = vst [vmem:[#allocation7_spill] sm:$0xff] %v5993_v1  ;;  %v5996_v35 = vadd.f32 %v4403_v60, %v2015_v26  ;;  %v2013_v31 = vadd.f32 %v1948_v4, %v5900_v16  ;;  %v2247_v25 = vpop.f32.mrf.mxu0 }
 0x196   : > { %v4358_v13 = vpop.f32.mrf.mxu1 }
 0x197   : > { %6506 = vst [vmem:[#allocation9_spill] sm:$0xff] %v5996_v35  ;;  %v5999_v51 = vadd.f32 %v2234_v46, %v2013_v31  ;;  %v2018_v29 = vadd.f32 %v4358_v13, %v5906_v33  ;;  %v4407_v12 = vpop.f32.mrf.mxu0 }
 0x198   : > { %v1961_v28 = vpop.f32.mrf.mxu1 }
 0x199   : > { %6507 = vst [vmem:[#allocation11_spill] sm:$0xff] %v5999_v51  ;;  %v6002_v59 = vadd.f32 %v4406_v39, %v2018_v29  ;;  %v2016_v44 = vadd.f32 %v1961_v28, %v5909_v19  ;;  %v2250_v53 = vpop.f32.mrf.mxu0 }
 0x19a   : > { %v4359_v18 = vpop.f32.mrf.mxu1 }
 0x19b   : > { %6508 = vst [vmem:[#allocation16_spill] sm:$0xff] %v6002_v59  ;;  %v6005_v34 = vadd.f32 %v2247_v25, %v2016_v44  ;;  %v2019_v57 = vadd.f32 %v4359_v18, %v5912_v3  ;;  %v4410_v49 = vpop.f32.mrf.mxu0 }
 0x19c   : > { %v1964_v16 = vpop.f32.mrf.mxu1 }
 0x19d   : > { %6509 = vst [vmem:[#allocation19_spill] sm:$0xff] %v6005_v34  ;;  %v6008_v37 = vadd.f32 %v4407_v12, %v2019_v57  ;;  %v2017_v2 = vadd.f32 %v1964_v16, %v5915_v24  ;;  %v2263_v27 = vpop.f32.mrf.mxu0 }
 0x19e   : > { %v4362_v33 = vpop.f32.mrf.mxu1 }
 0x19f   : > { %6510 = vst [vmem:[#allocation20_spill] sm:$0xff] %v6008_v37  ;;  %v6011_v43 = vadd.f32 %v2250_v53, %v2017_v2  ;;  %v2022_v10 = vadd.f32 %v4362_v33, %v5918_v55  ;;  %v4411_v47 = vpop.f32.mrf.mxu0 }
 0x1a0   : > { %v1977_v19 = vpop.f32.mrf.mxu1 }
 0x1a1   : > { %6511 = vst [vmem:[#allocation2_spill] sm:$0xff] %v6011_v43  ;;  %v6014_v20 = vadd.f32 %v4410_v49, %v2022_v10  ;;  %v2020_v38 = vadd.f32 %v1977_v19, %v5921_v52  ;;  %v2266_v14 = vpop.f32.mrf.mxu0 }
 0x1a2   : > { %v4363_v3 = vpop.f32.mrf.mxu1 }
 0x1a3   : > { %6512 = vst [vmem:[#allocation12_spill] sm:$0xff] %v6014_v20  ;;  %v6017_v5 = vadd.f32 %v2263_v27, %v2020_v38  ;;  %v2023_v60 = vadd.f32 %v4363_v3, %v5924_v9  ;;  %v6020_v7 = vpop.f32.mrf.mxu0 }
 0x1a4   : > { %v1980_v24 = vpop.f32.mrf.mxu1 }
 0x1a5   : > { %6513 = vst [vmem:[#allocation14_spill] sm:$0xff] %v6017_v5  ;;  %v6022_v50 = vadd.f32 %v4411_v47, %v2023_v60  ;;  %v2021_v46 = vadd.f32 %v1980_v24, %v5927_v11  ;;  %v6025_v55 = vpop.f32.mrf.mxu0 }
 0x1a6   : > { %v4430_v40 = vpop.f32.mrf.mxu1 }
 0x1a7   : > { %6514 = vst [vmem:[#allocation15_spill] sm:$0xff] %v6022_v50  ;;  %v6027_v26 = vadd.f32 %v2266_v14, %v2021_v46  ;;  %v6029_v39 = vpop.f32.mrf.mxu0 }
 0x1a8   : > { %v2421_v52 = vpop.f32.mrf.mxu1 }
 0x1a9   : > { %6515 = vst [vmem:[#allocation18_spill] sm:$0xff] %v6027_v26  ;;  %v6031_v4 = vpop.f32.mrf.mxu0 }
 0x1aa   : > { %v4431_v31 = vpop.f32.mrf.mxu1 }
 0x1ab   : > { %v6033_v25 = vpop.f32.mrf.mxu0 }
 0x1ac   : > { %v6035_v9 = vpop.f32.mrf.mxu1 }
 0x1ad   : > { %v6037_v13 = vpop.f32.mrf.mxu0 }
 0x1ae   : > { %v6039_v29 = vpop.f32.mrf.mxu1 }
 0x1af   : > { %v6041_v11 = vpop.f32.mrf.mxu0 }
 0x1b0   : > { %v6043_v12 = vpop.f32.mrf.mxu1 }
 0x1b1   : > { %v6045_v28 = vpop.f32.mrf.mxu0 }
 0x1b2   : > { %v6047_v44 = vpop.f32.mrf.mxu1 }
 0x1b3   : > { %v6049_v53 = vpop.f32.mrf.mxu0 }
 0x1b4   : > { %v6051_v18 = vpop.f32.mrf.mxu1 }
 0x1b5   : > { %v6053_v57 = vpop.f32.mrf.mxu0 }
 0x1b6   : > { %v6055_v49 = vpop.f32.mrf.mxu1 }
 0x1b7   : > { %v6057_v16 = vpop.f32.mrf.mxu0 }
 0x1b8   : > { %v6059_v2 = vpop.f32.mrf.mxu1 }
 0x1b9   : > { %v6061_v27 = vpop.f32.mrf.mxu0 }
 0x1ba   : > { %v6063_v33 = vpop.f32.mrf.mxu1 }
 0x1bb   : > { %v6065_v10 = vpop.f32.mrf.mxu0 }
 0x1bc   : > { %v6067_v47 = vpop.f32.mrf.mxu1 }
 0x1bd   : > { %v6069_v19 = vpop.f32.mrf.mxu0 }
 0x1be   : > { %v6071_v38 = vpop.f32.mrf.mxu1 }
 0x1bf   : > { %v6073_v14 = vpop.f32.mrf.mxu0 }
 0x1c0   : > { %v6075_v3 = vpop.f32.mrf.mxu1 }
 0x1c1   : > { %v6077_v60 = vpop.f32.mrf.mxu0 }
 0x1c2   : > { %v6079_v24 = vpop.f32.mrf.mxu1 }
 0x1c3   : > { %v6081_v46 = vpop.f32.mrf.mxu0 }
 0x1c4   : > { %6516 = vst [vmem:[#allocation4_spill] sm:$0xff] %v6081_v46  ;;  %v6083_v26 = vpop.f32.mrf.mxu1 }
 0x1c5   : > { %v6085_v50 = vpop.f32.mrf.mxu0 }
 0x1c6   : > { %6517 = vst [vmem:[#allocation6_spill] sm:$0xff] %v6085_v50  ;;  %v6087_v5 = vpop.f32.mrf.mxu1 }
 0x1c7   : > { %v6089_v20 = vpop.f32.mrf.mxu0 }
 0x1c8   : > { %6518 = vst [vmem:[#allocation8_spill] sm:$0xff] %v6089_v20  ;;  %v6091_v43 = vpop.f32.mrf.mxu1 }
 0x1c9   : > { %v6093_v37 = vpop.f32.mrf.mxu0 }
 0x1ca   : > { %6519 = vst [vmem:[#allocation10_spill] sm:$0xff] %v6093_v37  ;;  %v6095_v34 = vpop.f32.mrf.mxu1 }
 0x1cb   : > { %6520 = vst [vmem:[#allocation13_spill] sm:$0xff] %v6095_v34  ;;  %v6097_v59 = vpop.f32.mrf.mxu0 }
 0x1cc   : > { %6521 = vst [vmem:[#allocation21_spill] sm:$0xff] %v6097_v59  ;;  %v6099_v51 = vpop.f32.mrf.mxu1 }
 0x1cd   : > { %6522 = vst [vmem:[#allocation22_spill] sm:$0xff] %v6099_v51  ;;  %v6101_v35 = vpop.f32.mrf.mxu0 }
 0x1ce   : > { %6523 = vst [vmem:[#allocation23_spill] sm:$0xff] %v6101_v35  ;;  %v6103_v1 = vpop.f32.mrf.mxu1 }
 0x1cf   : > { %6524 = vst [vmem:[#allocation24_spill] sm:$0xff] %v6103_v1  ;;  %v6105_v61 = vpop.f32.mrf.mxu0 }
 0x1d0   : > { %6525 = vst [vmem:[#allocation25_spill] sm:$0xff] %v6105_v61  ;;  %v6107_v23 = vpop.f32.mrf.mxu1 }
 0x1d1   : > { %6526 = vst [vmem:[#allocation26_spill] sm:$0xff] %v6107_v23  ;;  %v6109_v50 = vpop.f32.mrf.mxu0 }
 0x1d2   : > { %6527 = vst [vmem:[#allocation27_spill] sm:$0xff] %v6109_v50  ;;  %v6111_v20 = vpop.f32.mrf.mxu1 }
 0x1d3   : > { %6528 = vst [vmem:[#allocation28_spill] sm:$0xff] %v6111_v20  ;;  %v6113_v36 = vpop.f32.mrf.mxu0 }
 0x1d4   : > { %6529 = vst [vmem:[#allocation29_spill] sm:$0xff] %v6113_v36  ;;  %v6115_v37 = vpop.f32.mrf.mxu1 }
 0x1d5   : > { %6530 = vst [vmem:[#allocation30_spill] sm:$0xff] %v6115_v37  ;;  %v6117_v34 = vpop.f32.mrf.mxu0 }
 0x1d6   : > { %6531 = vst [vmem:[#allocation31_spill] sm:$0xff] %v6117_v34  ;;  %v6119_v59 = vpop.f32.mrf.mxu1 }
 0x1d7   : > { %6532 = vst [vmem:[#allocation32_spill] sm:$0xff] %v6119_v59  ;;  %v6121_v51 = vpop.f32.mrf.mxu0 }
 0x1d8   : > { %6533 = vst [vmem:[#allocation33_spill] sm:$0xff] %v6121_v51  ;;  %v6123_v35 = vpop.f32.mrf.mxu1  ;;  %v2550_v51 = vadd.f32 %v4430_v40, %v5930_v56  ;;  %v2549_v56 = vadd.f32 %v6035_v9, %v5939_v48 }
 0x1d9   : > { %6534 = vst [vmem:[#allocation34_spill] sm:$0xff] %v6123_v35  ;;  %v6125_v1 = vpop.f32.mrf.mxu0 }
 0x1da   : > { %6535 = vst [vmem:[#allocation35_spill] sm:$0xff] %v6125_v1  ;;  %v6127_v61 = vpop.f32.mrf.mxu1  ;;  %v2548_v1 = vadd.f32 %v2421_v52, %v5933_v41  ;;  %v6157_v41 = vld [vmem:[%s6400_s2] ss:$0 sm:$0xff]  ;;  %v2813_v48 = vadd.f32 %v6031_v4, %v2549_v56 }
 0x1db   : > { %6536 = vst [vmem:[#allocation36_spill] sm:$0xff] %v6127_v61  ;;  %v6129_v23 = vpop.f32.mrf.mxu0 }
 0x1dc   : > { %6537 = vst [vmem:[#allocation37_spill] sm:$0xff] %v6129_v23  ;;  %v6131_v50 = vpop.f32.mrf.mxu1 }
 0x1dd   : > { %6538 = vst [vmem:[#allocation38_spill] sm:$0xff] %v6131_v50  ;;  %v6133_v20 = vpop.f32.mrf.mxu0  ;;  %v2814_v50 = vadd.f32 %v6020_v7, %v2550_v51 }
 0x1de   : > { %6539 = vst [vmem:[#allocation39_spill] sm:$0xff] %v6133_v20  ;;  %v6135_v36 = vpop.f32.mrf.mxu1  ;;  %v2551_v20 = vadd.f32 %v4431_v31, %v5936_v8 }
 0x1df   : > { %6540 = vst [vmem:[#allocation40_spill] sm:$0xff] %v6135_v36  ;;  %v6137_v37 = vpop.f32.mrf.mxu0 }
 0x1e0   : > { %6541 = vst [vmem:[#allocation41_spill] sm:$0xff] %v6137_v37  ;;  %v6139_v34 = vpop.f32.mrf.mxu1  ;;  %v2812_v37 = vadd.f32 %v6025_v55, %v2548_v1  ;;  %v2815_v51 = vadd.f32 %v6029_v39, %v2551_v20  ;;  %v2554_v1 = vadd.f32 %v6039_v29, %v5942_v17  ;;  %v2555_v20 = vadd.f32 %v6047_v44, %v5948_v15  ;;  %v6181_v15 = vld [vmem:[%s6402_s4] ss:$0 sm:$0xff] }
 0x1e1   : > { %v6142_v59 = vpop.f32.mrf.mxu0 }
 0x1e2   : > { %6542 = vst [vmem:[#allocation42_spill] sm:$0xff] %v6142_v59  ;;  %v6144_v35 = vpop.f32.mrf.mxu1  ;;  %v2818_v56 = vadd.f32 %v6033_v25, %v2554_v1  ;;  %v2819_v25 = vadd.f32 %v6041_v11, %v2555_v20 }
 0x1e3   : > { %6543 = vst [vmem:[#allocation43_spill] sm:$0xff] %v6144_v35  ;;  %v4574_v61 = vpop.f32.mrf.mxu0  ;;  %v2552_v35 = vadd.f32 %v6043_v12, %v5945_v58  ;;  %v2553_v58 = vadd.f32 %v6051_v18, %v5951_v21  ;;  %v2558_v21 = vadd.f32 %v6055_v49, %v5954_v42  ;;  %v2556_v42 = vadd.f32 %v6059_v2, %v5957_v63 }
 0x1e4   : > { %v6147_v23 = vpop.f32.mrf.mxu1 }
 0x1e5   : > { %6544 = vst [vmem:[#allocation44_spill] sm:$0xff] %v6147_v23  ;;  %v3241_v36 = vpop.f32.mrf.mxu0  ;;  %v2817_v11 = vadd.f32 %v6045_v28, %v2553_v58  ;;  %v2559_v28 = vadd.f32 %v6063_v33, %v5960_v30 }
 0x1e6   : > { %v4526_v46 = vpop.f32.mrf.mxu1 }
 0x1e7   : > { %v3100_v40 = vadd.f32 %v4526_v46, %v2814_v50  ;;  %v4575_v59 = vpop.f32.mrf.mxu0 }
 0x1e8   : > { %v2971_v52 = vpop.f32.mrf.mxu1 }
 0x1e9   : > { %v3370_v7 = vadd.f32 %v4574_v61, %v3100_v40  ;;  %v3098_v8 = vadd.f32 %v2971_v52, %v2812_v37  ;;  %v3244_v31 = vpop.f32.mrf.mxu0  ;;  %v6171_v61 = vld [vmem:[%s6401_s3] ss:$0 sm:$0xff] }
 0x1ea   : > { %v4527_v55 = vpop.f32.mrf.mxu1 }
 0x1eb   : > { %v3409_v50 = vadd.f32 %v6157_v41, %v3370_v7  ;;  %v3368_v9 = vadd.f32 %v3241_v36, %v3098_v8  ;;  %v3101_v46 = vadd.f32 %v4527_v55, %v2815_v51  ;;  %v4578_v23 = vpop.f32.mrf.mxu0  ;;  %v2816_v7 = vadd.f32 %v6037_v13, %v2552_v35 }
 0x1ec   : > { %v2974_v17 = vpop.f32.mrf.mxu1 }
 0x1ed   : > { %v3441_v37 = vmax.f32 %v3409_v50, 0.0  ;;  %v3407_v39 = vadd.f32 %v6157_v41, %v3368_v9  ;;  %v3371_v4 = vadd.f32 %v4575_v59, %v3101_v46  ;;  %v3099_v36 = vadd.f32 %v2974_v17, %v2813_v48  ;;  %v3257_v29 = vpop.f32.mrf.mxu0 }
 0x1ee   : > { %v4530_v12 = vpop.f32.mrf.mxu1 }
 0x1ef   : > { %v3480_v44 = vmul.f32 %v6171_v61, %v3441_v37  ;;  %v3439_v40 = vmax.f32 %v3407_v39, 0.0  ;;  %v3410_v52 = vadd.f32 %v6157_v41, %v3371_v4  ;;  %v3369_v51 = vadd.f32 %v3244_v31, %v3099_v36  ;;  %v4579_v59 = vpop.f32.mrf.mxu0 }
 0x1f0   : > { %v3104_v18 = vadd.f32 %v4530_v12, %v2818_v56  ;;  %v2987_v8 = vpop.f32.mrf.mxu1  ;;  %v2822_v39 = vadd.f32 %v6049_v53, %v2558_v21  ;;  %v2557_v53 = vadd.f32 %v6067_v47, %v5963_v22 }
 0x1f1   : > { %v3519_v1 = vadd.f32 %v6181_v15, %v3480_v44  ;;  %v3478_v31 = vmul.f32 %v6171_v61, %v3439_v40  ;;  %v3442_v55 = vmax.f32 %v3410_v52, 0.0  ;;  %v3408_v35 = vadd.f32 %v6157_v41, %v3369_v51  ;;  %v3260_v13 = vpop.f32.mrf.mxu0 }
 0x1f2   : > { %v3374_v49 = vadd.f32 %v4578_v23, %v3104_v18  ;;  %v3102_v48 = vadd.f32 %v2987_v8, %v2816_v7  ;;  %v4531_v50 = vpop.f32.mrf.mxu1  ;;  %v2820_v44 = vadd.f32 %v6053_v57, %v2556_v42  ;;  %v2562_v57 = vadd.f32 %v6071_v38, %v5966_v6 }
 0x1f3   : > { %3551 = vst [vmem:[%s6192_s12 + $0x10] sm:$0xff] %v3519_v1  ;;  %v3517_v9 = vadd.f32 %v6181_v15, %v3478_v31  ;;  %v3481_v46 = vmul.f32 %v6171_v61, %v3442_v55  ;;  %v3440_v20 = vmax.f32 %v3408_v35, 0.0  ;;  %v3105_v17 = vadd.f32 %v4531_v50, %v2819_v25  ;;  %v4582_v37 = vpop.f32.mrf.mxu0 }
 0x1f4   : > { %v3413_v4 = vadd.f32 %v6157_v41, %v3374_v49  ;;  %v3372_v63 = vadd.f32 %v3257_v29, %v3102_v48  ;;  %v2990_v23 = vpop.f32.mrf.mxu1  ;;  %v2823_v25 = vadd.f32 %v6057_v16, %v2559_v28  ;;  %v2821_v35 = vadd.f32 %v6061_v27, %v2557_v53 }
 0x1f5   : > { %3549 = vst [vmem:[%s6192_s12] sm:$0xff] %v3517_v9  ;;  %v3520_v2 = vadd.f32 %v6181_v15, %v3481_v46  ;;  %v3479_v36 = vmul.f32 %v6171_v61, %v3440_v20  ;;  %v3375_v56 = vadd.f32 %v4579_v59, %v3105_v17  ;;  %v3103_v58 = vadd.f32 %v2990_v23, %v2817_v11  ;;  %v3273_v12 = vpop.f32.mrf.mxu0 }
 0x1f6   : > { %v3445_v40 = vmax.f32 %v3413_v4, 0.0  ;;  %v3411_v30 = vadd.f32 %v6157_v41, %v3372_v63  ;;  %v4534_v33 = vpop.f32.mrf.mxu1  ;;  %v2560_v16 = vadd.f32 %v6075_v3, %v5969_v62  ;;  %v2826_v9 = vadd.f32 %v6065_v10, %v2562_v57 }
 0x1f7   : > { %3552 = vst [vmem:[%s6192_s12 + $0x18] sm:$0xff] %v3520_v2  ;;  %v3518_v29 = vadd.f32 %v6181_v15, %v3479_v36  ;;  %v3414_v52 = vadd.f32 %v6157_v41, %v3375_v56  ;;  %v3373_v51 = vadd.f32 %v3260_v13, %v3103_v58  ;;  %v3108_v7 = vadd.f32 %v4534_v33, %v2822_v39  ;;  %v4583_v59 = vpop.f32.mrf.mxu0 }
 0x1f8   : > { %v3484_v21 = vmul.f32 %v6171_v61, %v3445_v40  ;;  %v3443_v22 = vmax.f32 %v3411_v30, 0.0  ;;  %v3003_v47 = vpop.f32.mrf.mxu1  ;;  %v2563_v27 = vadd.f32 %v6079_v24, %v5972_v54  ;;  %v2824_v4 = vadd.f32 %v6069_v19, %v2560_v16 }
 0x1f9   : > { %3550 = vst [vmem:[%s6192_s12 + $0x8] sm:$0xff] %v3518_v29  ;;  %v3446_v18 = vmax.f32 %v3414_v52, 0.0  ;;  %v3412_v8 = vadd.f32 %v6157_v41, %v3373_v51  ;;  %v3378_v1 = vadd.f32 %v4582_v37, %v3108_v7  ;;  %v3106_v31 = vadd.f32 %v3003_v47, %v2820_v44  ;;  %v3276_v55 = vpop.f32.mrf.mxu0 }
 0x1fa   : > { %v3523_v13 = vadd.f32 %v6181_v15, %v3484_v21  ;;  %v3482_v6 = vmul.f32 %v6171_v61, %v3443_v22  ;;  %v4535_v38 = vpop.f32.mrf.mxu1  ;;  %v2561_v10 = vadd.f32 %v6083_v26, %v5975_v45  ;;  %v2566_v19 = vadd.f32 %v6087_v5, %v5978_v0  ;;  %v6545_v22 = vld [vmem:[#allocation4_spill] sm:$0xff] }
 0x1fb   : > { %v3485_v11 = vmul.f32 %v6171_v61, %v3446_v18  ;;  %v3444_v42 = vmax.f32 %v3412_v8, 0.0  ;;  %v3417_v49 = vadd.f32 %v6157_v41, %v3378_v1  ;;  %v3376_v48 = vadd.f32 %v3273_v12, %v3106_v31  ;;  %v4586_v50 = vpop.f32.mrf.mxu0  ;;  %v6546_v18 = vld [vmem:[#allocation17_spill] sm:$0xff] }
 0x1fc   : > { %3555 = vst [vmem:[%s6192_s12 + $0x30] sm:$0xff] %v3523_v13  ;;  %v3521_v62 = vadd.f32 %v6181_v15, %v3482_v6  ;;  %v3109_v3 = vadd.f32 %v4535_v38, %v2823_v25  ;;  %v3006_v46 = vpop.f32.mrf.mxu1  ;;  %v2827_v12 = vadd.f32 %v6073_v14, %v2563_v27  ;;  %v2825_v52 = vadd.f32 %v6077_v60, %v2561_v10  ;;  %v6547_v60 = vld [vmem:[#allocation13_spill] sm:$0xff]  ;;  %v6548_v6 = vld [vmem:[#allocation6_spill] sm:$0xff] }
 0x1fd   : > { %v3524_v20 = vadd.f32 %v6181_v15, %v3485_v11  ;;  %v3483_v17 = vmul.f32 %v6171_v61, %v3444_v42  ;;  %v3449_v37 = vmax.f32 %v3417_v49, 0.0  ;;  %v3415_v39 = vadd.f32 %v6157_v41, %v3376_v48  ;;  %v3289_v28 = vpop.f32.mrf.mxu0  ;;  %v6549_v11 = vld [vmem:[#allocation3_spill] sm:$0xff]  ;;  %v6550_v42 = vld [vmem:[#allocation22_spill] sm:$0xff] }
 0x1fe   : > { %3553 = vst [vmem:[%s6192_s12 + $0x20] sm:$0xff] %v3521_v62  ;;  %v3379_v54 = vadd.f32 %v4583_v59, %v3109_v3  ;;  %v3107_v24 = vadd.f32 %v3006_v46, %v2821_v35  ;;  %v4538_v63 = vpop.f32.mrf.mxu1  ;;  %v2564_v14 = vadd.f32 %v6091_v43, %v5981_v32  ;;  %v2830_v47 = vadd.f32 %v6545_v22, %v2566_v19  ;;  %v6555_v19 = vld [vmem:[#allocation7_spill] sm:$0xff] }
 0x1ff   : > { %3556 = vst [vmem:[%s6192_s12 + $0x38] sm:$0xff] %v3524_v20  ;;  %v3522_v23 = vadd.f32 %v6181_v15, %v3483_v17  ;;  %v3488_v2 = vmul.f32 %v6171_v61, %v3449_v37  ;;  %v3447_v36 = vmax.f32 %v3415_v39, 0.0  ;;  %v3112_v56 = vadd.f32 %v4538_v63, %v2826_v9  ;;  %v4587_v58 = vpop.f32.mrf.mxu0  ;;  %v6551_v17 = vld [vmem:[#allocation8_spill] sm:$0xff]  ;;  %v6552_v39 = vld [vmem:[#allocation5_spill] sm:$0xff] }
 0x200   : > { %v3418_v45 = vadd.f32 %v6157_v41, %v3379_v54  ;;  %v3377_v26 = vadd.f32 %v3276_v55, %v3107_v24  ;;  %v3019_v44 = vpop.f32.mrf.mxu1  ;;  %v2567_v8 = vadd.f32 %v6547_v60, %v6546_v18  ;;  %v2828_v38 = vadd.f32 %v6548_v6, %v2564_v14 }
 0x201   : > { %3554 = vst [vmem:[%s6192_s12 + $0x28] sm:$0xff] %v3522_v23  ;;  %v3527_v53 = vadd.f32 %v6181_v15, %v3488_v2  ;;  %v3486_v40 = vmul.f32 %v6171_v61, %v3447_v36  ;;  %v3382_v30 = vadd.f32 %v4586_v50, %v3112_v56  ;;  %v3110_v33 = vadd.f32 %v3019_v44, %v2824_v4  ;;  %v3292_v29 = vpop.f32.mrf.mxu0 }
 0x202   : > { %v3450_v51 = vmax.f32 %v3418_v45, 0.0  ;;  %v3416_v0 = vadd.f32 %v6157_v41, %v3377_v26  ;;  %v4539_v5 = vpop.f32.mrf.mxu1  ;;  %v2565_v49 = vadd.f32 %v6550_v42, %v6549_v11  ;;  %v2831_v37 = vadd.f32 %v6551_v17, %v2567_v8  ;;  %v6556_v45 = vld [vmem:[#allocation26_spill] sm:$0xff] }
 0x203   : > { %3559 = vst [vmem:[%s6192_s12 + $0x50] sm:$0xff] %v3527_v53  ;;  %v3525_v7 = vadd.f32 %v6181_v15, %v3486_v40  ;;  %v3421_v59 = vadd.f32 %v6157_v41, %v3382_v30  ;;  %v3380_v25 = vadd.f32 %v3289_v28, %v3110_v33  ;;  %v3113_v57 = vadd.f32 %v4539_v5, %v2827_v12  ;;  %v4590_v21 = vpop.f32.mrf.mxu0  ;;  %v6553_v28 = vld [vmem:[#allocation24_spill] sm:$0xff]  ;;  %v6558_v5 = vld [vmem:[#allocation9_spill] sm:$0xff] }
 0x204   : > { %v3489_v1 = vmul.f32 %v6171_v61, %v3450_v51  ;;  %v3448_v32 = vmax.f32 %v3416_v0, 0.0  ;;  %v3022_v43 = vpop.f32.mrf.mxu1  ;;  %v2570_v4 = vadd.f32 %v6553_v28, %v6552_v39  ;;  %v2568_v26 = vadd.f32 %v6556_v45, %v6555_v19  ;;  %v6557_v51 = vld [vmem:[#allocation21_spill] sm:$0xff] }
 0x205   : > { %3557 = vst [vmem:[%s6192_s12 + $0x40] sm:$0xff] %v3525_v7  ;;  %v3453_v31 = vmax.f32 %v3421_v59, 0.0  ;;  %v3419_v55 = vadd.f32 %v6157_v41, %v3380_v25  ;;  %v3383_v35 = vadd.f32 %v4587_v58, %v3113_v57  ;;  %v3111_v16 = vadd.f32 %v3022_v43, %v2825_v52  ;;  %v3305_v13 = vpop.f32.mrf.mxu0  ;;  %v6554_v58 = vld [vmem:[#allocation10_spill] sm:$0xff]  ;;  %v6559_v7 = vld [vmem:[#allocation28_spill] sm:$0xff]  ;;  %v6561_v43 = vld [vmem:[#allocation11_spill] sm:$0xff] }
 0x206   : > { %v3528_v48 = vadd.f32 %v6181_v15, %v3489_v1  ;;  %v3487_v50 = vmul.f32 %v6171_v61, %v3448_v32  ;;  %v4542_v9 = vpop.f32.mrf.mxu1  ;;  %v2829_v12 = vadd.f32 %v6554_v58, %v2565_v49  ;;  %v2834_v0 = vadd.f32 %v6557_v51, %v2570_v4  ;;  %v6560_v1 = vld [vmem:[#allocation23_spill] sm:$0xff] }
 0x207   : > { %v3492_v27 = vmul.f32 %v6171_v61, %v3453_v31  ;;  %v3451_v62 = vmax.f32 %v3419_v55, 0.0  ;;  %v3422_v3 = vadd.f32 %v6157_v41, %v3383_v35  ;;  %v3381_v46 = vadd.f32 %v3292_v29, %v3111_v16  ;;  %v4591_v20 = vpop.f32.mrf.mxu0  ;;  %v6562_v31 = vld [vmem:[#allocation30_spill] sm:$0xff] }
 0x208   : > { %3560 = vst [vmem:[%s6192_s12 + $0x58] sm:$0xff] %v3528_v48  ;;  %v3526_v10 = vadd.f32 %v6181_v15, %v3487_v50  ;;  %v3116_v54 = vadd.f32 %v4542_v9, %v2830_v47  ;;  %v3035_v24 = vpop.f32.mrf.mxu1  ;;  %v2571_v59 = vadd.f32 %v6559_v7, %v6558_v5  ;;  %v2832_v32 = vadd.f32 %v6560_v1, %v2568_v26  ;;  %v6563_v48 = vld [vmem:[#allocation25_spill] sm:$0xff]  ;;  %v6564_v9 = vld [vmem:[#allocation16_spill] sm:$0xff] }
 0x209   : > { %v3531_v63 = vadd.f32 %v6181_v15, %v3492_v27  ;;  %v3490_v23 = vmul.f32 %v6171_v61, %v3451_v62  ;;  %v3454_v2 = vmax.f32 %v3422_v3, 0.0  ;;  %v3420_v36 = vadd.f32 %v6157_v41, %v3381_v46  ;;  %v3308_v56 = vpop.f32.mrf.mxu0  ;;  %v6565_v27 = vld [vmem:[#allocation32_spill] sm:$0xff] }
 0x20a   : > { %3558 = vst [vmem:[%s6192_s12 + $0x48] sm:$0xff] %v3526_v10  ;;  %v3386_v44 = vadd.f32 %v4590_v21, %v3116_v54  ;;  %v3114_v53 = vadd.f32 %v3035_v24, %v2828_v38  ;;  %v4543_v40 = vpop.f32.mrf.mxu1  ;;  %v2569_v55 = vadd.f32 %v6562_v31, %v6561_v43  ;;  %v2835_v50 = vadd.f32 %v6563_v48, %v2571_v59  ;;  %v6566_v10 = vld [vmem:[#allocation27_spill] sm:$0xff] }
 0x20b   : > { %3563 = vst [vmem:[%s6192_s12 + $0x70] sm:$0xff] %v3531_v63  ;;  %v3529_v30 = vadd.f32 %v6181_v15, %v3490_v23  ;;  %v3493_v33 = vmul.f32 %v6171_v61, %v3454_v2  ;;  %v3452_v29 = vmax.f32 %v3420_v36, 0.0  ;;  %v3117_v52 = vadd.f32 %v4543_v40, %v2831_v37  ;;  %v4594_v14 = vpop.f32.mrf.mxu0  ;;  %v6567_v24 = vld [vmem:[#allocation19_spill] sm:$0xff]  ;;  %v6568_v63 = vld [vmem:[#allocation34_spill] sm:$0xff]  ;;  %v6570_v40 = vld [vmem:[#allocation20_spill] sm:$0xff] }
 0x20c   : > { %v3425_v25 = vadd.f32 %v6157_v41, %v3386_v44  ;;  %v3384_v57 = vadd.f32 %v3305_v13, %v3114_v53  ;;  %v3038_v21 = vpop.f32.mrf.mxu1  ;;  %v2574_v62 = vadd.f32 %v6565_v27, %v6564_v9  ;;  %v2833_v54 = vadd.f32 %v6566_v10, %v2569_v55  ;;  %v6569_v44 = vld [vmem:[#allocation29_spill] sm:$0xff]  ;;  %v6576_v9 = vld [vmem:[#allocation35_spill] sm:$0xff] }
 0x20d   : > { %3561 = vst [vmem:[%s6192_s12 + $0x60] sm:$0xff] %v3529_v30  ;;  %v3532_v22 = vadd.f32 %v6181_v15, %v3493_v33  ;;  %v3491_v47 = vmul.f32 %v6171_v61, %v3452_v29  ;;  %v3387_v18 = vadd.f32 %v4591_v20, %v3117_v52  ;;  %v3115_v60 = vadd.f32 %v3038_v21, %v2829_v12  ;;  %v3321_v8 = vpop.f32.mrf.mxu0  ;;  %v6571_v30 = vld [vmem:[#allocation36_spill] sm:$0xff]  ;;  %v6573_v21 = vld [vmem:[#allocation2_spill] sm:$0xff] }
 0x20e   : > { %v3457_v35 = vmax.f32 %v3425_v25, 0.0  ;;  %v3423_v16 = vadd.f32 %v6157_v41, %v3384_v57  ;;  %v4546_v6 = vpop.f32.mrf.mxu1  ;;  %v2572_v23 = vadd.f32 %v6568_v63, %v6567_v24  ;;  %v2838_v53 = vadd.f32 %v6569_v44, %v2574_v62  ;;  %v6572_v25 = vld [vmem:[#allocation31_spill] sm:$0xff]  ;;  %v6577_v62 = vld [vmem:[#allocation12_spill] sm:$0xff]  ;;  %v6579_v24 = vld [vmem:[#allocation14_spill] sm:$0xff] }
 0x20f   : > { %3564 = vst [vmem:[%s6192_s12 + $0x78] sm:$0xff] %v3532_v22  ;;  %v3530_v13 = vadd.f32 %v6181_v15, %v3491_v47  ;;  %v3426_v38 = vadd.f32 %v6157_v41, %v3387_v18  ;;  %v3385_v11 = vadd.f32 %v3308_v56, %v3115_v60  ;;  %v3120_v42 = vadd.f32 %v4546_v6, %v2834_v0  ;;  %v4595_v49 = vpop.f32.mrf.mxu0  ;;  %v6574_v22 = vld [vmem:[#allocation38_spill] sm:$0xff] }
 0x210   : > { %v3496_v3 = vmul.f32 %v6171_v61, %v3457_v35  ;;  %v3455_v46 = vmax.f32 %v3423_v16, 0.0  ;;  %v3051_v20 = vpop.f32.mrf.mxu1  ;;  %v2575_v33 = vadd.f32 %v6571_v30, %v6570_v40  ;;  %v2836_v57 = vadd.f32 %v6572_v25, %v2572_v23  ;;  %v6575_v35 = vld [vmem:[#allocation33_spill] sm:$0xff]  ;;  %v6580_v23 = vld [vmem:[#allocation15_spill] sm:$0xff]  ;;  %v6583_v30 = vld [vmem:[#allocation18_spill] sm:$0xff] }
 0x211   : > { %3562 = vst [vmem:[%s6192_s12 + $0x68] sm:$0xff] %v3530_v13  ;;  %v3458_v17 = vmax.f32 %v3426_v38, 0.0  ;;  %v3424_v37 = vadd.f32 %v6157_v41, %v3385_v11  ;;  %v3390_v39 = vadd.f32 %v4594_v14, %v3120_v42  ;;  %v3118_v28 = vadd.f32 %v3051_v20, %v2832_v32  ;;  %v3324_v4 = vpop.f32.mrf.mxu0  ;;  %v6585_v25 = vld [vmem:[#allocation39_spill] sm:$0xff] }
 0x212   : > { %v3535_v2 = vadd.f32 %v6181_v15, %v3496_v3  ;;  %v3494_v36 = vmul.f32 %v6171_v61, %v3455_v46  ;;  %v4547_v56 = vpop.f32.mrf.mxu1  ;;  %v2573_v47 = vadd.f32 %v6574_v22, %v6573_v21  ;;  %v2839_v16 = vadd.f32 %v6575_v35, %v2575_v33  ;;  %v6578_v3 = vld [vmem:[#allocation40_spill] sm:$0xff]  ;;  %v6586_v21 = vld [vmem:[#allocation41_spill] sm:$0xff] }
 0x213   : > { %v3497_v58 = vmul.f32 %v6171_v61, %v3458_v17  ;;  %v3456_v12 = vmax.f32 %v3424_v37, 0.0  ;;  %v3429_v19 = vadd.f32 %v6157_v41, %v3390_v39  ;;  %v3388_v45 = vadd.f32 %v3321_v8, %v3118_v28  ;;  %v4598_v26 = vpop.f32.mrf.mxu0  ;;  %v6584_v33 = vld [vmem:[#allocation44_spill] sm:$0xff] }
 0x214   : > { %3567 = vst [vmem:[%s6192_s12 + $0x90] sm:$0xff] %v3535_v2  ;;  %v3533_v29 = vadd.f32 %v6181_v15, %v3494_v36  ;;  %v3121_v52 = vadd.f32 %v4547_v56, %v2835_v50  ;;  %v3054_v14 = vpop.f32.mrf.mxu1  ;;  %v2837_v27 = vadd.f32 %v6576_v9, %v2573_v47  ;;  %v2578_v46 = vadd.f32 %v6578_v3, %v6577_v62  ;;  %v6581_v2 = vld [vmem:[#allocation43_spill] sm:$0xff] }
 0x215   : > { %v3536_v51 = vadd.f32 %v6181_v15, %v3497_v58  ;;  %v3495_v0 = vmul.f32 %v6171_v61, %v3456_v12  ;;  %v3461_v5 = vmax.f32 %v3429_v19, 0.0  ;;  %v3427_v7 = vadd.f32 %v6157_v41, %v3388_v45  ;;  %v3337_v59 = vpop.f32.mrf.mxu0 }
 0x216   : > { %3565 = vst [vmem:[%s6192_s12 + $0x80] sm:$0xff] %v3533_v29  ;;  %v3391_v18 = vadd.f32 %v4595_v49, %v3121_v52  ;;  %v3119_v60 = vadd.f32 %v3054_v14, %v2833_v54  ;;  %v4550_v8 = vpop.f32.mrf.mxu1  ;;  %v2576_v63 = vadd.f32 %v6139_v34, %v6579_v24  ;;  %v2579_v36 = vadd.f32 %v6581_v2, %v6580_v23 }
 0x217   : > { %3568 = vst [vmem:[%s6192_s12 + $0x98] sm:$0xff] %v3536_v51  ;;  %v3534_v1 = vadd.f32 %v6181_v15, %v3495_v0  ;;  %v3500_v32 = vmul.f32 %v6171_v61, %v3461_v5  ;;  %v3459_v43 = vmax.f32 %v3427_v7, 0.0  ;;  %v3124_v31 = vadd.f32 %v4550_v8, %v2838_v53  ;;  %v4599_v55 = vpop.f32.mrf.mxu0  ;;  %v6582_v53 = vld [vmem:[#allocation37_spill] sm:$0xff] }
 0x218   : > { %v3430_v6 = vadd.f32 %v6157_v41, %v3391_v18  ;;  %v3389_v13 = vadd.f32 %v3324_v4, %v3119_v60  ;;  %v3067_v38 = vpop.f32.mrf.mxu1  ;;  %v2842_v40 = vadd.f32 %v6582_v53, %v2578_v46  ;;  %v2577_v29 = vadd.f32 %v6584_v33, %v6583_v30 }
 0x219   : > { %3566 = vst [vmem:[%s6192_s12 + $0x88] sm:$0xff] %v3534_v1  ;;  %v3539_v11 = vadd.f32 %v6181_v15, %v3500_v32  ;;  %v3498_v42 = vmul.f32 %v6171_v61, %v3459_v43  ;;  %v3394_v49 = vadd.f32 %v4598_v26, %v3124_v31  ;;  %v3122_v48 = vadd.f32 %v3067_v38, %v2836_v57  ;;  %v3340_v50 = vpop.f32.mrf.mxu0  ;;  %v6587_v31 = vld [vmem:[#allocation42_spill] sm:$0xff] }
 0x21a   : > { %v3462_v20 = vmax.f32 %v3430_v6, 0.0  ;;  %v3428_v17 = vadd.f32 %v6157_v41, %v3389_v13  ;;  %v4551_v37 = vpop.f32.mrf.mxu1  ;;  %v2840_v57 = vadd.f32 %v6585_v25, %v2576_v63  ;;  %v2843_v22 = vadd.f32 %v6586_v21, %v2579_v36 }
 0x21b   : > { %3571 = vst [vmem:[%s6192_s12 + $0xb0] sm:$0xff] %v3539_v11  ;;  %v3537_v39 = vadd.f32 %v6181_v15, %v3498_v42  ;;  %v3433_v28 = vadd.f32 %v6157_v41, %v3394_v49  ;;  %v3392_v4 = vadd.f32 %v3337_v59, %v3122_v48  ;;  %v3125_v10 = vadd.f32 %v4551_v37, %v2839_v16  ;;  %v4602_v54 = vpop.f32.mrf.mxu0 }
 0x21c   : > { %v3501_v56 = vmul.f32 %v6171_v61, %v3462_v20  ;;  %v3460_v58 = vmax.f32 %v3428_v17, 0.0  ;;  %v3070_v12 = vpop.f32.mrf.mxu1 }
 0x21d   : > { %3569 = vst [vmem:[%s6192_s12 + $0xa0] sm:$0xff] %v3537_v39  ;;  %v3465_v19 = vmax.f32 %v3433_v28, 0.0  ;;  %v3431_v45 = vadd.f32 %v6157_v41, %v3392_v4  ;;  %v3395_v26 = vadd.f32 %v4599_v55, %v3125_v10  ;;  %v3123_v44 = vadd.f32 %v3070_v12, %v2837_v27  ;;  %v3353_v51 = vpop.f32.mrf.mxu0 }
 0x21e   : > { %v3540_v34 = vadd.f32 %v6181_v15, %v3501_v56  ;;  %v3499_v52 = vmul.f32 %v6171_v61, %v3460_v58  ;;  %v4554_v14 = vpop.f32.mrf.mxu1  ;;  %v2841_v55 = vadd.f32 %v6587_v31, %v2577_v29 }
 0x21f   : > { %v3504_v0 = vmul.f32 %v6171_v61, %v3465_v19  ;;  %v3463_v5 = vmax.f32 %v3431_v45, 0.0  ;;  %v3434_v7 = vadd.f32 %v6157_v41, %v3395_v26  ;;  %v3393_v59 = vadd.f32 %v3340_v50, %v3123_v44  ;;  %v4603_v13 = vpop.f32.mrf.mxu0 }
 0x220   : > { %3572 = vst [vmem:[%s6192_s12 + $0xb8] sm:$0xff] %v3540_v34  ;;  %v3538_v47 = vadd.f32 %v6181_v15, %v3499_v52  ;;  %v3128_v18 = vadd.f32 %v4554_v14, %v2842_v40  ;;  %v3083_v60 = vpop.f32.mrf.mxu1 }
 0x221   : > { %v3543_v8 = vadd.f32 %v6181_v15, %v3504_v0  ;;  %v3502_v1 = vmul.f32 %v6171_v61, %v3463_v5  ;;  %v3466_v32 = vmax.f32 %v3434_v7, 0.0  ;;  %v3432_v43 = vadd.f32 %v6157_v41, %v3393_v59  ;;  %v3356_v37 = vpop.f32.mrf.mxu0 }
 0x222   : > { %3570 = vst [vmem:[%s6192_s12 + $0xa8] sm:$0xff] %v3538_v47  ;;  %v3398_v35 = vadd.f32 %v4602_v54, %v3128_v18  ;;  %v3126_v16 = vadd.f32 %v3083_v60, %v2840_v57  ;;  %v4555_v6 = vpop.f32.mrf.mxu1 }
 0x223   : > { %3575 = vst [vmem:[%s6192_s12 + $0xd0] sm:$0xff] %v3543_v8  ;;  %v3541_v38 = vadd.f32 %v6181_v15, %v3502_v1  ;;  %v3505_v11 = vmul.f32 %v6171_v61, %v3466_v32  ;;  %v3464_v42 = vmax.f32 %v3432_v43, 0.0  ;;  %v3129_v49 = vadd.f32 %v4555_v6, %v2843_v22 }
 0x224   : > { %v3437_v48 = vadd.f32 %v6157_v41, %v3398_v35  ;;  %v3396_v50 = vadd.f32 %v3353_v51, %v3126_v16  ;;  %v3086_v9 = vpop.f32.mrf.mxu1 }
 0x225   : > { %3573 = vst [vmem:[%s6192_s12 + $0xc0] sm:$0xff] %v3541_v38  ;;  %v3544_v27 = vadd.f32 %v6181_v15, %v3505_v11  ;;  %v3503_v62 = vmul.f32 %v6171_v61, %v3464_v42  ;;  %v3399_v3 = vadd.f32 %v4603_v13, %v3129_v49  ;;  %v3127_v46 = vadd.f32 %v3086_v9, %v2841_v55 }
 0x226   : > { %v3469_v20 = vmax.f32 %v3437_v48, 0.0  ;;  %v3435_v17 = vadd.f32 %v6157_v41, %v3396_v50 }
 0x227   : > { %3576 = vst [vmem:[%s6192_s12 + $0xd8] sm:$0xff] %v3544_v27  ;;  %v3542_v39 = vadd.f32 %v6181_v15, %v3503_v62  ;;  %v3438_v28 = vadd.f32 %v6157_v41, %v3399_v3  ;;  %v3397_v4 = vadd.f32 %v3356_v37, %v3127_v46 }
 0x228   : > { %v3508_v10 = vmul.f32 %v6171_v61, %v3469_v20  ;;  %v3467_v54 = vmax.f32 %v3435_v17, 0.0 }
 0x229   : > { %3574 = vst [vmem:[%s6192_s12 + $0xc8] sm:$0xff] %v3542_v39  ;;  %v3470_v24 = vmax.f32 %v3438_v28, 0.0  ;;  %v3436_v63 = vadd.f32 %v6157_v41, %v3397_v4 }
 0x22a   : > { %v3547_v23 = vadd.f32 %v6181_v15, %v3508_v10  ;;  %v3506_v2 = vmul.f32 %v6171_v61, %v3467_v54 }
 0x22b   : > { %v3509_v36 = vmul.f32 %v6171_v61, %v3470_v24  ;;  %v3468_v56 = vmax.f32 %v3436_v63, 0.0 }
 0x22c   : > { %3579 = vst [vmem:[%s6192_s12 + $0xf0] sm:$0xff] %v3547_v23  ;;  %v3545_v58 = vadd.f32 %v6181_v15, %v3506_v2 }
 0x22d   : > { %v3548_v12 = vadd.f32 %v6181_v15, %v3509_v36  ;;  %v3507_v19 = vmul.f32 %v6171_v61, %v3468_v56 }
 0x22e   : > { %3577 = vst [vmem:[%s6192_s12 + $0xe0] sm:$0xff] %v3545_v58 }
 0x22f   : > { %3580 = vst [vmem:[%s6192_s12 + $0xf8] sm:$0xff] %v3548_v12  ;;  %v3546_v45 = vadd.f32 %v6181_v15, %v3507_v19 }
 0x231   : > { %3578 = vst [vmem:[%s6192_s12 + $0xe8] sm:$0xff] %v3546_v45 }
 0x232 PF: > { %s15_s20 = sadd.s32 1, %s4766_s20   ;;  %s6588_s18 = smov %s4762_s19 }
 0x233   : > { %p12_p5 = scmp.ge.s32.totalorder %s15_s20, 4   ;;  %s6589_s19 = smov %s6591_s21 }
 0x235   :  { %14 = sbr.rel (!%p12_p5) target bundleno = 2 (0x2), region = 79 }

</bundles_post_ra>
